<compile_context>
chip_gen: v7x
topology: tpu7x:2x2x1
jax: 0.10.0
libtpu: 0.0.40
codegen_flags: <defaults>
</compile_context>

<pallas_src>
import functools
import itertools

import jax
import jax.numpy as jnp
from jax.experimental import pallas as pl
from jax.experimental.pallas import tpu as pltpu


# --------------------------------------------------------------------------------------
# small helpers
# --------------------------------------------------------------------------------------
def _round_up(x, m):
    return (x + m - 1) // m * m


def _pick_tile(total, candidates):
    for c in candidates:
        if total % c == 0:
            return c
    return 128


# --------------------------------------------------------------------------------------
# Pallas GEMM: bf16 operands, f32 accumulation, bf16 output, fused prologue activation
# --------------------------------------------------------------------------------------
def _apply_act(a, act):
    if act == "lrelu":        # LeakyReLU(0.2) applied to the conv input (= LHS)
        return jnp.where(a >= 0, a, 0.2 * a)
    if act == "relu":
        return jnp.maximum(a, 0)
    return a


def _gemm_kernel_single_k(a_ref, b_ref, o_ref, *, act):
    a = _apply_act(a_ref[...], act)
    o_ref[...] = jnp.dot(a, b_ref[...],
                         preferred_element_type=jnp.float32).astype(o_ref.dtype)


def _gemm_kernel_multi_k(a_ref, b_ref, o_ref, acc_ref, *, act):
    @pl.when(pl.program_id(2) == 0)
    def _():
        acc_ref[...] = jnp.zeros_like(acc_ref)

    a = _apply_act(a_ref[...], act)
    acc_ref[...] += jnp.dot(a, b_ref[...], preferred_element_type=jnp.float32)

    @pl.when(pl.program_id(2) == pl.num_programs(2) - 1)
    def _():
        o_ref[...] = acc_ref[...].astype(o_ref.dtype)


def pallas_gemm(a, b_padded, n_true, act=None, out_dtype=jnp.bfloat16):
    """(M, K) @ (Kp, Np) -> (M, n_true).

    `b_padded` is pre-packed at init (zero-padded to 128-multiples, bf16).  The LHS is
    expected bf16 already (cast skipped if so); the optional pre-conv activation runs on
    the LHS tile inside the kernel.  Accumulation is f32; output is bf16 by default.
    """
    M, K = a.shape
    Kp, Np = b_padded.shape
    if a.dtype != jnp.bfloat16:
        a = a.astype(jnp.bfloat16)

    # N tiling: wide N tiles help the short-K convT GEMMs (cuts A re-reads / grid steps).
    n_cands = (1024, 512, 256, 128) if Kp <= 256 else (512, 256, 128)
    tn = _pick_tile(Np, n_cands)
    # K tiling: single K block whenever K is short (every layer at these sizes).
    tk = Kp if Kp <= 512 else _pick_tile(Kp, (512, 256, 128))
    nk = Kp // tk
    # M tiling.
    if M >= 4096:
        tm = 1024
    elif M >= 512:
        tm = 512
    else:
        tm = _round_up(M, 8)
    Mp = _round_up(M, tm)
    # Guarantee >=2 blocks along a "parallel" axis when cheap: keeps the second
    # TensorCore busy on v7x; on 1-TC chips it only adds one ~0.35us grid step.
    if (Mp // tm) * (Np // tn) == 1 and M >= 16:
        tm = _round_up(-(-M // 2), 8)
        Mp = 2 * tm

    if Mp > M or Kp > K:
        a = jnp.pad(a, ((0, Mp - M), (0, Kp - K)))

    cparams = pltpu.CompilerParams(
        dimension_semantics=(("parallel", "parallel") if nk == 1
                             else ("parallel", "parallel", "arbitrary")),
        vmem_limit_bytes=48 * 1024 * 1024,
    )
    cost = pl.CostEstimate(
        flops=2 * Mp * Kp * Np,
        transcendentals=0,
        bytes_accessed=Mp * Kp * 2 + Kp * Np * 2 + Mp * Np * jnp.dtype(out_dtype).itemsize,
    )

    if nk == 1:
        out = pl.pallas_call(
            functools.partial(_gemm_kernel_single_k, act=act),
            out_shape=jax.ShapeDtypeStruct((Mp, Np), out_dtype),
            grid=(Mp // tm, Np // tn),
            in_specs=[pl.BlockSpec((tm, Kp), lambda i, j: (i, 0)),
                      pl.BlockSpec((Kp, tn), lambda i, j: (0, j))],
            out_specs=pl.BlockSpec((tm, tn), lambda i, j: (i, j)),
            compiler_params=cparams,
            cost_estimate=cost,
        )(a, b_padded)
    else:
        out = pl.pallas_call(
            functools.partial(_gemm_kernel_multi_k, act=act),
            out_shape=jax.ShapeDtypeStruct((Mp, Np), out_dtype),
            grid=(Mp // tm, Np // tn, nk),
            in_specs=[pl.BlockSpec((tm, tk), lambda i, j, k: (i, k)),
                      pl.BlockSpec((tk, tn), lambda i, j, k: (k, j))],
            out_specs=pl.BlockSpec((tm, tn), lambda i, j, k: (i, j)),
            scratch_shapes=[pltpu.VMEM((tm, tn), jnp.float32)],
            compiler_params=cparams,
            cost_estimate=cost,
        )(a, b_padded)
    return out[:M, :n_true]


# --------------------------------------------------------------------------------------
# BatchNorm3d statistics (Pallas reduction); the affine is deferred to the next conv
# --------------------------------------------------------------------------------------
def _bn_stats_kernel(x_ref, sum_ref, sq_ref):
    @pl.when(pl.program_id(1) == 0)
    def _():
        sum_ref[...] = jnp.zeros_like(sum_ref)
        sq_ref[...] = jnp.zeros_like(sq_ref)

    x = x_ref[...].astype(jnp.float32)
    sum_ref[...] += jnp.sum(x, axis=0, keepdims=True)
    sq_ref[...] += jnp.sum(x * x, axis=0, keepdims=True)


def _stats_tiles(R, L, itemsize, budget=2 * 1024 * 1024):
    """Row tile, padded rows, lane tile.  Lane axis is tiled too so a block never
    exceeds ~2 MiB (double-buffered) -- important for v7x's smaller VMEM."""
    if R <= 256:
        RT, Rp = R, R
    else:
        RT, Rp = 256, _round_up(R, 256)
    LT = L
    if L % 128 == 0 and RT * L * itemsize > budget:
        max_mult = max(budget // (RT * itemsize * 128), 1)
        for mult in range(min(L // 128, max_mult), 0, -1):
            if L % (mult * 128) == 0:
                LT = mult * 128
                break
    return RT, Rp, LT


def batchnorm_scale_shift(h, gamma, beta, eps=1e-5):
    """BatchNorm3d, training mode: biased batch stats over (N,D,H,W) per channel.

    Returns per-channel (scale, shift); the affine itself is applied lazily by the
    consumer (fused into the next conv's input repack in XLA), so no separate
    apply pass / Pallas launch touches HBM.
    """
    N, D, H, W, C = h.shape
    R, L = N * D, H * W * C
    h2 = h.reshape(R, L)
    RT, Rp, LT = _stats_tiles(R, L, h.dtype.itemsize)
    if Rp > R:
        h2 = jnp.pad(h2, ((0, Rp - R), (0, 0)))

    sums, sqs = pl.pallas_call(
        _bn_stats_kernel,
        out_shape=(jax.ShapeDtypeStruct((1, L), jnp.float32),
                   jax.ShapeDtypeStruct((1, L), jnp.float32)),
        grid=(L // LT, Rp // RT),
        in_specs=[pl.BlockSpec((RT, LT), lambda l, r: (r, l))],
        out_specs=(pl.BlockSpec((1, LT), lambda l, r: (0, l)),
                   pl.BlockSpec((1, LT), lambda l, r: (0, l))),
        compiler_params=pltpu.CompilerParams(
            dimension_semantics=("parallel", "arbitrary")),
    )(h2)

    cnt = float(N * D * H * W)
    sum_c = sums.reshape(H * W, C).sum(axis=0)
    sq_c = sqs.reshape(H * W, C).sum(axis=0)
    mean = sum_c / cnt
    var = jnp.maximum(sq_c / cnt - mean * mean, 0.0)   # biased, like torch BN training
    inv = jax.lax.rsqrt(var + eps)
    scale = gamma * inv
    shift = beta - mean * scale
    return scale, shift


# --------------------------------------------------------------------------------------
# Conv3d / ConvTranspose3d (k=4, s=2, p=1) as pointwise GEMM + shift-add combine.
# Inputs arrive as (tensor, pending_bn_scale, pending_bn_shift) "parts"; the deferred BN
# affine is applied (in f32, bf16-stored) before the spatial pad so pad zeros stay zero
# after the fused lrelu/relu prologue (lrelu(0)=relu(0)=0).
# --------------------------------------------------------------------------------------
def _affine_bf16(x, scale, shift):
    if scale is None:
        return x.astype(jnp.bfloat16)
    return (x.astype(jnp.float32) * scale + shift).astype(jnp.bfloat16)


def conv3d_k4s2p1(x, scale, shift, wm, n_true, co, act):
    """Conv3d(Ci->co, k=4, s=2, p=1, bias=False); pending BN affine + pre-activation fused."""
    N, D, H, W, Ci = x.shape
    Do, Ho, Wo = D // 2, H // 2, W // 2
    xb = _affine_bf16(x, scale, shift)
    xp = jnp.pad(xb, ((0, 0), (1, 1), (1, 1), (1, 1), (0, 0)))
    # space-to-depth(2): X[n, j, (b), ci] = xpad[n, 2j+b, ci]
    X = xp.reshape(N, Do + 1, 2, Ho + 1, 2, Wo + 1, 2, Ci)
    X = X.transpose(0, 1, 3, 5, 2, 4, 6, 7)                  # (N, jd, jh, jw, bd, bh, bw, ci)
    A = X.reshape(N * (Do + 1) * (Ho + 1) * (Wo + 1), 8 * Ci)
    Y = pallas_gemm(A, wm, n_true, act=act)                  # (M', 8*co) bf16
    Y = Y.reshape(N, Do + 1, Ho + 1, Wo + 1, 8, co)
    # out[o] = sum_a Y[o + a, a]   (f32 accumulate, bf16 store)
    out = None
    for ad, ah, aw in itertools.product((0, 1), repeat=3):
        a_idx = ad * 4 + ah * 2 + aw
        t = Y[:, ad:ad + Do, ah:ah + Ho, aw:aw + Wo, a_idx, :].astype(jnp.float32)
        out = t if out is None else out + t
    return out.astype(jnp.bfloat16)


def convT3d_k4s2p1(parts, wm, n_true, co, bias=None, final_tanh=False):
    """ConvTranspose3d(k=4, s=2, p=1), sub-pixel decomposition.

    `parts` is a list of (x, scale, shift): the skip-connection concat is fused into the
    GEMM-LHS build (affine + pad + channel concat in one XLA fusion) instead of being
    materialized as a standalone feature-map copy.  ReLU runs in the GEMM prologue.
    """
    panels = [jnp.pad(_affine_bf16(x, s, t), ((0, 0), (1, 1), (1, 1), (1, 1), (0, 0)))
              for (x, s, t) in parts]
    xp = panels[0] if len(panels) == 1 else jnp.concatenate(panels, axis=-1)
    N, Dp, Hp, Wp, Ci = xp.shape
    Di, Hi, Wi = Dp - 2, Hp - 2, Wp - 2
    A = xp.reshape(N * Dp * Hp * Wp, Ci)
    Z = pallas_gemm(A, wm, n_true, act="relu")               # (M'', 64*co) bf16
    Z = Z.reshape(N, Dp, Hp, Wp, 8, 8, co)                   # (..., r, a, co)
    # out[2i + r] = sum_a Z[i + r + a, r, a]   (f32 accumulate)
    outs = []
    for rd, rh, rw in itertools.product((0, 1), repeat=3):
        r_idx = rd * 4 + rh * 2 + rw
        acc = None
        for ad, ah, aw in itertools.product((0, 1), repeat=3):
            a_idx = ad * 4 + ah * 2 + aw
            t = Z[:, rd + ad:rd + ad + Di, rh + ah:rh + ah + Hi,
                  rw + aw:rw + aw + Wi, r_idx, a_idx, :].astype(jnp.float32)
            acc = t if acc is None else acc + t
        outs.append(acc)
    O = jnp.stack(outs, axis=4)                              # (N, Di, Hi, Wi, 8, co)
    O = O.reshape(N, Di, Hi, Wi, 2, 2, 2, co)
    O = O.transpose(0, 1, 4, 2, 5, 3, 6, 7).reshape(N, 2 * Di, 2 * Hi, 2 * Wi, co)
    if bias is not None:
        O = O + bias
    if final_tanh:
        return jnp.tanh(O)        # fused by XLA into the combine epilogue; stays f32
    return O.astype(jnp.bfloat16)


# --------------------------------------------------------------------------------------
# Weight packing (once at init: rearrange + flip + pad to 128-multiples + bf16 cast)
# --------------------------------------------------------------------------------------
def _pad_cast_weight(wm):
    K, N_ = wm.shape
    Kp, Np = _round_up(K, 128), _round_up(N_, 128)
    return jnp.pad(wm, ((0, Kp - K), (0, Np - N_))).astype(jnp.bfloat16)


def _pack_down_weight(w):
    """PyTorch Conv3d weight (Co, Ci, 4,4,4) -> (8*Ci, 8*Co) GEMM matrix (padded, bf16)."""
    Co, Ci = w.shape[0], w.shape[1]
    w8 = w.reshape(Co, Ci, 2, 2, 2, 2, 2, 2)                 # (co, ci, ad, bd, ah, bh, aw, bw)
    wm = jnp.transpose(w8, (3, 5, 7, 1, 2, 4, 6, 0)).reshape(8 * Ci, 8 * Co)
    return _pad_cast_weight(wm)


def _pack_up_weight(w):
    """PyTorch ConvTranspose3d weight (Ci, Co, 4,4,4) -> (Ci, 64*Co) GEMM matrix (padded, bf16)."""
    Ci, Co = w.shape[0], w.shape[1]
    wf = jnp.flip(w, axis=(2, 3, 4))
    w8 = wf.reshape(Ci, Co, 2, 2, 2, 2, 2, 2)                # (ci, co, ad, rd, ah, rh, aw, rw)
    wm = jnp.transpose(w8, (0, 3, 5, 7, 2, 4, 6, 1)).reshape(Ci, 64 * Co)
    return _pad_cast_weight(wm)


# --------------------------------------------------------------------------------------
# UnetGenerator parameters + forward
# --------------------------------------------------------------------------------------
def init_unet_params(key, input_nc, output_nc, ngf, num_downs):
    assert input_nc == output_nc
    cfg = [("innermost", ngf * 8, ngf * 8)]
    for _ in range(num_downs - 5):
        cfg.append(("middle", ngf * 8, ngf * 8))
    cfg += [
        ("middle", ngf * 4, ngf * 8),
        ("middle", ngf * 2, ngf * 4),
        ("middle", ngf, ngf * 2),
        ("outermost", output_nc, ngf),
    ]
    cfg = cfg[::-1]  # outermost first

    blocks, kinds = [], []
    for kind, outer_nc, inner_nc in cfg:
        key, k1, k2, k3 = jax.random.split(key, 4)
        p = {}
        # downconv: Conv3d(outer_nc -> inner_nc), bias=False (BatchNorm norm layer)
        dw = 0.02 * jax.random.normal(k1, (inner_nc, outer_nc, 4, 4, 4), jnp.float32)
        p["dwm"] = _pack_down_weight(dw)
        p["d_n"] = 8 * inner_nc
        p["d_co"] = inner_nc
        # upconv: ConvTranspose3d(up_in -> outer_nc)
        up_in = inner_nc if kind == "innermost" else inner_nc * 2
        uw = 0.02 * jax.random.normal(k2, (up_in, outer_nc, 4, 4, 4), jnp.float32)
        p["uwm"] = _pack_up_weight(uw)
        p["u_n"] = 64 * outer_nc
        p["u_co"] = outer_nc
        if kind == "outermost":
            p["ub"] = 0.02 * jax.random.normal(k3, (outer_nc,), jnp.float32)
        if kind == "middle":
            p["dn_g"] = jnp.ones((inner_nc,), jnp.float32)
            p["dn_b"] = jnp.zeros((inner_nc,), jnp.float32)
        if kind != "outermost":
            p["un_g"] = jnp.ones((outer_nc,), jnp.float32)
            p["un_b"] = jnp.zeros((outer_nc,), jnp.float32)
        blocks.append(p)
        kinds.append(kind)
    return blocks, tuple(kinds)


def _run_block(part, blocks, kinds, i):
    """`part` = (tensor, pending_bn_scale, pending_bn_shift).  Non-outermost blocks return
    a list of parts representing torch.cat([model(x), x], 1) without materializing it."""
    p = blocks[i]
    kind = kinds[i]
    outermost = kind == "outermost"
    innermost = kind == "innermost"
    x, sx, tx = part

    # downrelu (LeakyReLU 0.2) is fused into the down-conv GEMM prologue.
    act_d = None if outermost else "lrelu"
    h = conv3d_k4s2p1(x, sx, tx, p["dwm"], p["d_n"], p["d_co"], act=act_d)   # downconv
    if (not outermost) and (not innermost):
        s_dn, t_dn = batchnorm_scale_shift(h, p["dn_g"], p["dn_b"])          # downnorm (deferred)
    else:
        s_dn = t_dn = None
    if innermost:
        up_parts = [(h, None, None)]
    else:
        up_parts = _run_block((h, s_dn, t_dn), blocks, kinds, i + 1)         # submodule
    # uprelu (ReLU) fused into the up-conv GEMM prologue; Tanh fused in XLA (outermost).
    u = convT3d_k4s2p1(up_parts, p["uwm"], p["u_n"], p["u_co"],
                       bias=p.get("ub"), final_tanh=outermost)
    if outermost:
        return u
    s_un, t_un = batchnorm_scale_shift(u, p["un_g"], p["un_b"])              # upnorm (deferred)
    return [(u, s_un, t_un), (x, sx, tx)]                                    # cat([model(x), x])


def unet_forward(x_ncdhw, blocks, kinds):
    # NCDHW at the boundary (PyTorch), channels-last (N,D,H,W,C) internally.
    x = jnp.transpose(x_ncdhw, (0, 2, 3, 4, 1)).astype(jnp.float32)
    y = _run_block((x, None, None), blocks, kinds, 0)
    return jnp.transpose(y, (0, 4, 1, 2, 3))


# --------------------------------------------------------------------------------------
if __name__ == "__main__":
    input_nc = output_nc = 2
    ngf = 4
    num_downs = 5                       # spatial must be divisible by 2**num_downs
    N, S = 1, 32                        # input volume (N, C, 32, 32, 32)

    key = jax.random.PRNGKey(0)
    kx, kp = jax.random.split(key)
    x = jax.random.normal(kx, (N, input_nc, S, S, S), jnp.float32)

    blocks, kinds = init_unet_params(kp, input_nc, output_nc, ngf, num_downs)

    fwd = jax.jit(lambda inp: unet_forward(inp, blocks, kinds))
    y = fwd(x)
    jax.block_until_ready(y)

    assert y.shape == (N, output_nc, S, S, S), y.shape
    assert bool(jnp.all(jnp.isfinite(y)))
    print("KERNEL_OK")
</pallas_src>

<mosaic_0001>
module attributes {stable_mosaic.version = 11 : i64} {
  func.func @_gemm_kernel_single_k(%arg0: i32, %arg1: i32, %arg2: memref<1024x128xbf16, #tpu.memory_space<vmem>>, %arg3: memref<128x128xbf16, #tpu.memory_space<vmem>>, %arg4: memref<1024x128xbf16, #tpu.memory_space<vmem>>) attributes {dimension_semantics = [#tpu.dimension_semantics<parallel>, #tpu.dimension_semantics<parallel>], iteration_bounds = array<i64: 5, 1>, scalar_prefetch = 0 : i64, scratch_operands = 0 : i64, tpu.core_type = #tpu.core_type<tc>, window_params = [{transform_indices = @transform_0, window_bounds = array<i64: 1024, 128>}, {transform_indices = @transform_1, window_bounds = array<i64: 128, 128>}, {transform_indices = @transform_2, window_bounds = array<i64: 1024, 128>}]} {
    %c0 = arith.constant 0 : index
    %c0_0 = arith.constant 0 : index
    %0 = vector.load %arg2[%c0, %c0_0] : memref<1024x128xbf16, #tpu.memory_space<vmem>>, vector<1024x128xbf16>
    %c0_1 = arith.constant 0 : index
    %c0_2 = arith.constant 0 : index
    %1 = vector.load %arg3[%c0_1, %c0_2] : memref<128x128xbf16, #tpu.memory_space<vmem>>, vector<128x128xbf16>
    %cst = arith.constant dense<0.000000e+00> : vector<1024x128xf32>
    %2 = tpu.matmul %0, %1, %cst {dimension_numbers = #tpu.dot_dimension_numbers<[1], [0], [0], [1], [0, 0, 1, 1], [], []>} : vector<1024x128xbf16>, vector<128x128xbf16>, vector<1024x128xf32> -> vector<1024x128xf32>
    %3 = arith.truncf %2 : vector<1024x128xf32> to vector<1024x128xbf16>
    %c0_3 = arith.constant 0 : index
    %c0_4 = arith.constant 0 : index
    %4 = vector.load %arg4[%c0_3, %c0_4] : memref<1024x128xbf16, #tpu.memory_space<vmem>>, vector<1024x128xbf16>
    tpu.vector_store %arg4[%c0_3, %c0_4], %3 {strides = array<i32>} : memref<1024x128xbf16, #tpu.memory_space<vmem>>, vector<1024x128xbf16>,
    return
  }
  func.func @transform_0(%arg0: i32, %arg1: i32) -> (i32, i32) {
    %c0_i32 = arith.constant 0 : i32
    %c0_i32_0 = arith.constant 0 : i32
    return %arg0, %c0_i32 : i32, i32
  }
  func.func @transform_1(%arg0: i32, %arg1: i32) -> (i32, i32) {
    %c0_i32 = arith.constant 0 : i32
    %c0_i32_0 = arith.constant 0 : i32
    return %c0_i32, %arg1 : i32, i32
  }
  func.func @transform_2(%arg0: i32, %arg1: i32) -> (i32, i32) {
    %c0_i32 = arith.constant 0 : i32
    return %arg0, %arg1 : i32, i32
  }
}

module attributes {stable_mosaic.version = 11 : i64} {
  func.func @_gemm_kernel_single_k(%arg0: i32, %arg1: i32, %arg2: memref<512x128xbf16, #tpu.memory_space<vmem>>, %arg3: memref<128x128xbf16, #tpu.memory_space<vmem>>, %arg4: memref<512x128xbf16, #tpu.memory_space<vmem>>) attributes {dimension_semantics = [#tpu.dimension_semantics<parallel>, #tpu.dimension_semantics<parallel>], iteration_bounds = array<i64: 2, 1>, scalar_prefetch = 0 : i64, scratch_operands = 0 : i64, tpu.core_type = #tpu.core_type<tc>, window_params = [{transform_indices = @transform_0, window_bounds = array<i64: 512, 128>}, {transform_indices = @transform_1, window_bounds = array<i64: 128, 128>}, {transform_indices = @transform_2, window_bounds = array<i64: 512, 128>}]} {
    %c0 = arith.constant 0 : index
    %c0_0 = arith.constant 0 : index
    %0 = vector.load %arg2[%c0, %c0_0] : memref<512x128xbf16, #tpu.memory_space<vmem>>, vector<512x128xbf16>
    %cst = arith.constant 0.000000e+00 : bf16
    %1 = vector.broadcast %cst : bf16 to vector<512x128xbf16>
    %2 = arith.cmpf oge, %0, %1 : vector<512x128xbf16>
    %cst_1 = arith.constant 2.001950e-01 : bf16
    %3 = vector.broadcast %cst_1 : bf16 to vector<512x128xbf16>
    %4 = arith.mulf %3, %0 : vector<512x128xbf16>
    %5 = arith.select %2, %0, %4 : vector<512x128xi1>, vector<512x128xbf16>
    %c0_2 = arith.constant 0 : index
    %c0_3 = arith.constant 0 : index
    %6 = vector.load %arg3[%c0_2, %c0_3] : memref<128x128xbf16, #tpu.memory_space<vmem>>, vector<128x128xbf16>
    %cst_4 = arith.constant dense<0.000000e+00> : vector<512x128xf32>
    %7 = tpu.matmul %5, %6, %cst_4 {dimension_numbers = #tpu.dot_dimension_numbers<[1], [0], [0], [1], [0, 0, 1, 1], [], []>} : vector<512x128xbf16>, vector<128x128xbf16>, vector<512x128xf32> -> vector<512x128xf32>
    %8 = arith.truncf %7 : vector<512x128xf32> to vector<512x128xbf16>
    %c0_5 = arith.constant 0 : index
    %c0_6 = arith.constant 0 : index
    %9 = vector.load %arg4[%c0_5, %c0_6] : memref<512x128xbf16, #tpu.memory_space<vmem>>, vector<512x128xbf16>
    tpu.vector_store %arg4[%c0_5, %c0_6], %8 {strides = array<i32>} : memref<512x128xbf16, #tpu.memory_space<vmem>>, vector<512x128xbf16>,
    return
  }
  func.func @transform_0(%arg0: i32, %arg1: i32) -> (i32, i32) {
    %c0_i32 = arith.constant 0 : i32
    %c0_i32_0 = arith.constant 0 : i32
    return %arg0, %c0_i32 : i32, i32
  }
  func.func @transform_1(%arg0: i32, %arg1: i32) -> (i32, i32) {
    %c0_i32 = arith.constant 0 : i32
    %c0_i32_0 = arith.constant 0 : i32
    return %c0_i32, %arg1 : i32, i32
  }
  func.func @transform_2(%arg0: i32, %arg1: i32) -> (i32, i32) {
    %c0_i32 = arith.constant 0 : i32
    return %arg0, %arg1 : i32, i32
  }
}

module attributes {stable_mosaic.version = 11 : i64} {
  func.func @_bn_stats_kernel(%arg0: i32, %arg1: i32, %arg2: memref<8x512xbf16, #tpu.memory_space<vmem>>, %arg3: memref<1x512xf32, #tpu.memory_space<vmem>>, %arg4: memref<1x512xf32, #tpu.memory_space<vmem>>) attributes {dimension_semantics = [#tpu.dimension_semantics<parallel>, #tpu.dimension_semantics<arbitrary>], iteration_bounds = array<i64: 1, 1>, scalar_prefetch = 0 : i64, scratch_operands = 0 : i64, tpu.core_type = #tpu.core_type<tc>, window_params = [{transform_indices = @transform_0, window_bounds = array<i64: 8, 512>}, {transform_indices = @transform_1, window_bounds = array<i64: 1, 512>}, {transform_indices = @transform_2, window_bounds = array<i64: 1, 512>}]} {
    %c0_i32 = arith.constant 0 : i32
    %0 = arith.cmpi eq, %arg1, %c0_i32 : i32
    %1 = arith.extui %0 : i1 to i32
    %c0_i32_0 = arith.constant 0 : i32
    %2 = arith.cmpi ne, %1, %c0_i32_0 : i32
    scf.if %2 {
      %cst_11 = arith.constant 0.000000e+00 : f32
      %16 = vector.broadcast %cst_11 : f32 to vector<1x512xf32>
      %c0_12 = arith.constant 0 : index
      %c0_13 = arith.constant 0 : index
      %17 = vector.load %arg3[%c0_12, %c0_13] : memref<1x512xf32, #tpu.memory_space<vmem>>, vector<1x512xf32>
      tpu.vector_store %arg3[%c0_12, %c0_13], %16 {strides = array<i32>} : memref<1x512xf32, #tpu.memory_space<vmem>>, vector<1x512xf32>,
      %cst_14 = arith.constant 0.000000e+00 : f32
      %18 = vector.broadcast %cst_14 : f32 to vector<1x512xf32>
      %c0_15 = arith.constant 0 : index
      %c0_16 = arith.constant 0 : index
      %19 = vector.load %arg4[%c0_15, %c0_16] : memref<1x512xf32, #tpu.memory_space<vmem>>, vector<1x512xf32>
      tpu.vector_store %arg4[%c0_15, %c0_16], %18 {strides = array<i32>} : memref<1x512xf32, #tpu.memory_space<vmem>>, vector<1x512xf32>,
    } else {
    }
    %c0 = arith.constant 0 : index
    %c0_1 = arith.constant 0 : index
    %3 = vector.load %arg2[%c0, %c0_1] : memref<8x512xbf16, #tpu.memory_space<vmem>>, vector<8x512xbf16>
    %4 = arith.extf %3 : vector<8x512xbf16> to vector<8x512xf32>
    %c0_2 = arith.constant 0 : index
    %c0_3 = arith.constant 0 : index
    %5 = vector.load %arg3[%c0_2, %c0_3] : memref<1x512xf32, #tpu.memory_space<vmem>>, vector<1x512xf32>
    %cst = arith.constant dense<0.000000e+00> : vector<512xf32>
    %6 = vector.multi_reduction <add>, %4, %cst [0] : vector<8x512xf32> to vector<512xf32>
    %7 = vector.shape_cast %6 : vector<512xf32> to vector<1x512xf32>
    %8 = arith.addf %5, %7 : vector<1x512xf32>
    %c0_4 = arith.constant 0 : index
    %c0_5 = arith.constant 0 : index
    %9 = vector.load %arg3[%c0_4, %c0_5] : memref<1x512xf32, #tpu.memory_space<vmem>>, vector<1x512xf32>
    tpu.vector_store %arg3[%c0_4, %c0_5], %8 {strides = array<i32>} : memref<1x512xf32, #tpu.memory_space<vmem>>, vector<1x512xf32>,
    %c0_6 = arith.constant 0 : index
    %c0_7 = arith.constant 0 : index
    %10 = vector.load %arg4[%c0_6, %c0_7] : memref<1x512xf32, #tpu.memory_space<vmem>>, vector<1x512xf32>
    %11 = arith.mulf %4, %4 : vector<8x512xf32>
    %cst_8 = arith.constant dense<0.000000e+00> : vector<512xf32>
    %12 = vector.multi_reduction <add>, %11, %cst_8 [0] : vector<8x512xf32> to vector<512xf32>
    %13 = vector.shape_cast %12 : vector<512xf32> to vector<1x512xf32>
    %14 = arith.addf %10, %13 : vector<1x512xf32>
    %c0_9 = arith.constant 0 : index
    %c0_10 = arith.constant 0 : index
    %15 = vector.load %arg4[%c0_9, %c0_10] : memref<1x512xf32, #tpu.memory_space<vmem>>, vector<1x512xf32>
    tpu.vector_store %arg4[%c0_9, %c0_10], %14 {strides = array<i32>} : memref<1x512xf32, #tpu.memory_space<vmem>>, vector<1x512xf32>,
    return
  }
  func.func @transform_0(%arg0: i32, %arg1: i32) -> (i32, i32) {
    %c0_i32 = arith.constant 0 : i32
    return %arg1, %arg0 : i32, i32
  }
  func.func @transform_1(%arg0: i32, %arg1: i32) -> (i32, i32) {
    %c0_i32 = arith.constant 0 : i32
    %c0_i32_0 = arith.constant 0 : i32
    return %c0_i32, %arg0 : i32, i32
  }
  func.func @transform_2(%arg0: i32, %arg1: i32) -> (i32, i32) {
    %c0_i32 = arith.constant 0 : i32
    %c0_i32_0 = arith.constant 0 : i32
    return %c0_i32, %arg0 : i32, i32
  }
}

module attributes {stable_mosaic.version = 11 : i64} {
  func.func @_gemm_kernel_single_k(%arg0: i32, %arg1: i32, %arg2: memref<64x128xbf16, #tpu.memory_space<vmem>>, %arg3: memref<128x128xbf16, #tpu.memory_space<vmem>>, %arg4: memref<64x128xbf16, #tpu.memory_space<vmem>>) attributes {dimension_semantics = [#tpu.dimension_semantics<parallel>, #tpu.dimension_semantics<parallel>], iteration_bounds = array<i64: 2, 1>, scalar_prefetch = 0 : i64, scratch_operands = 0 : i64, tpu.core_type = #tpu.core_type<tc>, window_params = [{transform_indices = @transform_0, window_bounds = array<i64: 64, 128>}, {transform_indices = @transform_1, window_bounds = array<i64: 128, 128>}, {transform_indices = @transform_2, window_bounds = array<i64: 64, 128>}]} {
    %c0 = arith.constant 0 : index
    %c0_0 = arith.constant 0 : index
    %0 = vector.load %arg2[%c0, %c0_0] : memref<64x128xbf16, #tpu.memory_space<vmem>>, vector<64x128xbf16>
    %cst = arith.constant 0.000000e+00 : bf16
    %1 = vector.broadcast %cst : bf16 to vector<64x128xbf16>
    %2 = arith.cmpf oge, %0, %1 : vector<64x128xbf16>
    %cst_1 = arith.constant 2.001950e-01 : bf16
    %3 = vector.broadcast %cst_1 : bf16 to vector<64x128xbf16>
    %4 = arith.mulf %3, %0 : vector<64x128xbf16>
    %5 = arith.select %2, %0, %4 : vector<64x128xi1>, vector<64x128xbf16>
    %c0_2 = arith.constant 0 : index
    %c0_3 = arith.constant 0 : index
    %6 = vector.load %arg3[%c0_2, %c0_3] : memref<128x128xbf16, #tpu.memory_space<vmem>>, vector<128x128xbf16>
    %cst_4 = arith.constant dense<0.000000e+00> : vector<64x128xf32>
    %7 = tpu.matmul %5, %6, %cst_4 {dimension_numbers = #tpu.dot_dimension_numbers<[1], [0], [0], [1], [0, 0, 1, 1], [], []>} : vector<64x128xbf16>, vector<128x128xbf16>, vector<64x128xf32> -> vector<64x128xf32>
    %8 = arith.truncf %7 : vector<64x128xf32> to vector<64x128xbf16>
    %c0_5 = arith.constant 0 : index
    %c0_6 = arith.constant 0 : index
    %9 = vector.load %arg4[%c0_5, %c0_6] : memref<64x128xbf16, #tpu.memory_space<vmem>>, vector<64x128xbf16>
    tpu.vector_store %arg4[%c0_5, %c0_6], %8 {strides = array<i32>} : memref<64x128xbf16, #tpu.memory_space<vmem>>, vector<64x128xbf16>,
    return
  }
  func.func @transform_0(%arg0: i32, %arg1: i32) -> (i32, i32) {
    %c0_i32 = arith.constant 0 : i32
    %c0_i32_0 = arith.constant 0 : i32
    return %arg0, %c0_i32 : i32, i32
  }
  func.func @transform_1(%arg0: i32, %arg1: i32) -> (i32, i32) {
    %c0_i32 = arith.constant 0 : i32
    %c0_i32_0 = arith.constant 0 : i32
    return %c0_i32, %arg1 : i32, i32
  }
  func.func @transform_2(%arg0: i32, %arg1: i32) -> (i32, i32) {
    %c0_i32 = arith.constant 0 : i32
    return %arg0, %arg1 : i32, i32
  }
}

module attributes {stable_mosaic.version = 11 : i64} {
  func.func @_bn_stats_kernel(%arg0: i32, %arg1: i32, %arg2: memref<4x256xbf16, #tpu.memory_space<vmem>>, %arg3: memref<1x256xf32, #tpu.memory_space<vmem>>, %arg4: memref<1x256xf32, #tpu.memory_space<vmem>>) attributes {dimension_semantics = [#tpu.dimension_semantics<parallel>, #tpu.dimension_semantics<arbitrary>], iteration_bounds = array<i64: 1, 1>, scalar_prefetch = 0 : i64, scratch_operands = 0 : i64, tpu.core_type = #tpu.core_type<tc>, window_params = [{transform_indices = @transform_0, window_bounds = array<i64: 4, 256>}, {transform_indices = @transform_1, window_bounds = array<i64: 1, 256>}, {transform_indices = @transform_2, window_bounds = array<i64: 1, 256>}]} {
    %c0_i32 = arith.constant 0 : i32
    %0 = arith.cmpi eq, %arg1, %c0_i32 : i32
    %1 = arith.extui %0 : i1 to i32
    %c0_i32_0 = arith.constant 0 : i32
    %2 = arith.cmpi ne, %1, %c0_i32_0 : i32
    scf.if %2 {
      %cst_11 = arith.constant 0.000000e+00 : f32
      %16 = vector.broadcast %cst_11 : f32 to vector<1x256xf32>
      %c0_12 = arith.constant 0 : index
      %c0_13 = arith.constant 0 : index
      %17 = vector.load %arg3[%c0_12, %c0_13] : memref<1x256xf32, #tpu.memory_space<vmem>>, vector<1x256xf32>
      tpu.vector_store %arg3[%c0_12, %c0_13], %16 {strides = array<i32>} : memref<1x256xf32, #tpu.memory_space<vmem>>, vector<1x256xf32>,
      %cst_14 = arith.constant 0.000000e+00 : f32
      %18 = vector.broadcast %cst_14 : f32 to vector<1x256xf32>
      %c0_15 = arith.constant 0 : index
      %c0_16 = arith.constant 0 : index
      %19 = vector.load %arg4[%c0_15, %c0_16] : memref<1x256xf32, #tpu.memory_space<vmem>>, vector<1x256xf32>
      tpu.vector_store %arg4[%c0_15, %c0_16], %18 {strides = array<i32>} : memref<1x256xf32, #tpu.memory_space<vmem>>, vector<1x256xf32>,
    } else {
    }
    %c0 = arith.constant 0 : index
    %c0_1 = arith.constant 0 : index
    %3 = vector.load %arg2[%c0, %c0_1] : memref<4x256xbf16, #tpu.memory_space<vmem>>, vector<4x256xbf16>
    %4 = arith.extf %3 : vector<4x256xbf16> to vector<4x256xf32>
    %c0_2 = arith.constant 0 : index
    %c0_3 = arith.constant 0 : index
    %5 = vector.load %arg3[%c0_2, %c0_3] : memref<1x256xf32, #tpu.memory_space<vmem>>, vector<1x256xf32>
    %cst = arith.constant dense<0.000000e+00> : vector<256xf32>
    %6 = vector.multi_reduction <add>, %4, %cst [0] : vector<4x256xf32> to vector<256xf32>
    %7 = vector.shape_cast %6 : vector<256xf32> to vector<1x256xf32>
    %8 = arith.addf %5, %7 : vector<1x256xf32>
    %c0_4 = arith.constant 0 : index
    %c0_5 = arith.constant 0 : index
    %9 = vector.load %arg3[%c0_4, %c0_5] : memref<1x256xf32, #tpu.memory_space<vmem>>, vector<1x256xf32>
    tpu.vector_store %arg3[%c0_4, %c0_5], %8 {strides = array<i32>} : memref<1x256xf32, #tpu.memory_space<vmem>>, vector<1x256xf32>,
    %c0_6 = arith.constant 0 : index
    %c0_7 = arith.constant 0 : index
    %10 = vector.load %arg4[%c0_6, %c0_7] : memref<1x256xf32, #tpu.memory_space<vmem>>, vector<1x256xf32>
    %11 = arith.mulf %4, %4 : vector<4x256xf32>
    %cst_8 = arith.constant dense<0.000000e+00> : vector<256xf32>
    %12 = vector.multi_reduction <add>, %11, %cst_8 [0] : vector<4x256xf32> to vector<256xf32>
    %13 = vector.shape_cast %12 : vector<256xf32> to vector<1x256xf32>
    %14 = arith.addf %10, %13 : vector<1x256xf32>
    %c0_9 = arith.constant 0 : index
    %c0_10 = arith.constant 0 : index
    %15 = vector.load %arg4[%c0_9, %c0_10] : memref<1x256xf32, #tpu.memory_space<vmem>>, vector<1x256xf32>
    tpu.vector_store %arg4[%c0_9, %c0_10], %14 {strides = array<i32>} : memref<1x256xf32, #tpu.memory_space<vmem>>, vector<1x256xf32>,
    return
  }
  func.func @transform_0(%arg0: i32, %arg1: i32) -> (i32, i32) {
    %c0_i32 = arith.constant 0 : i32
    return %arg1, %arg0 : i32, i32
  }
  func.func @transform_1(%arg0: i32, %arg1: i32) -> (i32, i32) {
    %c0_i32 = arith.constant 0 : i32
    %c0_i32_0 = arith.constant 0 : i32
    return %c0_i32, %arg0 : i32, i32
  }
  func.func @transform_2(%arg0: i32, %arg1: i32) -> (i32, i32) {
    %c0_i32 = arith.constant 0 : i32
    %c0_i32_0 = arith.constant 0 : i32
    return %c0_i32, %arg0 : i32, i32
  }
}

module attributes {stable_mosaic.version = 11 : i64} {
  func.func @_gemm_kernel_single_k(%arg0: i32, %arg1: i32, %arg2: memref<16x128xbf16, #tpu.memory_space<vmem>>, %arg3: memref<128x256xbf16, #tpu.memory_space<vmem>>, %arg4: memref<16x256xbf16, #tpu.memory_space<vmem>>) attributes {dimension_semantics = [#tpu.dimension_semantics<parallel>, #tpu.dimension_semantics<parallel>], iteration_bounds = array<i64: 2, 1>, scalar_prefetch = 0 : i64, scratch_operands = 0 : i64, tpu.core_type = #tpu.core_type<tc>, window_params = [{transform_indices = @transform_0, window_bounds = array<i64: 16, 128>}, {transform_indices = @transform_1, window_bounds = array<i64: 128, 256>}, {transform_indices = @transform_2, window_bounds = array<i64: 16, 256>}]} {
    %c0 = arith.constant 0 : index
    %c0_0 = arith.constant 0 : index
    %0 = vector.load %arg2[%c0, %c0_0] : memref<16x128xbf16, #tpu.memory_space<vmem>>, vector<16x128xbf16>
    %cst = arith.constant 0.000000e+00 : bf16
    %1 = vector.broadcast %cst : bf16 to vector<16x128xbf16>
    %2 = arith.cmpf oge, %0, %1 : vector<16x128xbf16>
    %cst_1 = arith.constant 2.001950e-01 : bf16
    %3 = vector.broadcast %cst_1 : bf16 to vector<16x128xbf16>
    %4 = arith.mulf %3, %0 : vector<16x128xbf16>
    %5 = arith.select %2, %0, %4 : vector<16x128xi1>, vector<16x128xbf16>
    %c0_2 = arith.constant 0 : index
    %c0_3 = arith.constant 0 : index
    %6 = vector.load %arg3[%c0_2, %c0_3] : memref<128x256xbf16, #tpu.memory_space<vmem>>, vector<128x256xbf16>
    %cst_4 = arith.constant dense<0.000000e+00> : vector<16x256xf32>
    %7 = tpu.matmul %5, %6, %cst_4 {dimension_numbers = #tpu.dot_dimension_numbers<[1], [0], [0], [1], [0, 0, 1, 1], [], []>} : vector<16x128xbf16>, vector<128x256xbf16>, vector<16x256xf32> -> vector<16x256xf32>
    %8 = arith.truncf %7 : vector<16x256xf32> to vector<16x256xbf16>
    %c0_5 = arith.constant 0 : index
    %c0_6 = arith.constant 0 : index
    %9 = vector.load %arg4[%c0_5, %c0_6] : memref<16x256xbf16, #tpu.memory_space<vmem>>, vector<16x256xbf16>
    tpu.vector_store %arg4[%c0_5, %c0_6], %8 {strides = array<i32>} : memref<16x256xbf16, #tpu.memory_space<vmem>>, vector<16x256xbf16>,
    return
  }
  func.func @transform_0(%arg0: i32, %arg1: i32) -> (i32, i32) {
    %c0_i32 = arith.constant 0 : i32
    %c0_i32_0 = arith.constant 0 : i32
    return %arg0, %c0_i32 : i32, i32
  }
  func.func @transform_1(%arg0: i32, %arg1: i32) -> (i32, i32) {
    %c0_i32 = arith.constant 0 : i32
    %c0_i32_0 = arith.constant 0 : i32
    return %c0_i32, %arg1 : i32, i32
  }
  func.func @transform_2(%arg0: i32, %arg1: i32) -> (i32, i32) {
    %c0_i32 = arith.constant 0 : i32
    return %arg0, %arg1 : i32, i32
  }
}

module attributes {stable_mosaic.version = 11 : i64} {
  func.func @_bn_stats_kernel(%arg0: i32, %arg1: i32, %arg2: memref<2x128xbf16, #tpu.memory_space<vmem>>, %arg3: memref<1x128xf32, #tpu.memory_space<vmem>>, %arg4: memref<1x128xf32, #tpu.memory_space<vmem>>) attributes {dimension_semantics = [#tpu.dimension_semantics<parallel>, #tpu.dimension_semantics<arbitrary>], iteration_bounds = array<i64: 1, 1>, scalar_prefetch = 0 : i64, scratch_operands = 0 : i64, tpu.core_type = #tpu.core_type<tc>, window_params = [{transform_indices = @transform_0, window_bounds = array<i64: 2, 128>}, {transform_indices = @transform_1, window_bounds = array<i64: 1, 128>}, {transform_indices = @transform_2, window_bounds = array<i64: 1, 128>}]} {
    %c0_i32 = arith.constant 0 : i32
    %0 = arith.cmpi eq, %arg1, %c0_i32 : i32
    %1 = arith.extui %0 : i1 to i32
    %c0_i32_0 = arith.constant 0 : i32
    %2 = arith.cmpi ne, %1, %c0_i32_0 : i32
    scf.if %2 {
      %cst_11 = arith.constant 0.000000e+00 : f32
      %16 = vector.broadcast %cst_11 : f32 to vector<1x128xf32>
      %c0_12 = arith.constant 0 : index
      %c0_13 = arith.constant 0 : index
      %17 = vector.load %arg3[%c0_12, %c0_13] : memref<1x128xf32, #tpu.memory_space<vmem>>, vector<1x128xf32>
      tpu.vector_store %arg3[%c0_12, %c0_13], %16 {strides = array<i32>} : memref<1x128xf32, #tpu.memory_space<vmem>>, vector<1x128xf32>,
      %cst_14 = arith.constant 0.000000e+00 : f32
      %18 = vector.broadcast %cst_14 : f32 to vector<1x128xf32>
      %c0_15 = arith.constant 0 : index
      %c0_16 = arith.constant 0 : index
      %19 = vector.load %arg4[%c0_15, %c0_16] : memref<1x128xf32, #tpu.memory_space<vmem>>, vector<1x128xf32>
      tpu.vector_store %arg4[%c0_15, %c0_16], %18 {strides = array<i32>} : memref<1x128xf32, #tpu.memory_space<vmem>>, vector<1x128xf32>,
    } else {
    }
    %c0 = arith.constant 0 : index
    %c0_1 = arith.constant 0 : index
    %3 = vector.load %arg2[%c0, %c0_1] : memref<2x128xbf16, #tpu.memory_space<vmem>>, vector<2x128xbf16>
    %4 = arith.extf %3 : vector<2x128xbf16> to vector<2x128xf32>
    %c0_2 = arith.constant 0 : index
    %c0_3 = arith.constant 0 : index
    %5 = vector.load %arg3[%c0_2, %c0_3] : memref<1x128xf32, #tpu.memory_space<vmem>>, vector<1x128xf32>
    %cst = arith.constant dense<0.000000e+00> : vector<128xf32>
    %6 = vector.multi_reduction <add>, %4, %cst [0] : vector<2x128xf32> to vector<128xf32>
    %7 = vector.shape_cast %6 : vector<128xf32> to vector<1x128xf32>
    %8 = arith.addf %5, %7 : vector<1x128xf32>
    %c0_4 = arith.constant 0 : index
    %c0_5 = arith.constant 0 : index
    %9 = vector.load %arg3[%c0_4, %c0_5] : memref<1x128xf32, #tpu.memory_space<vmem>>, vector<1x128xf32>
    tpu.vector_store %arg3[%c0_4, %c0_5], %8 {strides = array<i32>} : memref<1x128xf32, #tpu.memory_space<vmem>>, vector<1x128xf32>,
    %c0_6 = arith.constant 0 : index
    %c0_7 = arith.constant 0 : index
    %10 = vector.load %arg4[%c0_6, %c0_7] : memref<1x128xf32, #tpu.memory_space<vmem>>, vector<1x128xf32>
    %11 = arith.mulf %4, %4 : vector<2x128xf32>
    %cst_8 = arith.constant dense<0.000000e+00> : vector<128xf32>
    %12 = vector.multi_reduction <add>, %11, %cst_8 [0] : vector<2x128xf32> to vector<128xf32>
    %13 = vector.shape_cast %12 : vector<128xf32> to vector<1x128xf32>
    %14 = arith.addf %10, %13 : vector<1x128xf32>
    %c0_9 = arith.constant 0 : index
    %c0_10 = arith.constant 0 : index
    %15 = vector.load %arg4[%c0_9, %c0_10] : memref<1x128xf32, #tpu.memory_space<vmem>>, vector<1x128xf32>
    tpu.vector_store %arg4[%c0_9, %c0_10], %14 {strides = array<i32>} : memref<1x128xf32, #tpu.memory_space<vmem>>, vector<1x128xf32>,
    return
  }
  func.func @transform_0(%arg0: i32, %arg1: i32) -> (i32, i32) {
    %c0_i32 = arith.constant 0 : i32
    return %arg1, %arg0 : i32, i32
  }
  func.func @transform_1(%arg0: i32, %arg1: i32) -> (i32, i32) {
    %c0_i32 = arith.constant 0 : i32
    %c0_i32_0 = arith.constant 0 : i32
    return %c0_i32, %arg0 : i32, i32
  }
  func.func @transform_2(%arg0: i32, %arg1: i32) -> (i32, i32) {
    %c0_i32 = arith.constant 0 : i32
    %c0_i32_0 = arith.constant 0 : i32
    return %c0_i32, %arg0 : i32, i32
  }
}

module attributes {stable_mosaic.version = 11 : i64} {
  func.func @_gemm_kernel_single_k(%arg0: i32, %arg1: i32, %arg2: memref<8x256xbf16, #tpu.memory_space<vmem>>, %arg3: memref<256x256xbf16, #tpu.memory_space<vmem>>, %arg4: memref<8x256xbf16, #tpu.memory_space<vmem>>) attributes {dimension_semantics = [#tpu.dimension_semantics<parallel>, #tpu.dimension_semantics<parallel>], iteration_bounds = array<i64: 1, 1>, scalar_prefetch = 0 : i64, scratch_operands = 0 : i64, tpu.core_type = #tpu.core_type<tc>, window_params = [{transform_indices = @transform_0, window_bounds = array<i64: 8, 256>}, {transform_indices = @transform_1, window_bounds = array<i64: 256, 256>}, {transform_indices = @transform_2, window_bounds = array<i64: 8, 256>}]} {
    %c0 = arith.constant 0 : index
    %c0_0 = arith.constant 0 : index
    %0 = vector.load %arg2[%c0, %c0_0] : memref<8x256xbf16, #tpu.memory_space<vmem>>, vector<8x256xbf16>
    %cst = arith.constant 0.000000e+00 : bf16
    %1 = vector.broadcast %cst : bf16 to vector<8x256xbf16>
    %2 = arith.cmpf oge, %0, %1 : vector<8x256xbf16>
    %cst_1 = arith.constant 2.001950e-01 : bf16
    %3 = vector.broadcast %cst_1 : bf16 to vector<8x256xbf16>
    %4 = arith.mulf %3, %0 : vector<8x256xbf16>
    %5 = arith.select %2, %0, %4 : vector<8x256xi1>, vector<8x256xbf16>
    %c0_2 = arith.constant 0 : index
    %c0_3 = arith.constant 0 : index
    %6 = vector.load %arg3[%c0_2, %c0_3] : memref<256x256xbf16, #tpu.memory_space<vmem>>, vector<256x256xbf16>
    %cst_4 = arith.constant dense<0.000000e+00> : vector<8x256xf32>
    %7 = tpu.matmul %5, %6, %cst_4 {dimension_numbers = #tpu.dot_dimension_numbers<[1], [0], [0], [1], [0, 0, 1, 1], [], []>} : vector<8x256xbf16>, vector<256x256xbf16>, vector<8x256xf32> -> vector<8x256xf32>
    %8 = arith.truncf %7 : vector<8x256xf32> to vector<8x256xbf16>
    %c0_5 = arith.constant 0 : index
    %c0_6 = arith.constant 0 : index
    %9 = vector.load %arg4[%c0_5, %c0_6] : memref<8x256xbf16, #tpu.memory_space<vmem>>, vector<8x256xbf16>
    tpu.vector_store %arg4[%c0_5, %c0_6], %8 {strides = array<i32>} : memref<8x256xbf16, #tpu.memory_space<vmem>>, vector<8x256xbf16>,
    return
  }
  func.func @transform_0(%arg0: i32, %arg1: i32) -> (i32, i32) {
    %c0_i32 = arith.constant 0 : i32
    %c0_i32_0 = arith.constant 0 : i32
    return %arg0, %c0_i32 : i32, i32
  }
  func.func @transform_1(%arg0: i32, %arg1: i32) -> (i32, i32) {
    %c0_i32 = arith.constant 0 : i32
    %c0_i32_0 = arith.constant 0 : i32
    return %c0_i32, %arg1 : i32, i32
  }
  func.func @transform_2(%arg0: i32, %arg1: i32) -> (i32, i32) {
    %c0_i32 = arith.constant 0 : i32
    return %arg0, %arg1 : i32, i32
  }
}

module attributes {stable_mosaic.version = 11 : i64} {
  func.func @_gemm_kernel_single_k(%arg0: i32, %arg1: i32, %arg2: memref<32x128xbf16, #tpu.memory_space<vmem>>, %arg3: memref<128x1024xbf16, #tpu.memory_space<vmem>>, %arg4: memref<32x1024xbf16, #tpu.memory_space<vmem>>) attributes {dimension_semantics = [#tpu.dimension_semantics<parallel>, #tpu.dimension_semantics<parallel>], iteration_bounds = array<i64: 1, 2>, scalar_prefetch = 0 : i64, scratch_operands = 0 : i64, tpu.core_type = #tpu.core_type<tc>, window_params = [{transform_indices = @transform_0, window_bounds = array<i64: 32, 128>}, {transform_indices = @transform_1, window_bounds = array<i64: 128, 1024>}, {transform_indices = @transform_2, window_bounds = array<i64: 32, 1024>}]} {
    %c0 = arith.constant 0 : index
    %c0_0 = arith.constant 0 : index
    %0 = vector.load %arg2[%c0, %c0_0] : memref<32x128xbf16, #tpu.memory_space<vmem>>, vector<32x128xbf16>
    %cst = arith.constant 0.000000e+00 : bf16
    %1 = vector.broadcast %cst : bf16 to vector<32x128xbf16>
    %2 = arith.maximumf %0, %1 : vector<32x128xbf16>
    %c0_1 = arith.constant 0 : index
    %c0_2 = arith.constant 0 : index
    %3 = vector.load %arg3[%c0_1, %c0_2] : memref<128x1024xbf16, #tpu.memory_space<vmem>>, vector<128x1024xbf16>
    %cst_3 = arith.constant dense<0.000000e+00> : vector<32x1024xf32>
    %4 = tpu.matmul %2, %3, %cst_3 {dimension_numbers = #tpu.dot_dimension_numbers<[1], [0], [0], [1], [0, 0, 1, 1], [], []>} : vector<32x128xbf16>, vector<128x1024xbf16>, vector<32x1024xf32> -> vector<32x1024xf32>
    %5 = arith.truncf %4 : vector<32x1024xf32> to vector<32x1024xbf16>
    %c0_4 = arith.constant 0 : index
    %c0_5 = arith.constant 0 : index
    %6 = vector.load %arg4[%c0_4, %c0_5] : memref<32x1024xbf16, #tpu.memory_space<vmem>>, vector<32x1024xbf16>
    tpu.vector_store %arg4[%c0_4, %c0_5], %5 {strides = array<i32>} : memref<32x1024xbf16, #tpu.memory_space<vmem>>, vector<32x1024xbf16>,
    return
  }
  func.func @transform_0(%arg0: i32, %arg1: i32) -> (i32, i32) {
    %c0_i32 = arith.constant 0 : i32
    %c0_i32_0 = arith.constant 0 : i32
    return %arg0, %c0_i32 : i32, i32
  }
  func.func @transform_1(%arg0: i32, %arg1: i32) -> (i32, i32) {
    %c0_i32 = arith.constant 0 : i32
    %c0_i32_0 = arith.constant 0 : i32
    return %c0_i32, %arg1 : i32, i32
  }
  func.func @transform_2(%arg0: i32, %arg1: i32) -> (i32, i32) {
    %c0_i32 = arith.constant 0 : i32
    return %arg0, %arg1 : i32, i32
  }
}

module attributes {stable_mosaic.version = 11 : i64} {
  func.func @_gemm_kernel_single_k(%arg0: i32, %arg1: i32, %arg2: memref<32x128xbf16, #tpu.memory_space<vmem>>, %arg3: memref<128x1024xbf16, #tpu.memory_space<vmem>>, %arg4: memref<32x1024xbf16, #tpu.memory_space<vmem>>) attributes {dimension_semantics = [#tpu.dimension_semantics<parallel>, #tpu.dimension_semantics<parallel>], iteration_bounds = array<i64: 2, 1>, scalar_prefetch = 0 : i64, scratch_operands = 0 : i64, tpu.core_type = #tpu.core_type<tc>, window_params = [{transform_indices = @transform_0, window_bounds = array<i64: 32, 128>}, {transform_indices = @transform_1, window_bounds = array<i64: 128, 1024>}, {transform_indices = @transform_2, window_bounds = array<i64: 32, 1024>}]} {
    %c0 = arith.constant 0 : index
    %c0_0 = arith.constant 0 : index
    %0 = vector.load %arg2[%c0, %c0_0] : memref<32x128xbf16, #tpu.memory_space<vmem>>, vector<32x128xbf16>
    %cst = arith.constant 0.000000e+00 : bf16
    %1 = vector.broadcast %cst : bf16 to vector<32x128xbf16>
    %2 = arith.maximumf %0, %1 : vector<32x128xbf16>
    %c0_1 = arith.constant 0 : index
    %c0_2 = arith.constant 0 : index
    %3 = vector.load %arg3[%c0_1, %c0_2] : memref<128x1024xbf16, #tpu.memory_space<vmem>>, vector<128x1024xbf16>
    %cst_3 = arith.constant dense<0.000000e+00> : vector<32x1024xf32>
    %4 = tpu.matmul %2, %3, %cst_3 {dimension_numbers = #tpu.dot_dimension_numbers<[1], [0], [0], [1], [0, 0, 1, 1], [], []>} : vector<32x128xbf16>, vector<128x1024xbf16>, vector<32x1024xf32> -> vector<32x1024xf32>
    %5 = arith.truncf %4 : vector<32x1024xf32> to vector<32x1024xbf16>
    %c0_4 = arith.constant 0 : index
    %c0_5 = arith.constant 0 : index
    %6 = vector.load %arg4[%c0_4, %c0_5] : memref<32x1024xbf16, #tpu.memory_space<vmem>>, vector<32x1024xbf16>
    tpu.vector_store %arg4[%c0_4, %c0_5], %5 {strides = array<i32>} : memref<32x1024xbf16, #tpu.memory_space<vmem>>, vector<32x1024xbf16>,
    return
  }
  func.func @transform_0(%arg0: i32, %arg1: i32) -> (i32, i32) {
    %c0_i32 = arith.constant 0 : i32
    %c0_i32_0 = arith.constant 0 : i32
    return %arg0, %c0_i32 : i32, i32
  }
  func.func @transform_1(%arg0: i32, %arg1: i32) -> (i32, i32) {
    %c0_i32 = arith.constant 0 : i32
    %c0_i32_0 = arith.constant 0 : i32
    return %c0_i32, %arg1 : i32, i32
  }
  func.func @transform_2(%arg0: i32, %arg1: i32) -> (i32, i32) {
    %c0_i32 = arith.constant 0 : i32
    return %arg0, %arg1 : i32, i32
  }
}

module attributes {stable_mosaic.version = 11 : i64} {
  func.func @_gemm_kernel_single_k(%arg0: i32, %arg1: i32, %arg2: memref<112x128xbf16, #tpu.memory_space<vmem>>, %arg3: memref<128x512xbf16, #tpu.memory_space<vmem>>, %arg4: memref<112x512xbf16, #tpu.memory_space<vmem>>) attributes {dimension_semantics = [#tpu.dimension_semantics<parallel>, #tpu.dimension_semantics<parallel>], iteration_bounds = array<i64: 2, 1>, scalar_prefetch = 0 : i64, scratch_operands = 0 : i64, tpu.core_type = #tpu.core_type<tc>, window_params = [{transform_indices = @transform_0, window_bounds = array<i64: 112, 128>}, {transform_indices = @transform_1, window_bounds = array<i64: 128, 512>}, {transform_indices = @transform_2, window_bounds = array<i64: 112, 512>}]} {
    %c0 = arith.constant 0 : index
    %c0_0 = arith.constant 0 : index
    %0 = vector.load %arg2[%c0, %c0_0] : memref<112x128xbf16, #tpu.memory_space<vmem>>, vector<112x128xbf16>
    %cst = arith.constant 0.000000e+00 : bf16
    %1 = vector.broadcast %cst : bf16 to vector<112x128xbf16>
    %2 = arith.maximumf %0, %1 : vector<112x128xbf16>
    %c0_1 = arith.constant 0 : index
    %c0_2 = arith.constant 0 : index
    %3 = vector.load %arg3[%c0_1, %c0_2] : memref<128x512xbf16, #tpu.memory_space<vmem>>, vector<128x512xbf16>
    %cst_3 = arith.constant dense<0.000000e+00> : vector<112x512xf32>
    %4 = tpu.matmul %2, %3, %cst_3 {dimension_numbers = #tpu.dot_dimension_numbers<[1], [0], [0], [1], [0, 0, 1, 1], [], []>} : vector<112x128xbf16>, vector<128x512xbf16>, vector<112x512xf32> -> vector<112x512xf32>
    %5 = arith.truncf %4 : vector<112x512xf32> to vector<112x512xbf16>
    %c0_4 = arith.constant 0 : index
    %c0_5 = arith.constant 0 : index
    %6 = vector.load %arg4[%c0_4, %c0_5] : memref<112x512xbf16, #tpu.memory_space<vmem>>, vector<112x512xbf16>
    tpu.vector_store %arg4[%c0_4, %c0_5], %5 {strides = array<i32>} : memref<112x512xbf16, #tpu.memory_space<vmem>>, vector<112x512xbf16>,
    return
  }
  func.func @transform_0(%arg0: i32, %arg1: i32) -> (i32, i32) {
    %c0_i32 = arith.constant 0 : i32
    %c0_i32_0 = arith.constant 0 : i32
    return %arg0, %c0_i32 : i32, i32
  }
  func.func @transform_1(%arg0: i32, %arg1: i32) -> (i32, i32) {
    %c0_i32 = arith.constant 0 : i32
    %c0_i32_0 = arith.constant 0 : i32
    return %c0_i32, %arg1 : i32, i32
  }
  func.func @transform_2(%arg0: i32, %arg1: i32) -> (i32, i32) {
    %c0_i32 = arith.constant 0 : i32
    return %arg0, %arg1 : i32, i32
  }
}

module attributes {stable_mosaic.version = 11 : i64} {
  func.func @_gemm_kernel_single_k(%arg0: i32, %arg1: i32, %arg2: memref<512x128xbf16, #tpu.memory_space<vmem>>, %arg3: memref<128x256xbf16, #tpu.memory_space<vmem>>, %arg4: memref<512x256xbf16, #tpu.memory_space<vmem>>) attributes {dimension_semantics = [#tpu.dimension_semantics<parallel>, #tpu.dimension_semantics<parallel>], iteration_bounds = array<i64: 2, 1>, scalar_prefetch = 0 : i64, scratch_operands = 0 : i64, tpu.core_type = #tpu.core_type<tc>, window_params = [{transform_indices = @transform_0, window_bounds = array<i64: 512, 128>}, {transform_indices = @transform_1, window_bounds = array<i64: 128, 256>}, {transform_indices = @transform_2, window_bounds = array<i64: 512, 256>}]} {
    %c0 = arith.constant 0 : index
    %c0_0 = arith.constant 0 : index
    %0 = vector.load %arg2[%c0, %c0_0] : memref<512x128xbf16, #tpu.memory_space<vmem>>, vector<512x128xbf16>
    %cst = arith.constant 0.000000e+00 : bf16
    %1 = vector.broadcast %cst : bf16 to vector<512x128xbf16>
    %2 = arith.maximumf %0, %1 : vector<512x128xbf16>
    %c0_1 = arith.constant 0 : index
    %c0_2 = arith.constant 0 : index
    %3 = vector.load %arg3[%c0_1, %c0_2] : memref<128x256xbf16, #tpu.memory_space<vmem>>, vector<128x256xbf16>
    %cst_3 = arith.constant dense<0.000000e+00> : vector<512x256xf32>
    %4 = tpu.matmul %2, %3, %cst_3 {dimension_numbers = #tpu.dot_dimension_numbers<[1], [0], [0], [1], [0, 0, 1, 1], [], []>} : vector<512x128xbf16>, vector<128x256xbf16>, vector<512x256xf32> -> vector<512x256xf32>
    %5 = arith.truncf %4 : vector<512x256xf32> to vector<512x256xbf16>
    %c0_4 = arith.constant 0 : index
    %c0_5 = arith.constant 0 : index
    %6 = vector.load %arg4[%c0_4, %c0_5] : memref<512x256xbf16, #tpu.memory_space<vmem>>, vector<512x256xbf16>
    tpu.vector_store %arg4[%c0_4, %c0_5], %5 {strides = array<i32>} : memref<512x256xbf16, #tpu.memory_space<vmem>>, vector<512x256xbf16>,
    return
  }
  func.func @transform_0(%arg0: i32, %arg1: i32) -> (i32, i32) {
    %c0_i32 = arith.constant 0 : i32
    %c0_i32_0 = arith.constant 0 : i32
    return %arg0, %c0_i32 : i32, i32
  }
  func.func @transform_1(%arg0: i32, %arg1: i32) -> (i32, i32) {
    %c0_i32 = arith.constant 0 : i32
    %c0_i32_0 = arith.constant 0 : i32
    return %c0_i32, %arg1 : i32, i32
  }
  func.func @transform_2(%arg0: i32, %arg1: i32) -> (i32, i32) {
    %c0_i32 = arith.constant 0 : i32
    return %arg0, %arg1 : i32, i32
  }
}

module attributes {stable_mosaic.version = 11 : i64} {
  func.func @_bn_stats_kernel(%arg0: i32, %arg1: i32, %arg2: memref<16x1024xbf16, #tpu.memory_space<vmem>>, %arg3: memref<1x1024xf32, #tpu.memory_space<vmem>>, %arg4: memref<1x1024xf32, #tpu.memory_space<vmem>>) attributes {dimension_semantics = [#tpu.dimension_semantics<parallel>, #tpu.dimension_semantics<arbitrary>], iteration_bounds = array<i64: 1, 1>, scalar_prefetch = 0 : i64, scratch_operands = 0 : i64, tpu.core_type = #tpu.core_type<tc>, window_params = [{transform_indices = @transform_0, window_bounds = array<i64: 16, 1024>}, {transform_indices = @transform_1, window_bounds = array<i64: 1, 1024>}, {transform_indices = @transform_2, window_bounds = array<i64: 1, 1024>}]} {
    %c0_i32 = arith.constant 0 : i32
    %0 = arith.cmpi eq, %arg1, %c0_i32 : i32
    %1 = arith.extui %0 : i1 to i32
    %c0_i32_0 = arith.constant 0 : i32
    %2 = arith.cmpi ne, %1, %c0_i32_0 : i32
    scf.if %2 {
      %cst_11 = arith.constant 0.000000e+00 : f32
      %16 = vector.broadcast %cst_11 : f32 to vector<1x1024xf32>
      %c0_12 = arith.constant 0 : index
      %c0_13 = arith.constant 0 : index
      %17 = vector.load %arg3[%c0_12, %c0_13] : memref<1x1024xf32, #tpu.memory_space<vmem>>, vector<1x1024xf32>
      tpu.vector_store %arg3[%c0_12, %c0_13], %16 {strides = array<i32>} : memref<1x1024xf32, #tpu.memory_space<vmem>>, vector<1x1024xf32>,
      %cst_14 = arith.constant 0.000000e+00 : f32
      %18 = vector.broadcast %cst_14 : f32 to vector<1x1024xf32>
      %c0_15 = arith.constant 0 : index
      %c0_16 = arith.constant 0 : index
      %19 = vector.load %arg4[%c0_15, %c0_16] : memref<1x1024xf32, #tpu.memory_space<vmem>>, vector<1x1024xf32>
      tpu.vector_store %arg4[%c0_15, %c0_16], %18 {strides = array<i32>} : memref<1x1024xf32, #tpu.memory_space<vmem>>, vector<1x1024xf32>,
    } else {
    }
    %c0 = arith.constant 0 : index
    %c0_1 = arith.constant 0 : index
    %3 = vector.load %arg2[%c0, %c0_1] : memref<16x1024xbf16, #tpu.memory_space<vmem>>, vector<16x1024xbf16>
    %4 = arith.extf %3 : vector<16x1024xbf16> to vector<16x1024xf32>
    %c0_2 = arith.constant 0 : index
    %c0_3 = arith.constant 0 : index
    %5 = vector.load %arg3[%c0_2, %c0_3] : memref<1x1024xf32, #tpu.memory_space<vmem>>, vector<1x1024xf32>
    %cst = arith.constant dense<0.000000e+00> : vector<1024xf32>
    %6 = vector.multi_reduction <add>, %4, %cst [0] : vector<16x1024xf32> to vector<1024xf32>
    %7 = vector.shape_cast %6 : vector<1024xf32> to vector<1x1024xf32>
    %8 = arith.addf %5, %7 : vector<1x1024xf32>
    %c0_4 = arith.constant 0 : index
    %c0_5 = arith.constant 0 : index
    %9 = vector.load %arg3[%c0_4, %c0_5] : memref<1x1024xf32, #tpu.memory_space<vmem>>, vector<1x1024xf32>
    tpu.vector_store %arg3[%c0_4, %c0_5], %8 {strides = array<i32>} : memref<1x1024xf32, #tpu.memory_space<vmem>>, vector<1x1024xf32>,
    %c0_6 = arith.constant 0 : index
    %c0_7 = arith.constant 0 : index
    %10 = vector.load %arg4[%c0_6, %c0_7] : memref<1x1024xf32, #tpu.memory_space<vmem>>, vector<1x1024xf32>
    %11 = arith.mulf %4, %4 : vector<16x1024xf32>
    %cst_8 = arith.constant dense<0.000000e+00> : vector<1024xf32>
    %12 = vector.multi_reduction <add>, %11, %cst_8 [0] : vector<16x1024xf32> to vector<1024xf32>
    %13 = vector.shape_cast %12 : vector<1024xf32> to vector<1x1024xf32>
    %14 = arith.addf %10, %13 : vector<1x1024xf32>
    %c0_9 = arith.constant 0 : index
    %c0_10 = arith.constant 0 : index
    %15 = vector.load %arg4[%c0_9, %c0_10] : memref<1x1024xf32, #tpu.memory_space<vmem>>, vector<1x1024xf32>
    tpu.vector_store %arg4[%c0_9, %c0_10], %14 {strides = array<i32>} : memref<1x1024xf32, #tpu.memory_space<vmem>>, vector<1x1024xf32>,
    return
  }
  func.func @transform_0(%arg0: i32, %arg1: i32) -> (i32, i32) {
    %c0_i32 = arith.constant 0 : i32
    return %arg1, %arg0 : i32, i32
  }
  func.func @transform_1(%arg0: i32, %arg1: i32) -> (i32, i32) {
    %c0_i32 = arith.constant 0 : i32
    %c0_i32_0 = arith.constant 0 : i32
    return %c0_i32, %arg0 : i32, i32
  }
  func.func @transform_2(%arg0: i32, %arg1: i32) -> (i32, i32) {
    %c0_i32 = arith.constant 0 : i32
    %c0_i32_0 = arith.constant 0 : i32
    return %c0_i32, %arg0 : i32, i32
  }
}

module attributes {stable_mosaic.version = 11 : i64} {
  func.func @_gemm_kernel_single_k(%arg0: i32, %arg1: i32, %arg2: memref<1024x128xbf16, #tpu.memory_space<vmem>>, %arg3: memref<128x128xbf16, #tpu.memory_space<vmem>>, %arg4: memref<1024x128xbf16, #tpu.memory_space<vmem>>) attributes {dimension_semantics = [#tpu.dimension_semantics<parallel>, #tpu.dimension_semantics<parallel>], iteration_bounds = array<i64: 6, 1>, scalar_prefetch = 0 : i64, scratch_operands = 0 : i64, tpu.core_type = #tpu.core_type<tc>, window_params = [{transform_indices = @transform_0, window_bounds = array<i64: 1024, 128>}, {transform_indices = @transform_1, window_bounds = array<i64: 128, 128>}, {transform_indices = @transform_2, window_bounds = array<i64: 1024, 128>}]} {
    %c0 = arith.constant 0 : index
    %c0_0 = arith.constant 0 : index
    %0 = vector.load %arg2[%c0, %c0_0] : memref<1024x128xbf16, #tpu.memory_space<vmem>>, vector<1024x128xbf16>
    %cst = arith.constant 0.000000e+00 : bf16
    %1 = vector.broadcast %cst : bf16 to vector<1024x128xbf16>
    %2 = arith.maximumf %0, %1 : vector<1024x128xbf16>
    %c0_1 = arith.constant 0 : index
    %c0_2 = arith.constant 0 : index
    %3 = vector.load %arg3[%c0_1, %c0_2] : memref<128x128xbf16, #tpu.memory_space<vmem>>, vector<128x128xbf16>
    %cst_3 = arith.constant dense<0.000000e+00> : vector<1024x128xf32>
    %4 = tpu.matmul %2, %3, %cst_3 {dimension_numbers = #tpu.dot_dimension_numbers<[1], [0], [0], [1], [0, 0, 1, 1], [], []>} : vector<1024x128xbf16>, vector<128x128xbf16>, vector<1024x128xf32> -> vector<1024x128xf32>
    %5 = arith.truncf %4 : vector<1024x128xf32> to vector<1024x128xbf16>
    %c0_4 = arith.constant 0 : index
    %c0_5 = arith.constant 0 : index
    %6 = vector.load %arg4[%c0_4, %c0_5] : memref<1024x128xbf16, #tpu.memory_space<vmem>>, vector<1024x128xbf16>
    tpu.vector_store %arg4[%c0_4, %c0_5], %5 {strides = array<i32>} : memref<1024x128xbf16, #tpu.memory_space<vmem>>, vector<1024x128xbf16>,
    return
  }
  func.func @transform_0(%arg0: i32, %arg1: i32) -> (i32, i32) {
    %c0_i32 = arith.constant 0 : i32
    %c0_i32_0 = arith.constant 0 : i32
    return %arg0, %c0_i32 : i32, i32
  }
  func.func @transform_1(%arg0: i32, %arg1: i32) -> (i32, i32) {
    %c0_i32 = arith.constant 0 : i32
    %c0_i32_0 = arith.constant 0 : i32
    return %c0_i32, %arg1 : i32, i32
  }
  func.func @transform_2(%arg0: i32, %arg1: i32) -> (i32, i32) {
    %c0_i32 = arith.constant 0 : i32
    return %arg0, %arg1 : i32, i32
  }
}

</mosaic_0001>

<bundles_post_ra>
// kernel: _lambda_.17
= control target key start
LH: loop header
LB: loop body
LE: loop exit
PB: predicated region body
PF: predicated region fallthrough
CT: control target
= control target key end

     0   :  { %s3126_s9 = smov 0   ;;  %s3128_s10 = smov 0   ;;  %s3322_s0 = inlined_call_operand.vmem [shape: bf16[5120,128], index: 0, kind: input, shape index: {}]   ;;  %s3323_s1 = inlined_call_operand.vmem [shape: bf16[128,128], index: 1, kind: input, shape index: {}]   ;;  %s3324_s2 = inlined_call_operand.vmem [shape: bf16[5120,128], index: 2, kind: output, shape index: {}]  }
   0x1   :  { %s3130_s11 = smov 0  }
   0x2 LB: > { %s24_s12 = sadd.s32 1, %s3105_s10  ;;  %p2041_p0 = scmp.ge.s32.totalorder %s3109_s11, 1  ;;  %s3109_s11 = sphi %s3130_s11, %s12_s11   ;;  %s3105_s10 = sphi %s3128_s10, %s3326_s10   ;;  %s3101_s9 = sphi %s3126_s9, %s3325_s9  }
   0x3   : > { %p26_p1 = scmp.ge.s32.totalorder %s24_s12, 5  ;;  %p136_p2 = scmp.lt.s32.totalorder %s3109_s11, 6 }
   0x5   : > { %s3328_s12 = smov (%p26_p1, %s24_s12), 0  ;;  %p137_p3 = pnand %p2041_p0, %p136_p2 }
   0x6   : > { %v3015_v0 = vld [vmem:[%s3323_s1] sm:$0xff] (!%p137_p3)   ;;  %s2042_s15 = sshll.u32 (!%p137_p3), %s3101_s9, 7  ;;  %v3016_v1 = vld [vmem:[%s3323_s1 + $0x8] sm:$0xff] (!%p137_p3)   ;;  %v3017_v2 = vld [vmem:[%s3323_s1 + $0x10] sm:$0xff] (!%p137_p3)  }
   0x7   : > { %140 = sbr.rel (%p137_p3) target bundleno = 377 (0x179), region = 28  ;;  %p166_p4 = scmp.lt.s32.totalorder (!%p137_p3), %s2042_s15, 639  ;;  %2831 = vmatprep.subr.bf16.mxu0 (!%p137_p3), %v3015_v0  ;;  %2975 = vmatprep.subr.bf16.mxu1 (!%p137_p3), %v3015_v0  ;;  %v3018_v3 = vld [vmem:[%s3323_s1 + $0x18] sm:$0xff] (!%p137_p3)   ;;  %v3019_v6 = vld [vmem:[%s3323_s1 + $0x20] sm:$0xff] (!%p137_p3)   ;;  %v3020_v7 = vld [vmem:[%s3323_s1 + $0x28] sm:$0xff] (!%p137_p3)  }
   0x8   : > { %2832 = vmatpush3.bf16.msra.mxu0 (!%p137_p3), %v3015_v0  ;;  %2983 = vmatpush3.bf16.msra.mxu1 (!%p137_p3), %v3015_v0  ;;  %v3021_v8 = vld [vmem:[%s3323_s1 + $0x30] sm:$0xff] (!%p137_p3)   ;;  %v3022_v9 = vld [vmem:[%s3323_s1 + $0x38] sm:$0xff] (!%p137_p3)  }
   0x9   : > { %2833 = vmatprep.subr.bf16.mxu0 (!%p137_p3), %v3016_v1  ;;  %2976 = vmatprep.subr.bf16.mxu1 (!%p137_p3), %v3016_v1 }
   0xc   : > { %2834 = vmatpush3.bf16.msra.mxu0 (!%p137_p3), %v3016_v1  ;;  %2984 = vmatpush3.bf16.msra.mxu1 (!%p137_p3), %v3016_v1 }
   0xd   : > { %2835 = vmatprep.subr.bf16.mxu0 (!%p137_p3), %v3017_v2  ;;  %2977 = vmatprep.subr.bf16.mxu1 (!%p137_p3), %v3017_v2 }
   0xe   : > { %s3330_s15 = smov (!%p166_p4, %s2042_s15), 639 }
   0xf   : > { %s2043_s20 = sshll.u32 %s3330_s15, 2 }
  0x10   : > { %s3161_s23 = scalar_lea.vmem %s3322_s0, %s2043_s20  ;;  %2836 = vmatpush3.bf16.msra.mxu0 %v3017_v2  ;;  %2985 = vmatpush3.bf16.msra.mxu1 %v3017_v2  ;;  %s3247_s8 = scalar_lea.vmem %s3324_s2, %s2043_s20 }
  0x11   : > { %v3023_v4 = vld [vmem:[%s3161_s23] sm:$0xff]   ;;  %2837 = vmatprep.subr.bf16.mxu0 %v3018_v3  ;;  %2978 = vmatprep.subr.bf16.mxu1 %v3018_v3  ;;  %v3025_v10 = vld [vmem:[%s3161_s23 + $0x8] sm:$0xff]   ;;  %v3027_v12 = vld [vmem:[%s3161_s23 + $0x10] sm:$0xff]  }
  0x12   : > { %v3024_v5 = vld [vmem:[%s3161_s23 + $0x100] sm:$0xff]   ;;  %2847 = vmatprep.mubr.bf16.mxu0 %v3023_v4  ;;  %v3026_v11 = vld [vmem:[%s3161_s23 + $0x108] sm:$0xff]   ;;  %v3028_v13 = vld [vmem:[%s3161_s23 + $0x110] sm:$0xff]  }
  0x13   : > { %2911 = vmatprep.mubr.bf16.mxu1 %v3024_v5  ;;  %v3029_v14 = vld [vmem:[%s3161_s23 + $0x18] sm:$0xff]   ;;  %v3031_v16 = vld [vmem:[%s3161_s23 + $0x20] sm:$0xff]   ;;  %v3033_v18 = vld [vmem:[%s3161_s23 + $0x28] sm:$0xff]  }
  0x14   : > { %2838 = vmatpush3.bf16.msra.mxu0 %v3018_v3  ;;  %2986 = vmatpush3.bf16.msra.mxu1 %v3018_v3  ;;  %v3030_v15 = vld [vmem:[%s3161_s23 + $0x118] sm:$0xff]   ;;  %v3032_v17 = vld [vmem:[%s3161_s23 + $0x120] sm:$0xff]   ;;  %v3034_v19 = vld [vmem:[%s3161_s23 + $0x128] sm:$0xff]  }
  0x15   : > { %2839 = vmatprep.subr.bf16.mxu0 %v3019_v6  ;;  %2979 = vmatprep.subr.bf16.mxu1 %v3019_v6  ;;  %v3035_v20 = vld [vmem:[%s3161_s23 + $0x30] sm:$0xff]   ;;  %v3037_v22 = vld [vmem:[%s3161_s23 + $0x38] sm:$0xff]   ;;  %v3039_v24 = vld [vmem:[%s3161_s23 + $0x40] sm:$0xff]  }
  0x16   : > { %v3036_v21 = vld [vmem:[%s3161_s23 + $0x130] sm:$0xff]   ;;  %v3038_v23 = vld [vmem:[%s3161_s23 + $0x138] sm:$0xff]   ;;  %v3040_v25 = vld [vmem:[%s3161_s23 + $0x140] sm:$0xff]  }
  0x17   : > { %v3041_v26 = vld [vmem:[%s3161_s23 + $0x48] sm:$0xff]   ;;  %v3043_v28 = vld [vmem:[%s3161_s23 + $0x50] sm:$0xff]   ;;  %v3045_v30 = vld [vmem:[%s3161_s23 + $0x58] sm:$0xff]  }
  0x18   : > { %2840 = vmatpush3.bf16.msra.mxu0 %v3019_v6  ;;  %2987 = vmatpush3.bf16.msra.mxu1 %v3019_v6  ;;  %v3042_v27 = vld [vmem:[%s3161_s23 + $0x148] sm:$0xff]   ;;  %v3044_v29 = vld [vmem:[%s3161_s23 + $0x150] sm:$0xff]   ;;  %v3046_v31 = vld [vmem:[%s3161_s23 + $0x158] sm:$0xff]  }
  0x19   : > { %2841 = vmatprep.subr.bf16.mxu0 %v3020_v7  ;;  %2980 = vmatprep.subr.bf16.mxu1 %v3020_v7  ;;  %v3047_v32 = vld [vmem:[%s3161_s23 + $0x60] sm:$0xff]   ;;  %v3049_v34 = vld [vmem:[%s3161_s23 + $0x68] sm:$0xff]   ;;  %v3051_v36 = vld [vmem:[%s3161_s23 + $0x70] sm:$0xff]  }
  0x1a   : > { %v3048_v33 = vld [vmem:[%s3161_s23 + $0x160] sm:$0xff]   ;;  %v3050_v35 = vld [vmem:[%s3161_s23 + $0x168] sm:$0xff]   ;;  %v3052_v37 = vld [vmem:[%s3161_s23 + $0x170] sm:$0xff]  }
  0x1b   : > { %v3053_v38 = vld [vmem:[%s3161_s23 + $0x78] sm:$0xff]   ;;  %v3055_v40 = vld [vmem:[%s3161_s23 + $0x80] sm:$0xff]   ;;  %v3057_v42 = vld [vmem:[%s3161_s23 + $0x88] sm:$0xff]  }
  0x1c   : > { %2842 = vmatpush3.bf16.msra.mxu0 %v3020_v7  ;;  %2988 = vmatpush3.bf16.msra.mxu1 %v3020_v7  ;;  %v3054_v39 = vld [vmem:[%s3161_s23 + $0x178] sm:$0xff]   ;;  %v3056_v41 = vld [vmem:[%s3161_s23 + $0x180] sm:$0xff]   ;;  %v3058_v43 = vld [vmem:[%s3161_s23 + $0x188] sm:$0xff]  }
  0x1d   : > { %2843 = vmatprep.subr.bf16.mxu0 %v3021_v8  ;;  %2981 = vmatprep.subr.bf16.mxu1 %v3021_v8  ;;  %v3059_v44 = vld [vmem:[%s3161_s23 + $0x90] sm:$0xff]   ;;  %v3061_v46 = vld [vmem:[%s3161_s23 + $0x98] sm:$0xff]   ;;  %v3063_v48 = vld [vmem:[%s3161_s23 + $0xa0] sm:$0xff]  }
  0x1e   : > { %v3060_v45 = vld [vmem:[%s3161_s23 + $0x190] sm:$0xff]   ;;  %v3062_v47 = vld [vmem:[%s3161_s23 + $0x198] sm:$0xff]   ;;  %v3064_v49 = vld [vmem:[%s3161_s23 + $0x1a0] sm:$0xff]  }
  0x1f   : > { %v3065_v50 = vld [vmem:[%s3161_s23 + $0xa8] sm:$0xff]   ;;  %v3067_v52 = vld [vmem:[%s3161_s23 + $0xb0] sm:$0xff]   ;;  %v3069_v54 = vld [vmem:[%s3161_s23 + $0xb8] sm:$0xff]  }
  0x20   : > { %2844 = vmatpush3.bf16.msra.mxu0 %v3021_v8  ;;  %2989 = vmatpush3.bf16.msra.mxu1 %v3021_v8  ;;  %v3066_v51 = vld [vmem:[%s3161_s23 + $0x1a8] sm:$0xff]   ;;  %v3068_v53 = vld [vmem:[%s3161_s23 + $0x1b0] sm:$0xff]   ;;  %v3070_v55 = vld [vmem:[%s3161_s23 + $0x1b8] sm:$0xff]  }
  0x21   : > { %2845 = vmatprep.subr.bf16.mxu0 %v3022_v9  ;;  %2982 = vmatprep.subr.bf16.mxu1 %v3022_v9  ;;  %v3071_v56 = vld [vmem:[%s3161_s23 + $0xc0] sm:$0xff]   ;;  %v3073_v58 = vld [vmem:[%s3161_s23 + $0xc8] sm:$0xff]   ;;  %v3075_v60 = vld [vmem:[%s3161_s23 + $0xd0] sm:$0xff]  }
  0x22   : > { %v3072_v57 = vld [vmem:[%s3161_s23 + $0x1c0] sm:$0xff]   ;;  %v3074_v59 = vld [vmem:[%s3161_s23 + $0x1c8] sm:$0xff]   ;;  %v3076_v61 = vld [vmem:[%s3161_s23 + $0x1d0] sm:$0xff]  }
  0x23   : > { %v3077_v62 = vld [vmem:[%s3161_s23 + $0xd8] sm:$0xff]   ;;  %v3079_v0 = vld [vmem:[%s3161_s23 + $0xe0] sm:$0xff]   ;;  %v3081_v2 = vld [vmem:[%s3161_s23 + $0xe8] sm:$0xff]  }
  0x24   : > { %2846 = vmatpush3.bf16.msra.mxu0 %v3022_v9  ;;  %2990 = vmatpush3.bf16.msra.mxu1 %v3022_v9  ;;  %v3078_v63 = vld [vmem:[%s3161_s23 + $0x1d8] sm:$0xff]   ;;  %v3080_v1 = vld [vmem:[%s3161_s23 + $0x1e0] sm:$0xff]   ;;  %v3082_v3 = vld [vmem:[%s3161_s23 + $0x1e8] sm:$0xff]  }
  0x25   : > { %v3083_v4 = vld [vmem:[%s3161_s23 + $0xf0] sm:$0xff]   ;;  %v3085_v6 = vld [vmem:[%s3161_s23 + $0xf8] sm:$0xff]  }
  0x26   : > { %v3084_v5 = vld [vmem:[%s3161_s23 + $0x1f0] sm:$0xff]   ;;  %v3086_v7 = vld [vmem:[%s3161_s23 + $0x1f8] sm:$0xff]  }
  0x27   : > { %2848 = vmatmul.mubr.bf16.vlgmr.msra.gmra.mrb[0].mxu0 %v3025_v10  ;;  %2912 = vmatmul.mubr.bf16.vlgmr.msra.gmra.mrb[0].mxu1 %v3026_v11 }
  0x28   : > { %2851 = vmatprep.mubr.bf16.mxu0 %v3027_v12  ;;  %2915 = vmatprep.mubr.bf16.mxu1 %v3028_v13 }
  0x2f   : > { %2852 = vmatmul.mubr.bf16.gmra.mrb[4].mxu0 %v3029_v14  ;;  %2916 = vmatmul.mubr.bf16.gmra.mrb[4].mxu1 %v3030_v15 }
  0x30   : > { %2855 = vmatprep.mubr.bf16.mxu0 %v3031_v16  ;;  %2919 = vmatprep.mubr.bf16.mxu1 %v3032_v17 }
  0x37   : > { %2856 = vmatmul.mubr.bf16.gmra.mrb[8].mxu0 %v3033_v18  ;;  %2920 = vmatmul.mubr.bf16.gmra.mrb[8].mxu1 %v3034_v19 }
  0x38   : > { %2859 = vmatprep.mubr.bf16.mxu0 %v3035_v20  ;;  %2923 = vmatprep.mubr.bf16.mxu1 %v3036_v21 }
  0x3f   : > { %2860 = vmatmul.mubr.bf16.gmra.mrb[12].mxu0 %v3037_v22  ;;  %2924 = vmatmul.mubr.bf16.gmra.mrb[12].mxu1 %v3038_v23 }
  0x40   : > { %2863 = vmatprep.mubr.bf16.mxu0 %v3039_v24  ;;  %2927 = vmatprep.mubr.bf16.mxu1 %v3040_v25 }
  0x47   : > { %2864 = vmatmul.mubr.bf16.gmra.mrb[16].mxu0 %v3041_v26  ;;  %2928 = vmatmul.mubr.bf16.gmra.mrb[16].mxu1 %v3042_v27 }
  0x48   : > { %2867 = vmatprep.mubr.bf16.mxu0 %v3043_v28  ;;  %2931 = vmatprep.mubr.bf16.mxu1 %v3044_v29 }
  0x4f   : > { %2868 = vmatmul.mubr.bf16.gmra.mrb[20].mxu0 %v3045_v30  ;;  %2932 = vmatmul.mubr.bf16.gmra.mrb[20].mxu1 %v3046_v31 }
  0x50   : > { %2871 = vmatprep.mubr.bf16.mxu0 %v3047_v32  ;;  %2935 = vmatprep.mubr.bf16.mxu1 %v3048_v33 }
  0x57   : > { %2872 = vmatmul.mubr.bf16.gmra.mrb[24].mxu0 %v3049_v34  ;;  %2936 = vmatmul.mubr.bf16.gmra.mrb[24].mxu1 %v3050_v35 }
  0x58   : > { %2875 = vmatprep.mubr.bf16.mxu0 %v3051_v36  ;;  %2939 = vmatprep.mubr.bf16.mxu1 %v3052_v37 }
  0x5f   : > { %2876 = vmatmul.mubr.bf16.gmra.mrb[28].mxu0 %v3053_v38  ;;  %2940 = vmatmul.mubr.bf16.gmra.mrb[28].mxu1 %v3054_v39 }
  0x60   : > { %2879 = vmatprep.mubr.bf16.mxu0 %v3055_v40  ;;  %2943 = vmatprep.mubr.bf16.mxu1 %v3056_v41 }
  0x67   : > { %2880 = vmatmul.mubr.bf16.gmra.mrb[32].mxu0 %v3057_v42  ;;  %2944 = vmatmul.mubr.bf16.gmra.mrb[32].mxu1 %v3058_v43 }
  0x68   : > { %2883 = vmatprep.mubr.bf16.mxu0 %v3059_v44  ;;  %2947 = vmatprep.mubr.bf16.mxu1 %v3060_v45 }
  0x6f   : > { %2884 = vmatmul.mubr.bf16.gmra.mrb[36].mxu0 %v3061_v46  ;;  %2948 = vmatmul.mubr.bf16.gmra.mrb[36].mxu1 %v3062_v47 }
  0x70   : > { %2887 = vmatprep.mubr.bf16.mxu0 %v3063_v48  ;;  %2951 = vmatprep.mubr.bf16.mxu1 %v3064_v49 }
  0x77   : > { %2888 = vmatmul.mubr.bf16.gmra.mrb[40].mxu0 %v3065_v50  ;;  %2952 = vmatmul.mubr.bf16.gmra.mrb[40].mxu1 %v3066_v51 }
  0x78   : > { %2891 = vmatprep.mubr.bf16.mxu0 %v3067_v52  ;;  %2955 = vmatprep.mubr.bf16.mxu1 %v3068_v53 }
  0x7f   : > { %2892 = vmatmul.mubr.bf16.gmra.mrb[44].mxu0 %v3069_v54  ;;  %2956 = vmatmul.mubr.bf16.gmra.mrb[44].mxu1 %v3070_v55 }
  0x80   : > { %2895 = vmatprep.mubr.bf16.mxu0 %v3071_v56  ;;  %2959 = vmatprep.mubr.bf16.mxu1 %v3072_v57 }
  0x87   : > { %2896 = vmatmul.mubr.bf16.gmra.mrb[48].mxu0 %v3073_v58  ;;  %2960 = vmatmul.mubr.bf16.gmra.mrb[48].mxu1 %v3074_v59 }
  0x88   : > { %2899 = vmatprep.mubr.bf16.mxu0 %v3075_v60  ;;  %2963 = vmatprep.mubr.bf16.mxu1 %v3076_v61 }
  0x8f   : > { %2900 = vmatmul.mubr.bf16.gmra.mrb[52].mxu0 %v3077_v62  ;;  %2964 = vmatmul.mubr.bf16.gmra.mrb[52].mxu1 %v3078_v63 }
  0x90   : > { %2903 = vmatprep.mubr.bf16.mxu0 %v3079_v0  ;;  %2967 = vmatprep.mubr.bf16.mxu1 %v3080_v1 }
  0x97   : > { %2904 = vmatmul.mubr.bf16.gmra.mrb[56].mxu0 %v3081_v2  ;;  %2968 = vmatmul.mubr.bf16.gmra.mrb[56].mxu1 %v3082_v3 }
  0x98   : > { %2907 = vmatprep.mubr.bf16.mxu0 %v3083_v4  ;;  %2971 = vmatprep.mubr.bf16.mxu1 %v3084_v5 }
  0x9f   : > { %2908 = vmatmul.mubr.bf16.gmra.mrb[60].mxu0 %v3085_v6  ;;  %2972 = vmatmul.mubr.bf16.gmra.mrb[60].mxu1 %v3086_v7 }
  0xfa   : > { %v2849_v8 = vpop.f32.mrb[0].mxu0  ;;  %v2913_v9 = vpop.f32.mrb[0].mxu1 }
  0xfb   : > { %v795_v10 = vpop.f32.mrb[1].mxu0  ;;  %v1051_v11 = vpop.f32.mrb[1].mxu1 }
  0xfc   : > { %v2850_v12 = vpop.f32.mrb[2].mxu0  ;;  %v2914_v13 = vpop.f32.mrb[2].mxu1 }
  0xfd   : > { %v2384_v14 = vpack.c.bf16 %v2850_v12, %v2849_v8  ;;  %v2544_v15 = vpack.c.bf16 %v2914_v13, %v2913_v9  ;;  %v798_v16 = vpop.f32.mrb[3].mxu0  ;;  %v1054_v17 = vpop.f32.mrb[3].mxu1 }
  0xfe   : > { %v2379_v18 = vpack.c.bf16 %v798_v16, %v795_v10  ;;  %v2539_v19 = vpack.c.bf16 %v1054_v17, %v1051_v11 }
  0xff   : > { %2696 = vst [vmem:[%s3247_s8 + $0x8] sm:$0xff] %v2384_v14   ;;  %2728 = vst [vmem:[%s3247_s8 + $0x108] sm:$0xff] %v2544_v15  }
 0x100   : > { %2380 = vst [vmem:[%s3247_s8] sm:$0xff] %v2379_v18   ;;  %2727 = vst [vmem:[%s3247_s8 + $0x100] sm:$0xff] %v2539_v19  }
 0x102   : > { %v2853_v20 = vpop.f32.mrb[4].mxu0  ;;  %v2917_v21 = vpop.f32.mrb[4].mxu1 }
 0x103   : > { %v811_v22 = vpop.f32.mrb[5].mxu0  ;;  %v1067_v23 = vpop.f32.mrb[5].mxu1 }
 0x104   : > { %v2854_v24 = vpop.f32.mrb[6].mxu0  ;;  %v2918_v25 = vpop.f32.mrb[6].mxu1 }
 0x105   : > { %v2394_v26 = vpack.c.bf16 %v2854_v24, %v2853_v20  ;;  %v2554_v27 = vpack.c.bf16 %v2918_v25, %v2917_v21  ;;  %v814_v28 = vpop.f32.mrb[7].mxu0  ;;  %v1070_v29 = vpop.f32.mrb[7].mxu1 }
 0x106   : > { %v2389_v30 = vpack.c.bf16 %v814_v28, %v811_v22  ;;  %v2549_v31 = vpack.c.bf16 %v1070_v29, %v1067_v23 }
 0x107   : > { %2698 = vst [vmem:[%s3247_s8 + $0x18] sm:$0xff] %v2394_v26   ;;  %2730 = vst [vmem:[%s3247_s8 + $0x118] sm:$0xff] %v2554_v27  }
 0x108   : > { %2697 = vst [vmem:[%s3247_s8 + $0x10] sm:$0xff] %v2389_v30   ;;  %2729 = vst [vmem:[%s3247_s8 + $0x110] sm:$0xff] %v2549_v31  }
 0x10a   : > { %v2857_v32 = vpop.f32.mrb[8].mxu0  ;;  %v2921_v33 = vpop.f32.mrb[8].mxu1 }
 0x10b   : > { %v827_v34 = vpop.f32.mrb[9].mxu0  ;;  %v1083_v35 = vpop.f32.mrb[9].mxu1 }
 0x10c   : > { %v2858_v36 = vpop.f32.mrb[10].mxu0  ;;  %v2922_v37 = vpop.f32.mrb[10].mxu1 }
 0x10d   : > { %v2404_v38 = vpack.c.bf16 %v2858_v36, %v2857_v32  ;;  %v2564_v39 = vpack.c.bf16 %v2922_v37, %v2921_v33  ;;  %v830_v40 = vpop.f32.mrb[11].mxu0  ;;  %v1086_v41 = vpop.f32.mrb[11].mxu1 }
 0x10e   : > { %v2399_v42 = vpack.c.bf16 %v830_v40, %v827_v34  ;;  %v2559_v43 = vpack.c.bf16 %v1086_v41, %v1083_v35 }
 0x10f   : > { %2700 = vst [vmem:[%s3247_s8 + $0x28] sm:$0xff] %v2404_v38   ;;  %2732 = vst [vmem:[%s3247_s8 + $0x128] sm:$0xff] %v2564_v39  }
 0x110   : > { %2699 = vst [vmem:[%s3247_s8 + $0x20] sm:$0xff] %v2399_v42   ;;  %2731 = vst [vmem:[%s3247_s8 + $0x120] sm:$0xff] %v2559_v43  }
 0x112   : > { %v2861_v44 = vpop.f32.mrb[12].mxu0  ;;  %v2925_v45 = vpop.f32.mrb[12].mxu1 }
 0x113   : > { %v843_v46 = vpop.f32.mrb[13].mxu0  ;;  %v1099_v47 = vpop.f32.mrb[13].mxu1 }
 0x114   : > { %v2862_v48 = vpop.f32.mrb[14].mxu0  ;;  %v2926_v49 = vpop.f32.mrb[14].mxu1 }
 0x115   : > { %v2414_v50 = vpack.c.bf16 %v2862_v48, %v2861_v44  ;;  %v2574_v51 = vpack.c.bf16 %v2926_v49, %v2925_v45  ;;  %v846_v52 = vpop.f32.mrb[15].mxu0  ;;  %v1102_v53 = vpop.f32.mrb[15].mxu1 }
 0x116   : > { %v2409_v54 = vpack.c.bf16 %v846_v52, %v843_v46  ;;  %v2569_v55 = vpack.c.bf16 %v1102_v53, %v1099_v47 }
 0x117   : > { %2702 = vst [vmem:[%s3247_s8 + $0x38] sm:$0xff] %v2414_v50   ;;  %2734 = vst [vmem:[%s3247_s8 + $0x138] sm:$0xff] %v2574_v51  }
 0x118   : > { %2701 = vst [vmem:[%s3247_s8 + $0x30] sm:$0xff] %v2409_v54   ;;  %2733 = vst [vmem:[%s3247_s8 + $0x130] sm:$0xff] %v2569_v55  }
 0x11a   : > { %v2865_v56 = vpop.f32.mrb[16].mxu0  ;;  %v2929_v57 = vpop.f32.mrb[16].mxu1 }
 0x11b   : > { %v859_v58 = vpop.f32.mrb[17].mxu0  ;;  %v1115_v59 = vpop.f32.mrb[17].mxu1 }
 0x11c   : > { %v2866_v60 = vpop.f32.mrb[18].mxu0  ;;  %v2930_v61 = vpop.f32.mrb[18].mxu1 }
 0x11d   : > { %v2424_v62 = vpack.c.bf16 %v2866_v60, %v2865_v56  ;;  %v2584_v63 = vpack.c.bf16 %v2930_v61, %v2929_v57  ;;  %v862_v0 = vpop.f32.mrb[19].mxu0  ;;  %v1118_v1 = vpop.f32.mrb[19].mxu1 }
 0x11e   : > { %v2419_v2 = vpack.c.bf16 %v862_v0, %v859_v58  ;;  %v2579_v3 = vpack.c.bf16 %v1118_v1, %v1115_v59 }
 0x11f   : > { %2704 = vst [vmem:[%s3247_s8 + $0x48] sm:$0xff] %v2424_v62   ;;  %2736 = vst [vmem:[%s3247_s8 + $0x148] sm:$0xff] %v2584_v63  }
 0x120   : > { %2703 = vst [vmem:[%s3247_s8 + $0x40] sm:$0xff] %v2419_v2   ;;  %2735 = vst [vmem:[%s3247_s8 + $0x140] sm:$0xff] %v2579_v3  }
 0x122   : > { %v2869_v4 = vpop.f32.mrb[20].mxu0  ;;  %v2933_v5 = vpop.f32.mrb[20].mxu1 }
 0x123   : > { %v875_v6 = vpop.f32.mrb[21].mxu0  ;;  %v1131_v7 = vpop.f32.mrb[21].mxu1 }
 0x124   : > { %v2870_v8 = vpop.f32.mrb[22].mxu0  ;;  %v2934_v9 = vpop.f32.mrb[22].mxu1 }
 0x125   : > { %v2434_v10 = vpack.c.bf16 %v2870_v8, %v2869_v4  ;;  %v2594_v11 = vpack.c.bf16 %v2934_v9, %v2933_v5  ;;  %v878_v12 = vpop.f32.mrb[23].mxu0  ;;  %v1134_v13 = vpop.f32.mrb[23].mxu1 }
 0x126   : > { %v2429_v14 = vpack.c.bf16 %v878_v12, %v875_v6  ;;  %v2589_v15 = vpack.c.bf16 %v1134_v13, %v1131_v7 }
 0x127   : > { %2706 = vst [vmem:[%s3247_s8 + $0x58] sm:$0xff] %v2434_v10   ;;  %2738 = vst [vmem:[%s3247_s8 + $0x158] sm:$0xff] %v2594_v11  }
 0x128   : > { %2705 = vst [vmem:[%s3247_s8 + $0x50] sm:$0xff] %v2429_v14   ;;  %2737 = vst [vmem:[%s3247_s8 + $0x150] sm:$0xff] %v2589_v15  }
 0x12a   : > { %v2873_v16 = vpop.f32.mrb[24].mxu0  ;;  %v2937_v17 = vpop.f32.mrb[24].mxu1 }
 0x12b   : > { %v891_v18 = vpop.f32.mrb[25].mxu0  ;;  %v1147_v19 = vpop.f32.mrb[25].mxu1 }
 0x12c   : > { %v2874_v20 = vpop.f32.mrb[26].mxu0  ;;  %v2938_v21 = vpop.f32.mrb[26].mxu1 }
 0x12d   : > { %v2444_v22 = vpack.c.bf16 %v2874_v20, %v2873_v16  ;;  %v2604_v23 = vpack.c.bf16 %v2938_v21, %v2937_v17  ;;  %v894_v24 = vpop.f32.mrb[27].mxu0  ;;  %v1150_v25 = vpop.f32.mrb[27].mxu1 }
 0x12e   : > { %v2439_v26 = vpack.c.bf16 %v894_v24, %v891_v18  ;;  %v2599_v27 = vpack.c.bf16 %v1150_v25, %v1147_v19 }
 0x12f   : > { %2708 = vst [vmem:[%s3247_s8 + $0x68] sm:$0xff] %v2444_v22   ;;  %2740 = vst [vmem:[%s3247_s8 + $0x168] sm:$0xff] %v2604_v23  }
 0x130   : > { %2707 = vst [vmem:[%s3247_s8 + $0x60] sm:$0xff] %v2439_v26   ;;  %2739 = vst [vmem:[%s3247_s8 + $0x160] sm:$0xff] %v2599_v27  }
 0x132   : > { %v2877_v28 = vpop.f32.mrb[28].mxu0  ;;  %v2941_v29 = vpop.f32.mrb[28].mxu1 }
 0x133   : > { %v907_v30 = vpop.f32.mrb[29].mxu0  ;;  %v1163_v31 = vpop.f32.mrb[29].mxu1 }
 0x134   : > { %v2878_v32 = vpop.f32.mrb[30].mxu0  ;;  %v2942_v33 = vpop.f32.mrb[30].mxu1 }
 0x135   : > { %v2454_v34 = vpack.c.bf16 %v2878_v32, %v2877_v28  ;;  %v2614_v35 = vpack.c.bf16 %v2942_v33, %v2941_v29  ;;  %v910_v36 = vpop.f32.mrb[31].mxu0  ;;  %v1166_v37 = vpop.f32.mrb[31].mxu1 }
 0x136   : > { %v2449_v38 = vpack.c.bf16 %v910_v36, %v907_v30  ;;  %v2609_v39 = vpack.c.bf16 %v1166_v37, %v1163_v31 }
 0x137   : > { %2710 = vst [vmem:[%s3247_s8 + $0x78] sm:$0xff] %v2454_v34   ;;  %2742 = vst [vmem:[%s3247_s8 + $0x178] sm:$0xff] %v2614_v35  }
 0x138   : > { %2709 = vst [vmem:[%s3247_s8 + $0x70] sm:$0xff] %v2449_v38   ;;  %2741 = vst [vmem:[%s3247_s8 + $0x170] sm:$0xff] %v2609_v39  }
 0x13a   : > { %v2881_v40 = vpop.f32.mrb[32].mxu0  ;;  %v2945_v41 = vpop.f32.mrb[32].mxu1 }
 0x13b   : > { %v923_v42 = vpop.f32.mrb[33].mxu0  ;;  %v1179_v43 = vpop.f32.mrb[33].mxu1 }
 0x13c   : > { %v2882_v44 = vpop.f32.mrb[34].mxu0  ;;  %v2946_v45 = vpop.f32.mrb[34].mxu1 }
 0x13d   : > { %v2464_v46 = vpack.c.bf16 %v2882_v44, %v2881_v40  ;;  %v2624_v47 = vpack.c.bf16 %v2946_v45, %v2945_v41  ;;  %v926_v48 = vpop.f32.mrb[35].mxu0  ;;  %v1182_v49 = vpop.f32.mrb[35].mxu1 }
 0x13e   : > { %v2459_v50 = vpack.c.bf16 %v926_v48, %v923_v42  ;;  %v2619_v51 = vpack.c.bf16 %v1182_v49, %v1179_v43 }
 0x13f   : > { %2712 = vst [vmem:[%s3247_s8 + $0x88] sm:$0xff] %v2464_v46   ;;  %2744 = vst [vmem:[%s3247_s8 + $0x188] sm:$0xff] %v2624_v47  }
 0x140   : > { %2711 = vst [vmem:[%s3247_s8 + $0x80] sm:$0xff] %v2459_v50   ;;  %2743 = vst [vmem:[%s3247_s8 + $0x180] sm:$0xff] %v2619_v51  }
 0x142   : > { %v2885_v52 = vpop.f32.mrb[36].mxu0  ;;  %v2949_v53 = vpop.f32.mrb[36].mxu1 }
 0x143   : > { %v939_v54 = vpop.f32.mrb[37].mxu0  ;;  %v1195_v55 = vpop.f32.mrb[37].mxu1 }
 0x144   : > { %v2886_v56 = vpop.f32.mrb[38].mxu0  ;;  %v2950_v57 = vpop.f32.mrb[38].mxu1 }
 0x145   : > { %v2474_v58 = vpack.c.bf16 %v2886_v56, %v2885_v52  ;;  %v2634_v59 = vpack.c.bf16 %v2950_v57, %v2949_v53  ;;  %v942_v60 = vpop.f32.mrb[39].mxu0  ;;  %v1198_v61 = vpop.f32.mrb[39].mxu1 }
 0x146   : > { %v2469_v62 = vpack.c.bf16 %v942_v60, %v939_v54  ;;  %v2629_v63 = vpack.c.bf16 %v1198_v61, %v1195_v55 }
 0x147   : > { %2714 = vst [vmem:[%s3247_s8 + $0x98] sm:$0xff] %v2474_v58   ;;  %2746 = vst [vmem:[%s3247_s8 + $0x198] sm:$0xff] %v2634_v59  }
 0x148   : > { %2713 = vst [vmem:[%s3247_s8 + $0x90] sm:$0xff] %v2469_v62   ;;  %2745 = vst [vmem:[%s3247_s8 + $0x190] sm:$0xff] %v2629_v63  }
 0x14a   : > { %v2889_v0 = vpop.f32.mrb[40].mxu0  ;;  %v2953_v1 = vpop.f32.mrb[40].mxu1 }
 0x14b   : > { %v955_v2 = vpop.f32.mrb[41].mxu0  ;;  %v1211_v3 = vpop.f32.mrb[41].mxu1 }
 0x14c   : > { %v2890_v4 = vpop.f32.mrb[42].mxu0  ;;  %v2954_v5 = vpop.f32.mrb[42].mxu1 }
 0x14d   : > { %v2484_v6 = vpack.c.bf16 %v2890_v4, %v2889_v0  ;;  %v2644_v7 = vpack.c.bf16 %v2954_v5, %v2953_v1  ;;  %v958_v8 = vpop.f32.mrb[43].mxu0  ;;  %v1214_v9 = vpop.f32.mrb[43].mxu1 }
 0x14e   : > { %v2479_v10 = vpack.c.bf16 %v958_v8, %v955_v2  ;;  %v2639_v11 = vpack.c.bf16 %v1214_v9, %v1211_v3 }
 0x14f   : > { %2716 = vst [vmem:[%s3247_s8 + $0xa8] sm:$0xff] %v2484_v6   ;;  %2748 = vst [vmem:[%s3247_s8 + $0x1a8] sm:$0xff] %v2644_v7  }
 0x150   : > { %2715 = vst [vmem:[%s3247_s8 + $0xa0] sm:$0xff] %v2479_v10   ;;  %2747 = vst [vmem:[%s3247_s8 + $0x1a0] sm:$0xff] %v2639_v11  }
 0x152   : > { %v2893_v12 = vpop.f32.mrb[44].mxu0  ;;  %v2957_v13 = vpop.f32.mrb[44].mxu1 }
 0x153   : > { %v971_v14 = vpop.f32.mrb[45].mxu0  ;;  %v1227_v15 = vpop.f32.mrb[45].mxu1 }
 0x154   : > { %v2894_v16 = vpop.f32.mrb[46].mxu0  ;;  %v2958_v17 = vpop.f32.mrb[46].mxu1 }
 0x155   : > { %v2494_v18 = vpack.c.bf16 %v2894_v16, %v2893_v12  ;;  %v2654_v19 = vpack.c.bf16 %v2958_v17, %v2957_v13  ;;  %v974_v20 = vpop.f32.mrb[47].mxu0  ;;  %v1230_v21 = vpop.f32.mrb[47].mxu1 }
 0x156   : > { %v2489_v22 = vpack.c.bf16 %v974_v20, %v971_v14  ;;  %v2649_v23 = vpack.c.bf16 %v1230_v21, %v1227_v15 }
 0x157   : > { %2718 = vst [vmem:[%s3247_s8 + $0xb8] sm:$0xff] %v2494_v18   ;;  %2750 = vst [vmem:[%s3247_s8 + $0x1b8] sm:$0xff] %v2654_v19  }
 0x158   : > { %2717 = vst [vmem:[%s3247_s8 + $0xb0] sm:$0xff] %v2489_v22   ;;  %2749 = vst [vmem:[%s3247_s8 + $0x1b0] sm:$0xff] %v2649_v23  }
 0x15a   : > { %v2897_v24 = vpop.f32.mrb[48].mxu0  ;;  %v2961_v25 = vpop.f32.mrb[48].mxu1 }
 0x15b   : > { %v987_v26 = vpop.f32.mrb[49].mxu0  ;;  %v1243_v27 = vpop.f32.mrb[49].mxu1 }
 0x15c   : > { %v2898_v28 = vpop.f32.mrb[50].mxu0  ;;  %v2962_v29 = vpop.f32.mrb[50].mxu1 }
 0x15d   : > { %v2504_v30 = vpack.c.bf16 %v2898_v28, %v2897_v24  ;;  %v2664_v31 = vpack.c.bf16 %v2962_v29, %v2961_v25  ;;  %v990_v32 = vpop.f32.mrb[51].mxu0  ;;  %v1246_v33 = vpop.f32.mrb[51].mxu1 }
 0x15e   : > { %v2499_v34 = vpack.c.bf16 %v990_v32, %v987_v26  ;;  %v2659_v35 = vpack.c.bf16 %v1246_v33, %v1243_v27 }
 0x15f   : > { %2720 = vst [vmem:[%s3247_s8 + $0xc8] sm:$0xff] %v2504_v30   ;;  %2752 = vst [vmem:[%s3247_s8 + $0x1c8] sm:$0xff] %v2664_v31  }
 0x160   : > { %2719 = vst [vmem:[%s3247_s8 + $0xc0] sm:$0xff] %v2499_v34   ;;  %2751 = vst [vmem:[%s3247_s8 + $0x1c0] sm:$0xff] %v2659_v35  }
 0x162   : > { %v2901_v36 = vpop.f32.mrb[52].mxu0  ;;  %v2965_v37 = vpop.f32.mrb[52].mxu1 }
 0x163   : > { %v1003_v38 = vpop.f32.mrb[53].mxu0  ;;  %v1259_v39 = vpop.f32.mrb[53].mxu1 }
 0x164   : > { %v2902_v40 = vpop.f32.mrb[54].mxu0  ;;  %v2966_v41 = vpop.f32.mrb[54].mxu1 }
 0x165   : > { %v2514_v42 = vpack.c.bf16 %v2902_v40, %v2901_v36  ;;  %v2674_v43 = vpack.c.bf16 %v2966_v41, %v2965_v37  ;;  %v1006_v44 = vpop.f32.mrb[55].mxu0  ;;  %v1262_v45 = vpop.f32.mrb[55].mxu1 }
 0x166   : > { %v2509_v46 = vpack.c.bf16 %v1006_v44, %v1003_v38  ;;  %v2669_v47 = vpack.c.bf16 %v1262_v45, %v1259_v39 }
 0x167   : > { %2722 = vst [vmem:[%s3247_s8 + $0xd8] sm:$0xff] %v2514_v42   ;;  %2754 = vst [vmem:[%s3247_s8 + $0x1d8] sm:$0xff] %v2674_v43  }
 0x168   : > { %2721 = vst [vmem:[%s3247_s8 + $0xd0] sm:$0xff] %v2509_v46   ;;  %2753 = vst [vmem:[%s3247_s8 + $0x1d0] sm:$0xff] %v2669_v47  }
 0x16a   : > { %v2905_v48 = vpop.f32.mrb[56].mxu0  ;;  %v2969_v49 = vpop.f32.mrb[56].mxu1 }
 0x16b   : > { %v1019_v50 = vpop.f32.mrb[57].mxu0  ;;  %v1275_v51 = vpop.f32.mrb[57].mxu1 }
 0x16c   : > { %v2906_v52 = vpop.f32.mrb[58].mxu0  ;;  %v2970_v53 = vpop.f32.mrb[58].mxu1 }
 0x16d   : > { %v2524_v54 = vpack.c.bf16 %v2906_v52, %v2905_v48  ;;  %v2684_v55 = vpack.c.bf16 %v2970_v53, %v2969_v49  ;;  %v1022_v56 = vpop.f32.mrb[59].mxu0  ;;  %v1278_v57 = vpop.f32.mrb[59].mxu1 }
 0x16e   : > { %v2519_v58 = vpack.c.bf16 %v1022_v56, %v1019_v50  ;;  %v2679_v59 = vpack.c.bf16 %v1278_v57, %v1275_v51 }
 0x16f   : > { %2724 = vst [vmem:[%s3247_s8 + $0xe8] sm:$0xff] %v2524_v54   ;;  %2756 = vst [vmem:[%s3247_s8 + $0x1e8] sm:$0xff] %v2684_v55  }
 0x170   : > { %2723 = vst [vmem:[%s3247_s8 + $0xe0] sm:$0xff] %v2519_v58   ;;  %2755 = vst [vmem:[%s3247_s8 + $0x1e0] sm:$0xff] %v2679_v59  }
 0x172   : > { %v2909_v60 = vpop.f32.mrb[60].mxu0  ;;  %v2973_v61 = vpop.f32.mrb[60].mxu1 }
 0x173   : > { %v1035_v62 = vpop.f32.mrb[61].mxu0  ;;  %v1291_v63 = vpop.f32.mrb[61].mxu1 }
 0x174   : > { %v2910_v0 = vpop.f32.mrb[62].mxu0  ;;  %v2974_v1 = vpop.f32.mrb[62].mxu1 }
 0x175   : > { %v2534_v2 = vpack.c.bf16 %v2910_v0, %v2909_v60  ;;  %v2694_v3 = vpack.c.bf16 %v2974_v1, %v2973_v61  ;;  %v1038_v4 = vpop.f32.mrb[63].mxu0  ;;  %v1294_v5 = vpop.f32.mrb[63].mxu1 }
 0x176   : > { %v2529_v6 = vpack.c.bf16 %v1038_v4, %v1035_v62  ;;  %v2689_v7 = vpack.c.bf16 %v1294_v5, %v1291_v63 }
 0x177   : > { %2726 = vst [vmem:[%s3247_s8 + $0xf8] sm:$0xff] %v2534_v2   ;;  %2758 = vst [vmem:[%s3247_s8 + $0x1f8] sm:$0xff] %v2694_v3  }
 0x178   : > { %2725 = vst [vmem:[%s3247_s8 + $0xf0] sm:$0xff] %v2529_v6   ;;  %2757 = vst [vmem:[%s3247_s8 + $0x1f0] sm:$0xff] %v2689_v7  }
 0x179 PF: > { %s12_s11 = sadd.s32 1, %s3109_s11   ;;  %s3325_s9 = smov %s3105_s10 }
 0x17a   : > { %p9_p5 = scmp.ge.s32.totalorder %s12_s11, 7   ;;  %s3326_s10 = smov %s3328_s12 }
 0x17c   :  { %11 = sbr.rel (!%p9_p5) target bundleno = 2 (0x2), region = 61 }

// kernel: _lambda_.18
= control target key start
LH: loop header
LB: loop body
LE: loop exit
PB: predicated region body
PF: predicated region fallthrough
CT: control target
= control target key end

     0   :  { %s1975_s9 = smov 0   ;;  %s1977_s10 = smov 0   ;;  %s2180_s0 = inlined_call_operand.vmem [shape: bf16[1024,128], index: 0, kind: input, shape index: {}]   ;;  %s2181_s1 = inlined_call_operand.vmem [shape: bf16[128,128], index: 1, kind: input, shape index: {}]   ;;  %s2182_s2 = inlined_call_operand.vmem [shape: bf16[1024,128], index: 2, kind: output, shape index: {}]  }
   0x1   :  { %s1979_s11 = smov 0  }
   0x2 LB: > { %s24_s12 = sadd.s32 1, %s1954_s10  ;;  %p1402_p0 = scmp.ge.s32.totalorder %s1958_s11, 1  ;;  %s1958_s11 = sphi %s1979_s11, %s12_s11   ;;  %s1954_s10 = sphi %s1977_s10, %s2184_s10   ;;  %s1950_s9 = sphi %s1975_s9, %s2183_s9  }
   0x3   : > { %p26_p1 = scmp.ge.s32.totalorder %s24_s12, 2  ;;  %p136_p2 = scmp.lt.s32.totalorder %s1958_s11, 3 }
   0x5   : > { %s2186_s12 = smov (%p26_p1, %s24_s12), 0  ;;  %p137_p3 = pnand %p1402_p0, %p136_p2 }
   0x6   : > { %v1928_v0 = vld [vmem:[%s2181_s1] sm:$0xff] (!%p137_p3)   ;;  %s1403_s15 = sshll.u32 (!%p137_p3), %s1950_s9, 6  ;;  %v1929_v1 = vld [vmem:[%s2181_s1 + $0x8] sm:$0xff] (!%p137_p3)   ;;  %v1930_v2 = vld [vmem:[%s2181_s1 + $0x10] sm:$0xff] (!%p137_p3)  }
   0x7   : > { %140 = sbr.rel (%p137_p3) target bundleno = 314 (0x13a), region = 28  ;;  %p166_p4 = scmp.lt.s32.totalorder (!%p137_p3), %s1403_s15, 127  ;;  %1808 = vmatprep.subr.bf16.mxu0 (!%p137_p3), %v1928_v0  ;;  %1888 = vmatprep.subr.bf16.mxu1 (!%p137_p3), %v1928_v0  ;;  %v1931_v3 = vld [vmem:[%s2181_s1 + $0x18] sm:$0xff] (!%p137_p3)   ;;  %v1932_v14 = vld [vmem:[%s2181_s1 + $0x20] sm:$0xff] (!%p137_p3)   ;;  %v1933_v20 = vld [vmem:[%s2181_s1 + $0x28] sm:$0xff] (!%p137_p3)  }
   0x8   : > { %1809 = vmatpush3.bf16.msra.mxu0 (!%p137_p3), %v1928_v0  ;;  %1896 = vmatpush3.bf16.msra.mxu1 (!%p137_p3), %v1928_v0  ;;  %v1934_v25 = vld [vmem:[%s2181_s1 + $0x30] sm:$0xff] (!%p137_p3)   ;;  %v1935_v42 = vld [vmem:[%s2181_s1 + $0x38] sm:$0xff] (!%p137_p3)  }
   0x9   : > { %1810 = vmatprep.subr.bf16.mxu0 (!%p137_p3), %v1929_v1  ;;  %1889 = vmatprep.subr.bf16.mxu1 (!%p137_p3), %v1929_v1 }
   0xc   : > { %1811 = vmatpush3.bf16.msra.mxu0 (!%p137_p3), %v1929_v1  ;;  %1897 = vmatpush3.bf16.msra.mxu1 (!%p137_p3), %v1929_v1 }
   0xd   : > { %1812 = vmatprep.subr.bf16.mxu0 (!%p137_p3), %v1930_v2  ;;  %1890 = vmatprep.subr.bf16.mxu1 (!%p137_p3), %v1930_v2 }
   0xe   : > { %s2188_s15 = smov (!%p166_p4, %s1403_s15), 127 }
   0xf   : > { %s1404_s20 = sshll.u32 %s2188_s15, 2 }
  0x10   : > { %s2010_s23 = scalar_lea.vmem %s2180_s0, %s1404_s20  ;;  %1813 = vmatpush3.bf16.msra.mxu0 %v1930_v2  ;;  %1898 = vmatpush3.bf16.msra.mxu1 %v1930_v2  ;;  %s2137_s8 = scalar_lea.vmem %s2182_s2, %s1404_s20 }
  0x11   : > { %v186_v4 = vld [vmem:[%s2010_s23] sm:$0xf]  ;;  %v187_v5 = vld [vmem:[%s2010_s23 + $0x4] sm:$0xf]  ;;  %1814 = vmatprep.subr.bf16.mxu0 %v1931_v3  ;;  %1891 = vmatprep.subr.bf16.mxu1 %v1931_v3  ;;  %v188_v19 = vld [vmem:[%s2010_s23 + $0x8] sm:$0xf] }
  0x12   : > { %v218_v6 = vld [vmem:[%s2010_s23 + $0x80] sm:$0xf]  ;;  %vm250_vm0 = vcmp.ge.bf16.partialorder %v186_v4, 0  ;;  %vm251_vm1 = vcmp.ge.bf16.partialorder %v187_v5, 0  ;;  %v314_v7 = vmul.bf16 1045249613, %v186_v4 }
  0x13   : > { %v315_v8 = vmul.bf16 1045249613, %v187_v5  ;;  %v219_v9 = vld [vmem:[%s2010_s23 + $0x84] sm:$0xf]  ;;  %vm282_vm2 = vcmp.ge.bf16.partialorder %v218_v6, 0  ;;  %vm252_vm4 = vcmp.ge.bf16.partialorder %v188_v19, 0 }
  0x14   : > { %v346_v10 = vmul.bf16 1045249613, %v218_v6  ;;  %v378_v11 = vsel %vm250_vm0, %v186_v4, %v314_v7  ;;  %vm283_vm3 = vcmp.ge.bf16.partialorder %v219_v9, 0  ;;  %v347_v13 = vmul.bf16 1045249613, %v219_v9  ;;  %1815 = vmatpush3.bf16.msra.mxu0 %v1931_v3  ;;  %1899 = vmatpush3.bf16.msra.mxu1 %v1931_v3 }
  0x15   : > { %v379_v12 = vsel %vm251_vm1, %v187_v5, %v315_v8  ;;  %1816 = vmatprep.subr.bf16.mxu0 %v1932_v14  ;;  %1892 = vmatprep.subr.bf16.mxu1 %v1932_v14  ;;  %v189_v21 = vld [vmem:[%s2010_s23 + $0xc] sm:$0xf]  ;;  %v220_v22 = vld [vmem:[%s2010_s23 + $0x88] sm:$0xf]  ;;  %v190_v24 = vld [vmem:[%s2010_s23 + $0x10] sm:$0xf] }
  0x16   : > { %v1407_v15 = vcombine.low %v378_v11, %v379_v12  ;;  %v410_v16 = vsel %vm282_vm2, %v218_v6, %v346_v10  ;;  %v411_v17 = vsel %vm283_vm3, %v219_v9, %v347_v13  ;;  %v221_v23 = vld [vmem:[%s2010_s23 + $0x8c] sm:$0xf]  ;;  %v316_v26 = vmul.bf16 1045249613, %v188_v19  ;;  %v191_v27 = vld [vmem:[%s2010_s23 + $0x14] sm:$0xf] }
  0x17   : > { %v1423_v18 = vcombine.low %v410_v16, %v411_v17  ;;  %v222_v28 = vld [vmem:[%s2010_s23 + $0x90] sm:$0xf]  ;;  %vm253_vm5 = vcmp.ge.bf16.partialorder %v189_v21, 0  ;;  %v317_v29 = vmul.bf16 1045249613, %v189_v21  ;;  %vm284_vm6 = vcmp.ge.bf16.partialorder %v220_v22, 0 }
  0x18   : > { %1824 = vmatprep.mubr.bf16.mxu0 %v1407_v15  ;;  %1817 = vmatpush3.bf16.msra.mxu0 %v1932_v14  ;;  %v223_v30 = vld [vmem:[%s2010_s23 + $0x94] sm:$0xf]  ;;  %v348_v31 = vmul.bf16 1045249613, %v220_v22  ;;  %v349_v32 = vmul.bf16 1045249613, %v221_v23  ;;  %v380_v38 = vsel %vm252_vm4, %v188_v19, %v316_v26 }
  0x19   : > { %1856 = vmatprep.mubr.bf16.mxu1 %v1423_v18  ;;  %1900 = vmatpush3.bf16.msra.mxu1 %v1932_v14  ;;  %v318_v33 = vmul.bf16 1045249613, %v190_v24  ;;  %vm285_vm7 = vcmp.ge.bf16.partialorder %v221_v23, 0  ;;  %vm254_vm8 = vcmp.ge.bf16.partialorder %v190_v24, 0  ;;  %v319_v34 = vmul.bf16 1045249613, %v191_v27 }
  0x1a   : > { %1818 = vmatprep.subr.bf16.mxu0 %v1933_v20  ;;  %1893 = vmatprep.subr.bf16.mxu1 %v1933_v20  ;;  %v350_v35 = vmul.bf16 1045249613, %v222_v28  ;;  %vm255_vm9 = vcmp.ge.bf16.partialorder %v191_v27, 0  ;;  %vm286_vm10 = vcmp.ge.bf16.partialorder %v222_v28, 0  ;;  %v351_v36 = vmul.bf16 1045249613, %v223_v30 }
  0x1b   : > { %v192_v37 = vld [vmem:[%s2010_s23 + $0x18] sm:$0xf]  ;;  %v381_v39 = vsel %vm253_vm5, %v189_v21, %v317_v29  ;;  %vm287_vm11 = vcmp.ge.bf16.partialorder %v223_v30, 0  ;;  %v193_v40 = vld [vmem:[%s2010_s23 + $0x1c] sm:$0xf]  ;;  %v412_v43 = vsel %vm284_vm6, %v220_v22, %v348_v31  ;;  %v413_v44 = vsel %vm285_vm7, %v221_v23, %v349_v32 }
  0x1c   : > { %1819 = vmatpush3.bf16.msra.mxu0 %v1933_v20  ;;  %v224_v41 = vld [vmem:[%s2010_s23 + $0x98] sm:$0xf]  ;;  %v382_v45 = vsel %vm254_vm8, %v190_v24, %v318_v33  ;;  %v225_v46 = vld [vmem:[%s2010_s23 + $0x9c] sm:$0xf]  ;;  %v383_v47 = vsel %vm255_vm9, %v191_v27, %v319_v34  ;;  %v414_v48 = vsel %vm286_vm10, %v222_v28, %v350_v35  ;;  %vm256_vm12 = vcmp.ge.bf16.partialorder %v192_v37, 0 }
  0x1d   : > { %1901 = vmatpush3.bf16.msra.mxu1 %v1933_v20  ;;  %1820 = vmatprep.subr.bf16.mxu0 %v1934_v25  ;;  %v320_v49 = vmul.bf16 1045249613, %v192_v37  ;;  %v415_v50 = vsel %vm287_vm11, %v223_v30, %v351_v36  ;;  %vm257_vm13 = vcmp.ge.bf16.partialorder %v193_v40, 0  ;;  %v321_v51 = vmul.bf16 1045249613, %v193_v40 }
  0x1e   : > { %1894 = vmatprep.subr.bf16.mxu1 %v1934_v25  ;;  %v352_v52 = vmul.bf16 1045249613, %v224_v41  ;;  %vm288_vm14 = vcmp.ge.bf16.partialorder %v224_v41, 0  ;;  %vm289_vm15 = vcmp.ge.bf16.partialorder %v225_v46, 0  ;;  %v353_v53 = vmul.bf16 1045249613, %v225_v46 }
  0x1f   : > { %v194_v54 = vld [vmem:[%s2010_s23 + $0x20] sm:$0xf]  ;;  %v1408_v55 = vcombine.low %v380_v38, %v381_v39  ;;  %v195_v56 = vld [vmem:[%s2010_s23 + $0x24] sm:$0xf]  ;;  %v1424_v59 = vcombine.low %v412_v43, %v413_v44  ;;  %v1409_v60 = vcombine.low %v382_v45, %v383_v47  ;;  %v1425_v61 = vcombine.low %v414_v48, %v415_v50  ;;  %v196_v2 = vld [vmem:[%s2010_s23 + $0x28] sm:$0xf] }
  0x20   : > { %1821 = vmatpush3.bf16.msra.mxu0 %v1934_v25  ;;  %v226_v57 = vld [vmem:[%s2010_s23 + $0xa0] sm:$0xf]  ;;  %v227_v58 = vld [vmem:[%s2010_s23 + $0xa4] sm:$0xf]  ;;  %v384_v62 = vsel %vm256_vm12, %v192_v37, %v320_v49  ;;  %v385_v63 = vsel %vm257_vm13, %v193_v40, %v321_v51  ;;  %v416_v0 = vsel %vm288_vm14, %v224_v41, %v352_v52  ;;  %vm258_vm0 = vcmp.ge.bf16.partialorder %v194_v54, 0 }
  0x21   : > { %1902 = vmatpush3.bf16.msra.mxu1 %v1934_v25  ;;  %1822 = vmatprep.subr.bf16.mxu0 %v1935_v42  ;;  %v322_v1 = vmul.bf16 1045249613, %v194_v54  ;;  %v417_v3 = vsel %vm289_vm15, %v225_v46, %v353_v53  ;;  %v323_v4 = vmul.bf16 1045249613, %v195_v56  ;;  %v354_v5 = vmul.bf16 1045249613, %v226_v57 }
  0x22   : > { %1895 = vmatprep.subr.bf16.mxu1 %v1935_v42  ;;  %v355_v6 = vmul.bf16 1045249613, %v227_v58  ;;  %vm259_vm1 = vcmp.ge.bf16.partialorder %v195_v56, 0  ;;  %vm290_vm2 = vcmp.ge.bf16.partialorder %v226_v57, 0  ;;  %vm291_vm3 = vcmp.ge.bf16.partialorder %v227_v58, 0 }
  0x23   : > { %v197_v7 = vld [vmem:[%s2010_s23 + $0x2c] sm:$0xf]  ;;  %vm260_vm4 = vcmp.ge.bf16.partialorder %v196_v2, 0  ;;  %v228_v8 = vld [vmem:[%s2010_s23 + $0xa8] sm:$0xf]  ;;  %v1410_v9 = vcombine.low %v384_v62, %v385_v63  ;;  %v1426_v10 = vcombine.low %v416_v0, %v417_v3  ;;  %v386_v11 = vsel %vm258_vm0, %v194_v54, %v322_v1 }
  0x24   : > { %1823 = vmatpush3.bf16.msra.mxu0 %v1935_v42  ;;  %v324_v12 = vmul.bf16 1045249613, %v196_v2  ;;  %v229_v13 = vld [vmem:[%s2010_s23 + $0xac] sm:$0xf]  ;;  %v198_v14 = vld [vmem:[%s2010_s23 + $0x30] sm:$0xf]  ;;  %v387_v15 = vsel %vm259_vm1, %v195_v56, %v323_v4  ;;  %v418_v16 = vsel %vm290_vm2, %v226_v57, %v354_v5  ;;  %v419_v17 = vsel %vm291_vm3, %v227_v58, %v355_v6 }
  0x25   : > { %1903 = vmatpush3.bf16.msra.mxu1 %v1935_v42  ;;  %v199_v18 = vld [vmem:[%s2010_s23 + $0x34] sm:$0xf]  ;;  %v230_v19 = vld [vmem:[%s2010_s23 + $0xb0] sm:$0xf]  ;;  %vm261_vm5 = vcmp.ge.bf16.partialorder %v197_v7, 0  ;;  %vm292_vm6 = vcmp.ge.bf16.partialorder %v228_v8, 0  ;;  %v1411_v25 = vcombine.low %v386_v11, %v387_v15  ;;  %v1427_v29 = vcombine.low %v418_v16, %v419_v17 }
  0x26   : > { %v231_v20 = vld [vmem:[%s2010_s23 + $0xb4] sm:$0xf]  ;;  %v325_v21 = vmul.bf16 1045249613, %v197_v7  ;;  %v356_v22 = vmul.bf16 1045249613, %v228_v8  ;;  %v388_v30 = vsel %vm260_vm4, %v196_v2, %v324_v12 }
  0x27   : > { %1825 = vmatmul.mubr.bf16.vlgmr.msra.gmra.mrb[0].mxu0 %v1408_v55  ;;  %vm293_vm7 = vcmp.ge.bf16.partialorder %v229_v13, 0  ;;  %v357_v23 = vmul.bf16 1045249613, %v229_v13  ;;  %vm262_vm8 = vcmp.ge.bf16.partialorder %v198_v14, 0  ;;  %v326_v24 = vmul.bf16 1045249613, %v198_v14 }
  0x28   : > { %1857 = vmatmul.mubr.bf16.vlgmr.msra.gmra.mrb[0].mxu1 %v1424_v59  ;;  %1828 = vmatprep.mubr.bf16.mxu0 %v1409_v60  ;;  %v327_v26 = vmul.bf16 1045249613, %v199_v18  ;;  %v358_v27 = vmul.bf16 1045249613, %v230_v19  ;;  %v359_v28 = vmul.bf16 1045249613, %v231_v20  ;;  %v389_v32 = vsel %vm261_vm5, %v197_v7, %v325_v21 }
  0x29   : > { %1860 = vmatprep.mubr.bf16.mxu1 %v1425_v61  ;;  %vm263_vm9 = vcmp.ge.bf16.partialorder %v199_v18, 0  ;;  %vm294_vm10 = vcmp.ge.bf16.partialorder %v230_v19, 0  ;;  %vm295_vm11 = vcmp.ge.bf16.partialorder %v231_v20, 0  ;;  %v200_v31 = vld [vmem:[%s2010_s23 + $0x38] sm:$0xf]  ;;  %v420_v33 = vsel %vm292_vm6, %v228_v8, %v356_v22 }
  0x2a   : > { %v421_v34 = vsel %vm293_vm7, %v229_v13, %v357_v23  ;;  %v390_v35 = vsel %vm262_vm8, %v198_v14, %v326_v24  ;;  %v201_v36 = vld [vmem:[%s2010_s23 + $0x3c] sm:$0xf]  ;;  %v391_v37 = vsel %vm263_vm9, %v199_v18, %v327_v26  ;;  %v422_v38 = vsel %vm294_vm10, %v230_v19, %v358_v27  ;;  %v232_v41 = vld [vmem:[%s2010_s23 + $0xb8] sm:$0xf]  ;;  %v202_v44 = vld [vmem:[%s2010_s23 + $0x40] sm:$0xf] }
  0x2b   : > { %v423_v39 = vsel %vm295_vm11, %v231_v20, %v359_v28  ;;  %v328_v40 = vmul.bf16 1045249613, %v200_v31  ;;  %v233_v42 = vld [vmem:[%s2010_s23 + $0xbc] sm:$0xf]  ;;  %v1412_v43 = vcombine.low %v388_v30, %v389_v32  ;;  %vm264_vm12 = vcmp.ge.bf16.partialorder %v200_v31, 0 }
  0x2c   : > { %vm265_vm13 = vcmp.ge.bf16.partialorder %v201_v36, 0  ;;  %v203_v45 = vld [vmem:[%s2010_s23 + $0x44] sm:$0xf]  ;;  %v1428_v46 = vcombine.low %v420_v33, %v421_v34  ;;  %v1413_v47 = vcombine.low %v390_v35, %v391_v37  ;;  %v1429_v48 = vcombine.low %v422_v38, %v423_v39  ;;  %v234_v50 = vld [vmem:[%s2010_s23 + $0xc0] sm:$0xf] }
  0x2d   : > { %v329_v49 = vmul.bf16 1045249613, %v201_v36  ;;  %v235_v51 = vld [vmem:[%s2010_s23 + $0xc4] sm:$0xf]  ;;  %vm296_vm14 = vcmp.ge.bf16.partialorder %v232_v41, 0  ;;  %vm297_vm15 = vcmp.ge.bf16.partialorder %v233_v42, 0  ;;  %v392_v59 = vsel %vm264_vm12, %v200_v31, %v328_v40 }
  0x2e   : > { %v360_v52 = vmul.bf16 1045249613, %v232_v41  ;;  %v361_v53 = vmul.bf16 1045249613, %v233_v42  ;;  %vm266_vm0 = vcmp.ge.bf16.partialorder %v202_v44, 0  ;;  %vm267_vm1 = vcmp.ge.bf16.partialorder %v203_v45, 0 }
  0x2f   : > { %1829 = vmatmul.mubr.bf16.gmra.mrb[4].mxu0 %v1410_v9  ;;  %v330_v54 = vmul.bf16 1045249613, %v202_v44  ;;  %v331_v55 = vmul.bf16 1045249613, %v203_v45  ;;  %v362_v56 = vmul.bf16 1045249613, %v234_v50  ;;  %v393_v61 = vsel %vm265_vm13, %v201_v36, %v329_v49 }
  0x30   : > { %1861 = vmatmul.mubr.bf16.gmra.mrb[4].mxu1 %v1426_v10  ;;  %1832 = vmatprep.mubr.bf16.mxu0 %v1411_v25  ;;  %v363_v57 = vmul.bf16 1045249613, %v235_v51  ;;  %v204_v58 = vld [vmem:[%s2010_s23 + $0x48] sm:$0xf]  ;;  %vm298_vm2 = vcmp.ge.bf16.partialorder %v234_v50, 0  ;;  %vm299_vm3 = vcmp.ge.bf16.partialorder %v235_v51, 0  ;;  %v424_v62 = vsel %vm296_vm14, %v232_v41, %v360_v52 }
  0x31   : > { %1864 = vmatprep.mubr.bf16.mxu1 %v1427_v29  ;;  %v205_v60 = vld [vmem:[%s2010_s23 + $0x4c] sm:$0xf]  ;;  %v425_v63 = vsel %vm297_vm15, %v233_v42, %v361_v53  ;;  %v236_v0 = vld [vmem:[%s2010_s23 + $0xc8] sm:$0xf]  ;;  %v394_v1 = vsel %vm266_vm0, %v202_v44, %v330_v54  ;;  %v395_v2 = vsel %vm267_vm1, %v203_v45, %v331_v55  ;;  %v332_v3 = vmul.bf16 1045249613, %v204_v58 }
  0x32   : > { %v237_v4 = vld [vmem:[%s2010_s23 + $0xcc] sm:$0xf]  ;;  %v206_v5 = vld [vmem:[%s2010_s23 + $0x50] sm:$0xf]  ;;  %v426_v6 = vsel %vm298_vm2, %v234_v50, %v362_v56  ;;  %v427_v7 = vsel %vm299_vm3, %v235_v51, %v363_v57  ;;  %vm268_vm4 = vcmp.ge.bf16.partialorder %v204_v58, 0  ;;  %vm269_vm5 = vcmp.ge.bf16.partialorder %v205_v60, 0 }
  0x33   : > { %v207_v8 = vld [vmem:[%s2010_s23 + $0x54] sm:$0xf]  ;;  %v238_v9 = vld [vmem:[%s2010_s23 + $0xd0] sm:$0xf]  ;;  %v1414_v10 = vcombine.low %v392_v59, %v393_v61  ;;  %v1430_v11 = vcombine.low %v424_v62, %v425_v63  ;;  %v333_v12 = vmul.bf16 1045249613, %v205_v60  ;;  %v1415_v17 = vcombine.low %v394_v1, %v395_v2 }
  0x34   : > { %v364_v13 = vmul.bf16 1045249613, %v236_v0  ;;  %v239_v14 = vld [vmem:[%s2010_s23 + $0xd4] sm:$0xf]  ;;  %vm300_vm6 = vcmp.ge.bf16.partialorder %v236_v0, 0  ;;  %vm301_vm7 = vcmp.ge.bf16.partialorder %v237_v4, 0  ;;  %v1431_v18 = vcombine.low %v426_v6, %v427_v7 }
  0x35   : > { %v365_v15 = vmul.bf16 1045249613, %v237_v4  ;;  %v334_v16 = vmul.bf16 1045249613, %v206_v5  ;;  %v335_v19 = vmul.bf16 1045249613, %v207_v8  ;;  %v396_v23 = vsel %vm268_vm4, %v204_v58, %v332_v3 }
  0x36   : > { %v366_v20 = vmul.bf16 1045249613, %v238_v9  ;;  %v208_v21 = vld [vmem:[%s2010_s23 + $0x58] sm:$0xf]  ;;  %vm270_vm8 = vcmp.ge.bf16.partialorder %v206_v5, 0  ;;  %vm271_vm9 = vcmp.ge.bf16.partialorder %v207_v8, 0  ;;  %v397_v24 = vsel %vm269_vm5, %v205_v60, %v333_v12 }
  0x37   : > { %1833 = vmatmul.mubr.bf16.gmra.mrb[8].mxu0 %v1412_v43  ;;  %vm302_vm10 = vcmp.ge.bf16.partialorder %v238_v9, 0  ;;  %v367_v22 = vmul.bf16 1045249613, %v239_v14  ;;  %vm303_vm11 = vcmp.ge.bf16.partialorder %v239_v14, 0  ;;  %v209_v25 = vld [vmem:[%s2010_s23 + $0x5c] sm:$0xf]  ;;  %v428_v27 = vsel %vm300_vm6, %v236_v0, %v364_v13 }
  0x38   : > { %1865 = vmatmul.mubr.bf16.gmra.mrb[8].mxu1 %v1428_v46  ;;  %1836 = vmatprep.mubr.bf16.mxu0 %v1413_v47  ;;  %v240_v26 = vld [vmem:[%s2010_s23 + $0xd8] sm:$0xf]  ;;  %v429_v28 = vsel %vm301_vm7, %v237_v4, %v365_v15  ;;  %vm272_vm12 = vcmp.ge.bf16.partialorder %v208_v21, 0  ;;  %v336_v29 = vmul.bf16 1045249613, %v208_v21  ;;  %v398_v30 = vsel %vm270_vm8, %v206_v5, %v334_v16 }
  0x39   : > { %1868 = vmatprep.mubr.bf16.mxu1 %v1429_v48  ;;  %v399_v31 = vsel %vm271_vm9, %v207_v8, %v335_v19  ;;  %v430_v32 = vsel %vm302_vm10, %v238_v9, %v366_v20  ;;  %v241_v33 = vld [vmem:[%s2010_s23 + $0xdc] sm:$0xf]  ;;  %v210_v34 = vld [vmem:[%s2010_s23 + $0x60] sm:$0xf]  ;;  %v211_v35 = vld [vmem:[%s2010_s23 + $0x64] sm:$0xf]  ;;  %v431_v36 = vsel %vm303_vm11, %v239_v14, %v367_v22  ;;  %v1416_v38 = vcombine.low %v396_v23, %v397_v24 }
  0x3a   : > { %vm273_vm13 = vcmp.ge.bf16.partialorder %v209_v25, 0  ;;  %v337_v37 = vmul.bf16 1045249613, %v209_v25  ;;  %vm304_vm14 = vcmp.ge.bf16.partialorder %v240_v26, 0  ;;  %v1432_v39 = vcombine.low %v428_v27, %v429_v28  ;;  %v242_v41 = vld [vmem:[%s2010_s23 + $0xe0] sm:$0xf] }
  0x3b   : > { %v368_v40 = vmul.bf16 1045249613, %v240_v26  ;;  %v243_v42 = vld [vmem:[%s2010_s23 + $0xe4] sm:$0xf]  ;;  %v1417_v43 = vcombine.low %v398_v30, %v399_v31  ;;  %v369_v44 = vmul.bf16 1045249613, %v241_v33  ;;  %v1433_v47 = vcombine.low %v430_v32, %v431_v36 }
  0x3c   : > { %v338_v45 = vmul.bf16 1045249613, %v210_v34  ;;  %v339_v46 = vmul.bf16 1045249613, %v211_v35  ;;  %vm305_vm15 = vcmp.ge.bf16.partialorder %v241_v33, 0  ;;  %vm274_vm0 = vcmp.ge.bf16.partialorder %v210_v34, 0 }
  0x3d   : > { %vm275_vm1 = vcmp.ge.bf16.partialorder %v211_v35, 0  ;;  %v400_v48 = vsel %vm272_vm12, %v208_v21, %v336_v29  ;;  %v370_v49 = vmul.bf16 1045249613, %v242_v41  ;;  %v371_v50 = vmul.bf16 1045249613, %v243_v42 }
  0x3e   : > { %v401_v51 = vsel %vm273_vm13, %v209_v25, %v337_v37  ;;  %v432_v52 = vsel %vm304_vm14, %v240_v26, %v368_v40  ;;  %vm306_vm2 = vcmp.ge.bf16.partialorder %v242_v41, 0  ;;  %vm307_vm3 = vcmp.ge.bf16.partialorder %v243_v42, 0  ;;  %v212_v53 = vld [vmem:[%s2010_s23 + $0x68] sm:$0xf]  ;;  %v213_v57 = vld [vmem:[%s2010_s23 + $0x6c] sm:$0xf] }
  0x3f   : > { %1837 = vmatmul.mubr.bf16.gmra.mrb[12].mxu0 %v1414_v10  ;;  %v433_v54 = vsel %vm305_vm15, %v241_v33, %v369_v44  ;;  %v402_v55 = vsel %vm274_vm0, %v210_v34, %v338_v45  ;;  %v403_v56 = vsel %vm275_vm1, %v211_v35, %v339_v46  ;;  %v244_v58 = vld [vmem:[%s2010_s23 + $0xe8] sm:$0xf]  ;;  %v245_v59 = vld [vmem:[%s2010_s23 + $0xec] sm:$0xf]  ;;  %v1418_v60 = vcombine.low %v400_v48, %v401_v51  ;;  %v214_v0 = vld [vmem:[%s2010_s23 + $0x70] sm:$0xf] }
  0x40   : > { %1869 = vmatmul.mubr.bf16.gmra.mrb[12].mxu1 %v1430_v11  ;;  %1840 = vmatprep.mubr.bf16.mxu0 %v1415_v17  ;;  %v434_v61 = vsel %vm306_vm2, %v242_v41, %v370_v49  ;;  %v435_v62 = vsel %vm307_vm3, %v243_v42, %v371_v50  ;;  %v340_v63 = vmul.bf16 1045249613, %v212_v53  ;;  %v215_v1 = vld [vmem:[%s2010_s23 + $0x74] sm:$0xf]  ;;  %v1434_v2 = vcombine.low %v432_v52, %v433_v54  ;;  %v246_v4 = vld [vmem:[%s2010_s23 + $0xf0] sm:$0xf] }
  0x41   : > { %1872 = vmatprep.mubr.bf16.mxu1 %v1431_v18  ;;  %v1419_v3 = vcombine.low %v402_v55, %v403_v56  ;;  %vm276_vm4 = vcmp.ge.bf16.partialorder %v212_v53, 0  ;;  %vm277_vm5 = vcmp.ge.bf16.partialorder %v213_v57, 0  ;;  %v247_v5 = vld [vmem:[%s2010_s23 + $0xf4] sm:$0xf]  ;;  %v341_v6 = vmul.bf16 1045249613, %v213_v57 }
  0x42   : > { %vm308_vm6 = vcmp.ge.bf16.partialorder %v244_v58, 0  ;;  %vm309_vm7 = vcmp.ge.bf16.partialorder %v245_v59, 0  ;;  %v372_v7 = vmul.bf16 1045249613, %v244_v58  ;;  %v1435_v8 = vcombine.low %v434_v61, %v435_v62  ;;  %v216_v20 = vld [vmem:[%s2010_s23 + $0x78] sm:$0xf] }
  0x43   : > { %v373_v9 = vmul.bf16 1045249613, %v245_v59  ;;  %v342_v10 = vmul.bf16 1045249613, %v214_v0  ;;  %v343_v11 = vmul.bf16 1045249613, %v215_v1  ;;  %v404_v14 = vsel %vm276_vm4, %v212_v53, %v340_v63 }
  0x44   : > { %vm278_vm8 = vcmp.ge.bf16.partialorder %v214_v0, 0  ;;  %vm279_vm9 = vcmp.ge.bf16.partialorder %v215_v1, 0  ;;  %v374_v12 = vmul.bf16 1045249613, %v246_v4  ;;  %v375_v13 = vmul.bf16 1045249613, %v247_v5 }
  0x45   : > { %vm310_vm10 = vcmp.ge.bf16.partialorder %v246_v4, 0  ;;  %vm311_vm11 = vcmp.ge.bf16.partialorder %v247_v5, 0  ;;  %v405_v15 = vsel %vm277_vm5, %v213_v57, %v341_v6  ;;  %v436_v16 = vsel %vm308_vm6, %v244_v58, %v372_v7  ;;  %v217_v23 = vld [vmem:[%s2010_s23 + $0x7c] sm:$0xf]  ;;  %v248_v24 = vld [vmem:[%s2010_s23 + $0xf8] sm:$0xf] }
  0x46   : > { %v437_v17 = vsel %vm309_vm7, %v245_v59, %v373_v9  ;;  %v406_v18 = vsel %vm278_vm8, %v214_v0, %v342_v10  ;;  %v407_v19 = vsel %vm279_vm9, %v215_v1, %v343_v11  ;;  %v438_v21 = vsel %vm310_vm10, %v246_v4, %v374_v12  ;;  %v249_v25 = vld [vmem:[%s2010_s23 + $0xfc] sm:$0xf] }
  0x47   : > { %1841 = vmatmul.mubr.bf16.gmra.mrb[16].mxu0 %v1416_v38  ;;  %v439_v22 = vsel %vm311_vm11, %v247_v5, %v375_v13  ;;  %v1420_v26 = vcombine.low %v404_v14, %v405_v15  ;;  %v1436_v27 = vcombine.low %v436_v16, %v437_v17  ;;  %v1421_v28 = vcombine.low %v406_v18, %v407_v19 }
  0x48   : > { %1873 = vmatmul.mubr.bf16.gmra.mrb[16].mxu1 %v1432_v39  ;;  %1844 = vmatprep.mubr.bf16.mxu0 %v1417_v43  ;;  %vm280_vm12 = vcmp.ge.bf16.partialorder %v216_v20, 0  ;;  %v344_v29 = vmul.bf16 1045249613, %v216_v20  ;;  %v1437_v30 = vcombine.low %v438_v21, %v439_v22  ;;  %v345_v31 = vmul.bf16 1045249613, %v217_v23 }
  0x49   : > { %1876 = vmatprep.mubr.bf16.mxu1 %v1433_v47  ;;  %v376_v32 = vmul.bf16 1045249613, %v248_v24  ;;  %v377_v33 = vmul.bf16 1045249613, %v249_v25  ;;  %vm281_vm13 = vcmp.ge.bf16.partialorder %v217_v23, 0  ;;  %vm312_vm14 = vcmp.ge.bf16.partialorder %v248_v24, 0 }
  0x4a   : > { %vm313_vm15 = vcmp.ge.bf16.partialorder %v249_v25, 0  ;;  %v408_v34 = vsel %vm280_vm12, %v216_v20, %v344_v29  ;;  %v409_v35 = vsel %vm281_vm13, %v217_v23, %v345_v31 }
  0x4b   : > { %v440_v36 = vsel %vm312_vm14, %v248_v24, %v376_v32  ;;  %v441_v37 = vsel %vm313_vm15, %v249_v25, %v377_v33  ;;  %v1422_v38 = vcombine.low %v408_v34, %v409_v35 }
  0x4c   : > { %v1438_v39 = vcombine.low %v440_v36, %v441_v37 }
  0x4f   : > { %1845 = vmatmul.mubr.bf16.gmra.mrb[20].mxu0 %v1418_v60 }
  0x50   : > { %1877 = vmatmul.mubr.bf16.gmra.mrb[20].mxu1 %v1434_v2  ;;  %1848 = vmatprep.mubr.bf16.mxu0 %v1419_v3 }
  0x51   : > { %1880 = vmatprep.mubr.bf16.mxu1 %v1435_v8 }
  0x57   : > { %1849 = vmatmul.mubr.bf16.gmra.mrb[24].mxu0 %v1420_v26 }
  0x58   : > { %1881 = vmatmul.mubr.bf16.gmra.mrb[24].mxu1 %v1436_v27  ;;  %1852 = vmatprep.mubr.bf16.mxu0 %v1421_v28 }
  0x59   : > { %1884 = vmatprep.mubr.bf16.mxu1 %v1437_v30 }
  0x5f   : > { %1853 = vmatmul.mubr.bf16.gmra.mrb[28].mxu0 %v1422_v38 }
  0x60   : > { %1885 = vmatmul.mubr.bf16.gmra.mrb[28].mxu1 %v1438_v39 }
  0xfa   : > { %v1826_v40 = vpop.f32.mrb[0].mxu0 }
  0xfb   : > { %v1858_v41 = vpop.f32.mrb[0].mxu1  ;;  %v732_v42 = vpop.f32.mrb[1].mxu0 }
  0xfc   : > { %v860_v43 = vpop.f32.mrb[1].mxu1  ;;  %v1827_v44 = vpop.f32.mrb[2].mxu0 }
  0xfd   : > { %v1859_v45 = vpop.f32.mrb[2].mxu1  ;;  %v1585_v46 = vpack.c.bf16 %v1827_v44, %v1826_v40  ;;  %v735_v48 = vpop.f32.mrb[3].mxu0 }
  0xfe   : > { %v1665_v47 = vpack.c.bf16 %v1859_v45, %v1858_v41  ;;  %v863_v49 = vpop.f32.mrb[3].mxu1  ;;  %v1580_v50 = vpack.c.bf16 %v735_v48, %v732_v42 }
  0xff   : > { %v1660_v51 = vpack.c.bf16 %v863_v49, %v860_v43  ;;  %1737 = vst [vmem:[%s2137_s8 + $0x8] sm:$0xff] %v1585_v46  }
 0x100   : > { %1753 = vst [vmem:[%s2137_s8 + $0x88] sm:$0xff] %v1665_v47   ;;  %1581 = vst [vmem:[%s2137_s8] sm:$0xff] %v1580_v50  }
 0x101   : > { %1752 = vst [vmem:[%s2137_s8 + $0x80] sm:$0xff] %v1660_v51  }
 0x102   : > { %v1830_v52 = vpop.f32.mrb[4].mxu0 }
 0x103   : > { %v1862_v53 = vpop.f32.mrb[4].mxu1  ;;  %v748_v54 = vpop.f32.mrb[5].mxu0 }
 0x104   : > { %v876_v55 = vpop.f32.mrb[5].mxu1  ;;  %v1831_v56 = vpop.f32.mrb[6].mxu0 }
 0x105   : > { %v1863_v57 = vpop.f32.mrb[6].mxu1  ;;  %v1595_v58 = vpack.c.bf16 %v1831_v56, %v1830_v52  ;;  %v751_v60 = vpop.f32.mrb[7].mxu0 }
 0x106   : > { %v1675_v59 = vpack.c.bf16 %v1863_v57, %v1862_v53  ;;  %v879_v61 = vpop.f32.mrb[7].mxu1  ;;  %v1590_v62 = vpack.c.bf16 %v751_v60, %v748_v54 }
 0x107   : > { %v1670_v63 = vpack.c.bf16 %v879_v61, %v876_v55  ;;  %1739 = vst [vmem:[%s2137_s8 + $0x18] sm:$0xff] %v1595_v58  }
 0x108   : > { %1755 = vst [vmem:[%s2137_s8 + $0x98] sm:$0xff] %v1675_v59   ;;  %1738 = vst [vmem:[%s2137_s8 + $0x10] sm:$0xff] %v1590_v62  }
 0x109   : > { %1754 = vst [vmem:[%s2137_s8 + $0x90] sm:$0xff] %v1670_v63  }
 0x10a   : > { %v1834_v0 = vpop.f32.mrb[8].mxu0 }
 0x10b   : > { %v1866_v1 = vpop.f32.mrb[8].mxu1  ;;  %v764_v2 = vpop.f32.mrb[9].mxu0 }
 0x10c   : > { %v892_v3 = vpop.f32.mrb[9].mxu1  ;;  %v1835_v4 = vpop.f32.mrb[10].mxu0 }
 0x10d   : > { %v1867_v5 = vpop.f32.mrb[10].mxu1  ;;  %v1605_v6 = vpack.c.bf16 %v1835_v4, %v1834_v0  ;;  %v767_v8 = vpop.f32.mrb[11].mxu0 }
 0x10e   : > { %v1685_v7 = vpack.c.bf16 %v1867_v5, %v1866_v1  ;;  %v895_v9 = vpop.f32.mrb[11].mxu1  ;;  %v1600_v10 = vpack.c.bf16 %v767_v8, %v764_v2 }
 0x10f   : > { %v1680_v11 = vpack.c.bf16 %v895_v9, %v892_v3  ;;  %1741 = vst [vmem:[%s2137_s8 + $0x28] sm:$0xff] %v1605_v6  }
 0x110   : > { %1757 = vst [vmem:[%s2137_s8 + $0xa8] sm:$0xff] %v1685_v7   ;;  %1740 = vst [vmem:[%s2137_s8 + $0x20] sm:$0xff] %v1600_v10  }
 0x111   : > { %1756 = vst [vmem:[%s2137_s8 + $0xa0] sm:$0xff] %v1680_v11  }
 0x112   : > { %v1838_v12 = vpop.f32.mrb[12].mxu0 }
 0x113   : > { %v1870_v13 = vpop.f32.mrb[12].mxu1  ;;  %v780_v14 = vpop.f32.mrb[13].mxu0 }
 0x114   : > { %v908_v15 = vpop.f32.mrb[13].mxu1  ;;  %v1839_v16 = vpop.f32.mrb[14].mxu0 }
 0x115   : > { %v1871_v17 = vpop.f32.mrb[14].mxu1  ;;  %v1615_v18 = vpack.c.bf16 %v1839_v16, %v1838_v12  ;;  %v783_v20 = vpop.f32.mrb[15].mxu0 }
 0x116   : > { %v1695_v19 = vpack.c.bf16 %v1871_v17, %v1870_v13  ;;  %v911_v21 = vpop.f32.mrb[15].mxu1  ;;  %v1610_v22 = vpack.c.bf16 %v783_v20, %v780_v14 }
 0x117   : > { %v1690_v23 = vpack.c.bf16 %v911_v21, %v908_v15  ;;  %1743 = vst [vmem:[%s2137_s8 + $0x38] sm:$0xff] %v1615_v18  }
 0x118   : > { %1759 = vst [vmem:[%s2137_s8 + $0xb8] sm:$0xff] %v1695_v19   ;;  %1742 = vst [vmem:[%s2137_s8 + $0x30] sm:$0xff] %v1610_v22  }
 0x119   : > { %1758 = vst [vmem:[%s2137_s8 + $0xb0] sm:$0xff] %v1690_v23  }
 0x11a   : > { %v1842_v24 = vpop.f32.mrb[16].mxu0 }
 0x11b   : > { %v1874_v25 = vpop.f32.mrb[16].mxu1  ;;  %v796_v26 = vpop.f32.mrb[17].mxu0 }
 0x11c   : > { %v924_v27 = vpop.f32.mrb[17].mxu1  ;;  %v1843_v28 = vpop.f32.mrb[18].mxu0 }
 0x11d   : > { %v1875_v29 = vpop.f32.mrb[18].mxu1  ;;  %v1625_v30 = vpack.c.bf16 %v1843_v28, %v1842_v24  ;;  %v799_v32 = vpop.f32.mrb[19].mxu0 }
 0x11e   : > { %v1705_v31 = vpack.c.bf16 %v1875_v29, %v1874_v25  ;;  %v927_v33 = vpop.f32.mrb[19].mxu1  ;;  %v1620_v34 = vpack.c.bf16 %v799_v32, %v796_v26 }
 0x11f   : > { %v1700_v35 = vpack.c.bf16 %v927_v33, %v924_v27  ;;  %1745 = vst [vmem:[%s2137_s8 + $0x48] sm:$0xff] %v1625_v30  }
 0x120   : > { %1761 = vst [vmem:[%s2137_s8 + $0xc8] sm:$0xff] %v1705_v31   ;;  %1744 = vst [vmem:[%s2137_s8 + $0x40] sm:$0xff] %v1620_v34  }
 0x121   : > { %1760 = vst [vmem:[%s2137_s8 + $0xc0] sm:$0xff] %v1700_v35  }
 0x122   : > { %v1846_v36 = vpop.f32.mrb[20].mxu0 }
 0x123   : > { %v1878_v37 = vpop.f32.mrb[20].mxu1  ;;  %v812_v38 = vpop.f32.mrb[21].mxu0 }
 0x124   : > { %v940_v39 = vpop.f32.mrb[21].mxu1  ;;  %v1847_v40 = vpop.f32.mrb[22].mxu0 }
 0x125   : > { %v1879_v41 = vpop.f32.mrb[22].mxu1  ;;  %v1635_v42 = vpack.c.bf16 %v1847_v40, %v1846_v36  ;;  %v815_v44 = vpop.f32.mrb[23].mxu0 }
 0x126   : > { %v1715_v43 = vpack.c.bf16 %v1879_v41, %v1878_v37  ;;  %v943_v45 = vpop.f32.mrb[23].mxu1  ;;  %v1630_v46 = vpack.c.bf16 %v815_v44, %v812_v38 }
 0x127   : > { %v1710_v47 = vpack.c.bf16 %v943_v45, %v940_v39  ;;  %1747 = vst [vmem:[%s2137_s8 + $0x58] sm:$0xff] %v1635_v42  }
 0x128   : > { %1763 = vst [vmem:[%s2137_s8 + $0xd8] sm:$0xff] %v1715_v43   ;;  %1746 = vst [vmem:[%s2137_s8 + $0x50] sm:$0xff] %v1630_v46  }
 0x129   : > { %1762 = vst [vmem:[%s2137_s8 + $0xd0] sm:$0xff] %v1710_v47  }
 0x12a   : > { %v1850_v48 = vpop.f32.mrb[24].mxu0 }
 0x12b   : > { %v1882_v49 = vpop.f32.mrb[24].mxu1  ;;  %v828_v50 = vpop.f32.mrb[25].mxu0 }
 0x12c   : > { %v956_v51 = vpop.f32.mrb[25].mxu1  ;;  %v1851_v52 = vpop.f32.mrb[26].mxu0 }
 0x12d   : > { %v1883_v53 = vpop.f32.mrb[26].mxu1  ;;  %v1645_v54 = vpack.c.bf16 %v1851_v52, %v1850_v48  ;;  %v831_v56 = vpop.f32.mrb[27].mxu0 }
 0x12e   : > { %v1725_v55 = vpack.c.bf16 %v1883_v53, %v1882_v49  ;;  %v959_v57 = vpop.f32.mrb[27].mxu1  ;;  %v1640_v58 = vpack.c.bf16 %v831_v56, %v828_v50 }
 0x12f   : > { %v1720_v59 = vpack.c.bf16 %v959_v57, %v956_v51  ;;  %1749 = vst [vmem:[%s2137_s8 + $0x68] sm:$0xff] %v1645_v54  }
 0x130   : > { %1765 = vst [vmem:[%s2137_s8 + $0xe8] sm:$0xff] %v1725_v55   ;;  %1748 = vst [vmem:[%s2137_s8 + $0x60] sm:$0xff] %v1640_v58  }
 0x131   : > { %1764 = vst [vmem:[%s2137_s8 + $0xe0] sm:$0xff] %v1720_v59  }
 0x132   : > { %v1854_v60 = vpop.f32.mrb[28].mxu0 }
 0x133   : > { %v1886_v61 = vpop.f32.mrb[28].mxu1  ;;  %v844_v62 = vpop.f32.mrb[29].mxu0 }
 0x134   : > { %v972_v63 = vpop.f32.mrb[29].mxu1  ;;  %v1855_v0 = vpop.f32.mrb[30].mxu0 }
 0x135   : > { %v1887_v1 = vpop.f32.mrb[30].mxu1  ;;  %v1655_v2 = vpack.c.bf16 %v1855_v0, %v1854_v60  ;;  %v847_v4 = vpop.f32.mrb[31].mxu0 }
 0x136   : > { %v1735_v3 = vpack.c.bf16 %v1887_v1, %v1886_v61  ;;  %v975_v5 = vpop.f32.mrb[31].mxu1  ;;  %v1650_v6 = vpack.c.bf16 %v847_v4, %v844_v62 }
 0x137   : > { %v1730_v7 = vpack.c.bf16 %v975_v5, %v972_v63  ;;  %1751 = vst [vmem:[%s2137_s8 + $0x78] sm:$0xff] %v1655_v2  }
 0x138   : > { %1767 = vst [vmem:[%s2137_s8 + $0xf8] sm:$0xff] %v1735_v3   ;;  %1750 = vst [vmem:[%s2137_s8 + $0x70] sm:$0xff] %v1650_v6  }
 0x139   : > { %1766 = vst [vmem:[%s2137_s8 + $0xf0] sm:$0xff] %v1730_v7  }
 0x13a PF: > { %s12_s11 = sadd.s32 1, %s1958_s11   ;;  %s2183_s9 = smov %s1954_s10 }
 0x13b   : > { %p9_p5 = scmp.ge.s32.totalorder %s12_s11, 4   ;;  %s2184_s10 = smov %s2186_s12 }
 0x13d   :  { %11 = sbr.rel (!%p9_p5) target bundleno = 2 (0x2), region = 61 }

// kernel: _lambda_.19
= control target key start
LH: loop header
LB: loop body
LE: loop exit
PB: predicated region body
PF: predicated region fallthrough
CT: control target
= control target key end

     0   :  { %v14_v0 = vlaneseq  ;;  %v156_v3 = vmov 1966171168   ;;  %v157_v9 = vmov 0.0   ;;  %s209_s0 = inlined_call_operand.vmem [shape: bf16[8,512], index: 0, kind: input, shape index: {}]   ;;  %s210_s1 = inlined_call_operand.vmem [shape: f32[1,512], index: 1, kind: output, shape index: {0}]   ;;  %s211_s2 = inlined_call_operand.vmem [shape: f32[1,512], index: 2, kind: output, shape index: {1}]  }
   0x1   :  { %v20_v1 = vld [vmem:[%s209_s0] sm:$0xff]  ;;  %v21_v2 = vld [vmem:[%s209_s0 + $0x8] sm:$0xff]  ;;  %v58_v4 = vunpack.c.l.s4 %v156_v3 }
   0x2   :  { %vm179_vm0 = vcmp.lt.s32.totalorder %v14_v0, 512  ;;  %v22_v6 = vunpack.c.l.bf16 %v20_v1  ;;  %v23_v7 = vunpack.c.h.bf16 %v20_v1  ;;  %v24_v8 = vunpack.c.l.bf16 %v21_v2 }
   0x3   :  { %18 = vst.msk [vmem:[%s210_s1] sm:$0xf] %vm179_vm0, %v157_v9  ;;  %v25_v10 = vunpack.c.h.bf16 %v21_v2  ;;  %v59_v11 = vunpack.c.0.s8 %v58_v4  ;;  %v61_v12 = vshrl.u32 %v14_v0, 7  ;;  %19 = vst.msk [vmem:[%s211_s2] sm:$0xf] %vm179_vm0, %v157_v9 }
   0x4   :  { %v27_v13 = vrot.slane %v22_v6, 4  ;;  %v33_v14 = vrot.slane %v23_v7, 4  ;;  %v39_v15 = vrot.slane %v24_v8, 4  ;;  %v87_v16 = vmul.f32 %v22_v6, %v22_v6 }
   0x5   :  { %v45_v17 = vrot.slane %v25_v10, 4  ;;  %v62_v18 = vsub.s32 %v59_v11, %v61_v12  ;;  %v88_v19 = vmul.f32 %v23_v7, %v23_v7  ;;  %v89_v20 = vmul.f32 %v24_v8, %v24_v8 }
   0x6   :  { %v28_v21 = vadd.f32 %v27_v13, %v22_v6  ;;  %v34_v22 = vadd.f32 %v33_v14, %v23_v7  ;;  %v40_v23 = vadd.f32 %v39_v15, %v24_v8  ;;  %v90_v24 = vmul.f32 %v25_v10, %v25_v10 }
   0x7   :  { %v46_v25 = vadd.f32 %v45_v17, %v25_v10  ;;  %v91_v26 = vrot.slane %v87_v16, 4  ;;  %v97_v27 = vrot.slane %v88_v19, 4  ;;  %v103_v28 = vrot.slane %v89_v20, 4 }
   0x8   :  { %v29_v29 = vrot.slane %v28_v21, 2  ;;  %v35_v30 = vrot.slane %v34_v22, 2  ;;  %v41_v31 = vrot.slane %v40_v23, 2  ;;  %v109_v32 = vrot.slane %v90_v24, 4 }
   0x9   :  { %v47_v33 = vrot.slane %v46_v25, 2  ;;  %v92_v34 = vadd.f32 %v91_v26, %v87_v16  ;;  %v98_v35 = vadd.f32 %v97_v27, %v88_v19  ;;  %v104_v36 = vadd.f32 %v103_v28, %v89_v20 }
   0xa   :  { %v30_v37 = vadd.f32 %v29_v29, %v28_v21  ;;  %v36_v38 = vadd.f32 %v35_v30, %v34_v22  ;;  %v42_v39 = vadd.f32 %v41_v31, %v40_v23  ;;  %v110_v40 = vadd.f32 %v109_v32, %v90_v24  ;;  %v26_v11 = vld [vmem:[%s210_s1] sm:$0xf] }
   0xb   :  { %v48_v41 = vadd.f32 %v47_v33, %v46_v25  ;;  %v93_v42 = vrot.slane %v92_v34, 2  ;;  %v99_v43 = vrot.slane %v98_v35, 2  ;;  %v105_v44 = vrot.slane %v104_v36, 2  ;;  %v86_v16 = vld [vmem:[%s211_s2] sm:$0xf] }
   0xc   :  { %v31_v45 = vrot.slane %v30_v37, 1  ;;  %v37_v46 = vrot.slane %v36_v38, 1  ;;  %v43_v47 = vrot.slane %v42_v39, 1  ;;  %v111_v48 = vrot.slane %v110_v40, 2 }
   0xd   :  { %v49_v49 = vrot.slane %v48_v41, 1  ;;  %v94_v50 = vadd.f32 %v93_v42, %v92_v34  ;;  %v100_v51 = vadd.f32 %v99_v43, %v98_v35  ;;  %v106_v52 = vadd.f32 %v105_v44, %v104_v36 }
   0xe   :  { %v32_v53 = vadd.f32 %v31_v45, %v30_v37  ;;  %v38_v54 = vadd.f32 %v37_v46, %v36_v38  ;;  %v44_v55 = vadd.f32 %v43_v47, %v42_v39  ;;  %v112_v56 = vadd.f32 %v111_v48, %v110_v40 }
   0xf   :  { %v50_v57 = vadd.f32 %v49_v49, %v48_v41  ;;  %v95_v58 = vrot.slane %v94_v50, 1  ;;  %v101_v59 = vrot.slane %v100_v51, 1  ;;  %v107_v60 = vrot.slane %v106_v52, 1 }
  0x10   :  { %v55_v61 = vcombine.low %v32_v53, %v38_v54  ;;  %v113_v62 = vrot.slane %v112_v56, 1 }
  0x11   :  { %v56_v63 = vcombine.low %v44_v55, %v50_v57  ;;  %v96_v0 = vadd.f32 %v95_v58, %v94_v50  ;;  %v102_v1 = vadd.f32 %v101_v59, %v100_v51  ;;  %v108_v2 = vadd.f32 %v107_v60, %v106_v52 }
  0x12   :  { %v63_v3 = vrot.slane %v55_v61, %v62_v18  ;;  %v114_v4 = vadd.f32 %v113_v62, %v112_v56 }
  0x13   :  { %v70_v6 = vrot.slane %v56_v63, %v62_v18  ;;  %v119_v7 = vcombine.low %v96_v0, %v102_v1 }
  0x14   :  { %v120_v8 = vcombine.low %v108_v2, %v114_v4 }
  0x15   :  { %v71_v9 = vcombine.low %v63_v3, %v70_v6  ;;  %v127_v10 = vrot.slane %v119_v7, %v62_v18 }
  0x16   :  { %v134_v12 = vrot.slane %v120_v8, %v62_v18 }
  0x17   :  { %v78_v13 = vrot.slane %v71_v9, %v62_v18 }
  0x18   :  { %v135_v14 = vcombine.low %v127_v10, %v134_v12 }
  0x19   :  { %v80_v15 = vadd.f32 %v78_v13, %v26_v11 }
  0x1a   :  { %v142_v17 = vrot.slane %v135_v14, %v62_v18 }
  0x1b   :  { %85 = vst.msk [vmem:[%s210_s1] sm:$0xf] %vm179_vm0, %v80_v15 }
  0x1c   :  { %v144_v19 = vadd.f32 %v142_v17, %v86_v16 }
  0x1e   :  { %145 = vst.msk [vmem:[%s211_s2] sm:$0xf] %vm179_vm0, %v144_v19 }

// kernel: _lambda_.20
= control target key start
LH: loop header
LB: loop body
LE: loop exit
PB: predicated region body
PF: predicated region fallthrough
CT: control target
= control target key end

     0   :  { %s687_s9 = smov 0   ;;  %s689_s10 = smov 0   ;;  %s761_s0 = inlined_call_operand.vmem [shape: bf16[128,128], index: 0, kind: input, shape index: {}]   ;;  %s762_s1 = inlined_call_operand.vmem [shape: bf16[128,128], index: 1, kind: input, shape index: {}]   ;;  %s763_s2 = inlined_call_operand.vmem [shape: bf16[128,128], index: 2, kind: output, shape index: {}]  }
   0x1   :  { %s691_s11 = smov 0  }
   0x2 LB: > { %s24_s12 = sadd.s32 1, %s666_s10  ;;  %p506_p0 = scmp.ge.s32.totalorder %s670_s11, 1  ;;  %s670_s11 = sphi %s691_s11, %s12_s11   ;;  %s666_s10 = sphi %s689_s10, %s765_s10   ;;  %s662_s9 = sphi %s687_s9, %s764_s9  }
   0x3   : > { %p26_p1 = scmp.ge.s32.totalorder %s24_s12, 2  ;;  %p136_p2 = scmp.lt.s32.totalorder %s670_s11, 3 }
   0x5   : > { %s767_s12 = smov (%p26_p1, %s24_s12), 0  ;;  %p137_p3 = pnand %p506_p0, %p136_p2 }
   0x6   : > { %v640_v0 = vld [vmem:[%s762_s1] sm:$0xff] (!%p137_p3)   ;;  %s507_s15 = sshll.u32 (!%p137_p3), %s662_s9, 3  ;;  %v641_v1 = vld [vmem:[%s762_s1 + $0x8] sm:$0xff] (!%p137_p3)   ;;  %v642_v2 = vld [vmem:[%s762_s1 + $0x10] sm:$0xff] (!%p137_p3)  }
   0x7   : > { %140 = sbr.rel (%p137_p3) target bundleno = 257 (0x101), region = 28  ;;  %p166_p4 = scmp.lt.s32.totalorder (!%p137_p3), %s507_s15, 15  ;;  %576 = vmatprep.subr.bf16.mxu0 (!%p137_p3), %v640_v0  ;;  %600 = vmatprep.subr.bf16.mxu1 (!%p137_p3), %v640_v0  ;;  %v643_v3 = vld [vmem:[%s762_s1 + $0x18] sm:$0xff] (!%p137_p3)   ;;  %v644_v14 = vld [vmem:[%s762_s1 + $0x20] sm:$0xff] (!%p137_p3)   ;;  %v645_v19 = vld [vmem:[%s762_s1 + $0x28] sm:$0xff] (!%p137_p3)  }
   0x8   : > { %577 = vmatpush3.bf16.msra.mxu0 (!%p137_p3), %v640_v0  ;;  %608 = vmatpush3.bf16.msra.mxu1 (!%p137_p3), %v640_v0  ;;  %v646_v20 = vld [vmem:[%s762_s1 + $0x30] sm:$0xff] (!%p137_p3)   ;;  %v647_v29 = vld [vmem:[%s762_s1 + $0x38] sm:$0xff] (!%p137_p3)  }
   0x9   : > { %578 = vmatprep.subr.bf16.mxu0 (!%p137_p3), %v641_v1  ;;  %601 = vmatprep.subr.bf16.mxu1 (!%p137_p3), %v641_v1 }
   0xc   : > { %579 = vmatpush3.bf16.msra.mxu0 (!%p137_p3), %v641_v1  ;;  %609 = vmatpush3.bf16.msra.mxu1 (!%p137_p3), %v641_v1 }
   0xd   : > { %580 = vmatprep.subr.bf16.mxu0 (!%p137_p3), %v642_v2  ;;  %602 = vmatprep.subr.bf16.mxu1 (!%p137_p3), %v642_v2 }
   0xe   : > { %s769_s15 = smov (!%p166_p4, %s507_s15), 15 }
   0xf   : > { %s508_s20 = sshll.u32 %s769_s15, 2 }
  0x10   : > { %s722_s23 = scalar_lea.vmem %s761_s0, %s508_s20  ;;  %581 = vmatpush3.bf16.msra.mxu0 %v642_v2  ;;  %610 = vmatpush3.bf16.msra.mxu1 %v642_v2  ;;  %s182_s8 = scalar_lea.vmem %s763_s2, %s508_s20 }
  0x11   : > { %v186_v4 = vld [vmem:[%s722_s23] sm:$0xf]  ;;  %v187_v5 = vld [vmem:[%s722_s23 + $0x4] sm:$0xf]  ;;  %v190_v6 = vld [vmem:[%s722_s23 + $0x10] sm:$0xf]  ;;  %582 = vmatprep.subr.bf16.mxu0 %v643_v3  ;;  %603 = vmatprep.subr.bf16.mxu1 %v643_v3 }
  0x12   : > { %vm194_vm0 = vcmp.ge.bf16.partialorder %v186_v4, 0  ;;  %vm195_vm1 = vcmp.ge.bf16.partialorder %v187_v5, 0  ;;  %v202_v7 = vmul.bf16 1045249613, %v186_v4  ;;  %v203_v8 = vmul.bf16 1045249613, %v187_v5 }
  0x13   : > { %v191_v9 = vld [vmem:[%s722_s23 + $0x14] sm:$0xf]  ;;  %vm198_vm2 = vcmp.ge.bf16.partialorder %v190_v6, 0  ;;  %v206_v10 = vmul.bf16 1045249613, %v190_v6 }
  0x14   : > { %v210_v11 = vsel %vm194_vm0, %v186_v4, %v202_v7  ;;  %v211_v12 = vsel %vm195_vm1, %v187_v5, %v203_v8  ;;  %vm199_vm3 = vcmp.ge.bf16.partialorder %v191_v9, 0  ;;  %v207_v13 = vmul.bf16 1045249613, %v191_v9  ;;  %583 = vmatpush3.bf16.msra.mxu0 %v643_v3  ;;  %611 = vmatpush3.bf16.msra.mxu1 %v643_v3  ;;  %v188_v21 = vld [vmem:[%s722_s23 + $0x8] sm:$0xf] }
  0x15   : > { %v511_v15 = vcombine.low %v210_v11, %v211_v12  ;;  %v214_v16 = vsel %vm198_vm2, %v190_v6, %v206_v10  ;;  %584 = vmatprep.subr.bf16.mxu0 %v644_v14  ;;  %604 = vmatprep.subr.bf16.mxu1 %v644_v14  ;;  %v189_v22 = vld [vmem:[%s722_s23 + $0xc] sm:$0xf]  ;;  %v192_v23 = vld [vmem:[%s722_s23 + $0x18] sm:$0xf]  ;;  %v193_v24 = vld [vmem:[%s722_s23 + $0x1c] sm:$0xf] }
  0x16   : > { %v215_v17 = vsel %vm199_vm3, %v191_v9, %v207_v13  ;;  %vm196_vm4 = vcmp.ge.bf16.partialorder %v188_v21, 0  ;;  %v204_v25 = vmul.bf16 1045249613, %v188_v21  ;;  %v205_v26 = vmul.bf16 1045249613, %v189_v22 }
  0x17   : > { %592 = vmatprep.mubr.bf16.mxu0 %v511_v15  ;;  %v513_v18 = vcombine.low %v214_v16, %v215_v17  ;;  %v208_v27 = vmul.bf16 1045249613, %v192_v23  ;;  %v209_v28 = vmul.bf16 1045249613, %v193_v24  ;;  %vm197_vm5 = vcmp.ge.bf16.partialorder %v189_v22, 0 }
  0x18   : > { %585 = vmatpush3.bf16.msra.mxu0 %v644_v14  ;;  %612 = vmatpush3.bf16.msra.mxu1 %v644_v14  ;;  %vm200_vm6 = vcmp.ge.bf16.partialorder %v192_v23, 0  ;;  %vm201_vm7 = vcmp.ge.bf16.partialorder %v193_v24, 0  ;;  %v212_v30 = vsel %vm196_vm4, %v188_v21, %v204_v25  ;;  %v213_v31 = vsel %vm197_vm5, %v189_v22, %v205_v26 }
  0x19   : > { %596 = vmatprep.mubr.bf16.mxu1 %v513_v18  ;;  %586 = vmatprep.subr.bf16.mxu0 %v645_v19  ;;  %v216_v32 = vsel %vm200_vm6, %v192_v23, %v208_v27  ;;  %v217_v33 = vsel %vm201_vm7, %v193_v24, %v209_v28  ;;  %v512_v34 = vcombine.low %v212_v30, %v213_v31 }
  0x1a   : > { %605 = vmatprep.subr.bf16.mxu1 %v645_v19  ;;  %v514_v35 = vcombine.low %v216_v32, %v217_v33 }
  0x1c   : > { %587 = vmatpush3.bf16.msra.mxu0 %v645_v19  ;;  %613 = vmatpush3.bf16.msra.mxu1 %v645_v19 }
  0x1d   : > { %588 = vmatprep.subr.bf16.mxu0 %v646_v20  ;;  %606 = vmatprep.subr.bf16.mxu1 %v646_v20 }
  0x20   : > { %589 = vmatpush3.bf16.msra.mxu0 %v646_v20  ;;  %614 = vmatpush3.bf16.msra.mxu1 %v646_v20 }
  0x21   : > { %590 = vmatprep.subr.bf16.mxu0 %v647_v29  ;;  %607 = vmatprep.subr.bf16.mxu1 %v647_v29 }
  0x24   : > { %591 = vmatpush3.bf16.msra.mxu0 %v647_v29  ;;  %615 = vmatpush3.bf16.msra.mxu1 %v647_v29 }
  0x27   : > { %593 = vmatmul.mubr.bf16.vlgmr.msra.gmra.mrb[0].mxu0 %v512_v34  ;;  %597 = vmatmul.mubr.bf16.vlgmr.msra.gmra.mrb[0].mxu1 %v514_v35 }
  0xfa   : > { %v594_v36 = vpop.f32.mrb[0].mxu0  ;;  %v598_v37 = vpop.f32.mrb[0].mxu1 }
  0xfb   : > { %v340_v38 = vpop.f32.mrb[1].mxu0  ;;  %v356_v39 = vpop.f32.mrb[1].mxu1 }
  0xfc   : > { %v595_v40 = vpop.f32.mrb[2].mxu0  ;;  %v599_v41 = vpop.f32.mrb[2].mxu1 }
  0xfd   : > { %v549_v42 = vpack.c.bf16 %v595_v40, %v594_v36  ;;  %v559_v43 = vpack.c.bf16 %v599_v41, %v598_v37  ;;  %v343_v44 = vpop.f32.mrb[3].mxu0  ;;  %v359_v45 = vpop.f32.mrb[3].mxu1 }
  0xfe   : > { %v544_v46 = vpack.c.bf16 %v343_v44, %v340_v38  ;;  %v554_v47 = vpack.c.bf16 %v359_v45, %v356_v39 }
  0xff   : > { %561 = vst [vmem:[%s182_s8 + $0x8] sm:$0xff] %v549_v42   ;;  %563 = vst [vmem:[%s182_s8 + $0x18] sm:$0xff] %v559_v43  }
 0x100   : > { %545 = vst [vmem:[%s182_s8] sm:$0xff] %v544_v46   ;;  %562 = vst [vmem:[%s182_s8 + $0x10] sm:$0xff] %v554_v47  }
 0x101 PF: > { %s12_s11 = sadd.s32 1, %s670_s11   ;;  %s764_s9 = smov %s666_s10 }
 0x102   : > { %p9_p5 = scmp.ge.s32.totalorder %s12_s11, 4   ;;  %s765_s10 = smov %s767_s12 }
 0x104   :  { %11 = sbr.rel (!%p9_p5) target bundleno = 2 (0x2), region = 61 }

// kernel: _lambda_.21
= control target key start
LH: loop header
LB: loop body
LE: loop exit
PB: predicated region body
PF: predicated region fallthrough
CT: control target
= control target key end

     0   :  { %v14_v0 = vlaneseq  ;;  %vm26_vm0 = vcmask 1043456   ;;  %v114_v4 = vmov 0.0   ;;  %v115_v15 = vmov 1966171168   ;;  %s168_s0 = inlined_call_operand.vmem [shape: bf16[4,256], index: 0, kind: input, shape index: {}]   ;;  %s169_s1 = inlined_call_operand.vmem [shape: f32[1,256], index: 1, kind: output, shape index: {0}]   ;;  %s170_s2 = inlined_call_operand.vmem [shape: f32[1,256], index: 2, kind: output, shape index: {1}]  }
   0x1   :  { %v20_v1 = vld [vmem:[%s168_s0] sm:$0xf]  ;;  %v45_v16 = vunpack.c.l.s4 %v115_v15 }
   0x2   :  { %vm134_vm1 = vcmp.lt.s32.totalorder %v14_v0, 256  ;;  %v21_v3 = vunpack.c.l.bf16 %v20_v1  ;;  %v48_v27 = vshrl.u32 %v14_v0, 7 }
   0x3   :  { %18 = vst.msk [vmem:[%s169_s1] sm:$0x3] %vm134_vm1, %v114_v4  ;;  %19 = vst.msk [vmem:[%s170_s2] sm:$0x3] %vm134_vm1, %v114_v4  ;;  %v46_v26 = vunpack.c.0.s8 %v45_v16 }
   0x4   :  { %v24_v5 = vcombine.high %v21_v3, %v21_v3  ;;  %v27_v6 = vsel %vm26_vm0, %v21_v3, 0.0  ;;  %v66_v7 = vmul.f32 %v21_v3, %v21_v3 }
   0x5   :  { %v28_v8 = vrot.slane %v27_v6, 4  ;;  %v49_v37 = vsub.s32 %v46_v26, %v48_v27 }
   0x6   :  { %v34_v9 = vsel %vm26_vm0, %v24_v5, 0.0  ;;  %v68_v10 = vcombine.high %v66_v7, %v66_v7  ;;  %v70_v11 = vsel %vm26_vm0, %v66_v7, 0.0 }
   0x7   :  { %v29_v12 = vadd.f32 %v28_v8, %v27_v6  ;;  %v35_v13 = vrot.slane %v34_v9, 4  ;;  %v71_v14 = vrot.slane %v70_v11, 4 }
   0x8   :  { %v77_v17 = vsel %vm26_vm0, %v68_v10, 0.0 }
   0x9   :  { %v30_v18 = vrot.slane %v29_v12, 2  ;;  %v36_v19 = vadd.f32 %v35_v13, %v34_v9  ;;  %v72_v20 = vadd.f32 %v71_v14, %v70_v11  ;;  %v78_v21 = vrot.slane %v77_v17, 4 }
   0xa   :  { %v22_v44 = vld [vmem:[%s169_s1] sm:$0x3] }
   0xb   :  { %v31_v22 = vadd.f32 %v30_v18, %v29_v12  ;;  %v37_v23 = vrot.slane %v36_v19, 2  ;;  %v73_v24 = vrot.slane %v72_v20, 2  ;;  %v79_v25 = vadd.f32 %v78_v21, %v77_v17  ;;  %v65_v47 = vld [vmem:[%s170_s2] sm:$0x3] }
   0xd   :  { %v32_v28 = vrot.slane %v31_v22, 1  ;;  %v38_v29 = vadd.f32 %v37_v23, %v36_v19  ;;  %v74_v30 = vadd.f32 %v73_v24, %v72_v20  ;;  %v80_v31 = vrot.slane %v79_v25, 2 }
   0xf   :  { %v33_v32 = vadd.f32 %v32_v28, %v31_v22  ;;  %v39_v33 = vrot.slane %v38_v29, 1  ;;  %v75_v34 = vrot.slane %v74_v30, 1  ;;  %v81_v35 = vadd.f32 %v80_v31, %v79_v25 }
  0x11   :  { %v40_v36 = vadd.f32 %v39_v33, %v38_v29  ;;  %v76_v38 = vadd.f32 %v75_v34, %v74_v30  ;;  %v82_v39 = vrot.slane %v81_v35, 1 }
  0x13   :  { %v43_v40 = vcombine.low %v33_v32, %v40_v36  ;;  %v83_v41 = vadd.f32 %v82_v39, %v81_v35 }
  0x15   :  { %v50_v42 = vrot.slane %v43_v40, %v49_v37  ;;  %v86_v43 = vcombine.low %v76_v38, %v83_v41 }
  0x17   :  { %v57_v45 = vrot.slane %v50_v42, %v49_v37  ;;  %v93_v46 = vrot.slane %v86_v43, %v49_v37 }
  0x19   :  { %v59_v48 = vadd.f32 %v57_v45, %v22_v44  ;;  %v100_v49 = vrot.slane %v93_v46, %v49_v37 }
  0x1b   :  { %64 = vst.msk [vmem:[%s169_s1] sm:$0x3] %vm134_vm1, %v59_v48  ;;  %v102_v50 = vadd.f32 %v100_v49, %v65_v47 }
  0x1d   :  { %103 = vst.msk [vmem:[%s170_s2] sm:$0x3] %vm134_vm1, %v102_v50 }

// kernel: _lambda_.22
= control target key start
LH: loop header
LB: loop body
LE: loop exit
PB: predicated region body
PF: predicated region fallthrough
CT: control target
= control target key end

     0   :  { %s586_s9 = smov 0   ;;  %s588_s10 = smov 0   ;;  %s671_s0 = inlined_call_operand.vmem [shape: bf16[32,128], index: 0, kind: input, shape index: {}]   ;;  %s672_s1 = inlined_call_operand.vmem [shape: bf16[128,256], index: 1, kind: input, shape index: {}]   ;;  %s673_s2 = inlined_call_operand.vmem [shape: bf16[32,256], index: 2, kind: output, shape index: {}]  }
   0x1   :  { %s590_s11 = smov 0  }
   0x2 LB: > { %s24_s12 = sadd.s32 1, %s564_s10  ;;  %p467_p0 = scmp.ge.s32.totalorder %s568_s11, 1  ;;  %s568_s11 = sphi %s590_s11, %s12_s11   ;;  %s564_s10 = sphi %s588_s10, %s675_s10   ;;  %s560_s9 = sphi %s586_s9, %s674_s9  }
   0x3   : > { %p26_p1 = scmp.ge.s32.totalorder %s24_s12, 2  ;;  %p138_p2 = scmp.lt.s32.totalorder %s568_s11, 3 }
   0x5   : > { %s677_s12 = smov (%p26_p1, %s24_s12), 0  ;;  %p139_p3 = pnand %p467_p0, %p138_p2 }
   0x6   : > { %v522_v0 = vld [vmem:[%s672_s1 + $0x4] ss:$8 sps:$4 sm:$0xff] (!%p139_p3)   ;;  %v524_v1 = vld [vmem:[%s672_s1] ss:$8 sps:$4 sm:$0xff] (!%p139_p3)   ;;  %v570_v2 = vmov (!%p139_p3), 0   ;;  %s468_s21 = sshll.u32 (!%p139_p3), %s560_s9, 1 }
   0x7   : > { %142 = sbr.rel (%p139_p3) target bundleno = 257 (0x101), region = 28  ;;  %338 = vmatprep.mubr.bf16.mxu0 (!%p139_p3), %v570_v2  ;;  %306 = vmatprep.subr.bf16.mxu0 (!%p139_p3), %v522_v0  ;;  %v525_v3 = vld [vmem:[%s672_s1 + $0x14] ss:$8 sps:$4 sm:$0xff] (!%p139_p3)   ;;  %v527_v4 = vld [vmem:[%s672_s1 + $0x10] ss:$8 sps:$4 sm:$0xff] (!%p139_p3)   ;;  %p171_p4 = scmp.lt.s32.totalorder (!%p139_p3), %s468_s21, 3 }
   0x8   : > { %307 = vmatpush1.bf16.msra.mxu0 (!%p139_p3), %v524_v1  ;;  %v528_v5 = vld [vmem:[%s672_s1 + $0x24] ss:$8 sps:$4 sm:$0xff] (!%p139_p3)   ;;  %v530_v6 = vld [vmem:[%s672_s1 + $0x20] ss:$8 sps:$4 sm:$0xff] (!%p139_p3)   ;;  %v531_v7 = vld [vmem:[%s672_s1 + $0x34] ss:$8 sps:$4 sm:$0xff] (!%p139_p3)  }
   0x9   : > { %308 = vmatprep.subr.bf16.mxu0 (!%p139_p3), %v525_v3  ;;  %v533_v8 = vld [vmem:[%s672_s1 + $0x30] ss:$8 sps:$4 sm:$0xff] (!%p139_p3)   ;;  %v534_v9 = vld [vmem:[%s672_s1 + $0x44] ss:$8 sps:$4 sm:$0xff] (!%p139_p3)   ;;  %v536_v10 = vld [vmem:[%s672_s1 + $0x40] ss:$8 sps:$4 sm:$0xff] (!%p139_p3)  }
   0xa   : > { %v537_v11 = vld [vmem:[%s672_s1 + $0x54] ss:$8 sps:$4 sm:$0xff] (!%p139_p3)   ;;  %v539_v12 = vld [vmem:[%s672_s1 + $0x50] ss:$8 sps:$4 sm:$0xff] (!%p139_p3)   ;;  %v540_v13 = vld [vmem:[%s672_s1 + $0x64] ss:$8 sps:$4 sm:$0xff] (!%p139_p3)  }
   0xb   : > { %v542_v16 = vld [vmem:[%s672_s1 + $0x60] ss:$8 sps:$4 sm:$0xff] (!%p139_p3)   ;;  %v543_v19 = vld [vmem:[%s672_s1 + $0x74] ss:$8 sps:$4 sm:$0xff] (!%p139_p3)   ;;  %v545_v20 = vld [vmem:[%s672_s1 + $0x70] ss:$8 sps:$4 sm:$0xff] (!%p139_p3)  }
   0xc   : > { %309 = vmatpush1.bf16.msra.mxu0 (!%p139_p3), %v527_v4 }
   0xd   : > { %310 = vmatprep.subr.bf16.mxu0 (!%p139_p3), %v528_v5 }
   0xe   : > { %s679_s21 = smov (!%p171_p4, %s468_s21), 3 }
   0xf   : > { %s469_s4 = sshll.u32 %s679_s21, 2  ;;  %s494_s26 = sshll.u32 %s679_s21, 3 }
  0x10   : > { %311 = vmatpush1.bf16.msra.mxu0 %v530_v6  ;;  %s174_s14 = scalar_lea.vmem %s671_s0, %s469_s4  ;;  %s191_s29 = scalar_lea.vmem %s673_s2, %s494_s26 }
  0x11   : > { %312 = vmatprep.subr.bf16.mxu0 %v531_v7  ;;  %v196_v14 = vld [vmem:[%s174_s14] sm:$0xf]  ;;  %v197_v15 = vld [vmem:[%s174_s14 + $0x4] sm:$0xf] }
  0x12   : > { %v200_v17 = vmul.bf16 1045249613, %v196_v14  ;;  %v201_v18 = vmul.bf16 1045249613, %v197_v15  ;;  %vm198_vm0 = vcmp.ge.bf16.partialorder %v196_v14, 0  ;;  %vm199_vm1 = vcmp.ge.bf16.partialorder %v197_v15, 0 }
  0x14   : > { %313 = vmatpush1.bf16.msra.mxu0 %v533_v8  ;;  %v202_v21 = vsel %vm198_vm0, %v196_v14, %v200_v17  ;;  %v203_v22 = vsel %vm199_vm1, %v197_v15, %v201_v18 }
  0x15   : > { %314 = vmatprep.subr.bf16.mxu0 %v534_v9  ;;  %v473_v23 = vcombine.low %v202_v21, %v203_v22 }
  0x18   : > { %315 = vmatpush1.bf16.msra.mxu0 %v536_v10 }
  0x19   : > { %316 = vmatprep.subr.bf16.mxu0 %v537_v11 }
  0x1c   : > { %317 = vmatpush1.bf16.msra.mxu0 %v539_v12 }
  0x1d   : > { %318 = vmatprep.subr.bf16.mxu0 %v540_v13 }
  0x20   : > { %319 = vmatpush1.bf16.msra.mxu0 %v542_v16 }
  0x21   : > { %320 = vmatprep.subr.bf16.mxu0 %v543_v19 }
  0x24   : > { %321 = vmatpush1.bf16.msra.mxu0 %v545_v20 }
  0x27   : > { %339 = vmatmul.mubr.bf16.vlgmr.msra.gmra.mrb[0].mxu0 %v473_v23 }
  0xfa   : > { %v340_v24 = vpop.f32.mrb[0].mxu0 }
  0xfb   : > { %v342_v25 = vpop.f32.mrb[1].mxu0 }
  0xfc   : > { %v495_v26 = vpack.c.bf16 %v342_v25, %v340_v24  ;;  %v344_v27 = vpop.f32.mrb[2].mxu0 }
  0xfd   : > { %v346_v28 = vpop.f32.mrb[3].mxu0 }
  0xfe   : > { %361 = vst [vmem:[%s191_s29] sm:$0xff] %v495_v26  ;;  %v496_v29 = vpack.c.bf16 %v346_v28, %v344_v27 }
 0x100   : > { %362 = vst [vmem:[%s191_s29 + $0x8] sm:$0xff] %v496_v29 }
 0x101 PF: > { %s12_s11 = sadd.s32 1, %s568_s11   ;;  %s674_s9 = smov %s564_s10 }
 0x102   : > { %p9_p5 = scmp.ge.s32.totalorder %s12_s11, 4   ;;  %s675_s10 = smov %s677_s12 }
 0x104   :  { %11 = sbr.rel (!%p9_p5) target bundleno = 2 (0x2), region = 61 }

// kernel: _lambda_.23
= control target key start
LH: loop header
LB: loop body
LE: loop exit
PB: predicated region body
PF: predicated region fallthrough
CT: control target
= control target key end

     0   :  { %v49_v0 = vmov 0.0   ;;  %vm19_vm0 = vcmask 1041408   ;;  %s86_s1 = inlined_call_operand.vmem [shape: f32[1,128], index: 1, kind: output, shape index: {0}]   ;;  %s87_s2 = inlined_call_operand.vmem [shape: f32[1,128], index: 2, kind: output, shape index: {1}]   ;;  %s88_s0 = inlined_call_operand.vmem [shape: bf16[2,128], index: 0, kind: input, shape index: {}]  }
   0x1   :  { %14 = vst [vmem:[%s86_s1] sm:$0x1] %v49_v0  ;;  %15 = vst [vmem:[%s87_s2] sm:$0x1] %v49_v0  ;;  %v16_v1 = vld [vmem:[%s88_s0] sm:$0x1] }
   0x2   :  { %v17_v2 = vunpack.c.l.bf16 %v16_v1 }
   0x4   :  { %v20_v3 = vsel %vm19_vm0, %v17_v2, 0.0  ;;  %v30_v4 = vmul.f32 %v17_v2, %v17_v2 }
   0x5   :  { %v21_v5 = vrot.slane %v20_v3, 4 }
   0x6   :  { %v31_v6 = vsel %vm19_vm0, %v30_v4, 0.0 }
   0x7   :  { %v22_v7 = vadd.f32 %v21_v5, %v20_v3  ;;  %v32_v8 = vrot.slane %v31_v6, 4 }
   0x8   :  { %v18_v15 = vld [vmem:[%s86_s1] sm:$0x1] }
   0x9   :  { %v23_v9 = vrot.slane %v22_v7, 2  ;;  %v33_v10 = vadd.f32 %v32_v8, %v31_v6  ;;  %v29_v18 = vld [vmem:[%s87_s2] sm:$0x1] }
   0xb   :  { %v24_v11 = vadd.f32 %v23_v9, %v22_v7  ;;  %v34_v12 = vrot.slane %v33_v10, 2 }
   0xd   :  { %v25_v13 = vrot.slane %v24_v11, 1  ;;  %v35_v14 = vadd.f32 %v34_v12, %v33_v10 }
   0xf   :  { %v26_v16 = vadd.f32 %v25_v13, %v24_v11  ;;  %v36_v17 = vrot.slane %v35_v14, 1 }
  0x11   :  { %v27_v19 = vadd.f32 %v26_v16, %v18_v15  ;;  %v37_v20 = vadd.f32 %v36_v17, %v35_v14 }
  0x13   :  { %28 = vst [vmem:[%s86_s1] sm:$0x1] %v27_v19  ;;  %v38_v21 = vadd.f32 %v37_v20, %v29_v18 }
  0x15   :  { %39 = vst [vmem:[%s87_s2] sm:$0x1] %v38_v21 }

// kernel: _lambda_.24
= control target key start
LH: loop header
LB: loop body
LE: loop exit
PB: predicated region body
PF: predicated region fallthrough
CT: control target
= control target key end

     0   :  { %s471_s1 = inlined_call_operand.vmem [shape: bf16[256,256], index: 1, kind: input, shape index: {}]   ;;  %s472_s0 = inlined_call_operand.vmem [shape: bf16[8,256], index: 0, kind: input, shape index: {}]   ;;  %s473_s2 = inlined_call_operand.vmem [shape: bf16[8,256], index: 2, kind: output, shape index: {}]  }
   0x1   :  { %v306_v0 = vld [vmem:[%s471_s1 + $0x4] ss:$8 sps:$4 sm:$0xff]   ;;  %v308_v1 = vld [vmem:[%s471_s1] ss:$8 sps:$4 sm:$0xff]   ;;  %v309_v2 = vld [vmem:[%s471_s1 + $0x14] ss:$8 sps:$4 sm:$0xff]  }
   0x2   :  { %216 = vmatprep.subr.bf16.mxu0 %v306_v0  ;;  %v311_v3 = vld [vmem:[%s471_s1 + $0x10] ss:$8 sps:$4 sm:$0xff]   ;;  %v312_v4 = vld [vmem:[%s471_s1 + $0x24] ss:$8 sps:$4 sm:$0xff]   ;;  %v314_v5 = vld [vmem:[%s471_s1 + $0x20] ss:$8 sps:$4 sm:$0xff]  }
   0x3   :  { %217 = vmatpush1.bf16.msra.mxu0 %v308_v1  ;;  %v315_v6 = vld [vmem:[%s471_s1 + $0x34] ss:$8 sps:$4 sm:$0xff]   ;;  %v317_v7 = vld [vmem:[%s471_s1 + $0x30] ss:$8 sps:$4 sm:$0xff]   ;;  %v318_v8 = vld [vmem:[%s471_s1 + $0x44] ss:$8 sps:$4 sm:$0xff]  }
   0x4   :  { %218 = vmatprep.subr.bf16.mxu0 %v309_v2  ;;  %v320_v9 = vld [vmem:[%s471_s1 + $0x40] ss:$8 sps:$4 sm:$0xff]   ;;  %v321_v10 = vld [vmem:[%s471_s1 + $0x54] ss:$8 sps:$4 sm:$0xff]   ;;  %v323_v11 = vld [vmem:[%s471_s1 + $0x50] ss:$8 sps:$4 sm:$0xff]  }
   0x5   :  { %v324_v12 = vld [vmem:[%s471_s1 + $0x64] ss:$8 sps:$4 sm:$0xff]   ;;  %v326_v15 = vld [vmem:[%s471_s1 + $0x60] ss:$8 sps:$4 sm:$0xff]   ;;  %v327_v16 = vld [vmem:[%s471_s1 + $0x74] ss:$8 sps:$4 sm:$0xff]  }
   0x6   :  { %v13_v13 = vld [vmem:[%s472_s0] sm:$0xff]  ;;  %v329_v19 = vld [vmem:[%s471_s1 + $0x70] ss:$8 sps:$4 sm:$0xff]   ;;  %v333_v22 = vld [vmem:[%s471_s1 + $0x94] ss:$8 sps:$4 sm:$0xff]  }
   0x7   :  { %219 = vmatpush1.bf16.msra.mxu0 %v311_v3  ;;  %vm14_vm0 = vcmp.ge.bf16.partialorder %v13_v13, 0  ;;  %v15_v14 = vmul.bf16 1045249613, %v13_v13  ;;  %v330_v20 = vld [vmem:[%s471_s1 + $0x84] ss:$8 sps:$4 sm:$0xff]  }
   0x8   :  { %220 = vmatprep.subr.bf16.mxu0 %v312_v4  ;;  %v332_v21 = vld [vmem:[%s471_s1 + $0x80] ss:$8 sps:$4 sm:$0xff]   ;;  %v335_v23 = vld [vmem:[%s471_s1 + $0x90] ss:$8 sps:$4 sm:$0xff]   ;;  %v336_v24 = vld [vmem:[%s471_s1 + $0xa4] ss:$8 sps:$4 sm:$0xff]  }
   0x9   :  { %v16_v17 = vsel %vm14_vm0, %v13_v13, %v15_v14  ;;  %v338_v25 = vld [vmem:[%s471_s1 + $0xa0] ss:$8 sps:$4 sm:$0xff]   ;;  %v339_v26 = vld [vmem:[%s471_s1 + $0xb4] ss:$8 sps:$4 sm:$0xff]   ;;  %v341_v27 = vld [vmem:[%s471_s1 + $0xb0] ss:$8 sps:$4 sm:$0xff]  }
   0xa   :  { %v271_v18 = vcombine.high %v16_v17, %v16_v17  ;;  %v342_v28 = vld [vmem:[%s471_s1 + $0xc4] ss:$8 sps:$4 sm:$0xff]   ;;  %v344_v29 = vld [vmem:[%s471_s1 + $0xc0] ss:$8 sps:$4 sm:$0xff]   ;;  %v345_v30 = vld [vmem:[%s471_s1 + $0xd4] ss:$8 sps:$4 sm:$0xff]   ;;  %v270_v36 = vcombine.low %v16_v17, %v16_v17 }
   0xb   :  { %221 = vmatpush1.bf16.msra.mxu0 %v314_v5  ;;  %v347_v31 = vld [vmem:[%s471_s1 + $0xd0] ss:$8 sps:$4 sm:$0xff]   ;;  %v348_v32 = vld [vmem:[%s471_s1 + $0xe4] ss:$8 sps:$4 sm:$0xff]   ;;  %v350_v33 = vld [vmem:[%s471_s1 + $0xe0] ss:$8 sps:$4 sm:$0xff]  }
   0xc   :  { %222 = vmatprep.subr.bf16.mxu0 %v315_v6  ;;  %248 = vmatprep.mubr.bf16.mxu0 %v271_v18  ;;  %v351_v34 = vld [vmem:[%s471_s1 + $0xf4] ss:$8 sps:$4 sm:$0xff]   ;;  %v353_v35 = vld [vmem:[%s471_s1 + $0xf0] ss:$8 sps:$4 sm:$0xff]  }
   0xf   :  { %223 = vmatpush1.bf16.msra.mxu0 %v317_v7 }
  0x10   :  { %224 = vmatprep.subr.bf16.mxu0 %v318_v8 }
  0x13   :  { %225 = vmatpush1.bf16.msra.mxu0 %v320_v9 }
  0x14   :  { %226 = vmatprep.subr.bf16.mxu0 %v321_v10 }
  0x17   :  { %227 = vmatpush1.bf16.msra.mxu0 %v323_v11 }
  0x18   :  { %228 = vmatprep.subr.bf16.mxu0 %v324_v12 }
  0x1b   :  { %229 = vmatpush1.bf16.msra.mxu0 %v326_v15 }
  0x1c   :  { %230 = vmatprep.subr.bf16.mxu0 %v327_v16 }
  0x1f   :  { %231 = vmatpush1.bf16.msra.mxu0 %v329_v19 }
  0x20   :  { %232 = vmatprep.subr.bf16.mxu0 %v330_v20 }
  0x23   :  { %233 = vmatpush1.bf16.msra.mxu0 %v332_v21 }
  0x24   :  { %234 = vmatprep.subr.bf16.mxu0 %v333_v22 }
  0x27   :  { %235 = vmatpush1.bf16.msra.mxu0 %v335_v23 }
  0x28   :  { %236 = vmatprep.subr.bf16.mxu0 %v336_v24 }
  0x2b   :  { %237 = vmatpush1.bf16.msra.mxu0 %v338_v25 }
  0x2c   :  { %238 = vmatprep.subr.bf16.mxu0 %v339_v26 }
  0x2f   :  { %239 = vmatpush1.bf16.msra.mxu0 %v341_v27 }
  0x30   :  { %240 = vmatprep.subr.bf16.mxu0 %v342_v28 }
  0x33   :  { %241 = vmatpush1.bf16.msra.mxu0 %v344_v29 }
  0x34   :  { %242 = vmatprep.subr.bf16.mxu0 %v345_v30 }
  0x37   :  { %243 = vmatpush1.bf16.msra.mxu0 %v347_v31 }
  0x38   :  { %244 = vmatprep.subr.bf16.mxu0 %v348_v32 }
  0x3b   :  { %245 = vmatpush1.bf16.msra.mxu0 %v350_v33 }
  0x3c   :  { %246 = vmatprep.subr.bf16.mxu0 %v351_v34 }
  0x3f   :  { %247 = vmatpush1.bf16.msra.mxu0 %v353_v35 }
  0x42   :  { %249 = vmatmul.mubr.bf16.vlgmr.msra.gmra.mrb[0].mxu0 %v270_v36 }
 0x115   :  { %v250_v37 = vpop.f32.mrb[0].mxu0 }
 0x116   :  { %v252_v38 = vpop.f32.mrb[1].mxu0 }
 0x117   :  { %v305_v39 = vpack.c.bf16 %v252_v38, %v250_v37  ;;  %v254_v40 = vpop.f32.mrb[2].mxu0 }
 0x118   :  { %v255_v41 = vpop.f32.mrb[3].mxu0 }
 0x119   :  { %265 = vst [vmem:[%s473_s2] sm:$0xff] %v305_v39 }

// kernel: _lambda_.25
= control target key start
LH: loop header
LB: loop body
LE: loop exit
PB: predicated region body
PF: predicated region fallthrough
CT: control target
= control target key end

     0   :  { %s1408_s9 = smov 0   ;;  %s1410_s10 = smov 0   ;;  %s1752_s0 = inlined_call_operand.vmem [shape: bf16[32,128], index: 0, kind: input, shape index: {}]   ;;  %s1753_s1 = inlined_call_operand.vmem [shape: bf16[128,2048], index: 1, kind: input, shape index: {}]   ;;  %s1754_s2 = inlined_call_operand.vmem [shape: bf16[32,2048], index: 2, kind: output, shape index: {}]  }
   0x1   :  { %s1412_s11 = smov 0   ;;  %s1414_s12 = smov 0  }
   0x2   :  { %s1416_s13 = smov 0  }
   0x3 LB: > { %s21_s14 = sadd.s32 1, %s1386_s12  ;;  %s1195_s15 = sadd.s32 4294967295, %s1390_s13   ;;  %s1390_s13 = sphi %s1416_s13, %s12_s13   ;;  %s1386_s12 = sphi %s1414_s12, %s1759_s12   ;;  %s1382_s11 = sphi %s1412_s11, %s1758_s11   ;;  %s1378_s10 = sphi %s1410_s10, %s1757_s10   ;;  %s1374_s9 = sphi %s1408_s9, %s1756_s9  }
   0x4   : > { %p22_p0 = scmp.ge.s32.totalorder %s21_s14, 2  ;;  %p64_p1 = scmp.ne.s32.totalorder %s1378_s10, %s1374_s9 }
   0x5   : > { %p65_p2 = scmp.eq.s32.totalorder %s1390_s13, 0  ;;  %p96_p4 = scmp.eq.s32.totalorder %s1195_s15, 1 }
   0x6   : > { %s1761_s14 = smov (%p22_p0, %s21_s14), 0  ;;  %s57_s17 = sadd.s32 1, %s1378_s10 }
   0x7   : > { %p66_p3 = por %p65_p2, %p64_p1  ;;  %s54_s16 = ssub.s32 %s1386_s12, %s1761_s14 }
   0x8   : > { %p55_p5 = scmp.eq.s32.totalorder %s54_s16, 0  ;;  %p1443_p6 = por %p96_p4, %p64_p1 }
   0x9   : > { %p1199_p7 = scmp.ge.s32.totalorder %s1390_s13, 2 }
   0xa   : > { %s1448_s19 = scalar_select %p55_p5, %s1378_s10, %s57_s17  }
   0xb   : > { %127 = sbr.rel (%p1199_p7) target bundleno = 54 (0x36), region = 20 }
  0x12   : > { %130 = sbr.rel (!%p66_p3) target bundleno = 54 (0x36), region = 24  ;;  %s132_s20 = sand.u32 (%p66_p3), 1, %s1378_s10  }
  0x13   : > { %s1293_s21 = sshll.u32 (%p66_p3), %s1386_s12, 5  ;;  %s1200_s22 = sshll.u32 (%p66_p3), %s132_s20, 9 }
  0x14   : > { %s1456_s25 = scalar_lea.vmem (%p66_p3), %s1753_s1, %s1293_s21  ;;  %s1461_s26 = scalar_lea.vmem (%p66_p3), [#allocation2], %s1200_s22 }
  0x15   : > { %v150_v0 = vld [vmem:[%s1456_s25] sm:$0xff] (%p66_p3)  ;;  %v152_v1 = vld [vmem:[%s1456_s25 + $0x8] sm:$0xff] (%p66_p3)  ;;  %v154_v2 = vld [vmem:[%s1456_s25 + $0x10] sm:$0xff] (%p66_p3) }
  0x16   : > { %151 = vst [vmem:[%s1461_s26] sm:$0xff] (%p66_p3), %v150_v0  ;;  %153 = vst [vmem:[%s1461_s26 + $0x8] sm:$0xff] (%p66_p3), %v152_v1  ;;  %v156_v3 = vld [vmem:[%s1456_s25 + $0x18] sm:$0xff] (%p66_p3)  ;;  %v158_v4 = vld [vmem:[%s1456_s25 + $0x40] sm:$0xff] (%p66_p3) }
  0x17   : > { %155 = vst [vmem:[%s1461_s26 + $0x10] sm:$0xff] (%p66_p3), %v154_v2  ;;  %v160_v5 = vld [vmem:[%s1456_s25 + $0x48] sm:$0xff] (%p66_p3)  ;;  %157 = vst [vmem:[%s1461_s26 + $0x18] sm:$0xff] (%p66_p3), %v156_v3  ;;  %v162_v6 = vld [vmem:[%s1456_s25 + $0x50] sm:$0xff] (%p66_p3) }
  0x18   : > { %159 = vst [vmem:[%s1461_s26 + $0x20] sm:$0xff] (%p66_p3), %v158_v4  ;;  %161 = vst [vmem:[%s1461_s26 + $0x28] sm:$0xff] (%p66_p3), %v160_v5  ;;  %v164_v7 = vld [vmem:[%s1456_s25 + $0x58] sm:$0xff] (%p66_p3)  ;;  %v166_v8 = vld [vmem:[%s1456_s25 + $0x80] sm:$0xff] (%p66_p3) }
  0x19   : > { %163 = vst [vmem:[%s1461_s26 + $0x30] sm:$0xff] %v162_v6  ;;  %165 = vst [vmem:[%s1461_s26 + $0x38] sm:$0xff] %v164_v7  ;;  %v168_v9 = vld [vmem:[%s1456_s25 + $0x88] sm:$0xff]  ;;  %v170_v10 = vld [vmem:[%s1456_s25 + $0x90] sm:$0xff] }
  0x1a   : > { %167 = vst [vmem:[%s1461_s26 + $0x40] sm:$0xff] %v166_v8  ;;  %v172_v11 = vld [vmem:[%s1456_s25 + $0x98] sm:$0xff]  ;;  %169 = vst [vmem:[%s1461_s26 + $0x48] sm:$0xff] %v168_v9  ;;  %v174_v12 = vld [vmem:[%s1456_s25 + $0xc0] sm:$0xff] }
  0x1b   : > { %171 = vst [vmem:[%s1461_s26 + $0x50] sm:$0xff] %v170_v10  ;;  %173 = vst [vmem:[%s1461_s26 + $0x58] sm:$0xff] %v172_v11  ;;  %v176_v13 = vld [vmem:[%s1456_s25 + $0xc8] sm:$0xff]  ;;  %v178_v14 = vld [vmem:[%s1456_s25 + $0xd0] sm:$0xff] }
  0x1c   : > { %175 = vst [vmem:[%s1461_s26 + $0x60] sm:$0xff] %v174_v12  ;;  %177 = vst [vmem:[%s1461_s26 + $0x68] sm:$0xff] %v176_v13  ;;  %v180_v15 = vld [vmem:[%s1456_s25 + $0xd8] sm:$0xff]  ;;  %v182_v16 = vld [vmem:[%s1456_s25 + $0x100] sm:$0xff] }
  0x1d   : > { %179 = vst [vmem:[%s1461_s26 + $0x70] sm:$0xff] %v178_v14  ;;  %v184_v17 = vld [vmem:[%s1456_s25 + $0x108] sm:$0xff]  ;;  %181 = vst [vmem:[%s1461_s26 + $0x78] sm:$0xff] %v180_v15  ;;  %v186_v18 = vld [vmem:[%s1456_s25 + $0x110] sm:$0xff] }
  0x1e   : > { %183 = vst [vmem:[%s1461_s26 + $0x80] sm:$0xff] %v182_v16  ;;  %185 = vst [vmem:[%s1461_s26 + $0x88] sm:$0xff] %v184_v17  ;;  %v188_v19 = vld [vmem:[%s1456_s25 + $0x118] sm:$0xff]  ;;  %v190_v20 = vld [vmem:[%s1456_s25 + $0x140] sm:$0xff] }
  0x1f   : > { %187 = vst [vmem:[%s1461_s26 + $0x90] sm:$0xff] %v186_v18  ;;  %189 = vst [vmem:[%s1461_s26 + $0x98] sm:$0xff] %v188_v19  ;;  %v192_v21 = vld [vmem:[%s1456_s25 + $0x148] sm:$0xff]  ;;  %v194_v22 = vld [vmem:[%s1456_s25 + $0x150] sm:$0xff] }
  0x20   : > { %191 = vst [vmem:[%s1461_s26 + $0xa0] sm:$0xff] %v190_v20  ;;  %v196_v23 = vld [vmem:[%s1456_s25 + $0x158] sm:$0xff]  ;;  %193 = vst [vmem:[%s1461_s26 + $0xa8] sm:$0xff] %v192_v21  ;;  %v198_v24 = vld [vmem:[%s1456_s25 + $0x180] sm:$0xff] }
  0x21   : > { %195 = vst [vmem:[%s1461_s26 + $0xb0] sm:$0xff] %v194_v22  ;;  %197 = vst [vmem:[%s1461_s26 + $0xb8] sm:$0xff] %v196_v23  ;;  %v200_v25 = vld [vmem:[%s1456_s25 + $0x188] sm:$0xff]  ;;  %v202_v26 = vld [vmem:[%s1456_s25 + $0x190] sm:$0xff] }
  0x22   : > { %199 = vst [vmem:[%s1461_s26 + $0xc0] sm:$0xff] %v198_v24  ;;  %201 = vst [vmem:[%s1461_s26 + $0xc8] sm:$0xff] %v200_v25  ;;  %v204_v27 = vld [vmem:[%s1456_s25 + $0x198] sm:$0xff]  ;;  %v206_v28 = vld [vmem:[%s1456_s25 + $0x1c0] sm:$0xff] }
  0x23   : > { %203 = vst [vmem:[%s1461_s26 + $0xd0] sm:$0xff] %v202_v26  ;;  %v208_v29 = vld [vmem:[%s1456_s25 + $0x1c8] sm:$0xff]  ;;  %205 = vst [vmem:[%s1461_s26 + $0xd8] sm:$0xff] %v204_v27  ;;  %v210_v30 = vld [vmem:[%s1456_s25 + $0x1d0] sm:$0xff] }
  0x24   : > { %207 = vst [vmem:[%s1461_s26 + $0xe0] sm:$0xff] %v206_v28  ;;  %209 = vst [vmem:[%s1461_s26 + $0xe8] sm:$0xff] %v208_v29  ;;  %v212_v31 = vld [vmem:[%s1456_s25 + $0x1d8] sm:$0xff]  ;;  %v214_v32 = vld [vmem:[%s1456_s25 + $0x200] sm:$0xff] }
  0x25   : > { %211 = vst [vmem:[%s1461_s26 + $0xf0] sm:$0xff] %v210_v30  ;;  %213 = vst [vmem:[%s1461_s26 + $0xf8] sm:$0xff] %v212_v31  ;;  %v216_v33 = vld [vmem:[%s1456_s25 + $0x208] sm:$0xff]  ;;  %v218_v34 = vld [vmem:[%s1456_s25 + $0x210] sm:$0xff] }
  0x26   : > { %215 = vst [vmem:[%s1461_s26 + $0x100] sm:$0xff] %v214_v32  ;;  %v220_v35 = vld [vmem:[%s1456_s25 + $0x218] sm:$0xff]  ;;  %217 = vst [vmem:[%s1461_s26 + $0x108] sm:$0xff] %v216_v33  ;;  %v222_v36 = vld [vmem:[%s1456_s25 + $0x240] sm:$0xff] }
  0x27   : > { %219 = vst [vmem:[%s1461_s26 + $0x110] sm:$0xff] %v218_v34  ;;  %221 = vst [vmem:[%s1461_s26 + $0x118] sm:$0xff] %v220_v35  ;;  %v224_v37 = vld [vmem:[%s1456_s25 + $0x248] sm:$0xff]  ;;  %v226_v38 = vld [vmem:[%s1456_s25 + $0x250] sm:$0xff] }
  0x28   : > { %223 = vst [vmem:[%s1461_s26 + $0x120] sm:$0xff] %v222_v36  ;;  %225 = vst [vmem:[%s1461_s26 + $0x128] sm:$0xff] %v224_v37  ;;  %v228_v39 = vld [vmem:[%s1456_s25 + $0x258] sm:$0xff]  ;;  %v230_v40 = vld [vmem:[%s1456_s25 + $0x280] sm:$0xff] }
  0x29   : > { %227 = vst [vmem:[%s1461_s26 + $0x130] sm:$0xff] %v226_v38  ;;  %v232_v41 = vld [vmem:[%s1456_s25 + $0x288] sm:$0xff]  ;;  %229 = vst [vmem:[%s1461_s26 + $0x138] sm:$0xff] %v228_v39  ;;  %v234_v42 = vld [vmem:[%s1456_s25 + $0x290] sm:$0xff] }
  0x2a   : > { %231 = vst [vmem:[%s1461_s26 + $0x140] sm:$0xff] %v230_v40  ;;  %233 = vst [vmem:[%s1461_s26 + $0x148] sm:$0xff] %v232_v41  ;;  %v236_v43 = vld [vmem:[%s1456_s25 + $0x298] sm:$0xff]  ;;  %v238_v44 = vld [vmem:[%s1456_s25 + $0x2c0] sm:$0xff] }
  0x2b   : > { %235 = vst [vmem:[%s1461_s26 + $0x150] sm:$0xff] %v234_v42  ;;  %237 = vst [vmem:[%s1461_s26 + $0x158] sm:$0xff] %v236_v43  ;;  %v240_v45 = vld [vmem:[%s1456_s25 + $0x2c8] sm:$0xff]  ;;  %v242_v46 = vld [vmem:[%s1456_s25 + $0x2d0] sm:$0xff] }
  0x2c   : > { %239 = vst [vmem:[%s1461_s26 + $0x160] sm:$0xff] %v238_v44  ;;  %v244_v47 = vld [vmem:[%s1456_s25 + $0x2d8] sm:$0xff]  ;;  %241 = vst [vmem:[%s1461_s26 + $0x168] sm:$0xff] %v240_v45  ;;  %v246_v48 = vld [vmem:[%s1456_s25 + $0x300] sm:$0xff] }
  0x2d   : > { %243 = vst [vmem:[%s1461_s26 + $0x170] sm:$0xff] %v242_v46  ;;  %245 = vst [vmem:[%s1461_s26 + $0x178] sm:$0xff] %v244_v47  ;;  %v248_v49 = vld [vmem:[%s1456_s25 + $0x308] sm:$0xff]  ;;  %v250_v50 = vld [vmem:[%s1456_s25 + $0x310] sm:$0xff] }
  0x2e   : > { %247 = vst [vmem:[%s1461_s26 + $0x180] sm:$0xff] %v246_v48  ;;  %249 = vst [vmem:[%s1461_s26 + $0x188] sm:$0xff] %v248_v49  ;;  %v252_v51 = vld [vmem:[%s1456_s25 + $0x318] sm:$0xff]  ;;  %v254_v52 = vld [vmem:[%s1456_s25 + $0x340] sm:$0xff] }
  0x2f   : > { %251 = vst [vmem:[%s1461_s26 + $0x190] sm:$0xff] %v250_v50  ;;  %v256_v53 = vld [vmem:[%s1456_s25 + $0x348] sm:$0xff]  ;;  %253 = vst [vmem:[%s1461_s26 + $0x198] sm:$0xff] %v252_v51  ;;  %v258_v54 = vld [vmem:[%s1456_s25 + $0x350] sm:$0xff] }
  0x30   : > { %255 = vst [vmem:[%s1461_s26 + $0x1a0] sm:$0xff] %v254_v52  ;;  %257 = vst [vmem:[%s1461_s26 + $0x1a8] sm:$0xff] %v256_v53  ;;  %v260_v55 = vld [vmem:[%s1456_s25 + $0x358] sm:$0xff]  ;;  %v262_v56 = vld [vmem:[%s1456_s25 + $0x380] sm:$0xff] }
  0x31   : > { %259 = vst [vmem:[%s1461_s26 + $0x1b0] sm:$0xff] %v258_v54  ;;  %261 = vst [vmem:[%s1461_s26 + $0x1b8] sm:$0xff] %v260_v55  ;;  %v264_v57 = vld [vmem:[%s1456_s25 + $0x388] sm:$0xff]  ;;  %v266_v58 = vld [vmem:[%s1456_s25 + $0x390] sm:$0xff] }
  0x32   : > { %263 = vst [vmem:[%s1461_s26 + $0x1c0] sm:$0xff] %v262_v56  ;;  %v268_v59 = vld [vmem:[%s1456_s25 + $0x398] sm:$0xff]  ;;  %265 = vst [vmem:[%s1461_s26 + $0x1c8] sm:$0xff] %v264_v57  ;;  %v270_v60 = vld [vmem:[%s1456_s25 + $0x3c0] sm:$0xff] }
  0x33   : > { %267 = vst [vmem:[%s1461_s26 + $0x1d0] sm:$0xff] %v266_v58  ;;  %269 = vst [vmem:[%s1461_s26 + $0x1d8] sm:$0xff] %v268_v59  ;;  %v272_v61 = vld [vmem:[%s1456_s25 + $0x3c8] sm:$0xff]  ;;  %v274_v62 = vld [vmem:[%s1456_s25 + $0x3d0] sm:$0xff] }
  0x34   : > { %271 = vst [vmem:[%s1461_s26 + $0x1e0] sm:$0xff] %v270_v60  ;;  %273 = vst [vmem:[%s1461_s26 + $0x1e8] sm:$0xff] %v272_v61  ;;  %v276_v63 = vld [vmem:[%s1456_s25 + $0x3d8] sm:$0xff] }
  0x35   : > { %275 = vst [vmem:[%s1461_s26 + $0x1f0] sm:$0xff] %v274_v62  ;;  %277 = vst [vmem:[%s1461_s26 + $0x1f8] sm:$0xff] %v276_v63 }
  0x36 PF: > { %p1203_p8 = scmp.ge.s32.totalorder %s1390_s13, 1  ;;  %p282_p9 = scmp.lt.s32.totalorder %s1390_s13, 3 }
  0x38   : > { %p283_p10 = pnand %p1203_p8, %p282_p9 }
  0x39   : > { %s289_s27 = sand.u32 (!%p283_p10), 1, %s1374_s9   ;;  %v1392_v0 = vmov (!%p283_p10), 0   ;;  %v324_v60 = vld [vmem:[%s1752_s0] sm:$0xf] (!%p283_p10)  ;;  %v325_v61 = vld [vmem:[%s1752_s0 + $0x4] sm:$0xf] (!%p283_p10) }
  0x3a   : > { %286 = sbr.rel (%p283_p10) target bundleno = 362 (0x16a), region = 47  ;;  %s1204_s28 = sshll.u32 (!%p283_p10), %s289_s27, 9  ;;  %760 = vmatprep.mubr.bf16.mxu0 (!%p283_p10), %v1392_v0  ;;  %813 = vmatprep.mubr.bf16.mxu1 (!%p283_p10), %v1392_v0 }
  0x3b   : > { %s1595_s29 = scalar_lea.vmem (!%p283_p10), [#allocation2], %s1204_s28  ;;  %s1205_s16 = sshll.u32 (!%p283_p10), %s289_s27, 7 }
  0x3c   : > { %v332_v1 = vld [vmem:[%s1595_s29] sm:$0xff] (!%p283_p10)  ;;  %v333_v3 = vld [vmem:[%s1595_s29 + $0x8] sm:$0xff] (!%p283_p10)  ;;  %s1697_s17 = scalar_lea.vmem (!%p283_p10), [#allocation3], %s1205_s16 }
  0x3d   : > { %v336_v2 = vld [vmem:[%s1595_s29 + $0x20] sm:$0xff] (!%p283_p10)  ;;  %v337_v5 = vld [vmem:[%s1595_s29 + $0x28] sm:$0xff] (!%p283_p10) }
  0x3e   : > { %v1209_v4 = vcombine.high (!%p283_p10), %v332_v1, %v336_v2  ;;  %v1208_v6 = vcombine.low (!%p283_p10), %v332_v1, %v336_v2  ;;  %v340_v7 = vld [vmem:[%s1595_s29 + $0x40] sm:$0xff] (!%p283_p10)  ;;  %v1211_v9 = vcombine.high (!%p283_p10), %v333_v3, %v337_v5  ;;  %v1210_v10 = vcombine.low (!%p283_p10), %v333_v3, %v337_v5  ;;  %v341_v12 = vld [vmem:[%s1595_s29 + $0x48] sm:$0xff] (!%p283_p10)  ;;  %v334_v2 = vld [vmem:[%s1595_s29 + $0x10] sm:$0xff] (!%p283_p10) }
  0x3f   : > { %v344_v8 = vld [vmem:[%s1595_s29 + $0x60] sm:$0xff] (!%p283_p10)  ;;  %v345_v13 = vld [vmem:[%s1595_s29 + $0x68] sm:$0xff] (!%p283_p10)  ;;  %v338_v3 = vld [vmem:[%s1595_s29 + $0x30] sm:$0xff] (!%p283_p10)  ;;  %v329_v5 = vmax.bf16 (!%p283_p10), %v1392_v0, %v325_v61 }
  0x40   : > { %v1217_v11 = vcombine.high (!%p283_p10), %v340_v7, %v344_v8  ;;  %v348_v14 = vld [vmem:[%s1595_s29 + $0x80] sm:$0xff] (!%p283_p10)  ;;  %728 = vmatprep.subr.bf16.mxu0 (!%p283_p10), %v1209_v4  ;;  %v1219_v15 = vcombine.high (!%p283_p10), %v341_v12, %v345_v13  ;;  %v349_v17 = vld [vmem:[%s1595_s29 + $0x88] sm:$0xff] (!%p283_p10)  ;;  %781 = vmatprep.subr.bf16.mxu1 (!%p283_p10), %v1211_v9  ;;  %v1216_v19 = vcombine.low (!%p283_p10), %v340_v7, %v344_v8  ;;  %v339_v7 = vld [vmem:[%s1595_s29 + $0x38] sm:$0xff] (!%p283_p10) }
  0x41   : > { %v352_v16 = vld [vmem:[%s1595_s29 + $0xa0] sm:$0xff]  ;;  %v353_v18 = vld [vmem:[%s1595_s29 + $0xa8] sm:$0xff]  ;;  %729 = vmatpush1.bf16.msra.mxu0 %v1208_v6  ;;  %782 = vmatpush1.bf16.msra.mxu1 %v1210_v10  ;;  %v1218_v20 = vcombine.low %v341_v12, %v345_v13  ;;  %v328_v4 = vmax.bf16 %v1392_v0, %v324_v60  ;;  %v335_v6 = vld [vmem:[%s1595_s29 + $0x18] sm:$0xff]  ;;  %v1213_v10 = vcombine.high %v334_v2, %v338_v3  ;;  %s1310_s9 = sshll.u32 (%p1443_p6), %s1382_s11, 5 }
  0x42   : > { %730 = vmatprep.subr.bf16.mxu0 %v1217_v11  ;;  %v1225_v21 = vcombine.high %v348_v14, %v352_v16  ;;  %783 = vmatprep.subr.bf16.mxu1 %v1219_v15  ;;  %v1227_v22 = vcombine.high %v349_v17, %v353_v18  ;;  %v356_v23 = vld [vmem:[%s1595_s29 + $0xc0] sm:$0xff]  ;;  %v357_v25 = vld [vmem:[%s1595_s29 + $0xc8] sm:$0xff]  ;;  %v1224_v27 = vcombine.low %v348_v14, %v352_v16  ;;  %v342_v12 = vld [vmem:[%s1595_s29 + $0x50] sm:$0xff]  ;;  %s1064_s22 = scalar_lea.vmem (%p1443_p6), %s1754_s2, %s1310_s9 }
  0x43   : > { %v360_v24 = vld [vmem:[%s1595_s29 + $0xe0] sm:$0xff]  ;;  %v361_v26 = vld [vmem:[%s1595_s29 + $0xe8] sm:$0xff]  ;;  %v1226_v28 = vcombine.low %v349_v17, %v353_v18  ;;  %v1215_v11 = vcombine.high %v335_v6, %v339_v7  ;;  %v346_v13 = vld [vmem:[%s1595_s29 + $0x70] sm:$0xff]  ;;  %v1643_v14 = vcombine.low %v328_v4, %v329_v5  ;;  %v1212_v17 = vcombine.low %v334_v2, %v338_v3 }
  0x44   : > { %v1233_v29 = vcombine.high %v356_v23, %v360_v24  ;;  %v1235_v30 = vcombine.high %v357_v25, %v361_v26  ;;  %v364_v31 = vld [vmem:[%s1595_s29 + $0x100] sm:$0xff]  ;;  %v365_v33 = vld [vmem:[%s1595_s29 + $0x108] sm:$0xff]  ;;  %v1232_v35 = vcombine.low %v356_v23, %v360_v24  ;;  %v1234_v36 = vcombine.low %v357_v25, %v361_v26  ;;  %v343_v15 = vld [vmem:[%s1595_s29 + $0x58] sm:$0xff] }
  0x45   : > { %731 = vmatpush1.bf16.msra.mxu0 %v1216_v19  ;;  %784 = vmatpush1.bf16.msra.mxu1 %v1218_v20  ;;  %v368_v32 = vld [vmem:[%s1595_s29 + $0x120] sm:$0xff]  ;;  %v369_v34 = vld [vmem:[%s1595_s29 + $0x128] sm:$0xff]  ;;  %v347_v16 = vld [vmem:[%s1595_s29 + $0x78] sm:$0xff]  ;;  %v1214_v20 = vcombine.low %v335_v6, %v339_v7 }
  0x46   : > { %732 = vmatprep.subr.bf16.mxu0 %v1225_v21  ;;  %785 = vmatprep.subr.bf16.mxu1 %v1227_v22  ;;  %v1241_v37 = vcombine.high %v364_v31, %v368_v32  ;;  %v1243_v38 = vcombine.high %v365_v33, %v369_v34  ;;  %v372_v39 = vld [vmem:[%s1595_s29 + $0x140] sm:$0xff]  ;;  %v373_v41 = vld [vmem:[%s1595_s29 + $0x148] sm:$0xff]  ;;  %v1240_v43 = vcombine.low %v364_v31, %v368_v32  ;;  %v350_v23 = vld [vmem:[%s1595_s29 + $0x90] sm:$0xff] }
  0x47   : > { %v376_v40 = vld [vmem:[%s1595_s29 + $0x160] sm:$0xff]  ;;  %v377_v42 = vld [vmem:[%s1595_s29 + $0x168] sm:$0xff]  ;;  %v1242_v44 = vcombine.low %v365_v33, %v369_v34  ;;  %v1221_v21 = vcombine.high %v342_v12, %v346_v13  ;;  %v1223_v22 = vcombine.high %v343_v15, %v347_v16  ;;  %v354_v24 = vld [vmem:[%s1595_s29 + $0xb0] sm:$0xff] }
  0x48   : > { %v1249_v45 = vcombine.high %v372_v39, %v376_v40  ;;  %v1251_v46 = vcombine.high %v373_v41, %v377_v42  ;;  %v380_v47 = vld [vmem:[%s1595_s29 + $0x180] sm:$0xff]  ;;  %v381_v49 = vld [vmem:[%s1595_s29 + $0x188] sm:$0xff]  ;;  %v1248_v51 = vcombine.low %v372_v39, %v376_v40  ;;  %v1250_v52 = vcombine.low %v373_v41, %v377_v42  ;;  %v351_v25 = vld [vmem:[%s1595_s29 + $0x98] sm:$0xff] }
  0x49   : > { %733 = vmatpush1.bf16.msra.mxu0 %v1224_v27  ;;  %786 = vmatpush1.bf16.msra.mxu1 %v1226_v28  ;;  %v384_v48 = vld [vmem:[%s1595_s29 + $0x1a0] sm:$0xff]  ;;  %v385_v50 = vld [vmem:[%s1595_s29 + $0x1a8] sm:$0xff]  ;;  %v355_v26 = vld [vmem:[%s1595_s29 + $0xb8] sm:$0xff]  ;;  %v1229_v31 = vcombine.high %v350_v23, %v354_v24 }
  0x4a   : > { %734 = vmatprep.subr.bf16.mxu0 %v1233_v29  ;;  %787 = vmatprep.subr.bf16.mxu1 %v1235_v30  ;;  %v1257_v53 = vcombine.high %v380_v47, %v384_v48  ;;  %v1259_v54 = vcombine.high %v381_v49, %v385_v50  ;;  %v388_v55 = vld [vmem:[%s1595_s29 + $0x1c0] sm:$0xff]  ;;  %v389_v57 = vld [vmem:[%s1595_s29 + $0x1c8] sm:$0xff]  ;;  %v1256_v59 = vcombine.low %v380_v47, %v384_v48  ;;  %v358_v33 = vld [vmem:[%s1595_s29 + $0xd0] sm:$0xff] }
  0x4b   : > { %v392_v56 = vld [vmem:[%s1595_s29 + $0x1e0] sm:$0xff]  ;;  %v393_v58 = vld [vmem:[%s1595_s29 + $0x1e8] sm:$0xff]  ;;  %v1258_v62 = vcombine.low %v381_v49, %v385_v50  ;;  %v1220_v29 = vcombine.low %v342_v12, %v346_v13  ;;  %v1222_v30 = vcombine.low %v343_v15, %v347_v16  ;;  %v1231_v32 = vcombine.high %v351_v25, %v355_v26  ;;  %v362_v34 = vld [vmem:[%s1595_s29 + $0xf0] sm:$0xff] }
  0x4c   : > { %v1265_v63 = vcombine.high %v388_v55, %v392_v56  ;;  %v1267_v1 = vcombine.high %v389_v57, %v393_v58  ;;  %v1264_v8 = vcombine.low %v388_v55, %v392_v56  ;;  %v1266_v9 = vcombine.low %v389_v57, %v393_v58  ;;  %v326_v18 = vld [vmem:[%s1752_s0 + $0x8] sm:$0xf]  ;;  %v327_v19 = vld [vmem:[%s1752_s0 + $0xc] sm:$0xf]  ;;  %v366_v42 = vld [vmem:[%s1595_s29 + $0x110] sm:$0xff] }
  0x4d   : > { %735 = vmatpush1.bf16.msra.mxu0 %v1232_v35  ;;  %788 = vmatpush1.bf16.msra.mxu1 %v1234_v36  ;;  %v330_v27 = vmax.bf16 %v1392_v0, %v326_v18  ;;  %v331_v28 = vmax.bf16 %v1392_v0, %v327_v19  ;;  %v359_v35 = vld [vmem:[%s1595_s29 + $0xd8] sm:$0xff]  ;;  %v1230_v39 = vcombine.low %v351_v25, %v355_v26  ;;  %v374_v50 = vld [vmem:[%s1595_s29 + $0x150] sm:$0xff] }
  0x4e   : > { %736 = vmatprep.subr.bf16.mxu0 %v1241_v37  ;;  %789 = vmatprep.subr.bf16.mxu1 %v1243_v38  ;;  %v363_v36 = vld [vmem:[%s1595_s29 + $0xf8] sm:$0xff]  ;;  %v1228_v38 = vcombine.low %v350_v23, %v354_v24  ;;  %v1237_v40 = vcombine.high %v358_v33, %v362_v34  ;;  %v382_v58 = vld [vmem:[%s1595_s29 + $0x190] sm:$0xff] }
  0x4f   : > { %v1667_v37 = vcombine.low %v330_v27, %v331_v28  ;;  %v1239_v41 = vcombine.high %v359_v35, %v363_v36  ;;  %v1238_v47 = vcombine.low %v359_v35, %v363_v36  ;;  %v383_v60 = vld [vmem:[%s1595_s29 + $0x198] sm:$0xff]  ;;  %v390_v3 = vld [vmem:[%s1595_s29 + $0x1d0] sm:$0xff] }
  0x50   : > { %v387_v61 = vld [vmem:[%s1595_s29 + $0x1b8] sm:$0xff]  ;;  %v394_v4 = vld [vmem:[%s1595_s29 + $0x1f0] sm:$0xff] }
  0x51   : > { %737 = vmatpush1.bf16.msra.mxu0 %v1240_v43  ;;  %790 = vmatpush1.bf16.msra.mxu1 %v1242_v44  ;;  %v370_v43 = vld [vmem:[%s1595_s29 + $0x130] sm:$0xff]  ;;  %v367_v44 = vld [vmem:[%s1595_s29 + $0x118] sm:$0xff]  ;;  %v1263_v2 = vcombine.high %v383_v60, %v387_v61 }
  0x52   : > { %738 = vmatprep.subr.bf16.mxu0 %v1249_v45  ;;  %791 = vmatprep.subr.bf16.mxu1 %v1251_v46  ;;  %v371_v45 = vld [vmem:[%s1595_s29 + $0x138] sm:$0xff]  ;;  %v1236_v46 = vcombine.low %v358_v33, %v362_v34  ;;  %v1245_v48 = vcombine.high %v366_v42, %v370_v43 }
  0x53   : > { %v1247_v49 = vcombine.high %v367_v44, %v371_v45  ;;  %v1246_v55 = vcombine.low %v367_v44, %v371_v45  ;;  %v391_v5 = vld [vmem:[%s1595_s29 + $0x1d8] sm:$0xff] }
  0x54   : > { %v395_v6 = vld [vmem:[%s1595_s29 + $0x1f8] sm:$0xff] }
  0x55   : > { %739 = vmatpush1.bf16.msra.mxu0 %v1248_v51  ;;  %792 = vmatpush1.bf16.msra.mxu1 %v1250_v52  ;;  %v378_v51 = vld [vmem:[%s1595_s29 + $0x170] sm:$0xff]  ;;  %v375_v52 = vld [vmem:[%s1595_s29 + $0x158] sm:$0xff]  ;;  %v1270_v12 = vcombine.low %v391_v5, %v395_v6 }
  0x56   : > { %740 = vmatprep.subr.bf16.mxu0 %v1257_v53  ;;  %793 = vmatprep.subr.bf16.mxu1 %v1259_v54  ;;  %v379_v53 = vld [vmem:[%s1595_s29 + $0x178] sm:$0xff]  ;;  %v1244_v54 = vcombine.low %v366_v42, %v370_v43  ;;  %v1253_v56 = vcombine.high %v374_v50, %v378_v51 }
  0x57   : > { %v1255_v57 = vcombine.high %v375_v52, %v379_v53 }
  0x59   : > { %741 = vmatpush1.bf16.msra.mxu0 %v1256_v59  ;;  %794 = vmatpush1.bf16.msra.mxu1 %v1258_v62  ;;  %v386_v59 = vld [vmem:[%s1595_s29 + $0x1b0] sm:$0xff]  ;;  %v1252_v62 = vcombine.low %v374_v50, %v378_v51 }
  0x5a   : > { %742 = vmatprep.subr.bf16.mxu0 %v1265_v63  ;;  %795 = vmatprep.subr.bf16.mxu1 %v1267_v1  ;;  %v1254_v63 = vcombine.low %v375_v52, %v379_v53  ;;  %v1261_v1 = vcombine.high %v382_v58, %v386_v59  ;;  %v1260_v7 = vcombine.low %v382_v58, %v386_v59 }
  0x5d   : > { %743 = vmatpush1.bf16.msra.mxu0 %v1264_v8  ;;  %796 = vmatpush1.bf16.msra.mxu1 %v1266_v9  ;;  %v1262_v8 = vcombine.low %v383_v60, %v387_v61  ;;  %v1269_v9 = vcombine.high %v390_v3, %v394_v4 }
  0x5e   : > { %834 = vmatprep.subr.bf16.mxu0 %v1213_v10  ;;  %887 = vmatprep.subr.bf16.mxu1 %v1215_v11  ;;  %v1271_v10 = vcombine.high %v391_v5, %v395_v6  ;;  %v1268_v11 = vcombine.low %v390_v3, %v394_v4 }
  0x60   : > { %761 = vmatmul.mubr.bf16.vlgmr.msra.gmra.mrb[0].mxu0 %v1643_v14  ;;  %814 = vmatmul.mubr.bf16.vlgmr.msra.gmra.mrb[0].mxu1 %v1643_v14 }
  0x61   : > { %835 = vmatpush1.bf16.msra.mxu0 %v1212_v17  ;;  %888 = vmatpush1.bf16.msra.mxu1 %v1214_v20 }
  0x62   : > { %836 = vmatprep.subr.bf16.mxu0 %v1221_v21  ;;  %889 = vmatprep.subr.bf16.mxu1 %v1223_v22 }
  0x63   : > { %770 = vmatprep.mubr.bf16.mxu0 %v1392_v0  ;;  %823 = vmatprep.mubr.bf16.mxu1 %v1392_v0 }
  0x65   : > { %837 = vmatpush1.bf16.msra.mxu0 %v1220_v29  ;;  %890 = vmatpush1.bf16.msra.mxu1 %v1222_v30 }
  0x66   : > { %838 = vmatprep.subr.bf16.mxu0 %v1229_v31  ;;  %891 = vmatprep.subr.bf16.mxu1 %v1231_v32 }
  0x68   : > { %771 = vmatmul.mubr.bf16.gmra.mrb[4].mxu0 %v1667_v37  ;;  %824 = vmatmul.mubr.bf16.gmra.mrb[4].mxu1 %v1667_v37 }
  0x69   : > { %839 = vmatpush1.bf16.msra.mxu0 %v1228_v38  ;;  %892 = vmatpush1.bf16.msra.mxu1 %v1230_v39 }
  0x6a   : > { %840 = vmatprep.subr.bf16.mxu0 %v1237_v40  ;;  %893 = vmatprep.subr.bf16.mxu1 %v1239_v41 }
  0x6b   : > { %866 = vmatprep.mubr.bf16.mxu0 %v1392_v0  ;;  %919 = vmatprep.mubr.bf16.mxu1 %v1392_v0 }
  0x6d   : > { %841 = vmatpush1.bf16.msra.mxu0 %v1236_v46  ;;  %894 = vmatpush1.bf16.msra.mxu1 %v1238_v47 }
  0x6e   : > { %842 = vmatprep.subr.bf16.mxu0 %v1245_v48  ;;  %895 = vmatprep.subr.bf16.mxu1 %v1247_v49 }
  0x71   : > { %843 = vmatpush1.bf16.msra.mxu0 %v1244_v54  ;;  %896 = vmatpush1.bf16.msra.mxu1 %v1246_v55 }
  0x72   : > { %844 = vmatprep.subr.bf16.mxu0 %v1253_v56  ;;  %897 = vmatprep.subr.bf16.mxu1 %v1255_v57 }
  0x75   : > { %845 = vmatpush1.bf16.msra.mxu0 %v1252_v62  ;;  %898 = vmatpush1.bf16.msra.mxu1 %v1254_v63 }
  0x76   : > { %846 = vmatprep.subr.bf16.mxu0 %v1261_v1  ;;  %899 = vmatprep.subr.bf16.mxu1 %v1263_v2 }
  0x79   : > { %847 = vmatpush1.bf16.msra.mxu0 %v1260_v7  ;;  %900 = vmatpush1.bf16.msra.mxu1 %v1262_v8 }
  0x7a   : > { %848 = vmatprep.subr.bf16.mxu0 %v1269_v9  ;;  %901 = vmatprep.subr.bf16.mxu1 %v1271_v10 }
  0x7d   : > { %849 = vmatpush1.bf16.msra.mxu0 %v1268_v11  ;;  %902 = vmatpush1.bf16.msra.mxu1 %v1270_v12 }
  0x80   : > { %867 = vmatmul.mubr.bf16.vlgmr.msra.gmra.mrb[8].mxu0 %v1643_v14  ;;  %920 = vmatmul.mubr.bf16.vlgmr.msra.gmra.mrb[8].mxu1 %v1643_v14 }
  0x81   : > { %876 = vmatprep.mubr.bf16.mxu0 %v1392_v0  ;;  %929 = vmatprep.mubr.bf16.mxu1 %v1392_v0 }
  0x88   : > { %877 = vmatmul.mubr.bf16.gmra.mrb[12].mxu0 %v1667_v37  ;;  %930 = vmatmul.mubr.bf16.gmra.mrb[12].mxu1 %v1667_v37 }
 0x133   : > { %v762_v13 = vpop.f32.mrb[0].mxu0  ;;  %v815_v15 = vpop.f32.mrb[0].mxu1 }
 0x134   : > { %v764_v16 = vpop.f32.mrb[1].mxu0  ;;  %v817_v18 = vpop.f32.mrb[1].mxu1 }
 0x135   : > { %v1294_v17 = vpack.c.bf16 %v764_v16, %v762_v13  ;;  %v766_v19 = vpop.f32.mrb[2].mxu0  ;;  %v1295_v20 = vpack.c.bf16 %v817_v18, %v815_v15  ;;  %v819_v21 = vpop.f32.mrb[2].mxu1 }
 0x136   : > { %v768_v22 = vpop.f32.mrb[3].mxu0  ;;  %v821_v14 = vpop.f32.mrb[3].mxu1 }
 0x137   : > { %1036 = vst [vmem:[%s1697_s17] sm:$0xff] %v1294_v17  ;;  %v1298_v0 = vpack.c.bf16 %v768_v22, %v766_v19  ;;  %1037 = vst [vmem:[%s1697_s17 + $0x8] sm:$0xff] %v1295_v20  ;;  %v1299_v23 = vpack.c.bf16 %v821_v14, %v819_v21 }
 0x139   : > { %1040 = vst [vmem:[%s1697_s17 + $0x20] sm:$0xff] %v1298_v0  ;;  %1041 = vst [vmem:[%s1697_s17 + $0x28] sm:$0xff] %v1299_v23 }
 0x13b   : > { %v772_v24 = vpop.f32.mrb[4].mxu0  ;;  %v825_v25 = vpop.f32.mrb[4].mxu1 }
 0x13c   : > { %v774_v26 = vpop.f32.mrb[5].mxu0  ;;  %v827_v28 = vpop.f32.mrb[5].mxu1 }
 0x13d   : > { %v1302_v27 = vpack.c.bf16 %v774_v26, %v772_v24  ;;  %v776_v29 = vpop.f32.mrb[6].mxu0  ;;  %v1303_v30 = vpack.c.bf16 %v827_v28, %v825_v25  ;;  %v829_v31 = vpop.f32.mrb[6].mxu1 }
 0x13e   : > { %v778_v32 = vpop.f32.mrb[7].mxu0  ;;  %v831_v34 = vpop.f32.mrb[7].mxu1  ;;  %v1077_v60 = vld [vmem:[%s1697_s17] sm:$0xff] (%p1443_p6)  ;;  %v1079_v61 = vld [vmem:[%s1697_s17 + $0x8] sm:$0xff] (%p1443_p6) }
 0x13f   : > { %1044 = vst [vmem:[%s1697_s17 + $0x40] sm:$0xff] %v1302_v27  ;;  %v1306_v33 = vpack.c.bf16 %v778_v32, %v776_v29  ;;  %1045 = vst [vmem:[%s1697_s17 + $0x48] sm:$0xff] %v1303_v30  ;;  %v1307_v35 = vpack.c.bf16 %v831_v34, %v829_v31 }
 0x140   : > { %v1085_v1 = vld [vmem:[%s1697_s17 + $0x20] sm:$0xff] (%p1443_p6)  ;;  %v1087_v2 = vld [vmem:[%s1697_s17 + $0x28] sm:$0xff] (%p1443_p6)  ;;  %1078 = vst [vmem:[%s1064_s22] sm:$0xff] (%p1443_p6), %v1077_v60  ;;  %1080 = vst [vmem:[%s1064_s22 + $0x8] sm:$0xff] (%p1443_p6), %v1079_v61 }
 0x141   : > { %1048 = vst [vmem:[%s1697_s17 + $0x60] sm:$0xff] %v1306_v33  ;;  %1049 = vst [vmem:[%s1697_s17 + $0x68] sm:$0xff] %v1307_v35 }
 0x142   : > { %1086 = vst [vmem:[%s1064_s22 + $0x40] sm:$0xff] (%p1443_p6), %v1085_v1  ;;  %1088 = vst [vmem:[%s1064_s22 + $0x48] sm:$0xff] (%p1443_p6), %v1087_v2 }
 0x146   : > { %v1093_v5 = vld [vmem:[%s1697_s17 + $0x40] sm:$0xff] (%p1443_p6)  ;;  %v1095_v6 = vld [vmem:[%s1697_s17 + $0x48] sm:$0xff] (%p1443_p6) }
 0x147   : > { %1094 = vst [vmem:[%s1064_s22 + $0x80] sm:$0xff] (%p1443_p6), %v1093_v5  ;;  %1096 = vst [vmem:[%s1064_s22 + $0x88] sm:$0xff] (%p1443_p6), %v1095_v6 }
 0x148   : > { %v1101_v9 = vld [vmem:[%s1697_s17 + $0x60] sm:$0xff] (%p1443_p6)  ;;  %v1103_v10 = vld [vmem:[%s1697_s17 + $0x68] sm:$0xff] (%p1443_p6) }
 0x149   : > { %1102 = vst [vmem:[%s1064_s22 + $0xc0] sm:$0xff] (%p1443_p6), %v1101_v9  ;;  %1104 = vst [vmem:[%s1064_s22 + $0xc8] sm:$0xff] (%p1443_p6), %v1103_v10 }
 0x153   : > { %v868_v36 = vpop.f32.mrb[8].mxu0  ;;  %v921_v37 = vpop.f32.mrb[8].mxu1 }
 0x154   : > { %v870_v38 = vpop.f32.mrb[9].mxu0  ;;  %v923_v40 = vpop.f32.mrb[9].mxu1 }
 0x155   : > { %v1296_v39 = vpack.c.bf16 %v870_v38, %v868_v36  ;;  %v872_v41 = vpop.f32.mrb[10].mxu0  ;;  %v1297_v42 = vpack.c.bf16 %v923_v40, %v921_v37  ;;  %v925_v43 = vpop.f32.mrb[10].mxu1 }
 0x156   : > { %v874_v44 = vpop.f32.mrb[11].mxu0  ;;  %v927_v46 = vpop.f32.mrb[11].mxu1 }
 0x157   : > { %1038 = vst [vmem:[%s1697_s17 + $0x10] sm:$0xff] %v1296_v39  ;;  %v1300_v45 = vpack.c.bf16 %v874_v44, %v872_v41  ;;  %1039 = vst [vmem:[%s1697_s17 + $0x18] sm:$0xff] %v1297_v42  ;;  %v1301_v47 = vpack.c.bf16 %v927_v46, %v925_v43 }
 0x159   : > { %1042 = vst [vmem:[%s1697_s17 + $0x30] sm:$0xff] %v1300_v45  ;;  %1043 = vst [vmem:[%s1697_s17 + $0x38] sm:$0xff] %v1301_v47 }
 0x15b   : > { %v878_v48 = vpop.f32.mrb[12].mxu0  ;;  %v931_v49 = vpop.f32.mrb[12].mxu1  ;;  %1058 = sbr.rel (!%p1443_p6) target bundleno = 362 (0x16a), region = 55 }
 0x15c   : > { %v880_v50 = vpop.f32.mrb[13].mxu0  ;;  %v933_v52 = vpop.f32.mrb[13].mxu1 }
 0x15d   : > { %v1304_v51 = vpack.c.bf16 %v880_v50, %v878_v48  ;;  %v882_v53 = vpop.f32.mrb[14].mxu0  ;;  %v1305_v54 = vpack.c.bf16 %v933_v52, %v931_v49  ;;  %v935_v55 = vpop.f32.mrb[14].mxu1 }
 0x15e   : > { %v884_v56 = vpop.f32.mrb[15].mxu0  ;;  %v937_v58 = vpop.f32.mrb[15].mxu1  ;;  %v1081_v62 = vld [vmem:[%s1697_s17 + $0x10] sm:$0xff] (%p1443_p6)  ;;  %v1083_v63 = vld [vmem:[%s1697_s17 + $0x18] sm:$0xff] (%p1443_p6) }
 0x15f   : > { %1046 = vst [vmem:[%s1697_s17 + $0x50] sm:$0xff] %v1304_v51  ;;  %v1308_v57 = vpack.c.bf16 %v884_v56, %v882_v53  ;;  %1047 = vst [vmem:[%s1697_s17 + $0x58] sm:$0xff] %v1305_v54  ;;  %v1309_v59 = vpack.c.bf16 %v937_v58, %v935_v55 }
 0x160   : > { %1082 = vst [vmem:[%s1064_s22 + $0x10] sm:$0xff] (%p1443_p6), %v1081_v62  ;;  %1084 = vst [vmem:[%s1064_s22 + $0x18] sm:$0xff] (%p1443_p6), %v1083_v63  ;;  %v1089_v3 = vld [vmem:[%s1697_s17 + $0x30] sm:$0xff] (%p1443_p6)  ;;  %v1091_v4 = vld [vmem:[%s1697_s17 + $0x38] sm:$0xff] (%p1443_p6) }
 0x161   : > { %1050 = vst [vmem:[%s1697_s17 + $0x70] sm:$0xff] %v1308_v57  ;;  %1051 = vst [vmem:[%s1697_s17 + $0x78] sm:$0xff] %v1309_v59 }
 0x162   : > { %1090 = vst [vmem:[%s1064_s22 + $0x50] sm:$0xff] %v1089_v3  ;;  %1092 = vst [vmem:[%s1064_s22 + $0x58] sm:$0xff] %v1091_v4 }
 0x166   : > { %v1097_v7 = vld [vmem:[%s1697_s17 + $0x50] sm:$0xff]  ;;  %v1099_v8 = vld [vmem:[%s1697_s17 + $0x58] sm:$0xff] }
 0x167   : > { %1098 = vst [vmem:[%s1064_s22 + $0x90] sm:$0xff] %v1097_v7  ;;  %1100 = vst [vmem:[%s1064_s22 + $0x98] sm:$0xff] %v1099_v8 }
 0x168   : > { %v1105_v11 = vld [vmem:[%s1697_s17 + $0x70] sm:$0xff]  ;;  %v1107_v12 = vld [vmem:[%s1697_s17 + $0x78] sm:$0xff] }
 0x169   : > { %1106 = vst [vmem:[%s1064_s22 + $0xd0] sm:$0xff] %v1105_v11  ;;  %1108 = vst [vmem:[%s1064_s22 + $0xd8] sm:$0xff] %v1107_v12 }
 0x16a PF: > { %s12_s13 = sadd.s32 1, %s1390_s13   ;;  %s1756_s9 = smov %s1378_s10 }
 0x16b   : > { %p9_p11 = scmp.ge.s32.totalorder %s12_s13, 4   ;;  %s1757_s10 = smov %s1448_s19 }
 0x16c   : > { %s1758_s11 = smov %s1386_s12  ;;  %s1759_s12 = smov %s1761_s14 }
 0x16d   :  { %11 = sbr.rel (!%p9_p11) target bundleno = 3 (0x3), region = 112 }

// kernel: _lambda_.27
= control target key start
LH: loop header
LB: loop body
LE: loop exit
PB: predicated region body
PF: predicated region fallthrough
CT: control target
= control target key end

     0   :  { %s1199_s9 = smov 0   ;;  %s1201_s10 = smov 0   ;;  %s1479_s0 = inlined_call_operand.vmem [shape: bf16[64,128], index: 0, kind: input, shape index: {}]   ;;  %s1480_s1 = inlined_call_operand.vmem [shape: bf16[128,1024], index: 1, kind: input, shape index: {}]   ;;  %s1481_s2 = inlined_call_operand.vmem [shape: bf16[64,1024], index: 2, kind: output, shape index: {}]  }
   0x1   :  { %s1203_s11 = smov 0  }
   0x2 LB: > { %s24_s12 = sadd.s32 1, %s1177_s10  ;;  %p1027_p0 = scmp.ge.s32.totalorder %s1181_s11, 1  ;;  %s1181_s11 = sphi %s1203_s11, %s12_s11   ;;  %s1177_s10 = sphi %s1201_s10, %s1483_s10   ;;  %s1173_s9 = sphi %s1199_s9, %s1482_s9  }
   0x3   : > { %p26_p1 = scmp.ge.s32.totalorder %s24_s12, 2  ;;  %p138_p2 = scmp.lt.s32.totalorder %s1181_s11, 3 }
   0x5   : > { %s1485_s12 = smov (%p26_p1, %s24_s12), 0  ;;  %p139_p3 = pnand %p1027_p0, %p138_p2 }
   0x6   : > { %v203_v0 = vld [vmem:[%s1480_s1] sm:$0xff] (!%p139_p3)  ;;  %v204_v2 = vld [vmem:[%s1480_s1 + $0x8] sm:$0xff] (!%p139_p3)  ;;  %v1183_v8 = vmov (!%p139_p3), 0   ;;  %s1028_s21 = sshll.u32 (!%p139_p3), %s1173_s9, 2 }
   0x7   : > { %142 = sbr.rel (%p139_p3) target bundleno = 300 (0x12c), region = 28  ;;  %v207_v1 = vld [vmem:[%s1480_s1 + $0x20] sm:$0xff] (!%p139_p3)  ;;  %v208_v4 = vld [vmem:[%s1480_s1 + $0x28] sm:$0xff] (!%p139_p3)  ;;  %631 = vmatprep.mubr.bf16.mxu0 (!%p139_p3), %v1183_v8  ;;  %684 = vmatprep.mubr.bf16.mxu1 (!%p139_p3), %v1183_v8  ;;  %p171_p4 = scmp.lt.s32.totalorder (!%p139_p3), %s1028_s21, 7 }
   0x8   : > { %v1036_v3 = vcombine.high (!%p139_p3), %v203_v0, %v207_v1  ;;  %v1035_v5 = vcombine.low (!%p139_p3), %v203_v0, %v207_v1  ;;  %v211_v6 = vld [vmem:[%s1480_s1 + $0x40] sm:$0xff] (!%p139_p3)  ;;  %v1038_v9 = vcombine.high (!%p139_p3), %v204_v2, %v208_v4  ;;  %v1037_v10 = vcombine.low (!%p139_p3), %v204_v2, %v208_v4  ;;  %v212_v12 = vld [vmem:[%s1480_s1 + $0x48] sm:$0xff] (!%p139_p3)  ;;  %v205_v1 = vld [vmem:[%s1480_s1 + $0x10] sm:$0xff] (!%p139_p3) }
   0x9   : > { %v215_v7 = vld [vmem:[%s1480_s1 + $0x60] sm:$0xff] (!%p139_p3)  ;;  %v216_v13 = vld [vmem:[%s1480_s1 + $0x68] sm:$0xff] (!%p139_p3)  ;;  %v209_v2 = vld [vmem:[%s1480_s1 + $0x30] sm:$0xff] (!%p139_p3) }
   0xa   : > { %v1044_v11 = vcombine.high (!%p139_p3), %v211_v6, %v215_v7  ;;  %v219_v14 = vld [vmem:[%s1480_s1 + $0x80] sm:$0xff] (!%p139_p3)  ;;  %599 = vmatprep.subr.bf16.mxu0 (!%p139_p3), %v1036_v3  ;;  %v1046_v15 = vcombine.high (!%p139_p3), %v212_v12, %v216_v13  ;;  %v220_v17 = vld [vmem:[%s1480_s1 + $0x88] sm:$0xff] (!%p139_p3)  ;;  %652 = vmatprep.subr.bf16.mxu1 (!%p139_p3), %v1038_v9  ;;  %v1043_v19 = vcombine.low (!%p139_p3), %v211_v6, %v215_v7  ;;  %v210_v6 = vld [vmem:[%s1480_s1 + $0x38] sm:$0xff] (!%p139_p3) }
   0xb   : > { %v223_v16 = vld [vmem:[%s1480_s1 + $0xa0] sm:$0xff] (!%p139_p3)  ;;  %v224_v18 = vld [vmem:[%s1480_s1 + $0xa8] sm:$0xff] (!%p139_p3)  ;;  %600 = vmatpush1.bf16.msra.mxu0 (!%p139_p3), %v1035_v5  ;;  %653 = vmatpush1.bf16.msra.mxu1 (!%p139_p3), %v1037_v10  ;;  %v1045_v20 = vcombine.low (!%p139_p3), %v212_v12, %v216_v13  ;;  %v206_v5 = vld [vmem:[%s1480_s1 + $0x18] sm:$0xff] (!%p139_p3)  ;;  %v1040_v10 = vcombine.high (!%p139_p3), %v205_v1, %v209_v2 }
   0xc   : > { %601 = vmatprep.subr.bf16.mxu0 (!%p139_p3), %v1044_v11  ;;  %v1052_v21 = vcombine.high (!%p139_p3), %v219_v14, %v223_v16  ;;  %654 = vmatprep.subr.bf16.mxu1 (!%p139_p3), %v1046_v15  ;;  %v1054_v22 = vcombine.high (!%p139_p3), %v220_v17, %v224_v18  ;;  %v227_v23 = vld [vmem:[%s1480_s1 + $0xc0] sm:$0xff] (!%p139_p3)  ;;  %v228_v25 = vld [vmem:[%s1480_s1 + $0xc8] sm:$0xff] (!%p139_p3)  ;;  %v1051_v27 = vcombine.low (!%p139_p3), %v219_v14, %v223_v16  ;;  %v213_v12 = vld [vmem:[%s1480_s1 + $0x50] sm:$0xff] (!%p139_p3) }
   0xd   : > { %v231_v24 = vld [vmem:[%s1480_s1 + $0xe0] sm:$0xff] (!%p139_p3)  ;;  %v232_v26 = vld [vmem:[%s1480_s1 + $0xe8] sm:$0xff] (!%p139_p3)  ;;  %v1053_v28 = vcombine.low (!%p139_p3), %v220_v17, %v224_v18  ;;  %v1042_v11 = vcombine.high (!%p139_p3), %v206_v5, %v210_v6  ;;  %v217_v13 = vld [vmem:[%s1480_s1 + $0x70] sm:$0xff] (!%p139_p3)  ;;  %v1039_v17 = vcombine.low (!%p139_p3), %v205_v1, %v209_v2 }
   0xe   : > { %v1060_v29 = vcombine.high %v227_v23, %v231_v24  ;;  %v1062_v30 = vcombine.high %v228_v25, %v232_v26  ;;  %v235_v31 = vld [vmem:[%s1480_s1 + $0x100] sm:$0xff]  ;;  %v236_v33 = vld [vmem:[%s1480_s1 + $0x108] sm:$0xff]  ;;  %v1059_v35 = vcombine.low %v227_v23, %v231_v24  ;;  %v1061_v36 = vcombine.low %v228_v25, %v232_v26  ;;  %s1487_s21 = smov (!%p171_p4, %s1028_s21), 7  ;;  %v214_v15 = vld [vmem:[%s1480_s1 + $0x58] sm:$0xff] }
   0xf   : > { %602 = vmatpush1.bf16.msra.mxu0 %v1043_v19  ;;  %655 = vmatpush1.bf16.msra.mxu1 %v1045_v20  ;;  %v239_v32 = vld [vmem:[%s1480_s1 + $0x120] sm:$0xff]  ;;  %v240_v34 = vld [vmem:[%s1480_s1 + $0x128] sm:$0xff]  ;;  %s1029_s17 = sshll.u32 %s1487_s21, 2  ;;  %v218_v16 = vld [vmem:[%s1480_s1 + $0x78] sm:$0xff]  ;;  %v1041_v20 = vcombine.low %v206_v5, %v210_v6  ;;  %s1117_s27 = sshll.u32 %s1487_s21, 5 }
  0x10   : > { %603 = vmatprep.subr.bf16.mxu0 %v1052_v21  ;;  %656 = vmatprep.subr.bf16.mxu1 %v1054_v22  ;;  %v1068_v37 = vcombine.high %v235_v31, %v239_v32  ;;  %v1070_v38 = vcombine.high %v236_v33, %v240_v34  ;;  %v243_v39 = vld [vmem:[%s1480_s1 + $0x140] sm:$0xff]  ;;  %v244_v41 = vld [vmem:[%s1480_s1 + $0x148] sm:$0xff]  ;;  %v1067_v43 = vcombine.low %v235_v31, %v239_v32  ;;  %s1312_s25 = scalar_lea.vmem %s1479_s0, %s1029_s17  ;;  %v221_v23 = vld [vmem:[%s1480_s1 + $0x90] sm:$0xff]  ;;  %s1452_s29 = scalar_lea.vmem %s1481_s2, %s1117_s27 }
  0x11   : > { %v247_v40 = vld [vmem:[%s1480_s1 + $0x160] sm:$0xff]  ;;  %v248_v42 = vld [vmem:[%s1480_s1 + $0x168] sm:$0xff]  ;;  %v1069_v44 = vcombine.low %v236_v33, %v240_v34  ;;  %v1048_v21 = vcombine.high %v213_v12, %v217_v13  ;;  %v1050_v22 = vcombine.high %v214_v15, %v218_v16  ;;  %v225_v24 = vld [vmem:[%s1480_s1 + $0xb0] sm:$0xff] }
  0x12   : > { %v1076_v45 = vcombine.high %v243_v39, %v247_v40  ;;  %v1078_v46 = vcombine.high %v244_v41, %v248_v42  ;;  %v251_v47 = vld [vmem:[%s1480_s1 + $0x180] sm:$0xff]  ;;  %v252_v49 = vld [vmem:[%s1480_s1 + $0x188] sm:$0xff]  ;;  %v1075_v51 = vcombine.low %v243_v39, %v247_v40  ;;  %v1077_v52 = vcombine.low %v244_v41, %v248_v42  ;;  %v222_v25 = vld [vmem:[%s1480_s1 + $0x98] sm:$0xff] }
  0x13   : > { %604 = vmatpush1.bf16.msra.mxu0 %v1051_v27  ;;  %657 = vmatpush1.bf16.msra.mxu1 %v1053_v28  ;;  %v255_v48 = vld [vmem:[%s1480_s1 + $0x1a0] sm:$0xff]  ;;  %v256_v50 = vld [vmem:[%s1480_s1 + $0x1a8] sm:$0xff]  ;;  %v226_v26 = vld [vmem:[%s1480_s1 + $0xb8] sm:$0xff]  ;;  %v1056_v31 = vcombine.high %v221_v23, %v225_v24 }
  0x14   : > { %605 = vmatprep.subr.bf16.mxu0 %v1060_v29  ;;  %658 = vmatprep.subr.bf16.mxu1 %v1062_v30  ;;  %v1084_v53 = vcombine.high %v251_v47, %v255_v48  ;;  %v1086_v54 = vcombine.high %v252_v49, %v256_v50  ;;  %v259_v55 = vld [vmem:[%s1480_s1 + $0x1c0] sm:$0xff]  ;;  %v260_v57 = vld [vmem:[%s1480_s1 + $0x1c8] sm:$0xff]  ;;  %v1083_v59 = vcombine.low %v251_v47, %v255_v48  ;;  %v229_v33 = vld [vmem:[%s1480_s1 + $0xd0] sm:$0xff] }
  0x15   : > { %v263_v56 = vld [vmem:[%s1480_s1 + $0x1e0] sm:$0xff]  ;;  %v264_v58 = vld [vmem:[%s1480_s1 + $0x1e8] sm:$0xff]  ;;  %v1085_v62 = vcombine.low %v252_v49, %v256_v50  ;;  %v1047_v29 = vcombine.low %v213_v12, %v217_v13  ;;  %v1049_v30 = vcombine.low %v214_v15, %v218_v16  ;;  %v1058_v32 = vcombine.high %v222_v25, %v226_v26  ;;  %v233_v34 = vld [vmem:[%s1480_s1 + $0xf0] sm:$0xff] }
  0x16   : > { %v195_v60 = vld [vmem:[%s1312_s25] sm:$0xf]  ;;  %v196_v61 = vld [vmem:[%s1312_s25 + $0x4] sm:$0xf]  ;;  %v1092_v63 = vcombine.high %v259_v55, %v263_v56  ;;  %v1094_v0 = vcombine.high %v260_v57, %v264_v58  ;;  %v1091_v7 = vcombine.low %v259_v55, %v263_v56  ;;  %v1093_v9 = vcombine.low %v260_v57, %v264_v58  ;;  %v197_v18 = vld [vmem:[%s1312_s25 + $0x8] sm:$0xf] }
  0x17   : > { %606 = vmatpush1.bf16.msra.mxu0 %v1059_v35  ;;  %659 = vmatpush1.bf16.msra.mxu1 %v1061_v36  ;;  %v199_v3 = vmax.bf16 %v1183_v8, %v195_v60  ;;  %v200_v4 = vmax.bf16 %v1183_v8, %v196_v61  ;;  %v198_v19 = vld [vmem:[%s1312_s25 + $0xc] sm:$0xf]  ;;  %v201_v27 = vmax.bf16 %v1183_v8, %v197_v18  ;;  %v230_v35 = vld [vmem:[%s1480_s1 + $0xd8] sm:$0xff]  ;;  %v237_v42 = vld [vmem:[%s1480_s1 + $0x110] sm:$0xff] }
  0x18   : > { %607 = vmatprep.subr.bf16.mxu0 %v1068_v37  ;;  %660 = vmatprep.subr.bf16.mxu1 %v1070_v38  ;;  %v202_v28 = vmax.bf16 %v1183_v8, %v198_v19  ;;  %v234_v36 = vld [vmem:[%s1480_s1 + $0xf8] sm:$0xff]  ;;  %v1055_v38 = vcombine.low %v221_v23, %v225_v24  ;;  %v1057_v39 = vcombine.low %v222_v25, %v226_v26  ;;  %v245_v50 = vld [vmem:[%s1480_s1 + $0x150] sm:$0xff] }
  0x19   : > { %v1348_v14 = vcombine.low %v199_v3, %v200_v4  ;;  %v1064_v40 = vcombine.high %v229_v33, %v233_v34  ;;  %v1066_v41 = vcombine.high %v230_v35, %v234_v36  ;;  %v1065_v47 = vcombine.low %v230_v35, %v234_v36  ;;  %v253_v58 = vld [vmem:[%s1480_s1 + $0x190] sm:$0xff]  ;;  %v254_v60 = vld [vmem:[%s1480_s1 + $0x198] sm:$0xff] }
  0x1a   : > { %v1388_v37 = vcombine.low %v201_v27, %v202_v28  ;;  %v258_v61 = vld [vmem:[%s1480_s1 + $0x1b8] sm:$0xff]  ;;  %v261_v2 = vld [vmem:[%s1480_s1 + $0x1d0] sm:$0xff] }
  0x1b   : > { %608 = vmatpush1.bf16.msra.mxu0 %v1067_v43  ;;  %661 = vmatpush1.bf16.msra.mxu1 %v1069_v44  ;;  %v241_v43 = vld [vmem:[%s1480_s1 + $0x130] sm:$0xff]  ;;  %v238_v44 = vld [vmem:[%s1480_s1 + $0x118] sm:$0xff]  ;;  %v1090_v1 = vcombine.high %v254_v60, %v258_v61 }
  0x1c   : > { %609 = vmatprep.subr.bf16.mxu0 %v1076_v45  ;;  %662 = vmatprep.subr.bf16.mxu1 %v1078_v46  ;;  %v242_v45 = vld [vmem:[%s1480_s1 + $0x138] sm:$0xff]  ;;  %v1063_v46 = vcombine.low %v229_v33, %v233_v34  ;;  %v1072_v48 = vcombine.high %v237_v42, %v241_v43  ;;  %v265_v3 = vld [vmem:[%s1480_s1 + $0x1f0] sm:$0xff] }
  0x1d   : > { %v1074_v49 = vcombine.high %v238_v44, %v242_v45  ;;  %v1073_v55 = vcombine.low %v238_v44, %v242_v45  ;;  %v262_v4 = vld [vmem:[%s1480_s1 + $0x1d8] sm:$0xff] }
  0x1e   : > { %v266_v5 = vld [vmem:[%s1480_s1 + $0x1f8] sm:$0xff] }
  0x1f   : > { %610 = vmatpush1.bf16.msra.mxu0 %v1075_v51  ;;  %663 = vmatpush1.bf16.msra.mxu1 %v1077_v52  ;;  %v249_v51 = vld [vmem:[%s1480_s1 + $0x170] sm:$0xff]  ;;  %v246_v52 = vld [vmem:[%s1480_s1 + $0x158] sm:$0xff]  ;;  %v1097_v12 = vcombine.low %v262_v4, %v266_v5 }
  0x20   : > { %611 = vmatprep.subr.bf16.mxu0 %v1084_v53  ;;  %664 = vmatprep.subr.bf16.mxu1 %v1086_v54  ;;  %v250_v53 = vld [vmem:[%s1480_s1 + $0x178] sm:$0xff]  ;;  %v1071_v54 = vcombine.low %v237_v42, %v241_v43  ;;  %v1080_v56 = vcombine.high %v245_v50, %v249_v51 }
  0x21   : > { %v1082_v57 = vcombine.high %v246_v52, %v250_v53 }
  0x23   : > { %612 = vmatpush1.bf16.msra.mxu0 %v1083_v59  ;;  %665 = vmatpush1.bf16.msra.mxu1 %v1085_v62  ;;  %v257_v59 = vld [vmem:[%s1480_s1 + $0x1b0] sm:$0xff]  ;;  %v1079_v62 = vcombine.low %v245_v50, %v249_v51 }
  0x24   : > { %613 = vmatprep.subr.bf16.mxu0 %v1092_v63  ;;  %666 = vmatprep.subr.bf16.mxu1 %v1094_v0  ;;  %v1081_v63 = vcombine.low %v246_v52, %v250_v53  ;;  %v1088_v0 = vcombine.high %v253_v58, %v257_v59  ;;  %v1087_v6 = vcombine.low %v253_v58, %v257_v59 }
  0x27   : > { %614 = vmatpush1.bf16.msra.mxu0 %v1091_v7  ;;  %667 = vmatpush1.bf16.msra.mxu1 %v1093_v9  ;;  %v1089_v7 = vcombine.low %v254_v60, %v258_v61  ;;  %v1096_v9 = vcombine.high %v261_v2, %v265_v3 }
  0x28   : > { %705 = vmatprep.subr.bf16.mxu0 %v1040_v10  ;;  %758 = vmatprep.subr.bf16.mxu1 %v1042_v11  ;;  %v1098_v10 = vcombine.high %v262_v4, %v266_v5  ;;  %v1095_v11 = vcombine.low %v261_v2, %v265_v3 }
  0x2a   : > { %632 = vmatmul.mubr.bf16.vlgmr.msra.gmra.mrb[0].mxu0 %v1348_v14  ;;  %685 = vmatmul.mubr.bf16.vlgmr.msra.gmra.mrb[0].mxu1 %v1348_v14 }
  0x2b   : > { %706 = vmatpush1.bf16.msra.mxu0 %v1039_v17  ;;  %759 = vmatpush1.bf16.msra.mxu1 %v1041_v20 }
  0x2c   : > { %707 = vmatprep.subr.bf16.mxu0 %v1048_v21  ;;  %760 = vmatprep.subr.bf16.mxu1 %v1050_v22 }
  0x2d   : > { %641 = vmatprep.mubr.bf16.mxu0 %v1183_v8  ;;  %694 = vmatprep.mubr.bf16.mxu1 %v1183_v8 }
  0x2f   : > { %708 = vmatpush1.bf16.msra.mxu0 %v1047_v29  ;;  %761 = vmatpush1.bf16.msra.mxu1 %v1049_v30 }
  0x30   : > { %709 = vmatprep.subr.bf16.mxu0 %v1056_v31  ;;  %762 = vmatprep.subr.bf16.mxu1 %v1058_v32 }
  0x32   : > { %642 = vmatmul.mubr.bf16.gmra.mrb[4].mxu0 %v1388_v37  ;;  %695 = vmatmul.mubr.bf16.gmra.mrb[4].mxu1 %v1388_v37 }
  0x33   : > { %710 = vmatpush1.bf16.msra.mxu0 %v1055_v38  ;;  %763 = vmatpush1.bf16.msra.mxu1 %v1057_v39 }
  0x34   : > { %711 = vmatprep.subr.bf16.mxu0 %v1064_v40  ;;  %764 = vmatprep.subr.bf16.mxu1 %v1066_v41 }
  0x35   : > { %737 = vmatprep.mubr.bf16.mxu0 %v1183_v8  ;;  %790 = vmatprep.mubr.bf16.mxu1 %v1183_v8 }
  0x37   : > { %712 = vmatpush1.bf16.msra.mxu0 %v1063_v46  ;;  %765 = vmatpush1.bf16.msra.mxu1 %v1065_v47 }
  0x38   : > { %713 = vmatprep.subr.bf16.mxu0 %v1072_v48  ;;  %766 = vmatprep.subr.bf16.mxu1 %v1074_v49 }
  0x3b   : > { %714 = vmatpush1.bf16.msra.mxu0 %v1071_v54  ;;  %767 = vmatpush1.bf16.msra.mxu1 %v1073_v55 }
  0x3c   : > { %715 = vmatprep.subr.bf16.mxu0 %v1080_v56  ;;  %768 = vmatprep.subr.bf16.mxu1 %v1082_v57 }
  0x3f   : > { %716 = vmatpush1.bf16.msra.mxu0 %v1079_v62  ;;  %769 = vmatpush1.bf16.msra.mxu1 %v1081_v63 }
  0x40   : > { %717 = vmatprep.subr.bf16.mxu0 %v1088_v0  ;;  %770 = vmatprep.subr.bf16.mxu1 %v1090_v1 }
  0x43   : > { %718 = vmatpush1.bf16.msra.mxu0 %v1087_v6  ;;  %771 = vmatpush1.bf16.msra.mxu1 %v1089_v7 }
  0x44   : > { %719 = vmatprep.subr.bf16.mxu0 %v1096_v9  ;;  %772 = vmatprep.subr.bf16.mxu1 %v1098_v10 }
  0x47   : > { %720 = vmatpush1.bf16.msra.mxu0 %v1095_v11  ;;  %773 = vmatpush1.bf16.msra.mxu1 %v1097_v12 }
  0x4a   : > { %738 = vmatmul.mubr.bf16.vlgmr.msra.gmra.mrb[8].mxu0 %v1348_v14  ;;  %791 = vmatmul.mubr.bf16.vlgmr.msra.gmra.mrb[8].mxu1 %v1348_v14 }
  0x4b   : > { %747 = vmatprep.mubr.bf16.mxu0 %v1183_v8  ;;  %800 = vmatprep.mubr.bf16.mxu1 %v1183_v8 }
  0x52   : > { %748 = vmatmul.mubr.bf16.gmra.mrb[12].mxu0 %v1388_v37  ;;  %801 = vmatmul.mubr.bf16.gmra.mrb[12].mxu1 %v1388_v37 }
  0xfd   : > { %v633_v13 = vpop.f32.mrb[0].mxu0  ;;  %v686_v14 = vpop.f32.mrb[0].mxu1 }
  0xfe   : > { %v635_v15 = vpop.f32.mrb[1].mxu0  ;;  %v688_v17 = vpop.f32.mrb[1].mxu1 }
  0xff   : > { %v1118_v16 = vpack.c.bf16 %v635_v15, %v633_v13  ;;  %v637_v8 = vpop.f32.mrb[2].mxu0  ;;  %v1119_v18 = vpack.c.bf16 %v688_v17, %v686_v14  ;;  %v690_v19 = vpop.f32.mrb[2].mxu1 }
 0x100   : > { %v639_v20 = vpop.f32.mrb[3].mxu0  ;;  %v692_v22 = vpop.f32.mrb[3].mxu1 }
 0x101   : > { %907 = vst [vmem:[%s1452_s29] sm:$0xff] %v1118_v16  ;;  %v1122_v21 = vpack.c.bf16 %v639_v20, %v637_v8  ;;  %908 = vst [vmem:[%s1452_s29 + $0x8] sm:$0xff] %v1119_v18  ;;  %v1123_v23 = vpack.c.bf16 %v692_v22, %v690_v19 }
 0x103   : > { %911 = vst [vmem:[%s1452_s29 + $0x20] sm:$0xff] %v1122_v21  ;;  %912 = vst [vmem:[%s1452_s29 + $0x28] sm:$0xff] %v1123_v23 }
 0x105   : > { %v643_v24 = vpop.f32.mrb[4].mxu0  ;;  %v696_v25 = vpop.f32.mrb[4].mxu1 }
 0x106   : > { %v645_v26 = vpop.f32.mrb[5].mxu0  ;;  %v698_v28 = vpop.f32.mrb[5].mxu1 }
 0x107   : > { %v1126_v27 = vpack.c.bf16 %v645_v26, %v643_v24  ;;  %v647_v29 = vpop.f32.mrb[6].mxu0  ;;  %v1127_v30 = vpack.c.bf16 %v698_v28, %v696_v25  ;;  %v700_v31 = vpop.f32.mrb[6].mxu1 }
 0x108   : > { %v649_v32 = vpop.f32.mrb[7].mxu0  ;;  %v702_v34 = vpop.f32.mrb[7].mxu1 }
 0x109   : > { %915 = vst [vmem:[%s1452_s29 + $0x40] sm:$0xff] %v1126_v27  ;;  %v1130_v33 = vpack.c.bf16 %v649_v32, %v647_v29  ;;  %916 = vst [vmem:[%s1452_s29 + $0x48] sm:$0xff] %v1127_v30  ;;  %v1131_v35 = vpack.c.bf16 %v702_v34, %v700_v31 }
 0x10b   : > { %919 = vst [vmem:[%s1452_s29 + $0x60] sm:$0xff] %v1130_v33  ;;  %920 = vst [vmem:[%s1452_s29 + $0x68] sm:$0xff] %v1131_v35 }
 0x11d   : > { %v739_v36 = vpop.f32.mrb[8].mxu0  ;;  %v792_v37 = vpop.f32.mrb[8].mxu1 }
 0x11e   : > { %v741_v38 = vpop.f32.mrb[9].mxu0  ;;  %v794_v40 = vpop.f32.mrb[9].mxu1 }
 0x11f   : > { %v1120_v39 = vpack.c.bf16 %v741_v38, %v739_v36  ;;  %v743_v41 = vpop.f32.mrb[10].mxu0  ;;  %v1121_v42 = vpack.c.bf16 %v794_v40, %v792_v37  ;;  %v796_v43 = vpop.f32.mrb[10].mxu1 }
 0x120   : > { %v745_v44 = vpop.f32.mrb[11].mxu0  ;;  %v798_v46 = vpop.f32.mrb[11].mxu1 }
 0x121   : > { %909 = vst [vmem:[%s1452_s29 + $0x10] sm:$0xff] %v1120_v39  ;;  %v1124_v45 = vpack.c.bf16 %v745_v44, %v743_v41  ;;  %910 = vst [vmem:[%s1452_s29 + $0x18] sm:$0xff] %v1121_v42  ;;  %v1125_v47 = vpack.c.bf16 %v798_v46, %v796_v43 }
 0x123   : > { %913 = vst [vmem:[%s1452_s29 + $0x30] sm:$0xff] %v1124_v45  ;;  %914 = vst [vmem:[%s1452_s29 + $0x38] sm:$0xff] %v1125_v47 }
 0x125   : > { %v749_v48 = vpop.f32.mrb[12].mxu0  ;;  %v802_v49 = vpop.f32.mrb[12].mxu1 }
 0x126   : > { %v751_v50 = vpop.f32.mrb[13].mxu0  ;;  %v804_v52 = vpop.f32.mrb[13].mxu1 }
 0x127   : > { %v1128_v51 = vpack.c.bf16 %v751_v50, %v749_v48  ;;  %v753_v53 = vpop.f32.mrb[14].mxu0  ;;  %v1129_v54 = vpack.c.bf16 %v804_v52, %v802_v49  ;;  %v806_v55 = vpop.f32.mrb[14].mxu1 }
 0x128   : > { %v755_v56 = vpop.f32.mrb[15].mxu0  ;;  %v808_v58 = vpop.f32.mrb[15].mxu1 }
 0x129   : > { %917 = vst [vmem:[%s1452_s29 + $0x50] sm:$0xff] %v1128_v51  ;;  %v1132_v57 = vpack.c.bf16 %v755_v56, %v753_v53  ;;  %918 = vst [vmem:[%s1452_s29 + $0x58] sm:$0xff] %v1129_v54  ;;  %v1133_v59 = vpack.c.bf16 %v808_v58, %v806_v55 }
 0x12b   : > { %921 = vst [vmem:[%s1452_s29 + $0x70] sm:$0xff] %v1132_v57  ;;  %922 = vst [vmem:[%s1452_s29 + $0x78] sm:$0xff] %v1133_v59 }
 0x12c PF: > { %s12_s11 = sadd.s32 1, %s1181_s11   ;;  %s1482_s9 = smov %s1177_s10 }
 0x12d   : > { %p9_p5 = scmp.ge.s32.totalorder %s12_s11, 4   ;;  %s1483_s10 = smov %s1485_s12 }
 0x12f   :  { %11 = sbr.rel (!%p9_p5) target bundleno = 2 (0x2), region = 61 }

// kernel: _lambda_.29
= control target key start
LH: loop header
LB: loop body
LE: loop exit
PB: predicated region body
PF: predicated region fallthrough
CT: control target
= control target key end

     0   :  { %s1178_s9 = smov 0   ;;  %s1180_s10 = smov 0   ;;  %s1388_s0 = inlined_call_operand.vmem [shape: bf16[224,128], index: 0, kind: input, shape index: {}]   ;;  %s1389_s1 = inlined_call_operand.vmem [shape: bf16[128,512], index: 1, kind: input, shape index: {}]   ;;  %s1390_s2 = inlined_call_operand.vmem [shape: bf16[224,512], index: 2, kind: output, shape index: {}]  }
   0x1   :  { %s1182_s11 = smov 0  }
   0x2 LB: > { %s24_s12 = sadd.s32 1, %s1156_s10  ;;  %p963_p0 = scmp.ge.s32.totalorder %s1160_s11, 1  ;;  %s1160_s11 = sphi %s1182_s11, %s12_s11   ;;  %s1156_s10 = sphi %s1180_s10, %s1392_s10   ;;  %s1152_s9 = sphi %s1178_s9, %s1391_s9  }
   0x3   : > { %p26_p1 = scmp.ge.s32.totalorder %s24_s12, 2  ;;  %p138_p2 = scmp.lt.s32.totalorder %s1160_s11, 3 }
   0x5   : > { %s1394_s12 = smov (%p26_p1, %s24_s12), 0  ;;  %p139_p3 = pnand %p963_p0, %p138_p2 }
   0x6   : > { %v1090_v0 = vld [vmem:[%s1389_s1 + $0x4] ss:$16 sps:$4 sm:$0xff] (!%p139_p3)   ;;  %v1092_v1 = vld [vmem:[%s1389_s1 + $0xc] ss:$16 sps:$4 sm:$0xff] (!%p139_p3)   ;;  %v1162_v2 = vmov (!%p139_p3), 0   ;;  %s170_s3 = smul.u32 (!%p139_p3), 14, %s1152_s9 }
   0x7   : > { %142 = sbr.rel (%p139_p3) target bundleno = 306 (0x132), region = 28  ;;  %489 = vmatprep.mubr.bf16.mxu0 (!%p139_p3), %v1162_v2  ;;  %592 = vmatprep.mubr.bf16.mxu1 (!%p139_p3), %v1162_v2  ;;  %v1094_v3 = vld [vmem:[%s1389_s1] ss:$16 sps:$4 sm:$0xff] (!%p139_p3)   ;;  %v1095_v4 = vld [vmem:[%s1389_s1 + $0x8] ss:$16 sps:$4 sm:$0xff] (!%p139_p3)  }
   0x8   : > { %457 = vmatprep.subr.bf16.mxu0 (!%p139_p3), %v1090_v0  ;;  %560 = vmatprep.subr.bf16.mxu1 (!%p139_p3), %v1092_v1  ;;  %v1096_v5 = vld [vmem:[%s1389_s1 + $0x24] ss:$16 sps:$4 sm:$0xff] (!%p139_p3)   ;;  %v1098_v6 = vld [vmem:[%s1389_s1 + $0x2c] ss:$16 sps:$4 sm:$0xff] (!%p139_p3)   ;;  %v1100_v7 = vld [vmem:[%s1389_s1 + $0x20] ss:$16 sps:$4 sm:$0xff] (!%p139_p3)  }
   0x9   : > { %458 = vmatpush1.bf16.msra.mxu0 (!%p139_p3), %v1094_v3  ;;  %561 = vmatpush1.bf16.msra.mxu1 (!%p139_p3), %v1095_v4  ;;  %v1101_v8 = vld [vmem:[%s1389_s1 + $0x28] ss:$16 sps:$4 sm:$0xff] (!%p139_p3)   ;;  %v1102_v9 = vld [vmem:[%s1389_s1 + $0x44] ss:$16 sps:$4 sm:$0xff] (!%p139_p3)   ;;  %v1104_v10 = vld [vmem:[%s1389_s1 + $0x4c] ss:$16 sps:$4 sm:$0xff] (!%p139_p3)  }
   0xa   : > { %459 = vmatprep.subr.bf16.mxu0 (!%p139_p3), %v1096_v5  ;;  %562 = vmatprep.subr.bf16.mxu1 (!%p139_p3), %v1098_v6  ;;  %v1106_v11 = vld [vmem:[%s1389_s1 + $0x40] ss:$16 sps:$4 sm:$0xff] (!%p139_p3)   ;;  %v1107_v12 = vld [vmem:[%s1389_s1 + $0x48] ss:$16 sps:$4 sm:$0xff] (!%p139_p3)   ;;  %v1108_v13 = vld [vmem:[%s1389_s1 + $0x64] ss:$16 sps:$4 sm:$0xff] (!%p139_p3)  }
   0xb   : > { %v1110_v14 = vld [vmem:[%s1389_s1 + $0x6c] ss:$16 sps:$4 sm:$0xff] (!%p139_p3)   ;;  %p171_p4 = scmp.lt.s32.totalorder (!%p139_p3), %s170_s3, 27  ;;  %v1112_v15 = vld [vmem:[%s1389_s1 + $0x60] ss:$16 sps:$4 sm:$0xff] (!%p139_p3)  }
   0xc   : > { %v1113_v16 = vld [vmem:[%s1389_s1 + $0x68] ss:$16 sps:$4 sm:$0xff] (!%p139_p3)   ;;  %v1114_v17 = vld [vmem:[%s1389_s1 + $0x84] ss:$16 sps:$4 sm:$0xff] (!%p139_p3)   ;;  %v1116_v18 = vld [vmem:[%s1389_s1 + $0x8c] ss:$16 sps:$4 sm:$0xff] (!%p139_p3)  }
   0xd   : > { %460 = vmatpush1.bf16.msra.mxu0 (!%p139_p3), %v1100_v7  ;;  %563 = vmatpush1.bf16.msra.mxu1 (!%p139_p3), %v1101_v8  ;;  %v1118_v19 = vld [vmem:[%s1389_s1 + $0x80] ss:$16 sps:$4 sm:$0xff] (!%p139_p3)   ;;  %v1119_v20 = vld [vmem:[%s1389_s1 + $0x88] ss:$16 sps:$4 sm:$0xff] (!%p139_p3)   ;;  %v1120_v21 = vld [vmem:[%s1389_s1 + $0xa4] ss:$16 sps:$4 sm:$0xff] (!%p139_p3)  }
   0xe   : > { %461 = vmatprep.subr.bf16.mxu0 %v1102_v9  ;;  %564 = vmatprep.subr.bf16.mxu1 %v1104_v10  ;;  %s1396_s3 = smov (!%p171_p4, %s170_s3), 27  ;;  %v1122_v22 = vld [vmem:[%s1389_s1 + $0xac] ss:$16 sps:$4 sm:$0xff]   ;;  %v1124_v23 = vld [vmem:[%s1389_s1 + $0xa0] ss:$16 sps:$4 sm:$0xff]  }
   0xf   : > { %s964_s6 = sshll.u32 %s1396_s3, 2  ;;  %v1125_v24 = vld [vmem:[%s1389_s1 + $0xa8] ss:$16 sps:$4 sm:$0xff]   ;;  %v1126_v25 = vld [vmem:[%s1389_s1 + $0xc4] ss:$16 sps:$4 sm:$0xff]  }
  0x10   : > { %v1128_v26 = vld [vmem:[%s1389_s1 + $0xcc] ss:$16 sps:$4 sm:$0xff]   ;;  %s1285_s20 = scalar_lea.vmem %s1388_s0, %s964_s6  ;;  %v1130_v27 = vld [vmem:[%s1389_s1 + $0xc0] ss:$16 sps:$4 sm:$0xff]   ;;  %v1131_v28 = vld [vmem:[%s1389_s1 + $0xc8] ss:$16 sps:$4 sm:$0xff]  }
  0x11   : > { %462 = vmatpush1.bf16.msra.mxu0 %v1106_v11  ;;  %565 = vmatpush1.bf16.msra.mxu1 %v1107_v12  ;;  %v195_v29 = vld [vmem:[%s1285_s20] sm:$0xf]  ;;  %v196_v30 = vld [vmem:[%s1285_s20 + $0x4] sm:$0xf]  ;;  %v1134_v32 = vld [vmem:[%s1389_s1 + $0xec] ss:$16 sps:$4 sm:$0xff]  }
  0x12   : > { %463 = vmatprep.subr.bf16.mxu0 %v1108_v13  ;;  %566 = vmatprep.subr.bf16.mxu1 %v1110_v14  ;;  %v1132_v31 = vld [vmem:[%s1389_s1 + $0xe4] ss:$16 sps:$4 sm:$0xff]   ;;  %v209_v33 = vmax.bf16 %v1162_v2, %v195_v29  ;;  %v210_v34 = vmax.bf16 %v1162_v2, %v196_v30  ;;  %v1136_v35 = vld [vmem:[%s1389_s1 + $0xe0] ss:$16 sps:$4 sm:$0xff]   ;;  %v1137_v36 = vld [vmem:[%s1389_s1 + $0xe8] ss:$16 sps:$4 sm:$0xff]  }
  0x13   : > { %v197_v38 = vld [vmem:[%s1285_s20 + $0x8] sm:$0xf]  ;;  %v198_v39 = vld [vmem:[%s1285_s20 + $0xc] sm:$0xf]  ;;  %v199_v43 = vld [vmem:[%s1285_s20 + $0x10] sm:$0xf] }
  0x14   : > { %v967_v37 = vcombine.low %v209_v33, %v210_v34  ;;  %v211_v40 = vmax.bf16 %v1162_v2, %v197_v38  ;;  %v212_v41 = vmax.bf16 %v1162_v2, %v198_v39  ;;  %v200_v44 = vld [vmem:[%s1285_s20 + $0x14] sm:$0xf]  ;;  %v213_v45 = vmax.bf16 %v1162_v2, %v199_v43  ;;  %v201_v48 = vld [vmem:[%s1285_s20 + $0x18] sm:$0xf]  ;;  %v202_v49 = vld [vmem:[%s1285_s20 + $0x1c] sm:$0xf] }
  0x15   : > { %464 = vmatpush1.bf16.msra.mxu0 %v1112_v15  ;;  %567 = vmatpush1.bf16.msra.mxu1 %v1113_v16  ;;  %v214_v46 = vmax.bf16 %v1162_v2, %v200_v44  ;;  %v215_v50 = vmax.bf16 %v1162_v2, %v201_v48  ;;  %v216_v51 = vmax.bf16 %v1162_v2, %v202_v49  ;;  %v203_v53 = vld [vmem:[%s1285_s20 + $0x20] sm:$0xf]  ;;  %v204_v54 = vld [vmem:[%s1285_s20 + $0x24] sm:$0xf]  ;;  %v205_v58 = vld [vmem:[%s1285_s20 + $0x28] sm:$0xf] }
  0x16   : > { %465 = vmatprep.subr.bf16.mxu0 %v1114_v17  ;;  %568 = vmatprep.subr.bf16.mxu1 %v1116_v18  ;;  %v968_v42 = vcombine.low %v211_v40, %v212_v41  ;;  %v217_v55 = vmax.bf16 %v1162_v2, %v203_v53  ;;  %v218_v56 = vmax.bf16 %v1162_v2, %v204_v54  ;;  %v206_v59 = vld [vmem:[%s1285_s20 + $0x2c] sm:$0xf]  ;;  %v207_v63 = vld [vmem:[%s1285_s20 + $0x30] sm:$0xf]  ;;  %v208_v0 = vld [vmem:[%s1285_s20 + $0x34] sm:$0xf] }
  0x17   : > { %v969_v47 = vcombine.low %v213_v45, %v214_v46  ;;  %v970_v52 = vcombine.low %v215_v50, %v216_v51  ;;  %v219_v60 = vmax.bf16 %v1162_v2, %v205_v58  ;;  %v220_v61 = vmax.bf16 %v1162_v2, %v206_v59  ;;  %s1036_s6 = sshll.u32 %s1396_s3, 4 }
  0x18   : > { %v971_v57 = vcombine.low %v217_v55, %v218_v56  ;;  %v221_v1 = vmax.bf16 %v1162_v2, %v207_v63  ;;  %v222_v3 = vmax.bf16 %v1162_v2, %v208_v0  ;;  %s1349_s13 = scalar_lea.vmem %s1390_s2, %s1036_s6 }
  0x19   : > { %466 = vmatpush1.bf16.msra.mxu0 %v1118_v19  ;;  %569 = vmatpush1.bf16.msra.mxu1 %v1119_v20  ;;  %v972_v62 = vcombine.low %v219_v60, %v220_v61 }
  0x1a   : > { %467 = vmatprep.subr.bf16.mxu0 %v1120_v21  ;;  %570 = vmatprep.subr.bf16.mxu1 %v1122_v22  ;;  %v973_v4 = vcombine.low %v221_v1, %v222_v3 }
  0x1d   : > { %468 = vmatpush1.bf16.msra.mxu0 %v1124_v23  ;;  %571 = vmatpush1.bf16.msra.mxu1 %v1125_v24 }
  0x1e   : > { %469 = vmatprep.subr.bf16.mxu0 %v1126_v25  ;;  %572 = vmatprep.subr.bf16.mxu1 %v1128_v26 }
  0x21   : > { %470 = vmatpush1.bf16.msra.mxu0 %v1130_v27  ;;  %573 = vmatpush1.bf16.msra.mxu1 %v1131_v28 }
  0x22   : > { %471 = vmatprep.subr.bf16.mxu0 %v1132_v31  ;;  %574 = vmatprep.subr.bf16.mxu1 %v1134_v32 }
  0x25   : > { %472 = vmatpush1.bf16.msra.mxu0 %v1136_v35  ;;  %575 = vmatpush1.bf16.msra.mxu1 %v1137_v36 }
  0x28   : > { %490 = vmatmul.mubr.bf16.vlgmr.msra.gmra.mrb[0].mxu0 %v967_v37  ;;  %593 = vmatmul.mubr.bf16.vlgmr.msra.gmra.mrb[0].mxu1 %v967_v37 }
  0x29   : > { %499 = vmatprep.mubr.bf16.mxu0 %v1162_v2  ;;  %602 = vmatprep.mubr.bf16.mxu1 %v1162_v2 }
  0x30   : > { %500 = vmatmul.mubr.bf16.gmra.mrb[4].mxu0 %v968_v42  ;;  %603 = vmatmul.mubr.bf16.gmra.mrb[4].mxu1 %v968_v42 }
  0x31   : > { %509 = vmatprep.mubr.bf16.mxu0 %v1162_v2  ;;  %612 = vmatprep.mubr.bf16.mxu1 %v1162_v2 }
  0x38   : > { %510 = vmatmul.mubr.bf16.gmra.mrb[8].mxu0 %v969_v47  ;;  %613 = vmatmul.mubr.bf16.gmra.mrb[8].mxu1 %v969_v47 }
  0x39   : > { %519 = vmatprep.mubr.bf16.mxu0 %v1162_v2  ;;  %622 = vmatprep.mubr.bf16.mxu1 %v1162_v2 }
  0x40   : > { %520 = vmatmul.mubr.bf16.gmra.mrb[12].mxu0 %v970_v52  ;;  %623 = vmatmul.mubr.bf16.gmra.mrb[12].mxu1 %v970_v52 }
  0x41   : > { %529 = vmatprep.mubr.bf16.mxu0 %v1162_v2  ;;  %632 = vmatprep.mubr.bf16.mxu1 %v1162_v2 }
  0x48   : > { %530 = vmatmul.mubr.bf16.gmra.mrb[16].mxu0 %v971_v57  ;;  %633 = vmatmul.mubr.bf16.gmra.mrb[16].mxu1 %v971_v57 }
  0x49   : > { %539 = vmatprep.mubr.bf16.mxu0 %v1162_v2  ;;  %642 = vmatprep.mubr.bf16.mxu1 %v1162_v2 }
  0x50   : > { %540 = vmatmul.mubr.bf16.gmra.mrb[20].mxu0 %v972_v62  ;;  %643 = vmatmul.mubr.bf16.gmra.mrb[20].mxu1 %v972_v62 }
  0x51   : > { %549 = vmatprep.mubr.bf16.mxu0 %v1162_v2  ;;  %652 = vmatprep.mubr.bf16.mxu1 %v1162_v2 }
  0x58   : > { %550 = vmatmul.mubr.bf16.gmra.mrb[24].mxu0 %v973_v4  ;;  %653 = vmatmul.mubr.bf16.gmra.mrb[24].mxu1 %v973_v4 }
  0xfb   : > { %v491_v5 = vpop.f32.mrb[0].mxu0  ;;  %v594_v6 = vpop.f32.mrb[0].mxu1 }
  0xfc   : > { %v493_v7 = vpop.f32.mrb[1].mxu0  ;;  %v596_v8 = vpop.f32.mrb[1].mxu1 }
  0xfd   : > { %v1037_v9 = vpack.c.bf16 %v493_v7, %v491_v5  ;;  %v1038_v10 = vpack.c.bf16 %v596_v8, %v594_v6  ;;  %v495_v2 = vpop.f32.mrb[2].mxu0  ;;  %v598_v11 = vpop.f32.mrb[2].mxu1 }
  0xfe   : > { %v497_v12 = vpop.f32.mrb[3].mxu0  ;;  %v600_v13 = vpop.f32.mrb[3].mxu1 }
  0xff   : > { %831 = vst [vmem:[%s1349_s13] sm:$0xff] %v1037_v9  ;;  %832 = vst [vmem:[%s1349_s13 + $0x8] sm:$0xff] %v1038_v10  ;;  %v1039_v14 = vpack.c.bf16 %v497_v12, %v495_v2  ;;  %v1040_v15 = vpack.c.bf16 %v600_v13, %v598_v11 }
 0x101   : > { %833 = vst [vmem:[%s1349_s13 + $0x10] sm:$0xff] %v1039_v14  ;;  %834 = vst [vmem:[%s1349_s13 + $0x18] sm:$0xff] %v1040_v15 }
 0x103   : > { %v501_v16 = vpop.f32.mrb[4].mxu0  ;;  %v604_v17 = vpop.f32.mrb[4].mxu1 }
 0x104   : > { %v503_v18 = vpop.f32.mrb[5].mxu0  ;;  %v606_v19 = vpop.f32.mrb[5].mxu1 }
 0x105   : > { %v1041_v20 = vpack.c.bf16 %v503_v18, %v501_v16  ;;  %v1042_v21 = vpack.c.bf16 %v606_v19, %v604_v17  ;;  %v505_v22 = vpop.f32.mrb[6].mxu0  ;;  %v608_v23 = vpop.f32.mrb[6].mxu1 }
 0x106   : > { %v507_v24 = vpop.f32.mrb[7].mxu0  ;;  %v610_v25 = vpop.f32.mrb[7].mxu1 }
 0x107   : > { %835 = vst [vmem:[%s1349_s13 + $0x20] sm:$0xff] %v1041_v20  ;;  %836 = vst [vmem:[%s1349_s13 + $0x28] sm:$0xff] %v1042_v21  ;;  %v1043_v26 = vpack.c.bf16 %v507_v24, %v505_v22  ;;  %v1044_v27 = vpack.c.bf16 %v610_v25, %v608_v23 }
 0x109   : > { %837 = vst [vmem:[%s1349_s13 + $0x30] sm:$0xff] %v1043_v26  ;;  %838 = vst [vmem:[%s1349_s13 + $0x38] sm:$0xff] %v1044_v27 }
 0x10b   : > { %v511_v28 = vpop.f32.mrb[8].mxu0  ;;  %v614_v29 = vpop.f32.mrb[8].mxu1 }
 0x10c   : > { %v513_v30 = vpop.f32.mrb[9].mxu0  ;;  %v616_v31 = vpop.f32.mrb[9].mxu1 }
 0x10d   : > { %v1045_v32 = vpack.c.bf16 %v513_v30, %v511_v28  ;;  %v1046_v33 = vpack.c.bf16 %v616_v31, %v614_v29  ;;  %v515_v34 = vpop.f32.mrb[10].mxu0  ;;  %v618_v35 = vpop.f32.mrb[10].mxu1 }
 0x10e   : > { %v517_v36 = vpop.f32.mrb[11].mxu0  ;;  %v620_v37 = vpop.f32.mrb[11].mxu1 }
 0x10f   : > { %839 = vst [vmem:[%s1349_s13 + $0x40] sm:$0xff] %v1045_v32  ;;  %840 = vst [vmem:[%s1349_s13 + $0x48] sm:$0xff] %v1046_v33  ;;  %v1047_v38 = vpack.c.bf16 %v517_v36, %v515_v34  ;;  %v1048_v39 = vpack.c.bf16 %v620_v37, %v618_v35 }
 0x111   : > { %841 = vst [vmem:[%s1349_s13 + $0x50] sm:$0xff] %v1047_v38  ;;  %842 = vst [vmem:[%s1349_s13 + $0x58] sm:$0xff] %v1048_v39 }
 0x113   : > { %v521_v40 = vpop.f32.mrb[12].mxu0  ;;  %v624_v41 = vpop.f32.mrb[12].mxu1 }
 0x114   : > { %v523_v42 = vpop.f32.mrb[13].mxu0  ;;  %v626_v43 = vpop.f32.mrb[13].mxu1 }
 0x115   : > { %v1049_v44 = vpack.c.bf16 %v523_v42, %v521_v40  ;;  %v1050_v45 = vpack.c.bf16 %v626_v43, %v624_v41  ;;  %v525_v46 = vpop.f32.mrb[14].mxu0  ;;  %v628_v47 = vpop.f32.mrb[14].mxu1 }
 0x116   : > { %v527_v48 = vpop.f32.mrb[15].mxu0  ;;  %v630_v49 = vpop.f32.mrb[15].mxu1 }
 0x117   : > { %843 = vst [vmem:[%s1349_s13 + $0x60] sm:$0xff] %v1049_v44  ;;  %844 = vst [vmem:[%s1349_s13 + $0x68] sm:$0xff] %v1050_v45  ;;  %v1051_v50 = vpack.c.bf16 %v527_v48, %v525_v46  ;;  %v1052_v51 = vpack.c.bf16 %v630_v49, %v628_v47 }
 0x119   : > { %845 = vst [vmem:[%s1349_s13 + $0x70] sm:$0xff] %v1051_v50  ;;  %846 = vst [vmem:[%s1349_s13 + $0x78] sm:$0xff] %v1052_v51 }
 0x11b   : > { %v531_v52 = vpop.f32.mrb[16].mxu0  ;;  %v634_v53 = vpop.f32.mrb[16].mxu1 }
 0x11c   : > { %v533_v54 = vpop.f32.mrb[17].mxu0  ;;  %v636_v55 = vpop.f32.mrb[17].mxu1 }
 0x11d   : > { %v1053_v56 = vpack.c.bf16 %v533_v54, %v531_v52  ;;  %v1054_v57 = vpack.c.bf16 %v636_v55, %v634_v53  ;;  %v535_v58 = vpop.f32.mrb[18].mxu0  ;;  %v638_v59 = vpop.f32.mrb[18].mxu1 }
 0x11e   : > { %v537_v60 = vpop.f32.mrb[19].mxu0  ;;  %v640_v61 = vpop.f32.mrb[19].mxu1 }
 0x11f   : > { %847 = vst [vmem:[%s1349_s13 + $0x80] sm:$0xff] %v1053_v56  ;;  %848 = vst [vmem:[%s1349_s13 + $0x88] sm:$0xff] %v1054_v57  ;;  %v1055_v62 = vpack.c.bf16 %v537_v60, %v535_v58  ;;  %v1056_v63 = vpack.c.bf16 %v640_v61, %v638_v59 }
 0x121   : > { %849 = vst [vmem:[%s1349_s13 + $0x90] sm:$0xff] %v1055_v62  ;;  %850 = vst [vmem:[%s1349_s13 + $0x98] sm:$0xff] %v1056_v63 }
 0x123   : > { %v541_v0 = vpop.f32.mrb[20].mxu0  ;;  %v644_v1 = vpop.f32.mrb[20].mxu1 }
 0x124   : > { %v543_v3 = vpop.f32.mrb[21].mxu0  ;;  %v646_v4 = vpop.f32.mrb[21].mxu1 }
 0x125   : > { %v1057_v5 = vpack.c.bf16 %v543_v3, %v541_v0  ;;  %v1058_v6 = vpack.c.bf16 %v646_v4, %v644_v1  ;;  %v545_v7 = vpop.f32.mrb[22].mxu0  ;;  %v648_v8 = vpop.f32.mrb[22].mxu1 }
 0x126   : > { %v547_v9 = vpop.f32.mrb[23].mxu0  ;;  %v650_v10 = vpop.f32.mrb[23].mxu1 }
 0x127   : > { %851 = vst [vmem:[%s1349_s13 + $0xa0] sm:$0xff] %v1057_v5  ;;  %852 = vst [vmem:[%s1349_s13 + $0xa8] sm:$0xff] %v1058_v6  ;;  %v1059_v2 = vpack.c.bf16 %v547_v9, %v545_v7  ;;  %v1060_v11 = vpack.c.bf16 %v650_v10, %v648_v8 }
 0x129   : > { %853 = vst [vmem:[%s1349_s13 + $0xb0] sm:$0xff] %v1059_v2  ;;  %854 = vst [vmem:[%s1349_s13 + $0xb8] sm:$0xff] %v1060_v11 }
 0x12b   : > { %v551_v12 = vpop.f32.mrb[24].mxu0  ;;  %v654_v13 = vpop.f32.mrb[24].mxu1 }
 0x12c   : > { %v553_v14 = vpop.f32.mrb[25].mxu0  ;;  %v656_v15 = vpop.f32.mrb[25].mxu1 }
 0x12d   : > { %v1061_v16 = vpack.c.bf16 %v553_v14, %v551_v12  ;;  %v1062_v17 = vpack.c.bf16 %v656_v15, %v654_v13  ;;  %v555_v18 = vpop.f32.mrb[26].mxu0  ;;  %v658_v19 = vpop.f32.mrb[26].mxu1 }
 0x12e   : > { %v557_v20 = vpop.f32.mrb[27].mxu0  ;;  %v660_v21 = vpop.f32.mrb[27].mxu1 }
 0x12f   : > { %855 = vst [vmem:[%s1349_s13 + $0xc0] sm:$0xff] %v1061_v16  ;;  %856 = vst [vmem:[%s1349_s13 + $0xc8] sm:$0xff] %v1062_v17  ;;  %v1063_v22 = vpack.c.bf16 %v557_v20, %v555_v18  ;;  %v1064_v23 = vpack.c.bf16 %v660_v21, %v658_v19 }
 0x131   : > { %857 = vst [vmem:[%s1349_s13 + $0xd0] sm:$0xff] %v1063_v22  ;;  %858 = vst [vmem:[%s1349_s13 + $0xd8] sm:$0xff] %v1064_v23 }
 0x132 PF: > { %s12_s11 = sadd.s32 1, %s1160_s11   ;;  %s1391_s9 = smov %s1156_s10 }
 0x133   : > { %p9_p5 = scmp.ge.s32.totalorder %s12_s11, 4   ;;  %s1392_s10 = smov %s1394_s12 }
 0x135   :  { %11 = sbr.rel (!%p9_p5) target bundleno = 2 (0x2), region = 61 }

// kernel: _lambda_.31
= control target key start
LH: loop header
LB: loop body
LE: loop exit
PB: predicated region body
PF: predicated region fallthrough
CT: control target
= control target key end

     0   :  { %s1806_s9 = smov 0   ;;  %s1808_s10 = smov 0   ;;  %s2122_s0 = inlined_call_operand.vmem [shape: bf16[1024,128], index: 0, kind: input, shape index: {}]   ;;  %s2123_s1 = inlined_call_operand.vmem [shape: bf16[128,256], index: 1, kind: input, shape index: {}]   ;;  %s2124_s2 = inlined_call_operand.vmem [shape: bf16[1024,256], index: 2, kind: output, shape index: {}]  }
   0x1   :  { %s1810_s11 = smov 0  }
   0x2 LB: > { %s24_s12 = sadd.s32 1, %s1784_s10  ;;  %p1516_p0 = scmp.ge.s32.totalorder %s1788_s11, 1  ;;  %s1788_s11 = sphi %s1810_s11, %s12_s11   ;;  %s1784_s10 = sphi %s1808_s10, %s2126_s10   ;;  %s1780_s9 = sphi %s1806_s9, %s2125_s9  }
   0x3   : > { %p26_p1 = scmp.ge.s32.totalorder %s24_s12, 2  ;;  %p138_p2 = scmp.lt.s32.totalorder %s1788_s11, 3 }
   0x5   : > { %s2128_s12 = smov (%p26_p1, %s24_s12), 0  ;;  %p139_p3 = pnand %p1516_p0, %p138_p2 }
   0x6   : > { %v1742_v0 = vld [vmem:[%s2123_s1 + $0x4] ss:$8 sps:$4 sm:$0xff] (!%p139_p3)   ;;  %v1744_v1 = vld [vmem:[%s2123_s1] ss:$8 sps:$4 sm:$0xff] (!%p139_p3)   ;;  %v1790_v2 = vmov (!%p139_p3), 0   ;;  %s1517_s23 = sshll.u32 (!%p139_p3), %s1780_s9, 6 }
   0x7   : > { %142 = sbr.rel (%p139_p3) target bundleno = 378 (0x17a), region = 28  ;;  %643 = vmatprep.mubr.bf16.mxu0 (!%p139_p3), %v1790_v2  ;;  %803 = vmatprep.mubr.bf16.mxu1 (!%p139_p3), %v1790_v2  ;;  %v1745_v3 = vld [vmem:[%s2123_s1 + $0x14] ss:$8 sps:$4 sm:$0xff] (!%p139_p3)   ;;  %v1747_v4 = vld [vmem:[%s2123_s1 + $0x10] ss:$8 sps:$4 sm:$0xff] (!%p139_p3)   ;;  %p171_p4 = scmp.lt.s32.totalorder (!%p139_p3), %s1517_s23, 127 }
   0x8   : > { %611 = vmatprep.subr.bf16.mxu0 (!%p139_p3), %v1742_v0  ;;  %1701 = vmatprep.subr.bf16.mxu1 (!%p139_p3), %v1742_v0  ;;  %v1748_v5 = vld [vmem:[%s2123_s1 + $0x24] ss:$8 sps:$4 sm:$0xff] (!%p139_p3)   ;;  %v1750_v6 = vld [vmem:[%s2123_s1 + $0x20] ss:$8 sps:$4 sm:$0xff] (!%p139_p3)   ;;  %v1751_v7 = vld [vmem:[%s2123_s1 + $0x34] ss:$8 sps:$4 sm:$0xff] (!%p139_p3)  }
   0x9   : > { %612 = vmatpush1.bf16.msra.mxu0 (!%p139_p3), %v1744_v1  ;;  %1709 = vmatpush1.bf16.msra.mxu1 (!%p139_p3), %v1744_v1  ;;  %v1753_v8 = vld [vmem:[%s2123_s1 + $0x30] ss:$8 sps:$4 sm:$0xff] (!%p139_p3)   ;;  %v1754_v9 = vld [vmem:[%s2123_s1 + $0x44] ss:$8 sps:$4 sm:$0xff] (!%p139_p3)   ;;  %v1756_v10 = vld [vmem:[%s2123_s1 + $0x40] ss:$8 sps:$4 sm:$0xff] (!%p139_p3)  }
   0xa   : > { %613 = vmatprep.subr.bf16.mxu0 (!%p139_p3), %v1745_v3  ;;  %1702 = vmatprep.subr.bf16.mxu1 (!%p139_p3), %v1745_v3  ;;  %v1757_v11 = vld [vmem:[%s2123_s1 + $0x54] ss:$8 sps:$4 sm:$0xff] (!%p139_p3)   ;;  %v1759_v12 = vld [vmem:[%s2123_s1 + $0x50] ss:$8 sps:$4 sm:$0xff] (!%p139_p3)   ;;  %v1760_v13 = vld [vmem:[%s2123_s1 + $0x64] ss:$8 sps:$4 sm:$0xff] (!%p139_p3)  }
   0xb   : > { %v1762_v14 = vld [vmem:[%s2123_s1 + $0x60] ss:$8 sps:$4 sm:$0xff] (!%p139_p3)   ;;  %v1763_v19 = vld [vmem:[%s2123_s1 + $0x74] ss:$8 sps:$4 sm:$0xff] (!%p139_p3)   ;;  %v1765_v24 = vld [vmem:[%s2123_s1 + $0x70] ss:$8 sps:$4 sm:$0xff] (!%p139_p3)  }
   0xd   : > { %614 = vmatpush1.bf16.msra.mxu0 (!%p139_p3), %v1747_v4  ;;  %1710 = vmatpush1.bf16.msra.mxu1 (!%p139_p3), %v1747_v4 }
   0xe   : > { %615 = vmatprep.subr.bf16.mxu0 %v1748_v5  ;;  %1703 = vmatprep.subr.bf16.mxu1 %v1748_v5  ;;  %s2130_s23 = smov (!%p171_p4, %s1517_s23), 127 }
   0xf   : > { %s1518_s8 = sshll.u32 %s2130_s23, 2  ;;  %s1636_s26 = sshll.u32 %s2130_s23, 3 }
  0x10   : > { %s1871_s16 = scalar_lea.vmem %s2122_s0, %s1518_s8  ;;  %s2047_s29 = scalar_lea.vmem %s2124_s2, %s1636_s26 }
  0x11   : > { %616 = vmatpush1.bf16.msra.mxu0 %v1750_v6  ;;  %1711 = vmatpush1.bf16.msra.mxu1 %v1750_v6  ;;  %v195_v15 = vld [vmem:[%s1871_s16] sm:$0xf]  ;;  %v196_v16 = vld [vmem:[%s1871_s16 + $0x4] sm:$0xf]  ;;  %v197_v27 = vld [vmem:[%s1871_s16 + $0x8] sm:$0xf] }
  0x12   : > { %617 = vmatprep.subr.bf16.mxu0 %v1751_v7  ;;  %1704 = vmatprep.subr.bf16.mxu1 %v1751_v7  ;;  %v227_v17 = vld [vmem:[%s1871_s16 + $0x80] sm:$0xf]  ;;  %v228_v18 = vld [vmem:[%s1871_s16 + $0x84] sm:$0xf]  ;;  %v259_v20 = vmax.bf16 %v1790_v2, %v195_v15  ;;  %v260_v21 = vmax.bf16 %v1790_v2, %v196_v16  ;;  %v198_v28 = vld [vmem:[%s1871_s16 + $0xc] sm:$0xf]  ;;  %v261_v31 = vmax.bf16 %v1790_v2, %v197_v27 }
  0x13   : > { %v291_v22 = vmax.bf16 %v1790_v2, %v227_v17  ;;  %v292_v23 = vmax.bf16 %v1790_v2, %v228_v18  ;;  %v229_v29 = vld [vmem:[%s1871_s16 + $0x88] sm:$0xf]  ;;  %v230_v30 = vld [vmem:[%s1871_s16 + $0x8c] sm:$0xf]  ;;  %v262_v32 = vmax.bf16 %v1790_v2, %v198_v28  ;;  %v199_v37 = vld [vmem:[%s1871_s16 + $0x10] sm:$0xf] }
  0x14   : > { %v1522_v25 = vcombine.low %v259_v20, %v260_v21  ;;  %v293_v33 = vmax.bf16 %v1790_v2, %v229_v29  ;;  %v294_v34 = vmax.bf16 %v1790_v2, %v230_v30  ;;  %v200_v38 = vld [vmem:[%s1871_s16 + $0x14] sm:$0xf]  ;;  %v231_v39 = vld [vmem:[%s1871_s16 + $0x90] sm:$0xf]  ;;  %v263_v41 = vmax.bf16 %v1790_v2, %v199_v37  ;;  %v201_v47 = vld [vmem:[%s1871_s16 + $0x18] sm:$0xf] }
  0x15   : > { %618 = vmatpush1.bf16.msra.mxu0 %v1753_v8  ;;  %1712 = vmatpush1.bf16.msra.mxu1 %v1753_v8  ;;  %v1538_v26 = vcombine.low %v291_v22, %v292_v23  ;;  %v1523_v35 = vcombine.low %v261_v31, %v262_v32  ;;  %v232_v40 = vld [vmem:[%s1871_s16 + $0x94] sm:$0xf]  ;;  %v264_v42 = vmax.bf16 %v1790_v2, %v200_v38  ;;  %v202_v48 = vld [vmem:[%s1871_s16 + $0x1c] sm:$0xf]  ;;  %v233_v49 = vld [vmem:[%s1871_s16 + $0x98] sm:$0xf] }
  0x16   : > { %619 = vmatprep.subr.bf16.mxu0 %v1754_v9  ;;  %1705 = vmatprep.subr.bf16.mxu1 %v1754_v9  ;;  %v1539_v36 = vcombine.low %v293_v33, %v294_v34  ;;  %v295_v43 = vmax.bf16 %v1790_v2, %v231_v39  ;;  %v296_v44 = vmax.bf16 %v1790_v2, %v232_v40  ;;  %v234_v50 = vld [vmem:[%s1871_s16 + $0x9c] sm:$0xf]  ;;  %v203_v57 = vld [vmem:[%s1871_s16 + $0x20] sm:$0xf]  ;;  %v204_v58 = vld [vmem:[%s1871_s16 + $0x24] sm:$0xf] }
  0x17   : > { %v1524_v45 = vcombine.low %v263_v41, %v264_v42  ;;  %v265_v51 = vmax.bf16 %v1790_v2, %v201_v47  ;;  %v266_v52 = vmax.bf16 %v1790_v2, %v202_v48  ;;  %v297_v53 = vmax.bf16 %v1790_v2, %v233_v49  ;;  %v235_v59 = vld [vmem:[%s1871_s16 + $0xa0] sm:$0xf]  ;;  %v236_v60 = vld [vmem:[%s1871_s16 + $0xa4] sm:$0xf]  ;;  %v205_v4 = vld [vmem:[%s1871_s16 + $0x28] sm:$0xf] }
  0x18   : > { %v1540_v46 = vcombine.low %v295_v43, %v296_v44  ;;  %v298_v54 = vmax.bf16 %v1790_v2, %v234_v50  ;;  %v267_v61 = vmax.bf16 %v1790_v2, %v203_v57  ;;  %v268_v62 = vmax.bf16 %v1790_v2, %v204_v58  ;;  %v206_v5 = vld [vmem:[%s1871_s16 + $0x2c] sm:$0xf]  ;;  %v237_v6 = vld [vmem:[%s1871_s16 + $0xa8] sm:$0xf]  ;;  %v208_v15 = vld [vmem:[%s1871_s16 + $0x34] sm:$0xf] }
  0x19   : > { %620 = vmatpush1.bf16.msra.mxu0 %v1756_v10  ;;  %1713 = vmatpush1.bf16.msra.mxu1 %v1756_v10  ;;  %v1525_v55 = vcombine.low %v265_v51, %v266_v52  ;;  %v299_v63 = vmax.bf16 %v1790_v2, %v235_v59  ;;  %v300_v0 = vmax.bf16 %v1790_v2, %v236_v60  ;;  %v238_v7 = vld [vmem:[%s1871_s16 + $0xac] sm:$0xf]  ;;  %v239_v16 = vld [vmem:[%s1871_s16 + $0xb0] sm:$0xf]  ;;  %v240_v17 = vld [vmem:[%s1871_s16 + $0xb4] sm:$0xf] }
  0x1a   : > { %621 = vmatprep.subr.bf16.mxu0 %v1757_v11  ;;  %1706 = vmatprep.subr.bf16.mxu1 %v1757_v11  ;;  %v1541_v56 = vcombine.low %v297_v53, %v298_v54  ;;  %v1526_v1 = vcombine.low %v267_v61, %v268_v62  ;;  %v269_v8 = vmax.bf16 %v1790_v2, %v205_v4  ;;  %v242_v27 = vld [vmem:[%s1871_s16 + $0xbc] sm:$0xf]  ;;  %v211_v34 = vld [vmem:[%s1871_s16 + $0x40] sm:$0xf]  ;;  %v244_v37 = vld [vmem:[%s1871_s16 + $0xc4] sm:$0xf] }
  0x1b   : > { %v1542_v3 = vcombine.low %v299_v63, %v300_v0  ;;  %v270_v9 = vmax.bf16 %v1790_v2, %v206_v5  ;;  %v301_v10 = vmax.bf16 %v1790_v2, %v237_v6  ;;  %v302_v11 = vmax.bf16 %v1790_v2, %v238_v7  ;;  %v213_v44 = vld [vmem:[%s1871_s16 + $0x48] sm:$0xf]  ;;  %v246_v47 = vld [vmem:[%s1871_s16 + $0xcc] sm:$0xf]  ;;  %v215_v54 = vld [vmem:[%s1871_s16 + $0x50] sm:$0xf] }
  0x1c   : > { %v303_v20 = vmax.bf16 %v1790_v2, %v239_v16  ;;  %v304_v21 = vmax.bf16 %v1790_v2, %v240_v17  ;;  %v306_v31 = vmax.bf16 %v1790_v2, %v242_v27  ;;  %v275_v38 = vmax.bf16 %v1790_v2, %v211_v34  ;;  %v248_v57 = vld [vmem:[%s1871_s16 + $0xd4] sm:$0xf]  ;;  %v217_v0 = vld [vmem:[%s1871_s16 + $0x58] sm:$0xf]  ;;  %v250_v4 = vld [vmem:[%s1871_s16 + $0xdc] sm:$0xf] }
  0x1d   : > { %622 = vmatpush1.bf16.msra.mxu0 %v1759_v12  ;;  %1714 = vmatpush1.bf16.msra.mxu1 %v1759_v12  ;;  %v1527_v12 = vcombine.low %v269_v8, %v270_v9  ;;  %v308_v41 = vmax.bf16 %v1790_v2, %v244_v37  ;;  %v277_v48 = vmax.bf16 %v1790_v2, %v213_v44  ;;  %v256_v34 = vld [vmem:[%s1871_s16 + $0xf4] sm:$0xf]  ;;  %v258_v44 = vld [vmem:[%s1871_s16 + $0xfc] sm:$0xf] }
  0x1e   : > { %623 = vmatprep.subr.bf16.mxu0 %v1760_v13  ;;  %1707 = vmatprep.subr.bf16.mxu1 %v1760_v13  ;;  %v1543_v13 = vcombine.low %v301_v10, %v302_v11  ;;  %v1544_v23 = vcombine.low %v303_v20, %v304_v21  ;;  %v310_v51 = vmax.bf16 %v1790_v2, %v246_v47  ;;  %v219_v11 = vld [vmem:[%s1871_s16 + $0x60] sm:$0xf]  ;;  %v221_v21 = vld [vmem:[%s1871_s16 + $0x68] sm:$0xf] }
  0x1f   : > { %v279_v58 = vmax.bf16 %v1790_v2, %v215_v54  ;;  %v312_v61 = vmax.bf16 %v1790_v2, %v248_v57  ;;  %v281_v5 = vmax.bf16 %v1790_v2, %v217_v0  ;;  %v314_v8 = vmax.bf16 %v1790_v2, %v250_v4 }
  0x21   : > { %624 = vmatpush1.bf16.msra.mxu0 %v1762_v14  ;;  %1715 = vmatpush1.bf16.msra.mxu1 %v1762_v14  ;;  %v207_v14 = vld [vmem:[%s1871_s16 + $0x30] sm:$0xf] }
  0x22   : > { %625 = vmatprep.subr.bf16.mxu0 %v1763_v19  ;;  %1708 = vmatprep.subr.bf16.mxu1 %v1763_v19  ;;  %v271_v18 = vmax.bf16 %v1790_v2, %v207_v14  ;;  %v272_v19 = vmax.bf16 %v1790_v2, %v208_v15  ;;  %v252_v14 = vld [vmem:[%s1871_s16 + $0xe4] sm:$0xf]  ;;  %v283_v15 = vmax.bf16 %v1790_v2, %v219_v11 }
  0x24   : > { %v1528_v22 = vcombine.low %v271_v18, %v272_v19  ;;  %v316_v18 = vmax.bf16 %v1790_v2, %v252_v14 }
  0x25   : > { %626 = vmatpush1.bf16.msra.mxu0 %v1765_v24  ;;  %1716 = vmatpush1.bf16.msra.mxu1 %v1765_v24  ;;  %v209_v24 = vld [vmem:[%s1871_s16 + $0x38] sm:$0xf] }
  0x26   : > { %v273_v28 = vmax.bf16 %v1790_v2, %v209_v24  ;;  %v254_v24 = vld [vmem:[%s1871_s16 + $0xec] sm:$0xf] }
  0x28   : > { %644 = vmatmul.mubr.bf16.vlgmr.msra.gmra.mrb[0].mxu0 %v1522_v25  ;;  %804 = vmatmul.mubr.bf16.vlgmr.msra.gmra.mrb[0].mxu1 %v1538_v26  ;;  %v210_v25 = vld [vmem:[%s1871_s16 + $0x3c] sm:$0xf]  ;;  %v241_v26 = vld [vmem:[%s1871_s16 + $0xb8] sm:$0xf] }
  0x29   : > { %653 = vmatprep.mubr.bf16.mxu0 %v1790_v2  ;;  %813 = vmatprep.mubr.bf16.mxu1 %v1790_v2  ;;  %v274_v29 = vmax.bf16 %v1790_v2, %v210_v25  ;;  %v305_v30 = vmax.bf16 %v1790_v2, %v241_v26  ;;  %v285_v25 = vmax.bf16 %v1790_v2, %v221_v21 }
  0x2b   : > { %v1529_v32 = vcombine.low %v273_v28, %v274_v29  ;;  %v1545_v33 = vcombine.low %v305_v30, %v306_v31  ;;  %v318_v28 = vmax.bf16 %v1790_v2, %v254_v24  ;;  %v223_v31 = vld [vmem:[%s1871_s16 + $0x70] sm:$0xf] }
  0x30   : > { %654 = vmatmul.mubr.bf16.gmra.mrb[4].mxu0 %v1523_v35  ;;  %814 = vmatmul.mubr.bf16.gmra.mrb[4].mxu1 %v1539_v36  ;;  %v212_v35 = vld [vmem:[%s1871_s16 + $0x44] sm:$0xf]  ;;  %v243_v36 = vld [vmem:[%s1871_s16 + $0xc0] sm:$0xf] }
  0x31   : > { %663 = vmatprep.mubr.bf16.mxu0 %v1790_v2  ;;  %823 = vmatprep.mubr.bf16.mxu1 %v1790_v2  ;;  %v276_v39 = vmax.bf16 %v1790_v2, %v212_v35  ;;  %v307_v40 = vmax.bf16 %v1790_v2, %v243_v36  ;;  %v287_v35 = vmax.bf16 %v1790_v2, %v223_v31 }
  0x33   : > { %v1530_v42 = vcombine.low %v275_v38, %v276_v39  ;;  %v1546_v43 = vcombine.low %v307_v40, %v308_v41  ;;  %v320_v38 = vmax.bf16 %v1790_v2, %v256_v34  ;;  %v225_v41 = vld [vmem:[%s1871_s16 + $0x78] sm:$0xf] }
  0x38   : > { %664 = vmatmul.mubr.bf16.gmra.mrb[8].mxu0 %v1524_v45  ;;  %824 = vmatmul.mubr.bf16.gmra.mrb[8].mxu1 %v1540_v46  ;;  %v214_v45 = vld [vmem:[%s1871_s16 + $0x4c] sm:$0xf]  ;;  %v245_v46 = vld [vmem:[%s1871_s16 + $0xc8] sm:$0xf] }
  0x39   : > { %673 = vmatprep.mubr.bf16.mxu0 %v1790_v2  ;;  %833 = vmatprep.mubr.bf16.mxu1 %v1790_v2  ;;  %v278_v49 = vmax.bf16 %v1790_v2, %v214_v45  ;;  %v309_v50 = vmax.bf16 %v1790_v2, %v245_v46  ;;  %v289_v45 = vmax.bf16 %v1790_v2, %v225_v41 }
  0x3b   : > { %v1531_v52 = vcombine.low %v277_v48, %v278_v49  ;;  %v1547_v53 = vcombine.low %v309_v50, %v310_v51  ;;  %v322_v48 = vmax.bf16 %v1790_v2, %v258_v44 }
  0x40   : > { %674 = vmatmul.mubr.bf16.gmra.mrb[12].mxu0 %v1525_v55  ;;  %834 = vmatmul.mubr.bf16.gmra.mrb[12].mxu1 %v1541_v56  ;;  %v216_v55 = vld [vmem:[%s1871_s16 + $0x54] sm:$0xf]  ;;  %v247_v56 = vld [vmem:[%s1871_s16 + $0xd0] sm:$0xf] }
  0x41   : > { %683 = vmatprep.mubr.bf16.mxu0 %v1790_v2  ;;  %843 = vmatprep.mubr.bf16.mxu1 %v1790_v2  ;;  %v280_v59 = vmax.bf16 %v1790_v2, %v216_v55  ;;  %v311_v60 = vmax.bf16 %v1790_v2, %v247_v56 }
  0x43   : > { %v1532_v62 = vcombine.low %v279_v58, %v280_v59  ;;  %v1548_v63 = vcombine.low %v311_v60, %v312_v61 }
  0x48   : > { %684 = vmatmul.mubr.bf16.gmra.mrb[16].mxu0 %v1526_v1  ;;  %844 = vmatmul.mubr.bf16.gmra.mrb[16].mxu1 %v1542_v3  ;;  %v218_v1 = vld [vmem:[%s1871_s16 + $0x5c] sm:$0xf]  ;;  %v249_v3 = vld [vmem:[%s1871_s16 + $0xd8] sm:$0xf] }
  0x49   : > { %693 = vmatprep.mubr.bf16.mxu0 %v1790_v2  ;;  %853 = vmatprep.mubr.bf16.mxu1 %v1790_v2  ;;  %v282_v6 = vmax.bf16 %v1790_v2, %v218_v1  ;;  %v313_v7 = vmax.bf16 %v1790_v2, %v249_v3 }
  0x4b   : > { %v1533_v9 = vcombine.low %v281_v5, %v282_v6  ;;  %v1549_v10 = vcombine.low %v313_v7, %v314_v8 }
  0x50   : > { %694 = vmatmul.mubr.bf16.gmra.mrb[20].mxu0 %v1527_v12  ;;  %854 = vmatmul.mubr.bf16.gmra.mrb[20].mxu1 %v1543_v13  ;;  %v220_v12 = vld [vmem:[%s1871_s16 + $0x64] sm:$0xf]  ;;  %v251_v13 = vld [vmem:[%s1871_s16 + $0xe0] sm:$0xf] }
  0x51   : > { %703 = vmatprep.mubr.bf16.mxu0 %v1790_v2  ;;  %863 = vmatprep.mubr.bf16.mxu1 %v1790_v2  ;;  %v284_v16 = vmax.bf16 %v1790_v2, %v220_v12  ;;  %v315_v17 = vmax.bf16 %v1790_v2, %v251_v13 }
  0x53   : > { %v1534_v19 = vcombine.low %v283_v15, %v284_v16  ;;  %v1550_v20 = vcombine.low %v315_v17, %v316_v18 }
  0x58   : > { %704 = vmatmul.mubr.bf16.gmra.mrb[24].mxu0 %v1528_v22  ;;  %864 = vmatmul.mubr.bf16.gmra.mrb[24].mxu1 %v1544_v23  ;;  %v222_v22 = vld [vmem:[%s1871_s16 + $0x6c] sm:$0xf]  ;;  %v253_v23 = vld [vmem:[%s1871_s16 + $0xe8] sm:$0xf] }
  0x59   : > { %713 = vmatprep.mubr.bf16.mxu0 %v1790_v2  ;;  %873 = vmatprep.mubr.bf16.mxu1 %v1790_v2  ;;  %v286_v26 = vmax.bf16 %v1790_v2, %v222_v22  ;;  %v317_v27 = vmax.bf16 %v1790_v2, %v253_v23 }
  0x5b   : > { %v1535_v29 = vcombine.low %v285_v25, %v286_v26  ;;  %v1551_v30 = vcombine.low %v317_v27, %v318_v28 }
  0x60   : > { %714 = vmatmul.mubr.bf16.gmra.mrb[28].mxu0 %v1529_v32  ;;  %874 = vmatmul.mubr.bf16.gmra.mrb[28].mxu1 %v1545_v33  ;;  %v224_v32 = vld [vmem:[%s1871_s16 + $0x74] sm:$0xf]  ;;  %v255_v33 = vld [vmem:[%s1871_s16 + $0xf0] sm:$0xf] }
  0x61   : > { %723 = vmatprep.mubr.bf16.mxu0 %v1790_v2  ;;  %883 = vmatprep.mubr.bf16.mxu1 %v1790_v2  ;;  %v288_v36 = vmax.bf16 %v1790_v2, %v224_v32  ;;  %v319_v37 = vmax.bf16 %v1790_v2, %v255_v33 }
  0x63   : > { %v1536_v39 = vcombine.low %v287_v35, %v288_v36  ;;  %v1552_v40 = vcombine.low %v319_v37, %v320_v38 }
  0x68   : > { %724 = vmatmul.mubr.bf16.gmra.mrb[32].mxu0 %v1530_v42  ;;  %884 = vmatmul.mubr.bf16.gmra.mrb[32].mxu1 %v1546_v43  ;;  %v226_v42 = vld [vmem:[%s1871_s16 + $0x7c] sm:$0xf]  ;;  %v257_v43 = vld [vmem:[%s1871_s16 + $0xf8] sm:$0xf] }
  0x69   : > { %733 = vmatprep.mubr.bf16.mxu0 %v1790_v2  ;;  %893 = vmatprep.mubr.bf16.mxu1 %v1790_v2  ;;  %v290_v46 = vmax.bf16 %v1790_v2, %v226_v42  ;;  %v321_v47 = vmax.bf16 %v1790_v2, %v257_v43 }
  0x6b   : > { %v1537_v49 = vcombine.low %v289_v45, %v290_v46  ;;  %v1553_v50 = vcombine.low %v321_v47, %v322_v48 }
  0x70   : > { %734 = vmatmul.mubr.bf16.gmra.mrb[36].mxu0 %v1531_v52  ;;  %894 = vmatmul.mubr.bf16.gmra.mrb[36].mxu1 %v1547_v53 }
  0x71   : > { %743 = vmatprep.mubr.bf16.mxu0 %v1790_v2  ;;  %903 = vmatprep.mubr.bf16.mxu1 %v1790_v2 }
  0x78   : > { %744 = vmatmul.mubr.bf16.gmra.mrb[40].mxu0 %v1532_v62  ;;  %904 = vmatmul.mubr.bf16.gmra.mrb[40].mxu1 %v1548_v63 }
  0x79   : > { %753 = vmatprep.mubr.bf16.mxu0 %v1790_v2  ;;  %913 = vmatprep.mubr.bf16.mxu1 %v1790_v2 }
  0x80   : > { %754 = vmatmul.mubr.bf16.gmra.mrb[44].mxu0 %v1533_v9  ;;  %914 = vmatmul.mubr.bf16.gmra.mrb[44].mxu1 %v1549_v10 }
  0x81   : > { %763 = vmatprep.mubr.bf16.mxu0 %v1790_v2  ;;  %923 = vmatprep.mubr.bf16.mxu1 %v1790_v2 }
  0x88   : > { %764 = vmatmul.mubr.bf16.gmra.mrb[48].mxu0 %v1534_v19  ;;  %924 = vmatmul.mubr.bf16.gmra.mrb[48].mxu1 %v1550_v20 }
  0x89   : > { %773 = vmatprep.mubr.bf16.mxu0 %v1790_v2  ;;  %933 = vmatprep.mubr.bf16.mxu1 %v1790_v2 }
  0x90   : > { %774 = vmatmul.mubr.bf16.gmra.mrb[52].mxu0 %v1535_v29  ;;  %934 = vmatmul.mubr.bf16.gmra.mrb[52].mxu1 %v1551_v30 }
  0x91   : > { %783 = vmatprep.mubr.bf16.mxu0 %v1790_v2  ;;  %943 = vmatprep.mubr.bf16.mxu1 %v1790_v2 }
  0x98   : > { %784 = vmatmul.mubr.bf16.gmra.mrb[56].mxu0 %v1536_v39  ;;  %944 = vmatmul.mubr.bf16.gmra.mrb[56].mxu1 %v1552_v40 }
  0x99   : > { %793 = vmatprep.mubr.bf16.mxu0 %v1790_v2  ;;  %953 = vmatprep.mubr.bf16.mxu1 %v1790_v2 }
  0xa0   : > { %794 = vmatmul.mubr.bf16.gmra.mrb[60].mxu0 %v1537_v49  ;;  %954 = vmatmul.mubr.bf16.gmra.mrb[60].mxu1 %v1553_v50 }
  0xfb   : > { %v645_v51 = vpop.f32.mrb[0].mxu0  ;;  %v805_v52 = vpop.f32.mrb[0].mxu1 }
  0xfc   : > { %v647_v53 = vpop.f32.mrb[1].mxu0  ;;  %v807_v54 = vpop.f32.mrb[1].mxu1 }
  0xfd   : > { %v1637_v55 = vpack.c.bf16 %v647_v53, %v645_v51  ;;  %v1669_v2 = vpack.c.bf16 %v807_v54, %v805_v52  ;;  %v649_v56 = vpop.f32.mrb[2].mxu0  ;;  %v809_v57 = vpop.f32.mrb[2].mxu1 }
  0xfe   : > { %v651_v58 = vpop.f32.mrb[3].mxu0  ;;  %v811_v59 = vpop.f32.mrb[3].mxu1 }
  0xff   : > { %1348 = vst [vmem:[%s2047_s29] sm:$0xff] %v1637_v55  ;;  %1380 = vst [vmem:[%s2047_s29 + $0x100] sm:$0xff] %v1669_v2  ;;  %v1638_v60 = vpack.c.bf16 %v651_v58, %v649_v56  ;;  %v1670_v61 = vpack.c.bf16 %v811_v59, %v809_v57 }
 0x101   : > { %1349 = vst [vmem:[%s2047_s29 + $0x8] sm:$0xff] %v1638_v60  ;;  %1381 = vst [vmem:[%s2047_s29 + $0x108] sm:$0xff] %v1670_v61 }
 0x103   : > { %v655_v62 = vpop.f32.mrb[4].mxu0  ;;  %v815_v63 = vpop.f32.mrb[4].mxu1 }
 0x104   : > { %v657_v0 = vpop.f32.mrb[5].mxu0  ;;  %v817_v1 = vpop.f32.mrb[5].mxu1 }
 0x105   : > { %v1639_v3 = vpack.c.bf16 %v657_v0, %v655_v62  ;;  %v1671_v4 = vpack.c.bf16 %v817_v1, %v815_v63  ;;  %v659_v5 = vpop.f32.mrb[6].mxu0  ;;  %v819_v6 = vpop.f32.mrb[6].mxu1 }
 0x106   : > { %v661_v7 = vpop.f32.mrb[7].mxu0  ;;  %v821_v8 = vpop.f32.mrb[7].mxu1 }
 0x107   : > { %1350 = vst [vmem:[%s2047_s29 + $0x10] sm:$0xff] %v1639_v3  ;;  %1382 = vst [vmem:[%s2047_s29 + $0x110] sm:$0xff] %v1671_v4  ;;  %v1640_v9 = vpack.c.bf16 %v661_v7, %v659_v5  ;;  %v1672_v10 = vpack.c.bf16 %v821_v8, %v819_v6 }
 0x109   : > { %1351 = vst [vmem:[%s2047_s29 + $0x18] sm:$0xff] %v1640_v9  ;;  %1383 = vst [vmem:[%s2047_s29 + $0x118] sm:$0xff] %v1672_v10 }
 0x10b   : > { %v665_v11 = vpop.f32.mrb[8].mxu0  ;;  %v825_v12 = vpop.f32.mrb[8].mxu1 }
 0x10c   : > { %v667_v13 = vpop.f32.mrb[9].mxu0  ;;  %v827_v14 = vpop.f32.mrb[9].mxu1 }
 0x10d   : > { %v1641_v15 = vpack.c.bf16 %v667_v13, %v665_v11  ;;  %v1673_v16 = vpack.c.bf16 %v827_v14, %v825_v12  ;;  %v669_v17 = vpop.f32.mrb[10].mxu0  ;;  %v829_v18 = vpop.f32.mrb[10].mxu1 }
 0x10e   : > { %v671_v19 = vpop.f32.mrb[11].mxu0  ;;  %v831_v20 = vpop.f32.mrb[11].mxu1 }
 0x10f   : > { %1352 = vst [vmem:[%s2047_s29 + $0x20] sm:$0xff] %v1641_v15  ;;  %1384 = vst [vmem:[%s2047_s29 + $0x120] sm:$0xff] %v1673_v16  ;;  %v1642_v21 = vpack.c.bf16 %v671_v19, %v669_v17  ;;  %v1674_v22 = vpack.c.bf16 %v831_v20, %v829_v18 }
 0x111   : > { %1353 = vst [vmem:[%s2047_s29 + $0x28] sm:$0xff] %v1642_v21  ;;  %1385 = vst [vmem:[%s2047_s29 + $0x128] sm:$0xff] %v1674_v22 }
 0x113   : > { %v675_v23 = vpop.f32.mrb[12].mxu0  ;;  %v835_v24 = vpop.f32.mrb[12].mxu1 }
 0x114   : > { %v677_v25 = vpop.f32.mrb[13].mxu0  ;;  %v837_v26 = vpop.f32.mrb[13].mxu1 }
 0x115   : > { %v1643_v27 = vpack.c.bf16 %v677_v25, %v675_v23  ;;  %v1675_v28 = vpack.c.bf16 %v837_v26, %v835_v24  ;;  %v679_v29 = vpop.f32.mrb[14].mxu0  ;;  %v839_v30 = vpop.f32.mrb[14].mxu1 }
 0x116   : > { %v681_v31 = vpop.f32.mrb[15].mxu0  ;;  %v841_v32 = vpop.f32.mrb[15].mxu1 }
 0x117   : > { %1354 = vst [vmem:[%s2047_s29 + $0x30] sm:$0xff] %v1643_v27  ;;  %1386 = vst [vmem:[%s2047_s29 + $0x130] sm:$0xff] %v1675_v28  ;;  %v1644_v33 = vpack.c.bf16 %v681_v31, %v679_v29  ;;  %v1676_v34 = vpack.c.bf16 %v841_v32, %v839_v30 }
 0x119   : > { %1355 = vst [vmem:[%s2047_s29 + $0x38] sm:$0xff] %v1644_v33  ;;  %1387 = vst [vmem:[%s2047_s29 + $0x138] sm:$0xff] %v1676_v34 }
 0x11b   : > { %v685_v35 = vpop.f32.mrb[16].mxu0  ;;  %v845_v36 = vpop.f32.mrb[16].mxu1 }
 0x11c   : > { %v687_v37 = vpop.f32.mrb[17].mxu0  ;;  %v847_v38 = vpop.f32.mrb[17].mxu1 }
 0x11d   : > { %v1645_v39 = vpack.c.bf16 %v687_v37, %v685_v35  ;;  %v1677_v40 = vpack.c.bf16 %v847_v38, %v845_v36  ;;  %v689_v41 = vpop.f32.mrb[18].mxu0  ;;  %v849_v42 = vpop.f32.mrb[18].mxu1 }
 0x11e   : > { %v691_v43 = vpop.f32.mrb[19].mxu0  ;;  %v851_v44 = vpop.f32.mrb[19].mxu1 }
 0x11f   : > { %1356 = vst [vmem:[%s2047_s29 + $0x40] sm:$0xff] %v1645_v39  ;;  %1388 = vst [vmem:[%s2047_s29 + $0x140] sm:$0xff] %v1677_v40  ;;  %v1646_v45 = vpack.c.bf16 %v691_v43, %v689_v41  ;;  %v1678_v46 = vpack.c.bf16 %v851_v44, %v849_v42 }
 0x121   : > { %1357 = vst [vmem:[%s2047_s29 + $0x48] sm:$0xff] %v1646_v45  ;;  %1389 = vst [vmem:[%s2047_s29 + $0x148] sm:$0xff] %v1678_v46 }
 0x123   : > { %v695_v47 = vpop.f32.mrb[20].mxu0  ;;  %v855_v48 = vpop.f32.mrb[20].mxu1 }
 0x124   : > { %v697_v49 = vpop.f32.mrb[21].mxu0  ;;  %v857_v50 = vpop.f32.mrb[21].mxu1 }
 0x125   : > { %v1647_v51 = vpack.c.bf16 %v697_v49, %v695_v47  ;;  %v1679_v52 = vpack.c.bf16 %v857_v50, %v855_v48  ;;  %v699_v53 = vpop.f32.mrb[22].mxu0  ;;  %v859_v54 = vpop.f32.mrb[22].mxu1 }
 0x126   : > { %v701_v55 = vpop.f32.mrb[23].mxu0  ;;  %v861_v2 = vpop.f32.mrb[23].mxu1 }
 0x127   : > { %1358 = vst [vmem:[%s2047_s29 + $0x50] sm:$0xff] %v1647_v51  ;;  %1390 = vst [vmem:[%s2047_s29 + $0x150] sm:$0xff] %v1679_v52  ;;  %v1648_v56 = vpack.c.bf16 %v701_v55, %v699_v53  ;;  %v1680_v57 = vpack.c.bf16 %v861_v2, %v859_v54 }
 0x129   : > { %1359 = vst [vmem:[%s2047_s29 + $0x58] sm:$0xff] %v1648_v56  ;;  %1391 = vst [vmem:[%s2047_s29 + $0x158] sm:$0xff] %v1680_v57 }
 0x12b   : > { %v705_v58 = vpop.f32.mrb[24].mxu0  ;;  %v865_v59 = vpop.f32.mrb[24].mxu1 }
 0x12c   : > { %v707_v60 = vpop.f32.mrb[25].mxu0  ;;  %v867_v61 = vpop.f32.mrb[25].mxu1 }
 0x12d   : > { %v1649_v62 = vpack.c.bf16 %v707_v60, %v705_v58  ;;  %v1681_v63 = vpack.c.bf16 %v867_v61, %v865_v59  ;;  %v709_v0 = vpop.f32.mrb[26].mxu0  ;;  %v869_v1 = vpop.f32.mrb[26].mxu1 }
 0x12e   : > { %v711_v3 = vpop.f32.mrb[27].mxu0  ;;  %v871_v4 = vpop.f32.mrb[27].mxu1 }
 0x12f   : > { %1360 = vst [vmem:[%s2047_s29 + $0x60] sm:$0xff] %v1649_v62  ;;  %1392 = vst [vmem:[%s2047_s29 + $0x160] sm:$0xff] %v1681_v63  ;;  %v1650_v5 = vpack.c.bf16 %v711_v3, %v709_v0  ;;  %v1682_v6 = vpack.c.bf16 %v871_v4, %v869_v1 }
 0x131   : > { %1361 = vst [vmem:[%s2047_s29 + $0x68] sm:$0xff] %v1650_v5  ;;  %1393 = vst [vmem:[%s2047_s29 + $0x168] sm:$0xff] %v1682_v6 }
 0x133   : > { %v715_v7 = vpop.f32.mrb[28].mxu0  ;;  %v875_v8 = vpop.f32.mrb[28].mxu1 }
 0x134   : > { %v717_v9 = vpop.f32.mrb[29].mxu0  ;;  %v877_v10 = vpop.f32.mrb[29].mxu1 }
 0x135   : > { %v1651_v11 = vpack.c.bf16 %v717_v9, %v715_v7  ;;  %v1683_v12 = vpack.c.bf16 %v877_v10, %v875_v8  ;;  %v719_v13 = vpop.f32.mrb[30].mxu0  ;;  %v879_v14 = vpop.f32.mrb[30].mxu1 }
 0x136   : > { %v721_v15 = vpop.f32.mrb[31].mxu0  ;;  %v881_v16 = vpop.f32.mrb[31].mxu1 }
 0x137   : > { %1362 = vst [vmem:[%s2047_s29 + $0x70] sm:$0xff] %v1651_v11  ;;  %1394 = vst [vmem:[%s2047_s29 + $0x170] sm:$0xff] %v1683_v12  ;;  %v1652_v17 = vpack.c.bf16 %v721_v15, %v719_v13  ;;  %v1684_v18 = vpack.c.bf16 %v881_v16, %v879_v14 }
 0x139   : > { %1363 = vst [vmem:[%s2047_s29 + $0x78] sm:$0xff] %v1652_v17  ;;  %1395 = vst [vmem:[%s2047_s29 + $0x178] sm:$0xff] %v1684_v18 }
 0x13b   : > { %v725_v19 = vpop.f32.mrb[32].mxu0  ;;  %v885_v20 = vpop.f32.mrb[32].mxu1 }
 0x13c   : > { %v727_v21 = vpop.f32.mrb[33].mxu0  ;;  %v887_v22 = vpop.f32.mrb[33].mxu1 }
 0x13d   : > { %v1653_v23 = vpack.c.bf16 %v727_v21, %v725_v19  ;;  %v1685_v24 = vpack.c.bf16 %v887_v22, %v885_v20  ;;  %v729_v25 = vpop.f32.mrb[34].mxu0  ;;  %v889_v26 = vpop.f32.mrb[34].mxu1 }
 0x13e   : > { %v731_v27 = vpop.f32.mrb[35].mxu0  ;;  %v891_v28 = vpop.f32.mrb[35].mxu1 }
 0x13f   : > { %1364 = vst [vmem:[%s2047_s29 + $0x80] sm:$0xff] %v1653_v23  ;;  %1396 = vst [vmem:[%s2047_s29 + $0x180] sm:$0xff] %v1685_v24  ;;  %v1654_v29 = vpack.c.bf16 %v731_v27, %v729_v25  ;;  %v1686_v30 = vpack.c.bf16 %v891_v28, %v889_v26 }
 0x141   : > { %1365 = vst [vmem:[%s2047_s29 + $0x88] sm:$0xff] %v1654_v29  ;;  %1397 = vst [vmem:[%s2047_s29 + $0x188] sm:$0xff] %v1686_v30 }
 0x143   : > { %v735_v31 = vpop.f32.mrb[36].mxu0  ;;  %v895_v32 = vpop.f32.mrb[36].mxu1 }
 0x144   : > { %v737_v33 = vpop.f32.mrb[37].mxu0  ;;  %v897_v34 = vpop.f32.mrb[37].mxu1 }
 0x145   : > { %v1655_v35 = vpack.c.bf16 %v737_v33, %v735_v31  ;;  %v1687_v36 = vpack.c.bf16 %v897_v34, %v895_v32  ;;  %v739_v37 = vpop.f32.mrb[38].mxu0  ;;  %v899_v38 = vpop.f32.mrb[38].mxu1 }
 0x146   : > { %v741_v39 = vpop.f32.mrb[39].mxu0  ;;  %v901_v40 = vpop.f32.mrb[39].mxu1 }
 0x147   : > { %1366 = vst [vmem:[%s2047_s29 + $0x90] sm:$0xff] %v1655_v35  ;;  %1398 = vst [vmem:[%s2047_s29 + $0x190] sm:$0xff] %v1687_v36  ;;  %v1656_v41 = vpack.c.bf16 %v741_v39, %v739_v37  ;;  %v1688_v42 = vpack.c.bf16 %v901_v40, %v899_v38 }
 0x149   : > { %1367 = vst [vmem:[%s2047_s29 + $0x98] sm:$0xff] %v1656_v41  ;;  %1399 = vst [vmem:[%s2047_s29 + $0x198] sm:$0xff] %v1688_v42 }
 0x14b   : > { %v745_v43 = vpop.f32.mrb[40].mxu0  ;;  %v905_v44 = vpop.f32.mrb[40].mxu1 }
 0x14c   : > { %v747_v45 = vpop.f32.mrb[41].mxu0  ;;  %v907_v46 = vpop.f32.mrb[41].mxu1 }
 0x14d   : > { %v1657_v47 = vpack.c.bf16 %v747_v45, %v745_v43  ;;  %v1689_v48 = vpack.c.bf16 %v907_v46, %v905_v44  ;;  %v749_v49 = vpop.f32.mrb[42].mxu0  ;;  %v909_v50 = vpop.f32.mrb[42].mxu1 }
 0x14e   : > { %v751_v51 = vpop.f32.mrb[43].mxu0  ;;  %v911_v52 = vpop.f32.mrb[43].mxu1 }
 0x14f   : > { %1368 = vst [vmem:[%s2047_s29 + $0xa0] sm:$0xff] %v1657_v47  ;;  %1400 = vst [vmem:[%s2047_s29 + $0x1a0] sm:$0xff] %v1689_v48  ;;  %v1658_v53 = vpack.c.bf16 %v751_v51, %v749_v49  ;;  %v1690_v54 = vpack.c.bf16 %v911_v52, %v909_v50 }
 0x151   : > { %1369 = vst [vmem:[%s2047_s29 + $0xa8] sm:$0xff] %v1658_v53  ;;  %1401 = vst [vmem:[%s2047_s29 + $0x1a8] sm:$0xff] %v1690_v54 }
 0x153   : > { %v755_v55 = vpop.f32.mrb[44].mxu0  ;;  %v915_v2 = vpop.f32.mrb[44].mxu1 }
 0x154   : > { %v757_v56 = vpop.f32.mrb[45].mxu0  ;;  %v917_v57 = vpop.f32.mrb[45].mxu1 }
 0x155   : > { %v1659_v58 = vpack.c.bf16 %v757_v56, %v755_v55  ;;  %v1691_v59 = vpack.c.bf16 %v917_v57, %v915_v2  ;;  %v759_v60 = vpop.f32.mrb[46].mxu0  ;;  %v919_v61 = vpop.f32.mrb[46].mxu1 }
 0x156   : > { %v761_v62 = vpop.f32.mrb[47].mxu0  ;;  %v921_v63 = vpop.f32.mrb[47].mxu1 }
 0x157   : > { %1370 = vst [vmem:[%s2047_s29 + $0xb0] sm:$0xff] %v1659_v58  ;;  %1402 = vst [vmem:[%s2047_s29 + $0x1b0] sm:$0xff] %v1691_v59  ;;  %v1660_v0 = vpack.c.bf16 %v761_v62, %v759_v60  ;;  %v1692_v1 = vpack.c.bf16 %v921_v63, %v919_v61 }
 0x159   : > { %1371 = vst [vmem:[%s2047_s29 + $0xb8] sm:$0xff] %v1660_v0  ;;  %1403 = vst [vmem:[%s2047_s29 + $0x1b8] sm:$0xff] %v1692_v1 }
 0x15b   : > { %v765_v3 = vpop.f32.mrb[48].mxu0  ;;  %v925_v4 = vpop.f32.mrb[48].mxu1 }
 0x15c   : > { %v767_v5 = vpop.f32.mrb[49].mxu0  ;;  %v927_v6 = vpop.f32.mrb[49].mxu1 }
 0x15d   : > { %v1661_v7 = vpack.c.bf16 %v767_v5, %v765_v3  ;;  %v1693_v8 = vpack.c.bf16 %v927_v6, %v925_v4  ;;  %v769_v9 = vpop.f32.mrb[50].mxu0  ;;  %v929_v10 = vpop.f32.mrb[50].mxu1 }
 0x15e   : > { %v771_v11 = vpop.f32.mrb[51].mxu0  ;;  %v931_v12 = vpop.f32.mrb[51].mxu1 }
 0x15f   : > { %1372 = vst [vmem:[%s2047_s29 + $0xc0] sm:$0xff] %v1661_v7  ;;  %1404 = vst [vmem:[%s2047_s29 + $0x1c0] sm:$0xff] %v1693_v8  ;;  %v1662_v13 = vpack.c.bf16 %v771_v11, %v769_v9  ;;  %v1694_v14 = vpack.c.bf16 %v931_v12, %v929_v10 }
 0x161   : > { %1373 = vst [vmem:[%s2047_s29 + $0xc8] sm:$0xff] %v1662_v13  ;;  %1405 = vst [vmem:[%s2047_s29 + $0x1c8] sm:$0xff] %v1694_v14 }
 0x163   : > { %v775_v15 = vpop.f32.mrb[52].mxu0  ;;  %v935_v16 = vpop.f32.mrb[52].mxu1 }
 0x164   : > { %v777_v17 = vpop.f32.mrb[53].mxu0  ;;  %v937_v18 = vpop.f32.mrb[53].mxu1 }
 0x165   : > { %v1663_v19 = vpack.c.bf16 %v777_v17, %v775_v15  ;;  %v1695_v20 = vpack.c.bf16 %v937_v18, %v935_v16  ;;  %v779_v21 = vpop.f32.mrb[54].mxu0  ;;  %v939_v22 = vpop.f32.mrb[54].mxu1 }
 0x166   : > { %v781_v23 = vpop.f32.mrb[55].mxu0  ;;  %v941_v24 = vpop.f32.mrb[55].mxu1 }
 0x167   : > { %1374 = vst [vmem:[%s2047_s29 + $0xd0] sm:$0xff] %v1663_v19  ;;  %1406 = vst [vmem:[%s2047_s29 + $0x1d0] sm:$0xff] %v1695_v20  ;;  %v1664_v25 = vpack.c.bf16 %v781_v23, %v779_v21  ;;  %v1696_v26 = vpack.c.bf16 %v941_v24, %v939_v22 }
 0x169   : > { %1375 = vst [vmem:[%s2047_s29 + $0xd8] sm:$0xff] %v1664_v25  ;;  %1407 = vst [vmem:[%s2047_s29 + $0x1d8] sm:$0xff] %v1696_v26 }
 0x16b   : > { %v785_v27 = vpop.f32.mrb[56].mxu0  ;;  %v945_v28 = vpop.f32.mrb[56].mxu1 }
 0x16c   : > { %v787_v29 = vpop.f32.mrb[57].mxu0  ;;  %v947_v30 = vpop.f32.mrb[57].mxu1 }
 0x16d   : > { %v1665_v31 = vpack.c.bf16 %v787_v29, %v785_v27  ;;  %v1697_v32 = vpack.c.bf16 %v947_v30, %v945_v28  ;;  %v789_v33 = vpop.f32.mrb[58].mxu0  ;;  %v949_v34 = vpop.f32.mrb[58].mxu1 }
 0x16e   : > { %v791_v35 = vpop.f32.mrb[59].mxu0  ;;  %v951_v36 = vpop.f32.mrb[59].mxu1 }
 0x16f   : > { %1376 = vst [vmem:[%s2047_s29 + $0xe0] sm:$0xff] %v1665_v31  ;;  %1408 = vst [vmem:[%s2047_s29 + $0x1e0] sm:$0xff] %v1697_v32  ;;  %v1666_v37 = vpack.c.bf16 %v791_v35, %v789_v33  ;;  %v1698_v38 = vpack.c.bf16 %v951_v36, %v949_v34 }
 0x171   : > { %1377 = vst [vmem:[%s2047_s29 + $0xe8] sm:$0xff] %v1666_v37  ;;  %1409 = vst [vmem:[%s2047_s29 + $0x1e8] sm:$0xff] %v1698_v38 }
 0x173   : > { %v795_v39 = vpop.f32.mrb[60].mxu0  ;;  %v955_v40 = vpop.f32.mrb[60].mxu1 }
 0x174   : > { %v797_v41 = vpop.f32.mrb[61].mxu0  ;;  %v957_v42 = vpop.f32.mrb[61].mxu1 }
 0x175   : > { %v1667_v43 = vpack.c.bf16 %v797_v41, %v795_v39  ;;  %v1699_v44 = vpack.c.bf16 %v957_v42, %v955_v40  ;;  %v799_v45 = vpop.f32.mrb[62].mxu0  ;;  %v959_v46 = vpop.f32.mrb[62].mxu1 }
 0x176   : > { %v801_v47 = vpop.f32.mrb[63].mxu0  ;;  %v961_v48 = vpop.f32.mrb[63].mxu1 }
 0x177   : > { %1378 = vst [vmem:[%s2047_s29 + $0xf0] sm:$0xff] %v1667_v43  ;;  %1410 = vst [vmem:[%s2047_s29 + $0x1f0] sm:$0xff] %v1699_v44  ;;  %v1668_v49 = vpack.c.bf16 %v801_v47, %v799_v45  ;;  %v1700_v50 = vpack.c.bf16 %v961_v48, %v959_v46 }
 0x179   : > { %1379 = vst [vmem:[%s2047_s29 + $0xf8] sm:$0xff] %v1668_v49  ;;  %1411 = vst [vmem:[%s2047_s29 + $0x1f8] sm:$0xff] %v1700_v50 }
 0x17a PF: > { %s12_s11 = sadd.s32 1, %s1788_s11   ;;  %s2125_s9 = smov %s1784_s10 }
 0x17b   : > { %p9_p5 = scmp.ge.s32.totalorder %s12_s11, 4   ;;  %s2126_s10 = smov %s2128_s12 }
 0x17d   :  { %11 = sbr.rel (!%p9_p5) target bundleno = 2 (0x2), region = 61 }

// kernel: _lambda_.32
= control target key start
LH: loop header
LB: loop body
LE: loop exit
PB: predicated region body
PF: predicated region fallthrough
CT: control target
= control target key end

     0   :  { %v300_v3 = vmov 1966171168   ;;  %v112_v5 = vlaneseq  ;;  %s444_s0 = inlined_call_operand.vmem [shape: bf16[16,1024], index: 0, kind: input, shape index: {}]   ;;  %s445_s1 = inlined_call_operand.vmem [shape: f32[1,1024], index: 1, kind: output, shape index: {0}]   ;;  %s446_s2 = inlined_call_operand.vmem [shape: f32[1,1024], index: 2, kind: output, shape index: {1}]  }
   0x1   :  { %v16_v0 = vld [vmem:[%s444_s0] sm:$0xff]  ;;  %v17_v1 = vld [vmem:[%s444_s0 + $0x8] sm:$0xff]  ;;  %v18_v2 = vld [vmem:[%s444_s0 + $0x10] sm:$0xff]  ;;  %v325_v4 = vunpack.c.l.s4 %v300_v3 }
   0x2   :  { %v19_v6 = vld [vmem:[%s444_s0 + $0x18] sm:$0xff]  ;;  %v20_v7 = vld [vmem:[%s444_s0 + $0x20] sm:$0xff]  ;;  %v21_v8 = vld [vmem:[%s444_s0 + $0x28] sm:$0xff]  ;;  %v336_v9 = vunpack.c.l.bf16 %v16_v0  ;;  %v338_v10 = vunpack.c.h.bf16 %v16_v0  ;;  %v340_v11 = vunpack.c.l.bf16 %v17_v1  ;;  %v342_v12 = vunpack.c.h.bf16 %v17_v1 }
   0x3   :  { %v22_v13 = vld [vmem:[%s444_s0 + $0x30] sm:$0xff]  ;;  %v23_v14 = vld [vmem:[%s444_s0 + $0x38] sm:$0xff]  ;;  %v350_v15 = vunpack.c.l.bf16 %v18_v2  ;;  %v352_v16 = vunpack.c.h.bf16 %v18_v2  ;;  %v354_v17 = vunpack.c.l.bf16 %v19_v6  ;;  %v356_v18 = vunpack.c.h.bf16 %v19_v6 }
   0x4   :  { %v358_v19 = vunpack.c.l.bf16 %v20_v7  ;;  %v360_v20 = vunpack.c.h.bf16 %v20_v7  ;;  %v362_v21 = vunpack.c.l.bf16 %v21_v8  ;;  %v364_v22 = vunpack.c.h.bf16 %v21_v8 }
   0x5   :  { %v366_v23 = vunpack.c.l.bf16 %v22_v13  ;;  %v368_v24 = vunpack.c.h.bf16 %v22_v13  ;;  %v370_v25 = vunpack.c.l.bf16 %v23_v14  ;;  %v372_v26 = vunpack.c.h.bf16 %v23_v14 }
   0x6   :  { %v41_v27 = vadd.f32 %v358_v19, %v336_v9  ;;  %v48_v28 = vadd.f32 %v360_v20, %v338_v10  ;;  %v55_v29 = vadd.f32 %v362_v21, %v340_v11  ;;  %v62_v30 = vadd.f32 %v364_v22, %v342_v12 }
   0x7   :  { %v69_v31 = vadd.f32 %v366_v23, %v350_v15  ;;  %v76_v32 = vadd.f32 %v368_v24, %v352_v16  ;;  %v83_v33 = vadd.f32 %v370_v25, %v354_v17  ;;  %v90_v34 = vadd.f32 %v372_v26, %v356_v18 }
   0x8   :  { %v42_v35 = vrot.slane %v41_v27, 4  ;;  %v49_v36 = vrot.slane %v48_v28, 4  ;;  %v56_v37 = vrot.slane %v55_v29, 4  ;;  %v63_v38 = vrot.slane %v62_v30, 4 }
   0x9   :  { %v70_v39 = vrot.slane %v69_v31, 4  ;;  %v77_v40 = vrot.slane %v76_v32, 4  ;;  %v84_v41 = vrot.slane %v83_v33, 4  ;;  %v91_v42 = vrot.slane %v90_v34, 4 }
   0xa   :  { %v43_v43 = vadd.f32 %v42_v35, %v41_v27  ;;  %v50_v44 = vadd.f32 %v49_v36, %v48_v28  ;;  %v57_v45 = vadd.f32 %v56_v37, %v55_v29  ;;  %v64_v46 = vadd.f32 %v63_v38, %v62_v30 }
   0xb   :  { %v71_v47 = vadd.f32 %v70_v39, %v69_v31  ;;  %v78_v48 = vadd.f32 %v77_v40, %v76_v32  ;;  %v85_v49 = vadd.f32 %v84_v41, %v83_v33  ;;  %v92_v50 = vadd.f32 %v91_v42, %v90_v34 }
   0xc   :  { %v44_v51 = vrot.slane %v43_v43, 2  ;;  %v51_v52 = vrot.slane %v50_v44, 2  ;;  %v58_v53 = vrot.slane %v57_v45, 2  ;;  %v65_v54 = vrot.slane %v64_v46, 2 }
   0xd   :  { %v72_v55 = vrot.slane %v71_v47, 2  ;;  %v79_v56 = vrot.slane %v78_v48, 2  ;;  %v86_v57 = vrot.slane %v85_v49, 2  ;;  %v93_v58 = vrot.slane %v92_v50, 2 }
   0xe   :  { %v45_v59 = vadd.f32 %v44_v51, %v43_v43  ;;  %v52_v60 = vadd.f32 %v51_v52, %v50_v44  ;;  %v59_v61 = vadd.f32 %v58_v53, %v57_v45  ;;  %v66_v62 = vadd.f32 %v65_v54, %v64_v46 }
   0xf   :  { %v73_v63 = vadd.f32 %v72_v55, %v71_v47  ;;  %v80_v0 = vadd.f32 %v79_v56, %v78_v48  ;;  %v87_v1 = vadd.f32 %v86_v57, %v85_v49  ;;  %v94_v2 = vadd.f32 %v93_v58, %v92_v50 }
  0x10   :  { %v46_v3 = vrot.slane %v45_v59, 1  ;;  %v53_v6 = vrot.slane %v52_v60, 1  ;;  %v60_v7 = vrot.slane %v59_v61, 1  ;;  %v67_v8 = vrot.slane %v66_v62, 1 }
  0x11   :  { %v74_v13 = vrot.slane %v73_v63, 1  ;;  %v81_v14 = vrot.slane %v80_v0, 1  ;;  %v88_v27 = vrot.slane %v87_v1, 1  ;;  %v95_v28 = vrot.slane %v94_v2, 1 }
  0x12   :  { %v47_v29 = vadd.f32 %v46_v3, %v45_v59  ;;  %v54_v30 = vadd.f32 %v53_v6, %v52_v60  ;;  %v61_v31 = vadd.f32 %v60_v7, %v59_v61  ;;  %v68_v32 = vadd.f32 %v67_v8, %v66_v62 }
  0x13   :  { %v75_v33 = vadd.f32 %v74_v13, %v73_v63  ;;  %v82_v34 = vadd.f32 %v81_v14, %v80_v0  ;;  %v89_v35 = vadd.f32 %v88_v27, %v87_v1  ;;  %v96_v36 = vadd.f32 %v95_v28, %v94_v2 }
  0x14   :  { %v105_v37 = vcombine.low %v47_v29, %v54_v30  ;;  %v106_v38 = vcombine.low %v61_v31, %v68_v32  ;;  %v111_v39 = vunpack.c.0.s8 %v325_v4  ;;  %v113_v40 = vshrl.u32 %v112_v5, 7 }
  0x15   :  { %v107_v41 = vcombine.low %v75_v33, %v82_v34  ;;  %v108_v42 = vcombine.low %v89_v35, %v96_v36  ;;  %v158_v43 = vmul.f32 %v336_v9, %v336_v9  ;;  %v159_v44 = vmul.f32 %v338_v10, %v338_v10 }
  0x16   :  { %v396_v45 = vsub.s32 %v111_v39, %v113_v40  ;;  %v160_v46 = vmul.f32 %v340_v11, %v340_v11  ;;  %v161_v47 = vmul.f32 %v342_v12, %v342_v12  ;;  %v162_v4 = vmul.f32 %v350_v15, %v350_v15 }
  0x17   :  { %v163_v5 = vmul.f32 %v352_v16, %v352_v16  ;;  %v164_v9 = vmul.f32 %v354_v17, %v354_v17  ;;  %v165_v10 = vmul.f32 %v356_v18, %v356_v18  ;;  %v166_v48 = vmul.f32 %v358_v19, %v358_v19 }
  0x18   :  { %v115_v11 = vrot.slane %v105_v37, %v396_v45  ;;  %v122_v49 = vrot.slane %v106_v38, %v396_v45  ;;  %v129_v12 = vrot.slane %v107_v41, %v396_v45  ;;  %v136_v15 = vrot.slane %v108_v42, %v396_v45 }
  0x19   :  { %v167_v16 = vmul.f32 %v360_v20, %v360_v20  ;;  %v168_v17 = vmul.f32 %v362_v21, %v362_v21  ;;  %v169_v18 = vmul.f32 %v364_v22, %v364_v22  ;;  %v170_v19 = vmul.f32 %v366_v23, %v366_v23 }
  0x1a   :  { %v137_v50 = vcombine.low %v115_v11, %v122_v49  ;;  %v138_v51 = vcombine.low %v129_v12, %v136_v15  ;;  %v171_v52 = vmul.f32 %v368_v24, %v368_v24  ;;  %v172_v53 = vmul.f32 %v370_v25, %v370_v25 }
  0x1b   :  { %v173_v20 = vmul.f32 %v372_v26, %v372_v26  ;;  %v174_v54 = vadd.f32 %v166_v48, %v158_v43  ;;  %v181_v55 = vadd.f32 %v167_v16, %v159_v44  ;;  %v188_v21 = vadd.f32 %v168_v17, %v160_v46 }
  0x1c   :  { %v145_v56 = vrot.slane %v137_v50, %v396_v45  ;;  %v152_v22 = vrot.slane %v138_v51, %v396_v45  ;;  %v195_v57 = vadd.f32 %v169_v18, %v161_v47  ;;  %v202_v23 = vadd.f32 %v170_v19, %v162_v4 }
  0x1d   :  { %v175_v58 = vrot.slane %v174_v54, 4  ;;  %v182_v59 = vrot.slane %v181_v55, 4  ;;  %v189_v60 = vrot.slane %v188_v21, 4  ;;  %v209_v61 = vadd.f32 %v171_v52, %v163_v5 }
  0x1e   :  { %v153_v24 = vcombine.low %v145_v56, %v152_v22  ;;  %v196_v62 = vrot.slane %v195_v57, 4  ;;  %v203_v63 = vrot.slane %v202_v23, 4  ;;  %v216_v25 = vadd.f32 %v172_v53, %v164_v9 }
  0x1f   :  { %v176_v0 = vadd.f32 %v175_v58, %v174_v54  ;;  %v183_v1 = vadd.f32 %v182_v59, %v181_v55  ;;  %v190_v26 = vadd.f32 %v189_v60, %v188_v21  ;;  %v210_v2 = vrot.slane %v209_v61, 4 }
  0x20   :  { %v197_v3 = vadd.f32 %v196_v62, %v195_v57  ;;  %v204_v6 = vadd.f32 %v203_v63, %v202_v23  ;;  %v217_v7 = vrot.slane %v216_v25, 4  ;;  %156 = vst [vmem:[%s445_s1] sm:$0xff] %v153_v24  ;;  %v223_v31 = vadd.f32 %v173_v20, %v165_v10 }
  0x21   :  { %v177_v8 = vrot.slane %v176_v0, 2  ;;  %v184_v13 = vrot.slane %v183_v1, 2  ;;  %v191_v14 = vrot.slane %v190_v26, 2  ;;  %v211_v27 = vadd.f32 %v210_v2, %v209_v61 }
  0x22   :  { %v198_v28 = vrot.slane %v197_v3, 2  ;;  %v205_v29 = vrot.slane %v204_v6, 2  ;;  %v218_v30 = vadd.f32 %v217_v7, %v216_v25  ;;  %v224_v39 = vrot.slane %v223_v31, 4 }
  0x23   :  { %v178_v32 = vadd.f32 %v177_v8, %v176_v0  ;;  %v185_v33 = vadd.f32 %v184_v13, %v183_v1  ;;  %v192_v34 = vadd.f32 %v191_v14, %v190_v26  ;;  %v212_v35 = vrot.slane %v211_v27, 2 }
  0x24   :  { %v199_v36 = vadd.f32 %v198_v28, %v197_v3  ;;  %v206_v37 = vadd.f32 %v205_v29, %v204_v6  ;;  %v219_v38 = vrot.slane %v218_v30, 2  ;;  %v225_v4 = vadd.f32 %v224_v39, %v223_v31 }
  0x25   :  { %v179_v40 = vrot.slane %v178_v32, 1  ;;  %v186_v41 = vrot.slane %v185_v33, 1  ;;  %v193_v42 = vrot.slane %v192_v34, 1  ;;  %v213_v43 = vadd.f32 %v212_v35, %v211_v27 }
  0x26   :  { %v200_v44 = vrot.slane %v199_v36, 1  ;;  %v207_v46 = vrot.slane %v206_v37, 1  ;;  %v220_v47 = vadd.f32 %v219_v38, %v218_v30  ;;  %v226_v15 = vrot.slane %v225_v4, 2 }
  0x27   :  { %v180_v5 = vadd.f32 %v179_v40, %v178_v32  ;;  %v187_v9 = vadd.f32 %v186_v41, %v185_v33  ;;  %v194_v48 = vadd.f32 %v193_v42, %v192_v34  ;;  %v214_v10 = vrot.slane %v213_v43, 1 }
  0x28   :  { %v201_v11 = vadd.f32 %v200_v44, %v199_v36  ;;  %v208_v49 = vadd.f32 %v207_v46, %v206_v37  ;;  %v221_v12 = vrot.slane %v220_v47, 1  ;;  %v227_v18 = vadd.f32 %v226_v15, %v225_v4 }
  0x29   :  { %v215_v16 = vadd.f32 %v214_v10, %v213_v43  ;;  %v238_v17 = vcombine.low %v180_v5, %v187_v9 }
  0x2a   :  { %v239_v19 = vcombine.low %v194_v48, %v201_v11  ;;  %v222_v50 = vadd.f32 %v221_v12, %v220_v47  ;;  %v228_v51 = vrot.slane %v227_v18, 1 }
  0x2b   :  { %v240_v52 = vcombine.low %v208_v49, %v215_v16  ;;  %v248_v53 = vrot.slane %v238_v17, %v396_v45 }
  0x2c   :  { %v255_v20 = vrot.slane %v239_v19, %v396_v45  ;;  %v229_v54 = vadd.f32 %v228_v51, %v227_v18 }
  0x2d   :  { %v262_v21 = vrot.slane %v240_v52, %v396_v45 }
  0x2e   :  { %v241_v55 = vcombine.low %v222_v50, %v229_v54  ;;  %v270_v56 = vcombine.low %v248_v53, %v255_v20 }
  0x30   :  { %v269_v22 = vrot.slane %v241_v55, %v396_v45  ;;  %v278_v23 = vrot.slane %v270_v56, %v396_v45 }
  0x32   :  { %v271_v57 = vcombine.low %v262_v21, %v269_v22 }
  0x34   :  { %v285_v58 = vrot.slane %v271_v57, %v396_v45 }
  0x36   :  { %v286_v59 = vcombine.low %v278_v23, %v285_v58 }
  0x38   :  { %289 = vst [vmem:[%s446_s2] sm:$0xff] %v286_v59 }

// kernel: _lambda_.33
= control target key start
LH: loop header
LB: loop body
LE: loop exit
PB: predicated region body
PF: predicated region fallthrough
CT: control target
= control target key end

     0   :  { %s3192_s9 = smov 0   ;;  %s3194_s10 = smov 0   ;;  %s4087_s0 = inlined_call_operand.vmem [shape: bf16[6144,128], index: 0, kind: input, shape index: {}]   ;;  %s4088_s1 = inlined_call_operand.vmem [shape: bf16[128,128], index: 1, kind: input, shape index: {}]   ;;  %s4089_s2 = inlined_call_operand.vmem [shape: bf16[6144,128], index: 2, kind: output, shape index: {}]  }
   0x1   :  { %s3196_s11 = smov 0  }
   0x2 LB: > { %s24_s12 = sadd.s32 1, %s3170_s10  ;;  %p2169_p0 = scmp.ge.s32.totalorder %s3174_s11, 1  ;;  %s3174_s11 = sphi %s3196_s11, %s12_s11   ;;  %s3170_s10 = sphi %s3194_s10, %s4244_s10   ;;  %s3166_s9 = sphi %s3192_s9, %s4243_s9  }
   0x3   : > { %p26_p1 = scmp.ge.s32.totalorder %s24_s12, 6  ;;  %p136_p2 = scmp.lt.s32.totalorder %s3174_s11, 7 }
   0x5   : > { %s4246_s12 = smov (%p26_p1, %s24_s12), 0  ;;  %p137_p3 = pnand %p2169_p0, %p136_p2 }
   0x7   : > { %140 = sbr.rel (%p137_p3) target bundleno = 385 (0x181), region = 28 }
   0xe   : > { %v3144_v0 = vld [vmem:[%s4088_s1] sm:$0xff]   ;;  %s2170_s15 = sshll.u32 %s3166_s9, 7  ;;  %v3145_v1 = vld [vmem:[%s4088_s1 + $0x8] sm:$0xff]   ;;  %v3146_v2 = vld [vmem:[%s4088_s1 + $0x10] sm:$0xff]   ;;  %v3176_v7 = vmov 0  }
   0xf   : > { %p166_p4 = scmp.lt.s32.totalorder %s2170_s15, 767  ;;  %2959 = vmatprep.subr.bf16.mxu0 %v3144_v0  ;;  %3103 = vmatprep.subr.bf16.mxu1 %v3144_v0  ;;  %v3147_v3 = vld [vmem:[%s4088_s1 + $0x18] sm:$0xff]   ;;  %v3148_v18 = vld [vmem:[%s4088_s1 + $0x20] sm:$0xff]   ;;  %v3149_v24 = vld [vmem:[%s4088_s1 + $0x28] sm:$0xff]  }
  0x10   : > { %2960 = vmatpush3.bf16.msra.mxu0 %v3144_v0  ;;  %3111 = vmatpush3.bf16.msra.mxu1 %v3144_v0  ;;  %v3150_v42 = vld [vmem:[%s4088_s1 + $0x30] sm:$0xff]  }
  0x11   : > { %s4248_s15 = smov (!%p166_p4, %s2170_s15), 767  ;;  %2961 = vmatprep.subr.bf16.mxu0 %v3145_v1  ;;  %3104 = vmatprep.subr.bf16.mxu1 %v3145_v1 }
  0x12   : > { %s2171_s20 = sshll.u32 %s4248_s15, 2 }
  0x13   : > { %s3227_s23 = scalar_lea.vmem %s4087_s0, %s2171_s20  ;;  %s4012_s8 = scalar_lea.vmem %s4089_s2, %s2171_s20 }
  0x14   : > { %2962 = vmatpush3.bf16.msra.mxu0 %v3145_v1  ;;  %3112 = vmatpush3.bf16.msra.mxu1 %v3145_v1  ;;  %v185_v4 = vld [vmem:[%s3227_s23] sm:$0xf]  ;;  %v186_v5 = vld [vmem:[%s3227_s23 + $0x4] sm:$0xf]  ;;  %v187_v13 = vld [vmem:[%s3227_s23 + $0x8] sm:$0xf] }
  0x15   : > { %2963 = vmatprep.subr.bf16.mxu0 %v3146_v2  ;;  %3105 = vmatprep.subr.bf16.mxu1 %v3146_v2  ;;  %v249_v6 = vld [vmem:[%s3227_s23 + $0x100] sm:$0xf]  ;;  %v313_v8 = vmax.bf16 %v3176_v7, %v185_v4  ;;  %v314_v9 = vmax.bf16 %v3176_v7, %v186_v5  ;;  %v250_v10 = vld [vmem:[%s3227_s23 + $0x104] sm:$0xf]  ;;  %v188_v15 = vld [vmem:[%s3227_s23 + $0xc] sm:$0xf]  ;;  %v3255_v25 = vmax.bf16 %v3176_v7, %v187_v13 }
  0x16   : > { %v377_v11 = vmax.bf16 %v3176_v7, %v249_v6  ;;  %v378_v12 = vmax.bf16 %v3176_v7, %v250_v10  ;;  %v251_v16 = vld [vmem:[%s3227_s23 + $0x108] sm:$0xf]  ;;  %v252_v17 = vld [vmem:[%s3227_s23 + $0x10c] sm:$0xf]  ;;  %v189_v20 = vld [vmem:[%s3227_s23 + $0x10] sm:$0xf]  ;;  %v3258_v26 = vmax.bf16 %v3176_v7, %v188_v15 }
  0x17   : > { %v2174_v14 = vcombine.low %v313_v8, %v314_v9  ;;  %v190_v21 = vld [vmem:[%s3227_s23 + $0x14] sm:$0xf]  ;;  %v253_v22 = vld [vmem:[%s3227_s23 + $0x110] sm:$0xf]  ;;  %v3261_v27 = vmax.bf16 %v3176_v7, %v251_v16  ;;  %v3264_v28 = vmax.bf16 %v3176_v7, %v252_v17  ;;  %v3267_v29 = vmax.bf16 %v3176_v7, %v189_v20  ;;  %v191_v31 = vld [vmem:[%s3227_s23 + $0x18] sm:$0xf] }
  0x18   : > { %2964 = vmatpush3.bf16.msra.mxu0 %v3146_v2  ;;  %3113 = vmatpush3.bf16.msra.mxu1 %v3146_v2  ;;  %v2206_v19 = vcombine.low %v377_v11, %v378_v12  ;;  %v254_v23 = vld [vmem:[%s3227_s23 + $0x114] sm:$0xf]  ;;  %v3270_v30 = vmax.bf16 %v3176_v7, %v190_v21  ;;  %v192_v32 = vld [vmem:[%s3227_s23 + $0x1c] sm:$0xf]  ;;  %v255_v33 = vld [vmem:[%s3227_s23 + $0x118] sm:$0xf]  ;;  %v3276_v34 = vmax.bf16 %v3176_v7, %v253_v22 }
  0x19   : > { %2965 = vmatprep.subr.bf16.mxu0 %v3147_v3  ;;  %3106 = vmatprep.subr.bf16.mxu1 %v3147_v3  ;;  %v3279_v35 = vmax.bf16 %v3176_v7, %v254_v23  ;;  %v256_v36 = vld [vmem:[%s3227_s23 + $0x11c] sm:$0xf]  ;;  %v193_v37 = vld [vmem:[%s3227_s23 + $0x20] sm:$0xf]  ;;  %v194_v38 = vld [vmem:[%s3227_s23 + $0x24] sm:$0xf]  ;;  %v2175_v43 = vcombine.low %v3255_v25, %v3258_v26  ;;  %v2207_v44 = vcombine.low %v3261_v27, %v3264_v28 }
  0x1a   : > { %2975 = vmatprep.mubr.bf16.mxu0 %v2174_v14  ;;  %3039 = vmatprep.mubr.bf16.mxu1 %v2206_v19  ;;  %v257_v39 = vld [vmem:[%s3227_s23 + $0x120] sm:$0xf]  ;;  %v258_v40 = vld [vmem:[%s3227_s23 + $0x124] sm:$0xf]  ;;  %v195_v41 = vld [vmem:[%s3227_s23 + $0x28] sm:$0xf]  ;;  %v3295_v45 = vmax.bf16 %v3176_v7, %v191_v31  ;;  %v3298_v46 = vmax.bf16 %v3176_v7, %v192_v32  ;;  %v3306_v51 = vmax.bf16 %v3176_v7, %v255_v33 }
  0x1b   : > { %v196_v47 = vld [vmem:[%s3227_s23 + $0x2c] sm:$0xf]  ;;  %v259_v48 = vld [vmem:[%s3227_s23 + $0x128] sm:$0xf]  ;;  %v3309_v52 = vmax.bf16 %v3176_v7, %v256_v36  ;;  %v197_v53 = vld [vmem:[%s3227_s23 + $0x30] sm:$0xf]  ;;  %v3317_v57 = vmax.bf16 %v3176_v7, %v193_v37  ;;  %v3320_v58 = vmax.bf16 %v3176_v7, %v194_v38  ;;  %v3326_v62 = vmax.bf16 %v3176_v7, %v257_v39 }
  0x1c   : > { %2966 = vmatpush3.bf16.msra.mxu0 %v3147_v3  ;;  %3114 = vmatpush3.bf16.msra.mxu1 %v3147_v3  ;;  %v260_v49 = vld [vmem:[%s3227_s23 + $0x12c] sm:$0xf]  ;;  %v198_v54 = vld [vmem:[%s3227_s23 + $0x34] sm:$0xf]  ;;  %v261_v55 = vld [vmem:[%s3227_s23 + $0x130] sm:$0xf]  ;;  %v3329_v63 = vmax.bf16 %v3176_v7, %v258_v40  ;;  %v3332_v0 = vmax.bf16 %v3176_v7, %v195_v41  ;;  %v3335_v1 = vmax.bf16 %v3176_v7, %v196_v47 }
  0x1d   : > { %2967 = vmatprep.subr.bf16.mxu0 %v3148_v18  ;;  %3107 = vmatprep.subr.bf16.mxu1 %v3148_v18  ;;  %v262_v59 = vld [vmem:[%s3227_s23 + $0x134] sm:$0xf]  ;;  %v199_v60 = vld [vmem:[%s3227_s23 + $0x38] sm:$0xf]  ;;  %v200_v61 = vld [vmem:[%s3227_s23 + $0x3c] sm:$0xf]  ;;  %v3341_v5 = vmax.bf16 %v3176_v7, %v259_v48  ;;  %v3344_v6 = vmax.bf16 %v3176_v7, %v260_v49  ;;  %v3347_v8 = vmax.bf16 %v3176_v7, %v197_v53 }
  0x1e   : > { %v263_v2 = vld [vmem:[%s3227_s23 + $0x138] sm:$0xf]  ;;  %v264_v3 = vld [vmem:[%s3227_s23 + $0x13c] sm:$0xf]  ;;  %v201_v4 = vld [vmem:[%s3227_s23 + $0x40] sm:$0xf]  ;;  %v3350_v9 = vmax.bf16 %v3176_v7, %v198_v54  ;;  %v3356_v13 = vmax.bf16 %v3176_v7, %v261_v55  ;;  %v3359_v14 = vmax.bf16 %v3176_v7, %v262_v59  ;;  %v3362_v15 = vmax.bf16 %v3176_v7, %v199_v60 }
  0x1f   : > { %v202_v10 = vld [vmem:[%s3227_s23 + $0x44] sm:$0xf]  ;;  %v265_v11 = vld [vmem:[%s3227_s23 + $0x140] sm:$0xf]  ;;  %v3151_v16 = vld [vmem:[%s4088_s1 + $0x38] sm:$0xff]   ;;  %v3368_v17 = vmax.bf16 %v3176_v7, %v200_v61  ;;  %v3374_v19 = vmax.bf16 %v3176_v7, %v264_v3  ;;  %v3377_v20 = vmax.bf16 %v3176_v7, %v201_v4  ;;  %v4126_v25 = vcombine.low %v3267_v29, %v3270_v30 }
  0x20   : > { %2968 = vmatpush3.bf16.msra.mxu0 %v3148_v18  ;;  %3115 = vmatpush3.bf16.msra.mxu1 %v3148_v18  ;;  %v266_v12 = vld [vmem:[%s3227_s23 + $0x144] sm:$0xf]  ;;  %v3371_v18 = vmax.bf16 %v3176_v7, %v263_v2  ;;  %v3380_v21 = vmax.bf16 %v3176_v7, %v202_v10  ;;  %v3383_v22 = vmax.bf16 %v3176_v7, %v265_v11  ;;  %v204_v37 = vld [vmem:[%s3227_s23 + $0x4c] sm:$0xf]  ;;  %v267_v38 = vld [vmem:[%s3227_s23 + $0x148] sm:$0xf] }
  0x21   : > { %2969 = vmatprep.subr.bf16.mxu0 %v3149_v24  ;;  %3108 = vmatprep.subr.bf16.mxu1 %v3149_v24  ;;  %v3386_v23 = vmax.bf16 %v3176_v7, %v266_v12  ;;  %v268_v39 = vld [vmem:[%s3227_s23 + $0x14c] sm:$0xf]  ;;  %v205_v48 = vld [vmem:[%s3227_s23 + $0x50] sm:$0xf]  ;;  %v206_v49 = vld [vmem:[%s3227_s23 + $0x54] sm:$0xf]  ;;  %v3426_v10 = vmax.bf16 %v3176_v7, %v204_v37  ;;  %v3432_v54 = vmax.bf16 %v3176_v7, %v267_v38 }
  0x22   : > { %v211_v53 = vld [vmem:[%s3227_s23 + $0x68] sm:$0xf]  ;;  %v269_v59 = vld [vmem:[%s3227_s23 + $0x150] sm:$0xf]  ;;  %v270_v60 = vld [vmem:[%s3227_s23 + $0x154] sm:$0xf]  ;;  %v3438_v2 = vmax.bf16 %v3176_v7, %v205_v48  ;;  %v3447_v38 = vmax.bf16 %v3176_v7, %v206_v49  ;;  %v4127_v26 = vcombine.low %v3276_v34, %v3279_v35 }
  0x23   : > { %v212_v61 = vld [vmem:[%s3227_s23 + $0x6c] sm:$0xf]  ;;  %v275_v11 = vld [vmem:[%s3227_s23 + $0x168] sm:$0xf]  ;;  %v213_v55 = vld [vmem:[%s3227_s23 + $0x70] sm:$0xf]  ;;  %v3458_v40 = vmax.bf16 %v3176_v7, %v270_v60 }
  0x24   : > { %2970 = vmatpush3.bf16.msra.mxu0 %v3149_v24  ;;  %3116 = vmatpush3.bf16.msra.mxu1 %v3149_v24  ;;  %v203_v24 = vld [vmem:[%s3227_s23 + $0x48] sm:$0xf]  ;;  %v276_v12 = vld [vmem:[%s3227_s23 + $0x16c] sm:$0xf]  ;;  %v214_v37 = vld [vmem:[%s3227_s23 + $0x74] sm:$0xf]  ;;  %v3453_v48 = vmax.bf16 %v3176_v7, %v212_v61  ;;  %v3461_v36 = vmax.bf16 %v3176_v7, %v275_v11  ;;  %v3467_v49 = vmax.bf16 %v3176_v7, %v213_v55 }
  0x25   : > { %2971 = vmatprep.subr.bf16.mxu0 %v3150_v42  ;;  %3109 = vmatprep.subr.bf16.mxu1 %v3150_v42  ;;  %v3423_v4 = vmax.bf16 %v3176_v7, %v203_v24  ;;  %v3441_v24 = vmax.bf16 %v3176_v7, %v211_v53  ;;  %v277_v3 = vld [vmem:[%s3227_s23 + $0x170] sm:$0xf]  ;;  %v278_v47 = vld [vmem:[%s3227_s23 + $0x174] sm:$0xf]  ;;  %v215_v53 = vld [vmem:[%s3227_s23 + $0x78] sm:$0xf]  ;;  %v3474_v60 = vmax.bf16 %v3176_v7, %v214_v37 }
  0x26   : > { %v216_v41 = vld [vmem:[%s3227_s23 + $0x7c] sm:$0xf]  ;;  %v3477_v11 = vmax.bf16 %v3176_v7, %v277_v3  ;;  %v217_v32 = vld [vmem:[%s3227_s23 + $0x80] sm:$0xf]  ;;  %v218_v55 = vld [vmem:[%s3227_s23 + $0x84] sm:$0xf]  ;;  %v3494_v37 = vmax.bf16 %v3176_v7, %v215_v53 }
  0x27   : > { %v280_v61 = vld [vmem:[%s3227_s23 + $0x17c] sm:$0xf]  ;;  %v281_v31 = vld [vmem:[%s3227_s23 + $0x180] sm:$0xf]  ;;  %v282_v33 = vld [vmem:[%s3227_s23 + $0x184] sm:$0xf]  ;;  %v3523_v34 = vmax.bf16 %v3176_v7, %v217_v32  ;;  %v3526_v35 = vmax.bf16 %v3176_v7, %v218_v55 }
  0x28   : > { %2972 = vmatpush3.bf16.msra.mxu0 %v3150_v42  ;;  %3117 = vmatpush3.bf16.msra.mxu1 %v3150_v42  ;;  %v3435_v42 = vmax.bf16 %v3176_v7, %v268_v39  ;;  %v3450_v39 = vmax.bf16 %v3176_v7, %v269_v59  ;;  %v279_v59 = vld [vmem:[%s3227_s23 + $0x178] sm:$0xf]  ;;  %4124 = vst [vmem:[#allocation2_spill] sm:$0xff] %v3494_v37  ;;  %v219_v56 = vld [vmem:[%s3227_s23 + $0x88] sm:$0xf] }
  0x29   : > { %2973 = vmatprep.subr.bf16.mxu0 %v3151_v16  ;;  %3110 = vmatprep.subr.bf16.mxu1 %v3151_v16  ;;  %v220_v50 = vld [vmem:[%s3227_s23 + $0x8c] sm:$0xf]  ;;  %v3520_v30 = vmax.bf16 %v3176_v7, %v280_v61  ;;  %4129 = vst [vmem:[#allocation5_spill] sm:$0xff] %v3523_v34  ;;  %4130 = vst [vmem:[#allocation6_spill] sm:$0xff] %v3526_v35  ;;  %v221_v53 = vld [vmem:[%s3227_s23 + $0x90] sm:$0xf]  ;;  %v3537_v61 = vmax.bf16 %v3176_v7, %v219_v56 }
  0x2a   : > { %v3540_v32 = vmax.bf16 %v3176_v7, %v220_v50  ;;  %v285_v29 = vld [vmem:[%s3227_s23 + $0x190] sm:$0xf]  ;;  %v286_v55 = vld [vmem:[%s3227_s23 + $0x194] sm:$0xf]  ;;  %v223_v28 = vld [vmem:[%s3227_s23 + $0x98] sm:$0xf] }
  0x2b   : > { %4128 = vst [vmem:[#allocation4_spill] sm:$0xff] %v3520_v30  ;;  %4132 = vst [vmem:[#allocation8_spill] sm:$0xff] %v3537_v61  ;;  %v224_v50 = vld [vmem:[%s3227_s23 + $0x9c] sm:$0xf]  ;;  %v287_v3 = vld [vmem:[%s3227_s23 + $0x198] sm:$0xf]  ;;  %v3573_v30 = vmax.bf16 %v3176_v7, %v285_v29  ;;  %v3576_v37 = vmax.bf16 %v3176_v7, %v286_v55  ;;  %v3579_v27 = vmax.bf16 %v3176_v7, %v223_v28 }
  0x2c   : > { %2974 = vmatpush3.bf16.msra.mxu0 %v3151_v16  ;;  %3118 = vmatpush3.bf16.msra.mxu1 %v3151_v16  ;;  %v3464_v16 = vmax.bf16 %v3176_v7, %v276_v12  ;;  %v3480_v12 = vmax.bf16 %v3176_v7, %v278_v47  ;;  %v3497_v47 = vmax.bf16 %v3176_v7, %v216_v41  ;;  %v284_v41 = vld [vmem:[%s3227_s23 + $0x18c] sm:$0xf]  ;;  %v226_v35 = vld [vmem:[%s3227_s23 + $0xa4] sm:$0xf]  ;;  %v227_v34 = vld [vmem:[%s3227_s23 + $0xa8] sm:$0xf] }
  0x2d   : > { %4133 = vst [vmem:[#allocation9_spill] sm:$0xff] %v3540_v32  ;;  %v3553_v56 = vmax.bf16 %v3176_v7, %v284_v41  ;;  %v225_v41 = vld [vmem:[%s3227_s23 + $0xa0] sm:$0xf]  ;;  %v3586_v61 = vmax.bf16 %v3176_v7, %v224_v50  ;;  %v3589_v29 = vmax.bf16 %v3176_v7, %v287_v3  ;;  %v228_v28 = vld [vmem:[%s3227_s23 + $0xac] sm:$0xf]  ;;  %v4139_v32 = vcombine.low %v3306_v51, %v3309_v52 }
  0x2e   : > { %4125 = vst [vmem:[#allocation3_spill] sm:$0xff] %v3497_v47  ;;  %v288_v47 = vld [vmem:[%s3227_s23 + $0x19c] sm:$0xf]  ;;  %v3606_v50 = vmax.bf16 %v3176_v7, %v225_v41  ;;  %v231_v41 = vld [vmem:[%s3227_s23 + $0xb8] sm:$0xf] }
  0x2f   : > { %2976 = vmatmul.mubr.bf16.vlgmr.msra.gmra.mrb[0].mxu0 %v2175_v43  ;;  %3040 = vmatmul.mubr.bf16.vlgmr.msra.gmra.mrb[0].mxu1 %v2207_v44  ;;  %v3513_v43 = vmax.bf16 %v3176_v7, %v279_v59  ;;  %v283_v44 = vld [vmem:[%s3227_s23 + $0x188] sm:$0xf]  ;;  %v222_v59 = vld [vmem:[%s3227_s23 + $0x94] sm:$0xf]  ;;  %4135 = vst [vmem:[#allocation11_spill] sm:$0xff] %v3553_v56  ;;  %v3592_v55 = vmax.bf16 %v3176_v7, %v288_v47 }
  0x30   : > { %2979 = vmatprep.mubr.bf16.mxu0 %v4126_v25  ;;  %3043 = vmatprep.mubr.bf16.mxu1 %v4127_v26  ;;  %v3531_v25 = vmax.bf16 %v3176_v7, %v281_v31  ;;  %v3534_v26 = vmax.bf16 %v3176_v7, %v282_v33  ;;  %v3550_v33 = vmax.bf16 %v3176_v7, %v283_v44  ;;  %v291_v56 = vld [vmem:[%s3227_s23 + $0x1a8] sm:$0xf]  ;;  %v233_v52 = vld [vmem:[%s3227_s23 + $0xc0] sm:$0xf] }
  0x31   : > { %v3563_v31 = vmax.bf16 %v3176_v7, %v221_v53  ;;  %v3566_v44 = vmax.bf16 %v3176_v7, %v222_v59  ;;  %v289_v53 = vld [vmem:[%s3227_s23 + $0x1a0] sm:$0xf]  ;;  %v290_v59 = vld [vmem:[%s3227_s23 + $0x1a4] sm:$0xf]  ;;  %4140 = vst [vmem:[#allocation14_spill] sm:$0xff] %v3606_v50  ;;  %v3609_v47 = vmax.bf16 %v3176_v7, %v226_v35  ;;  %v3691_v51 = vmax.bf16 %v3176_v7, %v233_v52 }
  0x32   : > { %4131 = vst [vmem:[#allocation7_spill] sm:$0xff] %v3534_v26  ;;  %4134 = vst [vmem:[#allocation10_spill] sm:$0xff] %v3550_v33  ;;  %v4138_v33 = vcombine.low %v3295_v45, %v3298_v46  ;;  %v230_v26 = vld [vmem:[%s3227_s23 + $0xb4] sm:$0xf]  ;;  %v4142_v45 = vcombine.low %v3317_v57, %v3320_v58  ;;  %v4143_v46 = vcombine.low %v3326_v62, %v3329_v63  ;;  %v295_v57 = vld [vmem:[%s3227_s23 + $0x1b8] sm:$0xf] }
  0x33   : > { %4136 = vst [vmem:[#allocation12_spill] sm:$0xff] %v3563_v31  ;;  %4137 = vst [vmem:[#allocation13_spill] sm:$0xff] %v3566_v44  ;;  %v292_v44 = vld [vmem:[%s3227_s23 + $0x1ac] sm:$0xf]  ;;  %v229_v31 = vld [vmem:[%s3227_s23 + $0xb0] sm:$0xf]  ;;  %v3625_v35 = vmax.bf16 %v3176_v7, %v289_v53  ;;  %v3632_v58 = vmax.bf16 %v3176_v7, %v290_v59  ;;  %v3635_v62 = vmax.bf16 %v3176_v7, %v227_v34 }
  0x34   : > { %4141 = vst [vmem:[#allocation15_spill] sm:$0xff] %v3609_v47  ;;  %v3638_v63 = vmax.bf16 %v3176_v7, %v228_v28  ;;  %v232_v53 = vld [vmem:[%s3227_s23 + $0xbc] sm:$0xf]  ;;  %v3649_v59 = vmax.bf16 %v3176_v7, %v229_v31  ;;  %v3652_v34 = vmax.bf16 %v3176_v7, %v230_v26  ;;  %v234_v26 = vld [vmem:[%s3227_s23 + $0xc4] sm:$0xf] }
  0x35   : > { %4144 = vst [vmem:[#allocation16_spill] sm:$0xff] %v3632_v58  ;;  %4145 = vst [vmem:[#allocation17_spill] sm:$0xff] %v3635_v62  ;;  %v296_v28 = vld [vmem:[%s3227_s23 + $0x1bc] sm:$0xf]  ;;  %v297_v3 = vld [vmem:[%s3227_s23 + $0x1c0] sm:$0xf]  ;;  %v3685_v58 = vmax.bf16 %v3176_v7, %v295_v57 }
  0x36   : > { %4146 = vst [vmem:[#allocation18_spill] sm:$0xff] %v3638_v63  ;;  %4148 = vst [vmem:[#allocation20_spill] sm:$0xff] %v3649_v59  ;;  %v298_v47 = vld [vmem:[%s3227_s23 + $0x1c4] sm:$0xf]  ;;  %v236_v63 = vld [vmem:[%s3227_s23 + $0xcc] sm:$0xf]  ;;  %v3688_v50 = vmax.bf16 %v3176_v7, %v296_v28  ;;  %v3698_v59 = vmax.bf16 %v3176_v7, %v234_v26  ;;  %v3701_v57 = vmax.bf16 %v3176_v7, %v297_v3 }
  0x37   : > { %2980 = vmatmul.mubr.bf16.gmra.mrb[4].mxu0 %v4138_v33  ;;  %3044 = vmatmul.mubr.bf16.gmra.mrb[4].mxu1 %v4139_v32  ;;  %v293_v32 = vld [vmem:[%s3227_s23 + $0x1b0] sm:$0xf]  ;;  %v294_v33 = vld [vmem:[%s3227_s23 + $0x1b4] sm:$0xf]  ;;  %4149 = vst [vmem:[#allocation21_spill] sm:$0xff] %v3652_v34  ;;  %v3704_v28 = vmax.bf16 %v3176_v7, %v298_v47  ;;  %v4155_v34 = vcombine.low %v3341_v5, %v3344_v6 }
  0x38   : > { %2983 = vmatprep.mubr.bf16.mxu0 %v4142_v45  ;;  %3047 = vmatprep.mubr.bf16.mxu1 %v4143_v46  ;;  %v3643_v45 = vmax.bf16 %v3176_v7, %v291_v56  ;;  %v3646_v46 = vmax.bf16 %v3176_v7, %v292_v44  ;;  %v3662_v44 = vmax.bf16 %v3176_v7, %v293_v32  ;;  %v237_v62 = vld [vmem:[%s3227_s23 + $0xd0] sm:$0xf]  ;;  %v238_v52 = vld [vmem:[%s3227_s23 + $0xd4] sm:$0xf]  ;;  %v243_v6 = vld [vmem:[%s3227_s23 + $0xe8] sm:$0xf] }
  0x39   : > { %v3665_v31 = vmax.bf16 %v3176_v7, %v294_v33  ;;  %v3675_v56 = vmax.bf16 %v3176_v7, %v231_v41  ;;  %v3678_v32 = vmax.bf16 %v3176_v7, %v232_v53  ;;  %v235_v33 = vld [vmem:[%s3227_s23 + $0xc8] sm:$0xf]  ;;  %v300_v53 = vld [vmem:[%s3227_s23 + $0x1cc] sm:$0xf]  ;;  %v3721_v47 = vmax.bf16 %v3176_v7, %v236_v63 }
  0x3a   : > { %4147 = vst [vmem:[#allocation19_spill] sm:$0xff] %v3646_v46  ;;  %4150 = vst [vmem:[#allocation22_spill] sm:$0xff] %v3662_v44  ;;  %v299_v41 = vld [vmem:[%s3227_s23 + $0x1c8] sm:$0xf]  ;;  %v4154_v44 = vcombine.low %v3332_v0, %v3335_v1  ;;  %v3718_v26 = vmax.bf16 %v3176_v7, %v235_v33  ;;  %v240_v46 = vld [vmem:[%s3227_s23 + $0xdc] sm:$0xf]  ;;  %v4158_v0 = vcombine.low %v3347_v8, %v3350_v9 }
  0x3b   : > { %4151 = vst [vmem:[#allocation23_spill] sm:$0xff] %v3665_v31  ;;  %4152 = vst [vmem:[#allocation24_spill] sm:$0xff] %v3675_v56  ;;  %v301_v31 = vld [vmem:[%s3227_s23 + $0x1d0] sm:$0xf]  ;;  %v239_v56 = vld [vmem:[%s3227_s23 + $0xd8] sm:$0xf]  ;;  %v4159_v1 = vcombine.low %v3356_v13, %v3359_v14  ;;  %v3737_v63 = vmax.bf16 %v3176_v7, %v299_v41  ;;  %v3744_v9 = vmax.bf16 %v3176_v7, %v300_v53 }
  0x3c   : > { %4153 = vst [vmem:[#allocation25_spill] sm:$0xff] %v3678_v32  ;;  %4156 = vst [vmem:[#allocation26_spill] sm:$0xff] %v3718_v26  ;;  %v302_v32 = vld [vmem:[%s3227_s23 + $0x1d4] sm:$0xf]  ;;  %v3747_v13 = vmax.bf16 %v3176_v7, %v237_v62  ;;  %v3750_v14 = vmax.bf16 %v3176_v7, %v238_v52  ;;  %v241_v33 = vld [vmem:[%s3227_s23 + $0xe0] sm:$0xf]  ;;  %v3761_v53 = vmax.bf16 %v3176_v7, %v239_v56 }
  0x3d   : > { %4157 = vst [vmem:[#allocation27_spill] sm:$0xff] %v3721_v47  ;;  %4160 = vst [vmem:[#allocation28_spill] sm:$0xff] %v3744_v9  ;;  %v242_v41 = vld [vmem:[%s3227_s23 + $0xe4] sm:$0xf]  ;;  %v3764_v62 = vmax.bf16 %v3176_v7, %v240_v46  ;;  %v305_v8 = vld [vmem:[%s3227_s23 + $0x1e0] sm:$0xf]  ;;  %v3803_v5 = vmax.bf16 %v3176_v7, %v243_v6  ;;  %v4168_v6 = vcombine.low %v3362_v15, %v3368_v17 }
  0x3e   : > { %4161 = vst [vmem:[#allocation29_spill] sm:$0xff] %v3747_v13  ;;  %4162 = vst [vmem:[#allocation30_spill] sm:$0xff] %v3750_v14  ;;  %v306_v52 = vld [vmem:[%s3227_s23 + $0x1e4] sm:$0xf]  ;;  %v244_v3 = vld [vmem:[%s3227_s23 + $0xec] sm:$0xf]  ;;  %v3797_v9 = vmax.bf16 %v3176_v7, %v305_v8  ;;  %v4170_v15 = vcombine.low %v3377_v20, %v3380_v21  ;;  %v4171_v17 = vcombine.low %v3383_v22, %v3386_v23 }
  0x3f   : > { %2984 = vmatmul.mubr.bf16.gmra.mrb[8].mxu0 %v4154_v44  ;;  %3048 = vmatmul.mubr.bf16.gmra.mrb[8].mxu1 %v4155_v34  ;;  %v303_v34 = vld [vmem:[%s3227_s23 + $0x1d8] sm:$0xf]  ;;  %v304_v44 = vld [vmem:[%s3227_s23 + $0x1dc] sm:$0xf]  ;;  %4163 = vst [vmem:[#allocation31_spill] sm:$0xff] %v3761_v53  ;;  %4164 = vst [vmem:[#allocation32_spill] sm:$0xff] %v3764_v62  ;;  %v3800_v26 = vmax.bf16 %v3176_v7, %v306_v52  ;;  %v3809_v62 = vmax.bf16 %v3176_v7, %v244_v3 }
  0x40   : > { %2987 = vmatprep.mubr.bf16.mxu0 %v4158_v0  ;;  %3051 = vmatprep.mubr.bf16.mxu1 %v4159_v1  ;;  %v3755_v0 = vmax.bf16 %v3176_v7, %v301_v31  ;;  %v3758_v1 = vmax.bf16 %v3176_v7, %v302_v32  ;;  %v3774_v32 = vmax.bf16 %v3176_v7, %v303_v34  ;;  %v307_v46 = vld [vmem:[%s3227_s23 + $0x1e8] sm:$0xf]  ;;  %v308_v47 = vld [vmem:[%s3227_s23 + $0x1ec] sm:$0xf]  ;;  %v246_v14 = vld [vmem:[%s3227_s23 + $0xf4] sm:$0xf] }
  0x41   : > { %v3777_v56 = vmax.bf16 %v3176_v7, %v304_v44  ;;  %v3787_v31 = vmax.bf16 %v3176_v7, %v241_v33  ;;  %v3790_v34 = vmax.bf16 %v3176_v7, %v242_v41  ;;  %v245_v44 = vld [vmem:[%s3227_s23 + $0xf0] sm:$0xf]  ;;  %v3812_v13 = vmax.bf16 %v3176_v7, %v307_v46  ;;  %v247_v52 = vld [vmem:[%s3227_s23 + $0xf8] sm:$0xf] }
  0x42   : > { %4165 = vst [vmem:[#allocation33_spill] sm:$0xff] %v3774_v32  ;;  %v309_v33 = vld [vmem:[%s3227_s23 + $0x1f0] sm:$0xf]  ;;  %v3815_v8 = vmax.bf16 %v3176_v7, %v308_v47  ;;  %v248_v32 = vld [vmem:[%s3227_s23 + $0xfc] sm:$0xf]  ;;  %v4169_v53 = vcombine.low %v3371_v18, %v3374_v19  ;;  %v3829_v46 = vmax.bf16 %v3176_v7, %v245_v44  ;;  %v3832_v47 = vmax.bf16 %v3176_v7, %v246_v14 }
  0x43   : > { %4166 = vst [vmem:[#allocation34_spill] sm:$0xff] %v3777_v56  ;;  %4167 = vst [vmem:[#allocation35_spill] sm:$0xff] %v3790_v34  ;;  %v310_v56 = vld [vmem:[%s3227_s23 + $0x1f4] sm:$0xf]  ;;  %v311_v41 = vld [vmem:[%s3227_s23 + $0x1f8] sm:$0xf]  ;;  %v3847_v14 = vmax.bf16 %v3176_v7, %v309_v33  ;;  %v3855_v21 = vmax.bf16 %v3176_v7, %v247_v52  ;;  %v3858_v22 = vmax.bf16 %v3176_v7, %v248_v32 }
  0x44   : > { %v312_v34 = vld [vmem:[%s3227_s23 + $0x1fc] sm:$0xf]  ;;  %v3852_v20 = vmax.bf16 %v3176_v7, %v310_v56  ;;  %v3861_v23 = vmax.bf16 %v3176_v7, %v311_v41  ;;  %v2183_v33 = vcombine.low %v3423_v4, %v3426_v10  ;;  %v2215_v56 = vcombine.low %v3432_v54, %v3435_v42  ;;  %v207_v52 = vld [vmem:[%s3227_s23 + $0x58] sm:$0xf]  ;;  %v209_v4 = vld [vmem:[%s3227_s23 + $0x60] sm:$0xf] }
  0x45   : > { %v3864_v44 = vmax.bf16 %v3176_v7, %v312_v34  ;;  %v2184_v41 = vcombine.low %v3438_v2, %v3447_v38  ;;  %v2216_v34 = vcombine.low %v3450_v39, %v3458_v40  ;;  %v210_v54 = vld [vmem:[%s3227_s23 + $0x64] sm:$0xf]  ;;  %v273_v10 = vld [vmem:[%s3227_s23 + $0x160] sm:$0xf]  ;;  %v335_v32 = vmax.bf16 %v3176_v7, %v207_v52 }
  0x46   : > { %v274_v19 = vld [vmem:[%s3227_s23 + $0x164] sm:$0xf]  ;;  %v337_v40 = vmax.bf16 %v3176_v7, %v209_v4  ;;  %v338_v39 = vmax.bf16 %v3176_v7, %v210_v54  ;;  %v4192_v4 = vld [vmem:[#allocation12_spill] sm:$0xff]  ;;  %v4193_v54 = vld [vmem:[#allocation13_spill] sm:$0xff] }
  0x47   : > { %2988 = vmatmul.mubr.bf16.gmra.mrb[12].mxu0 %v4168_v6  ;;  %3052 = vmatmul.mubr.bf16.gmra.mrb[12].mxu1 %v4169_v53  ;;  %v208_v6 = vld [vmem:[%s3227_s23 + $0x5c] sm:$0xf]  ;;  %v2237_v42 = vcombine.low %v3861_v23, %v3864_v44  ;;  %v401_v23 = vmax.bf16 %v3176_v7, %v273_v10  ;;  %v402_v44 = vmax.bf16 %v3176_v7, %v274_v19  ;;  %v4177_v19 = vld [vmem:[#allocation3_spill] sm:$0xff] }
  0x48   : > { %2991 = vmatprep.mubr.bf16.mxu0 %v4170_v15  ;;  %3055 = vmatprep.mubr.bf16.mxu1 %v4171_v17  ;;  %v271_v17 = vld [vmem:[%s3227_s23 + $0x158] sm:$0xf]  ;;  %v272_v53 = vld [vmem:[%s3227_s23 + $0x15c] sm:$0xf]  ;;  %v336_v18 = vmax.bf16 %v3176_v7, %v208_v6  ;;  %v2186_v3 = vcombine.low %v337_v40, %v338_v39  ;;  %v4195_v10 = vcombine.low %v3573_v30, %v3576_v37  ;;  %v4199_v40 = vld [vmem:[#allocation15_spill] sm:$0xff] }
  0x49   : > { %v399_v2 = vmax.bf16 %v3176_v7, %v271_v17  ;;  %v400_v38 = vmax.bf16 %v3176_v7, %v272_v53  ;;  %v2218_v6 = vcombine.low %v401_v23, %v402_v44  ;;  %v4172_v53 = vcombine.low %v3441_v24, %v3453_v48  ;;  %v4181_v48 = vld [vmem:[#allocation5_spill] sm:$0xff]  ;;  %v4201_v23 = vld [vmem:[#allocation16_spill] sm:$0xff]  ;;  %v4206_v30 = vld [vmem:[#allocation19_spill] sm:$0xff] }
  0x4a   : > { %v2185_v15 = vcombine.low %v335_v32, %v336_v18  ;;  %v4175_v7 = vcombine.low %v3477_v11, %v3480_v12  ;;  %v4176_v18 = vld [vmem:[#allocation2_spill] sm:$0xff]  ;;  %v4179_v32 = vld [vmem:[#allocation4_spill] sm:$0xff]  ;;  %v4202_v44 = vcombine.low %v3625_v35, %v4201_v23 }
  0x4b   : > { %v2217_v52 = vcombine.low %v399_v2, %v400_v38  ;;  %v4180_v24 = vcombine.low %v3513_v43, %v4179_v32  ;;  %v4189_v12 = vld [vmem:[#allocation10_spill] sm:$0xff]  ;;  %v4194_v43 = vcombine.low %v4192_v4, %v4193_v54  ;;  %v4197_v2 = vcombine.low %v3589_v29, %v3592_v55 }
  0x4c   : > { %v4198_v38 = vld [vmem:[#allocation14_spill] sm:$0xff] }
  0x4d   : > { %v4200_v39 = vcombine.low %v4198_v38, %v4199_v40  ;;  %v4211_v55 = vld [vmem:[#allocation22_spill] sm:$0xff] }
  0x4e   : > { %v4220_v32 = vld [vmem:[#allocation26_spill] sm:$0xff] }
  0x4f   : > { %2992 = vmatmul.mubr.bf16.gmra.mrb[16].mxu0 %v2183_v33  ;;  %3056 = vmatmul.mubr.bf16.gmra.mrb[16].mxu1 %v2215_v56  ;;  %v4173_v33 = vcombine.low %v3461_v36, %v3464_v16  ;;  %v4174_v56 = vcombine.low %v3467_v49, %v3474_v60  ;;  %v4184_v16 = vld [vmem:[#allocation7_spill] sm:$0xff]  ;;  %v4186_v60 = vld [vmem:[#allocation8_spill] sm:$0xff] }
  0x50   : > { %2995 = vmatprep.mubr.bf16.mxu0 %v2184_v41  ;;  %3059 = vmatprep.mubr.bf16.mxu1 %v2216_v34  ;;  %v4185_v49 = vcombine.low %v3531_v25, %v4184_v16  ;;  %v4187_v41 = vld [vmem:[#allocation9_spill] sm:$0xff]  ;;  %v4190_v34 = vld [vmem:[#allocation11_spill] sm:$0xff]  ;;  %v4196_v25 = vcombine.low %v3579_v27, %v3586_v61  ;;  %v4207_v27 = vcombine.low %v3643_v45, %v4206_v30  ;;  %v4208_v61 = vld [vmem:[#allocation20_spill] sm:$0xff] }
  0x51   : > { %v4188_v11 = vcombine.low %v4186_v60, %v4187_v41  ;;  %v4191_v17 = vcombine.low %v4189_v12, %v4190_v34  ;;  %v4218_v45 = vcombine.low %v3691_v51, %v3698_v59  ;;  %v4225_v16 = vld [vmem:[#allocation29_spill] sm:$0xff]  ;;  %v4228_v51 = vcombine.low %v3755_v0, %v3758_v1  ;;  %v4230_v59 = vld [vmem:[#allocation32_spill] sm:$0xff]  ;;  %v4233_v60 = vld [vmem:[#allocation34_spill] sm:$0xff] }
  0x52   : > { %v4237_v12 = vcombine.low %v3797_v9, %v3800_v26  ;;  %v4238_v0 = vcombine.low %v3803_v5, %v3809_v62  ;;  %v4239_v1 = vcombine.low %v3812_v13, %v3815_v8  ;;  %v4240_v34 = vcombine.low %v3829_v46, %v3832_v47 }
  0x53   : > { %v4242_v26 = vcombine.low %v3855_v21, %v3858_v22 }
  0x57   : > { %2996 = vmatmul.mubr.bf16.gmra.mrb[20].mxu0 %v2185_v15  ;;  %3060 = vmatmul.mubr.bf16.gmra.mrb[20].mxu1 %v2217_v52  ;;  %v4182_v15 = vld [vmem:[#allocation6_spill] sm:$0xff]  ;;  %v4203_v52 = vld [vmem:[#allocation17_spill] sm:$0xff] }
  0x58   : > { %2999 = vmatprep.mubr.bf16.mxu0 %v2186_v3  ;;  %3063 = vmatprep.mubr.bf16.mxu1 %v2218_v6  ;;  %v4178_v3 = vcombine.low %v4176_v18, %v4177_v19  ;;  %v4183_v36 = vcombine.low %v4181_v48, %v4182_v15  ;;  %v4204_v6 = vld [vmem:[#allocation18_spill] sm:$0xff]  ;;  %v4215_v18 = vld [vmem:[#allocation25_spill] sm:$0xff]  ;;  %v4217_v19 = vcombine.low %v3685_v58, %v3688_v50  ;;  %v4223_v15 = vld [vmem:[#allocation28_spill] sm:$0xff] }
  0x59   : > { %v4205_v37 = vcombine.low %v4203_v52, %v4204_v6  ;;  %v4229_v58 = vld [vmem:[#allocation31_spill] sm:$0xff] }
  0x5f   : > { %3000 = vmatmul.mubr.bf16.gmra.mrb[24].mxu0 %v4172_v53  ;;  %3064 = vmatmul.mubr.bf16.gmra.mrb[24].mxu1 %v4173_v33  ;;  %v4209_v53 = vld [vmem:[#allocation21_spill] sm:$0xff]  ;;  %v4212_v33 = vld [vmem:[#allocation23_spill] sm:$0xff] }
  0x60   : > { %3003 = vmatprep.mubr.bf16.mxu0 %v4174_v56  ;;  %3067 = vmatprep.mubr.bf16.mxu1 %v4175_v7  ;;  %v4210_v29 = vcombine.low %v4208_v61, %v4209_v53  ;;  %v4213_v56 = vcombine.low %v4211_v55, %v4212_v33  ;;  %v4214_v7 = vld [vmem:[#allocation24_spill] sm:$0xff] }
  0x61   : > { %v4216_v35 = vcombine.low %v4214_v7, %v4215_v18 }
  0x67   : > { %3004 = vmatmul.mubr.bf16.gmra.mrb[28].mxu0 %v4178_v3  ;;  %3068 = vmatmul.mubr.bf16.gmra.mrb[28].mxu1 %v4180_v24  ;;  %v4219_v3 = vcombine.low %v3701_v57, %v3704_v28  ;;  %v4221_v24 = vld [vmem:[#allocation27_spill] sm:$0xff]  ;;  %v4231_v57 = vcombine.low %v4229_v58, %v4230_v59  ;;  %v4232_v28 = vld [vmem:[#allocation33_spill] sm:$0xff] }
  0x68   : > { %3007 = vmatprep.mubr.bf16.mxu0 %v4183_v36  ;;  %3071 = vmatprep.mubr.bf16.mxu1 %v4185_v49  ;;  %v4222_v48 = vcombine.low %v4220_v32, %v4221_v24  ;;  %v4224_v36 = vcombine.low %v3737_v63, %v4223_v15  ;;  %v4226_v49 = vld [vmem:[#allocation30_spill] sm:$0xff]  ;;  %v4234_v41 = vcombine.low %v4232_v28, %v4233_v60  ;;  %v4235_v63 = vld [vmem:[#allocation35_spill] sm:$0xff] }
  0x69   : > { %v4227_v50 = vcombine.low %v4225_v16, %v4226_v49 }
  0x6f   : > { %3008 = vmatmul.mubr.bf16.gmra.mrb[32].mxu0 %v4188_v11  ;;  %3072 = vmatmul.mubr.bf16.gmra.mrb[32].mxu1 %v4191_v17  ;;  %v4236_v11 = vcombine.low %v3787_v31, %v4235_v63  ;;  %v4241_v31 = vcombine.low %v3847_v14, %v3852_v20 }
  0x70   : > { %3011 = vmatprep.mubr.bf16.mxu0 %v4194_v43  ;;  %3075 = vmatprep.mubr.bf16.mxu1 %v4195_v10 }
  0x77   : > { %3012 = vmatmul.mubr.bf16.gmra.mrb[36].mxu0 %v4196_v25  ;;  %3076 = vmatmul.mubr.bf16.gmra.mrb[36].mxu1 %v4197_v2 }
  0x78   : > { %3015 = vmatprep.mubr.bf16.mxu0 %v4200_v39  ;;  %3079 = vmatprep.mubr.bf16.mxu1 %v4202_v44 }
  0x7f   : > { %3016 = vmatmul.mubr.bf16.gmra.mrb[40].mxu0 %v4205_v37  ;;  %3080 = vmatmul.mubr.bf16.gmra.mrb[40].mxu1 %v4207_v27 }
  0x80   : > { %3019 = vmatprep.mubr.bf16.mxu0 %v4210_v29  ;;  %3083 = vmatprep.mubr.bf16.mxu1 %v4213_v56 }
  0x87   : > { %3020 = vmatmul.mubr.bf16.gmra.mrb[44].mxu0 %v4216_v35  ;;  %3084 = vmatmul.mubr.bf16.gmra.mrb[44].mxu1 %v4217_v19 }
  0x88   : > { %3023 = vmatprep.mubr.bf16.mxu0 %v4218_v45  ;;  %3087 = vmatprep.mubr.bf16.mxu1 %v4219_v3 }
  0x8f   : > { %3024 = vmatmul.mubr.bf16.gmra.mrb[48].mxu0 %v4222_v48  ;;  %3088 = vmatmul.mubr.bf16.gmra.mrb[48].mxu1 %v4224_v36 }
  0x90   : > { %3027 = vmatprep.mubr.bf16.mxu0 %v4227_v50  ;;  %3091 = vmatprep.mubr.bf16.mxu1 %v4228_v51 }
  0x97   : > { %3028 = vmatmul.mubr.bf16.gmra.mrb[52].mxu0 %v4231_v57  ;;  %3092 = vmatmul.mubr.bf16.gmra.mrb[52].mxu1 %v4234_v41 }
  0x98   : > { %3031 = vmatprep.mubr.bf16.mxu0 %v4236_v11  ;;  %3095 = vmatprep.mubr.bf16.mxu1 %v4237_v12 }
  0x9f   : > { %3032 = vmatmul.mubr.bf16.gmra.mrb[56].mxu0 %v4238_v0  ;;  %3096 = vmatmul.mubr.bf16.gmra.mrb[56].mxu1 %v4239_v1 }
  0xa0   : > { %3035 = vmatprep.mubr.bf16.mxu0 %v4240_v34  ;;  %3099 = vmatprep.mubr.bf16.mxu1 %v4241_v31 }
  0xa7   : > { %3036 = vmatmul.mubr.bf16.gmra.mrb[60].mxu0 %v4242_v26  ;;  %3100 = vmatmul.mubr.bf16.gmra.mrb[60].mxu1 %v2237_v42 }
 0x102   : > { %v2977_v9 = vpop.f32.mrb[0].mxu0  ;;  %v3041_v5 = vpop.f32.mrb[0].mxu1 }
 0x103   : > { %v923_v62 = vpop.f32.mrb[1].mxu0  ;;  %v1179_v17 = vpop.f32.mrb[1].mxu1 }
 0x104   : > { %v2978_v13 = vpop.f32.mrb[2].mxu0  ;;  %v3042_v8 = vpop.f32.mrb[2].mxu1 }
 0x105   : > { %v2512_v46 = vpack.c.bf16 %v2978_v13, %v2977_v9  ;;  %v2672_v47 = vpack.c.bf16 %v3042_v8, %v3041_v5  ;;  %v926_v14 = vpop.f32.mrb[3].mxu0  ;;  %v1182_v20 = vpop.f32.mrb[3].mxu1 }
 0x106   : > { %v2507_v21 = vpack.c.bf16 %v926_v14, %v923_v62  ;;  %v2667_v22 = vpack.c.bf16 %v1182_v20, %v1179_v17 }
 0x107   : > { %2824 = vst [vmem:[%s4012_s8 + $0x8] sm:$0xff] %v2512_v46   ;;  %2856 = vst [vmem:[%s4012_s8 + $0x108] sm:$0xff] %v2672_v47  }
 0x108   : > { %2508 = vst [vmem:[%s4012_s8] sm:$0xff] %v2507_v21   ;;  %2855 = vst [vmem:[%s4012_s8 + $0x100] sm:$0xff] %v2667_v22  }
 0x10a   : > { %v2981_v42 = vpop.f32.mrb[4].mxu0  ;;  %v3045_v4 = vpop.f32.mrb[4].mxu1 }
 0x10b   : > { %v939_v54 = vpop.f32.mrb[5].mxu0  ;;  %v1195_v43 = vpop.f32.mrb[5].mxu1 }
 0x10c   : > { %v2982_v10 = vpop.f32.mrb[6].mxu0  ;;  %v3046_v25 = vpop.f32.mrb[6].mxu1 }
 0x10d   : > { %v2522_v2 = vpack.c.bf16 %v2982_v10, %v2981_v42  ;;  %v2682_v38 = vpack.c.bf16 %v3046_v25, %v3045_v4  ;;  %v942_v40 = vpop.f32.mrb[7].mxu0  ;;  %v1198_v39 = vpop.f32.mrb[7].mxu1 }
 0x10e   : > { %v2517_v23 = vpack.c.bf16 %v942_v40, %v939_v54  ;;  %v2677_v44 = vpack.c.bf16 %v1198_v39, %v1195_v43 }
 0x10f   : > { %2826 = vst [vmem:[%s4012_s8 + $0x18] sm:$0xff] %v2522_v2   ;;  %2858 = vst [vmem:[%s4012_s8 + $0x118] sm:$0xff] %v2682_v38  }
 0x110   : > { %2825 = vst [vmem:[%s4012_s8 + $0x10] sm:$0xff] %v2517_v23   ;;  %2857 = vst [vmem:[%s4012_s8 + $0x110] sm:$0xff] %v2677_v44  }
 0x112   : > { %v2985_v52 = vpop.f32.mrb[8].mxu0  ;;  %v3049_v6 = vpop.f32.mrb[8].mxu1 }
 0x113   : > { %v955_v37 = vpop.f32.mrb[9].mxu0  ;;  %v1211_v30 = vpop.f32.mrb[9].mxu1 }
 0x114   : > { %v2986_v27 = vpop.f32.mrb[10].mxu0  ;;  %v3050_v61 = vpop.f32.mrb[10].mxu1 }
 0x115   : > { %v2532_v53 = vpack.c.bf16 %v2986_v27, %v2985_v52  ;;  %v2692_v29 = vpack.c.bf16 %v3050_v61, %v3049_v6  ;;  %v958_v55 = vpop.f32.mrb[11].mxu0  ;;  %v1214_v33 = vpop.f32.mrb[11].mxu1 }
 0x116   : > { %v2527_v56 = vpack.c.bf16 %v958_v55, %v955_v37  ;;  %v2687_v7 = vpack.c.bf16 %v1214_v33, %v1211_v30 }
 0x117   : > { %2828 = vst [vmem:[%s4012_s8 + $0x28] sm:$0xff] %v2532_v53   ;;  %2860 = vst [vmem:[%s4012_s8 + $0x128] sm:$0xff] %v2692_v29  }
 0x118   : > { %2827 = vst [vmem:[%s4012_s8 + $0x20] sm:$0xff] %v2527_v56   ;;  %2859 = vst [vmem:[%s4012_s8 + $0x120] sm:$0xff] %v2687_v7  }
 0x11a   : > { %v2989_v18 = vpop.f32.mrb[12].mxu0  ;;  %v3053_v35 = vpop.f32.mrb[12].mxu1 }
 0x11b   : > { %v971_v19 = vpop.f32.mrb[13].mxu0  ;;  %v1227_v45 = vpop.f32.mrb[13].mxu1 }
 0x11c   : > { %v2990_v3 = vpop.f32.mrb[14].mxu0  ;;  %v3054_v32 = vpop.f32.mrb[14].mxu1 }
 0x11d   : > { %v2542_v24 = vpack.c.bf16 %v2990_v3, %v2989_v18  ;;  %v2702_v48 = vpack.c.bf16 %v3054_v32, %v3053_v35  ;;  %v974_v15 = vpop.f32.mrb[15].mxu0  ;;  %v1230_v36 = vpop.f32.mrb[15].mxu1 }
 0x11e   : > { %v2537_v16 = vpack.c.bf16 %v974_v15, %v971_v19  ;;  %v2697_v49 = vpack.c.bf16 %v1230_v36, %v1227_v45 }
 0x11f   : > { %2830 = vst [vmem:[%s4012_s8 + $0x38] sm:$0xff] %v2542_v24   ;;  %2862 = vst [vmem:[%s4012_s8 + $0x138] sm:$0xff] %v2702_v48  }
 0x120   : > { %2829 = vst [vmem:[%s4012_s8 + $0x30] sm:$0xff] %v2537_v16   ;;  %2861 = vst [vmem:[%s4012_s8 + $0x130] sm:$0xff] %v2697_v49  }
 0x122   : > { %v2993_v50 = vpop.f32.mrb[16].mxu0  ;;  %v3057_v51 = vpop.f32.mrb[16].mxu1 }
 0x123   : > { %v987_v58 = vpop.f32.mrb[17].mxu0  ;;  %v1243_v59 = vpop.f32.mrb[17].mxu1 }
 0x124   : > { %v2994_v57 = vpop.f32.mrb[18].mxu0  ;;  %v3058_v28 = vpop.f32.mrb[18].mxu1 }
 0x125   : > { %v2552_v60 = vpack.c.bf16 %v2994_v57, %v2993_v50  ;;  %v2712_v41 = vpack.c.bf16 %v3058_v28, %v3057_v51  ;;  %v990_v63 = vpop.f32.mrb[19].mxu0  ;;  %v1246_v11 = vpop.f32.mrb[19].mxu1 }
 0x126   : > { %v2547_v12 = vpack.c.bf16 %v990_v63, %v987_v58  ;;  %v2707_v0 = vpack.c.bf16 %v1246_v11, %v1243_v59 }
 0x127   : > { %2832 = vst [vmem:[%s4012_s8 + $0x48] sm:$0xff] %v2552_v60   ;;  %2864 = vst [vmem:[%s4012_s8 + $0x148] sm:$0xff] %v2712_v41  }
 0x128   : > { %2831 = vst [vmem:[%s4012_s8 + $0x40] sm:$0xff] %v2547_v12   ;;  %2863 = vst [vmem:[%s4012_s8 + $0x140] sm:$0xff] %v2707_v0  }
 0x12a   : > { %v2997_v1 = vpop.f32.mrb[20].mxu0  ;;  %v3061_v34 = vpop.f32.mrb[20].mxu1 }
 0x12b   : > { %v1003_v31 = vpop.f32.mrb[21].mxu0  ;;  %v1259_v26 = vpop.f32.mrb[21].mxu1 }
 0x12c   : > { %v2998_v9 = vpop.f32.mrb[22].mxu0  ;;  %v3062_v5 = vpop.f32.mrb[22].mxu1 }
 0x12d   : > { %v2562_v62 = vpack.c.bf16 %v2998_v9, %v2997_v1  ;;  %v2722_v17 = vpack.c.bf16 %v3062_v5, %v3061_v34  ;;  %v1006_v13 = vpop.f32.mrb[23].mxu0  ;;  %v1262_v8 = vpop.f32.mrb[23].mxu1 }
 0x12e   : > { %v2557_v46 = vpack.c.bf16 %v1006_v13, %v1003_v31  ;;  %v2717_v47 = vpack.c.bf16 %v1262_v8, %v1259_v26 }
 0x12f   : > { %2834 = vst [vmem:[%s4012_s8 + $0x58] sm:$0xff] %v2562_v62   ;;  %2866 = vst [vmem:[%s4012_s8 + $0x158] sm:$0xff] %v2722_v17  }
 0x130   : > { %2833 = vst [vmem:[%s4012_s8 + $0x50] sm:$0xff] %v2557_v46   ;;  %2865 = vst [vmem:[%s4012_s8 + $0x150] sm:$0xff] %v2717_v47  }
 0x132   : > { %v3001_v14 = vpop.f32.mrb[24].mxu0  ;;  %v3065_v20 = vpop.f32.mrb[24].mxu1 }
 0x133   : > { %v1019_v21 = vpop.f32.mrb[25].mxu0  ;;  %v1275_v22 = vpop.f32.mrb[25].mxu1 }
 0x134   : > { %v3002_v42 = vpop.f32.mrb[26].mxu0  ;;  %v3066_v4 = vpop.f32.mrb[26].mxu1 }
 0x135   : > { %v2572_v54 = vpack.c.bf16 %v3002_v42, %v3001_v14  ;;  %v2732_v43 = vpack.c.bf16 %v3066_v4, %v3065_v20  ;;  %v1022_v10 = vpop.f32.mrb[27].mxu0  ;;  %v1278_v25 = vpop.f32.mrb[27].mxu1 }
 0x136   : > { %v2567_v2 = vpack.c.bf16 %v1022_v10, %v1019_v21  ;;  %v2727_v38 = vpack.c.bf16 %v1278_v25, %v1275_v22 }
 0x137   : > { %2836 = vst [vmem:[%s4012_s8 + $0x68] sm:$0xff] %v2572_v54   ;;  %2868 = vst [vmem:[%s4012_s8 + $0x168] sm:$0xff] %v2732_v43  }
 0x138   : > { %2835 = vst [vmem:[%s4012_s8 + $0x60] sm:$0xff] %v2567_v2   ;;  %2867 = vst [vmem:[%s4012_s8 + $0x160] sm:$0xff] %v2727_v38  }
 0x13a   : > { %v3005_v40 = vpop.f32.mrb[28].mxu0  ;;  %v3069_v39 = vpop.f32.mrb[28].mxu1 }
 0x13b   : > { %v1035_v23 = vpop.f32.mrb[29].mxu0  ;;  %v1291_v44 = vpop.f32.mrb[29].mxu1 }
 0x13c   : > { %v3006_v52 = vpop.f32.mrb[30].mxu0  ;;  %v3070_v6 = vpop.f32.mrb[30].mxu1 }
 0x13d   : > { %v2582_v37 = vpack.c.bf16 %v3006_v52, %v3005_v40  ;;  %v2742_v30 = vpack.c.bf16 %v3070_v6, %v3069_v39  ;;  %v1038_v27 = vpop.f32.mrb[31].mxu0  ;;  %v1294_v61 = vpop.f32.mrb[31].mxu1 }
 0x13e   : > { %v2577_v53 = vpack.c.bf16 %v1038_v27, %v1035_v23  ;;  %v2737_v29 = vpack.c.bf16 %v1294_v61, %v1291_v44 }
 0x13f   : > { %2838 = vst [vmem:[%s4012_s8 + $0x78] sm:$0xff] %v2582_v37   ;;  %2870 = vst [vmem:[%s4012_s8 + $0x178] sm:$0xff] %v2742_v30  }
 0x140   : > { %2837 = vst [vmem:[%s4012_s8 + $0x70] sm:$0xff] %v2577_v53   ;;  %2869 = vst [vmem:[%s4012_s8 + $0x170] sm:$0xff] %v2737_v29  }
 0x142   : > { %v3009_v55 = vpop.f32.mrb[32].mxu0  ;;  %v3073_v33 = vpop.f32.mrb[32].mxu1 }
 0x143   : > { %v1051_v56 = vpop.f32.mrb[33].mxu0  ;;  %v1307_v7 = vpop.f32.mrb[33].mxu1 }
 0x144   : > { %v3010_v18 = vpop.f32.mrb[34].mxu0  ;;  %v3074_v35 = vpop.f32.mrb[34].mxu1 }
 0x145   : > { %v2592_v19 = vpack.c.bf16 %v3010_v18, %v3009_v55  ;;  %v2752_v45 = vpack.c.bf16 %v3074_v35, %v3073_v33  ;;  %v1054_v3 = vpop.f32.mrb[35].mxu0  ;;  %v1310_v32 = vpop.f32.mrb[35].mxu1 }
 0x146   : > { %v2587_v24 = vpack.c.bf16 %v1054_v3, %v1051_v56  ;;  %v2747_v48 = vpack.c.bf16 %v1310_v32, %v1307_v7 }
 0x147   : > { %2840 = vst [vmem:[%s4012_s8 + $0x88] sm:$0xff] %v2592_v19   ;;  %2872 = vst [vmem:[%s4012_s8 + $0x188] sm:$0xff] %v2752_v45  }
 0x148   : > { %2839 = vst [vmem:[%s4012_s8 + $0x80] sm:$0xff] %v2587_v24   ;;  %2871 = vst [vmem:[%s4012_s8 + $0x180] sm:$0xff] %v2747_v48  }
 0x14a   : > { %v3013_v15 = vpop.f32.mrb[36].mxu0  ;;  %v3077_v36 = vpop.f32.mrb[36].mxu1 }
 0x14b   : > { %v1067_v16 = vpop.f32.mrb[37].mxu0  ;;  %v1323_v49 = vpop.f32.mrb[37].mxu1 }
 0x14c   : > { %v3014_v50 = vpop.f32.mrb[38].mxu0  ;;  %v3078_v51 = vpop.f32.mrb[38].mxu1 }
 0x14d   : > { %v2602_v58 = vpack.c.bf16 %v3014_v50, %v3013_v15  ;;  %v2762_v59 = vpack.c.bf16 %v3078_v51, %v3077_v36  ;;  %v1070_v57 = vpop.f32.mrb[39].mxu0  ;;  %v1326_v28 = vpop.f32.mrb[39].mxu1 }
 0x14e   : > { %v2597_v60 = vpack.c.bf16 %v1070_v57, %v1067_v16  ;;  %v2757_v41 = vpack.c.bf16 %v1326_v28, %v1323_v49 }
 0x14f   : > { %2842 = vst [vmem:[%s4012_s8 + $0x98] sm:$0xff] %v2602_v58   ;;  %2874 = vst [vmem:[%s4012_s8 + $0x198] sm:$0xff] %v2762_v59  }
 0x150   : > { %2841 = vst [vmem:[%s4012_s8 + $0x90] sm:$0xff] %v2597_v60   ;;  %2873 = vst [vmem:[%s4012_s8 + $0x190] sm:$0xff] %v2757_v41  }
 0x152   : > { %v3017_v63 = vpop.f32.mrb[40].mxu0  ;;  %v3081_v11 = vpop.f32.mrb[40].mxu1 }
 0x153   : > { %v1083_v12 = vpop.f32.mrb[41].mxu0  ;;  %v1339_v0 = vpop.f32.mrb[41].mxu1 }
 0x154   : > { %v3018_v1 = vpop.f32.mrb[42].mxu0  ;;  %v3082_v34 = vpop.f32.mrb[42].mxu1 }
 0x155   : > { %v2612_v31 = vpack.c.bf16 %v3018_v1, %v3017_v63  ;;  %v2772_v26 = vpack.c.bf16 %v3082_v34, %v3081_v11  ;;  %v1086_v9 = vpop.f32.mrb[43].mxu0  ;;  %v1342_v5 = vpop.f32.mrb[43].mxu1 }
 0x156   : > { %v2607_v62 = vpack.c.bf16 %v1086_v9, %v1083_v12  ;;  %v2767_v17 = vpack.c.bf16 %v1342_v5, %v1339_v0 }
 0x157   : > { %2844 = vst [vmem:[%s4012_s8 + $0xa8] sm:$0xff] %v2612_v31   ;;  %2876 = vst [vmem:[%s4012_s8 + $0x1a8] sm:$0xff] %v2772_v26  }
 0x158   : > { %2843 = vst [vmem:[%s4012_s8 + $0xa0] sm:$0xff] %v2607_v62   ;;  %2875 = vst [vmem:[%s4012_s8 + $0x1a0] sm:$0xff] %v2767_v17  }
 0x15a   : > { %v3021_v13 = vpop.f32.mrb[44].mxu0  ;;  %v3085_v8 = vpop.f32.mrb[44].mxu1 }
 0x15b   : > { %v1099_v46 = vpop.f32.mrb[45].mxu0  ;;  %v1355_v47 = vpop.f32.mrb[45].mxu1 }
 0x15c   : > { %v3022_v14 = vpop.f32.mrb[46].mxu0  ;;  %v3086_v20 = vpop.f32.mrb[46].mxu1 }
 0x15d   : > { %v2622_v21 = vpack.c.bf16 %v3022_v14, %v3021_v13  ;;  %v2782_v22 = vpack.c.bf16 %v3086_v20, %v3085_v8  ;;  %v1102_v42 = vpop.f32.mrb[47].mxu0  ;;  %v1358_v4 = vpop.f32.mrb[47].mxu1 }
 0x15e   : > { %v2617_v54 = vpack.c.bf16 %v1102_v42, %v1099_v46  ;;  %v2777_v43 = vpack.c.bf16 %v1358_v4, %v1355_v47 }
 0x15f   : > { %2846 = vst [vmem:[%s4012_s8 + $0xb8] sm:$0xff] %v2622_v21   ;;  %2878 = vst [vmem:[%s4012_s8 + $0x1b8] sm:$0xff] %v2782_v22  }
 0x160   : > { %2845 = vst [vmem:[%s4012_s8 + $0xb0] sm:$0xff] %v2617_v54   ;;  %2877 = vst [vmem:[%s4012_s8 + $0x1b0] sm:$0xff] %v2777_v43  }
 0x162   : > { %v3025_v10 = vpop.f32.mrb[48].mxu0  ;;  %v3089_v25 = vpop.f32.mrb[48].mxu1 }
 0x163   : > { %v1115_v2 = vpop.f32.mrb[49].mxu0  ;;  %v1371_v38 = vpop.f32.mrb[49].mxu1 }
 0x164   : > { %v3026_v40 = vpop.f32.mrb[50].mxu0  ;;  %v3090_v39 = vpop.f32.mrb[50].mxu1 }
 0x165   : > { %v2632_v23 = vpack.c.bf16 %v3026_v40, %v3025_v10  ;;  %v2792_v44 = vpack.c.bf16 %v3090_v39, %v3089_v25  ;;  %v1118_v52 = vpop.f32.mrb[51].mxu0  ;;  %v1374_v6 = vpop.f32.mrb[51].mxu1 }
 0x166   : > { %v2627_v37 = vpack.c.bf16 %v1118_v52, %v1115_v2  ;;  %v2787_v30 = vpack.c.bf16 %v1374_v6, %v1371_v38 }
 0x167   : > { %2848 = vst [vmem:[%s4012_s8 + $0xc8] sm:$0xff] %v2632_v23   ;;  %2880 = vst [vmem:[%s4012_s8 + $0x1c8] sm:$0xff] %v2792_v44  }
 0x168   : > { %2847 = vst [vmem:[%s4012_s8 + $0xc0] sm:$0xff] %v2627_v37   ;;  %2879 = vst [vmem:[%s4012_s8 + $0x1c0] sm:$0xff] %v2787_v30  }
 0x16a   : > { %v3029_v27 = vpop.f32.mrb[52].mxu0  ;;  %v3093_v61 = vpop.f32.mrb[52].mxu1 }
 0x16b   : > { %v1131_v53 = vpop.f32.mrb[53].mxu0  ;;  %v1387_v29 = vpop.f32.mrb[53].mxu1 }
 0x16c   : > { %v3030_v55 = vpop.f32.mrb[54].mxu0  ;;  %v3094_v33 = vpop.f32.mrb[54].mxu1 }
 0x16d   : > { %v2642_v56 = vpack.c.bf16 %v3030_v55, %v3029_v27  ;;  %v2802_v7 = vpack.c.bf16 %v3094_v33, %v3093_v61  ;;  %v1134_v18 = vpop.f32.mrb[55].mxu0  ;;  %v1390_v35 = vpop.f32.mrb[55].mxu1 }
 0x16e   : > { %v2637_v19 = vpack.c.bf16 %v1134_v18, %v1131_v53  ;;  %v2797_v45 = vpack.c.bf16 %v1390_v35, %v1387_v29 }
 0x16f   : > { %2850 = vst [vmem:[%s4012_s8 + $0xd8] sm:$0xff] %v2642_v56   ;;  %2882 = vst [vmem:[%s4012_s8 + $0x1d8] sm:$0xff] %v2802_v7  }
 0x170   : > { %2849 = vst [vmem:[%s4012_s8 + $0xd0] sm:$0xff] %v2637_v19   ;;  %2881 = vst [vmem:[%s4012_s8 + $0x1d0] sm:$0xff] %v2797_v45  }
 0x172   : > { %v3033_v3 = vpop.f32.mrb[56].mxu0  ;;  %v3097_v32 = vpop.f32.mrb[56].mxu1 }
 0x173   : > { %v1147_v24 = vpop.f32.mrb[57].mxu0  ;;  %v1403_v48 = vpop.f32.mrb[57].mxu1 }
 0x174   : > { %v3034_v15 = vpop.f32.mrb[58].mxu0  ;;  %v3098_v36 = vpop.f32.mrb[58].mxu1 }
 0x175   : > { %v2652_v16 = vpack.c.bf16 %v3034_v15, %v3033_v3  ;;  %v2812_v49 = vpack.c.bf16 %v3098_v36, %v3097_v32  ;;  %v1150_v50 = vpop.f32.mrb[59].mxu0  ;;  %v1406_v51 = vpop.f32.mrb[59].mxu1 }
 0x176   : > { %v2647_v58 = vpack.c.bf16 %v1150_v50, %v1147_v24  ;;  %v2807_v59 = vpack.c.bf16 %v1406_v51, %v1403_v48 }
 0x177   : > { %2852 = vst [vmem:[%s4012_s8 + $0xe8] sm:$0xff] %v2652_v16   ;;  %2884 = vst [vmem:[%s4012_s8 + $0x1e8] sm:$0xff] %v2812_v49  }
 0x178   : > { %2851 = vst [vmem:[%s4012_s8 + $0xe0] sm:$0xff] %v2647_v58   ;;  %2883 = vst [vmem:[%s4012_s8 + $0x1e0] sm:$0xff] %v2807_v59  }
 0x17a   : > { %v3037_v57 = vpop.f32.mrb[60].mxu0  ;;  %v3101_v28 = vpop.f32.mrb[60].mxu1 }
 0x17b   : > { %v1163_v60 = vpop.f32.mrb[61].mxu0  ;;  %v1419_v41 = vpop.f32.mrb[61].mxu1 }
 0x17c   : > { %v3038_v63 = vpop.f32.mrb[62].mxu0  ;;  %v3102_v11 = vpop.f32.mrb[62].mxu1 }
 0x17d   : > { %v2662_v12 = vpack.c.bf16 %v3038_v63, %v3037_v57  ;;  %v2822_v0 = vpack.c.bf16 %v3102_v11, %v3101_v28  ;;  %v1166_v1 = vpop.f32.mrb[63].mxu0  ;;  %v1422_v34 = vpop.f32.mrb[63].mxu1 }
 0x17e   : > { %v2657_v31 = vpack.c.bf16 %v1166_v1, %v1163_v60  ;;  %v2817_v26 = vpack.c.bf16 %v1422_v34, %v1419_v41 }
 0x17f   : > { %2854 = vst [vmem:[%s4012_s8 + $0xf8] sm:$0xff] %v2662_v12   ;;  %2886 = vst [vmem:[%s4012_s8 + $0x1f8] sm:$0xff] %v2822_v0  }
 0x180   : > { %2853 = vst [vmem:[%s4012_s8 + $0xf0] sm:$0xff] %v2657_v31   ;;  %2885 = vst [vmem:[%s4012_s8 + $0x1f0] sm:$0xff] %v2817_v26  }
 0x181 PF: > { %s12_s11 = sadd.s32 1, %s3174_s11   ;;  %s4243_s9 = smov %s3170_s10 }
 0x182   : > { %p9_p5 = scmp.ge.s32.totalorder %s12_s11, 8   ;;  %s4244_s10 = smov %s4246_s12 }
 0x184   :  { %11 = sbr.rel (!%p9_p5) target bundleno = 2 (0x2), region = 61 }

</bundles_post_ra>
